<compile_context>
chip_gen: v6e
topology: v6e:2x2x1
jax: 0.10.0
libtpu: 0.0.40
codegen_flags: <defaults>
</compile_context>

<pallas_src>
import jax
import jax.numpy as jnp
from jax.experimental import pallas as pl
from jax.experimental.pallas import tpu as pltpu


# Sublane-aligned column offset of the image interior inside the padded VMEM
# scratch.  Halo columns sit at _PAD-1 and _PAD+W, so the interior store is
# sublane-tile aligned and the 3x3 taps read static offsets {_PAD-1,_PAD,_PAD+1}.
_PAD = 8


def _fused_spatial_cnn_kernel(x_ref, w1_ref, b1_ref, w2_ref, b2_ref, o_ref,
                              xpad_ref, hpad_ref):
    """conv3x3+bias+ReLU twice, fully VMEM-resident, one matmul per layer.

    x_ref:    (N, H, W, Cin)            input (whole batch, NHWC)
    w1_ref:   (9*Cin, C1)               im2col-reshaped layer-1 weights
    b1_ref:   (1, C1)
    w2_ref:   (9*C1, C2)                im2col-reshaped layer-2 weights
    b2_ref:   (1, C2)
    o_ref:    (N, H, W, C2)             output (whole batch, NHWC)
    xpad_ref: VMEM (N, H+2, 2*_PAD+W, Cin)  padded layer-1 input scratch
    hpad_ref: VMEM (N, H+2, 2*_PAD+W, C1)   padded intermediate scratch
    """
    N, H, W, Cin = x_ref.shape
    C1 = w1_ref.shape[1]
    C2 = o_ref.shape[3]
    M = N * H * W
    lo = _PAD - 1            # leftmost column any tap reads
    hi = _PAD + W            # rightmost column any tap reads (right halo)

    def pad_and_im2col(pad_ref, interior, C):
        """Write `interior` (N,H,W,C) into pad_ref, zero ONLY the halo ring,
        and return the (M, 9*C) im2col patch matrix."""
        # Halo ring only — the interior is overwritten with real data below,
        # and columns outside [lo, hi] are never read by any tap.
        pad_ref[:, 0:1, lo:hi + 1, :] = jnp.zeros((N, 1, W + 2, C), jnp.float32)
        pad_ref[:, H + 1:H + 2, lo:hi + 1, :] = jnp.zeros((N, 1, W + 2, C),
                                                          jnp.float32)
        pad_ref[:, :, lo:lo + 1, :] = jnp.zeros((N, H + 2, 1, C), jnp.float32)
        pad_ref[:, :, hi:hi + 1, :] = jnp.zeros((N, H + 2, 1, C), jnp.float32)
        pad_ref[:, 1:H + 1, _PAD:_PAD + W, :] = interior.astype(jnp.float32)

        # Hoist the 3 column-shifted (unaligned-sublane) views once per layer;
        # the dy slices below are on a non-minor axis and are free.
        cols = [pad_ref[:, :, lo + dx:lo + dx + W, :] for dx in range(3)]
        # Column order (dy, dx, c) matches the host-side weight reshape.
        slabs = [cols[dx][:, dy:dy + H, :, :].reshape(M, C)
                 for dy in range(3) for dx in range(3)]
        return jnp.concatenate(slabs, axis=-1)                  # (M, 9*C)

    # ---- layer 1: one im2col matmul + bias + ReLU -------------------------
    p1 = pad_and_im2col(xpad_ref, x_ref[...], Cin)              # (M, 9*Cin)
    h = jnp.maximum(
        jnp.dot(p1, w1_ref[...], preferred_element_type=jnp.float32)
        + b1_ref[...], 0.0)                                     # (M, C1), VMEM

    # ---- layer 2: intermediate never leaves the chip ----------------------
    p2 = pad_and_im2col(hpad_ref, h.reshape(N, H, W, C1), C1)   # (M, 9*C1)
    y = jnp.maximum(
        jnp.dot(p2, w2_ref[...], preferred_element_type=jnp.float32)
        + b2_ref[...], 0.0)                                     # (M, C2)

    o_ref[...] = y.reshape(N, H, W, C2).astype(o_ref.dtype)


def spatial_cnn_forward(x_nhwc, w1_k, b1_r, w2_k, b2_r):
    """Fused two-layer CNN forward.

    x_nhwc: (N, H, W, Cin); w1_k: (9*Cin, C1); b1_r: (1, C1);
    w2_k: (9*C1, C2); b2_r: (1, C2).  Returns (N, H, W, C2).
    """
    N, H, W, Cin = x_nhwc.shape
    K1, C1 = w1_k.shape
    K2, C2 = w2_k.shape
    pad_w = 2 * _PAD + W     # holds halo columns at _PAD-1 and _PAD+W

    flops = 2 * N * H * W * (K1 * C1 + K2 * C2)
    bytes_accessed = 4 * (x_nhwc.size + w1_k.size + b1_r.size
                          + w2_k.size + b2_r.size + N * H * W * C2)

    return pl.pallas_call(
        _fused_spatial_cnn_kernel,
        out_shape=jax.ShapeDtypeStruct((N, H, W, C2), x_nhwc.dtype),
        grid_spec=pltpu.PrefetchScalarGridSpec(
            num_scalar_prefetch=0,
            grid=(1,),   # batch folded into the matmul M dim -> single step
            in_specs=[
                pl.BlockSpec((N, H, W, Cin), lambda i: (0, 0, 0, 0)),
                pl.BlockSpec((K1, C1), lambda i: (0, 0)),
                pl.BlockSpec((1, C1), lambda i: (0, 0)),
                pl.BlockSpec((K2, C2), lambda i: (0, 0)),
                pl.BlockSpec((1, C2), lambda i: (0, 0)),
            ],
            out_specs=pl.BlockSpec((N, H, W, C2), lambda i: (0, 0, 0, 0)),
            scratch_shapes=[
                pltpu.VMEM((N, H + 2, pad_w, Cin), jnp.float32),
                pltpu.VMEM((N, H + 2, pad_w, C1), jnp.float32),
            ],
        ),
        compiler_params=pltpu.CompilerParams(
            dimension_semantics=("arbitrary",),
        ),
        cost_estimate=pl.CostEstimate(
            flops=flops, transcendentals=0, bytes_accessed=bytes_accessed),
    )(x_nhwc, w1_k, b1_r, w2_k, b2_r)


class SpatialCNNPallas:
    """Pallas equivalent of the PyTorch SpatialCNN module (forward only)."""

    def __init__(self, in_channels=5, out_channels=32, key=None):
        if key is None:
            key = jax.random.PRNGKey(42)
        k1, k2, k3, k4 = jax.random.split(key, 4)
        hidden = 16
        fan1 = in_channels * 9
        fan2 = hidden * 9
        # Weights stored as (kh, kw, Cin, Cout) for the NHWC reference, and
        # pre-reshaped ON THE HOST to (9*Cin, Cout) for the kernel's im2col
        # matmul (one MXU weight load per layer instead of 9).
        self.w1 = jax.random.uniform(
            k1, (3, 3, in_channels, hidden), jnp.float32,
            minval=-1.0, maxval=1.0) * (fan1 ** -0.5)
        self.b1 = jax.random.uniform(
            k2, (hidden,), jnp.float32, minval=-1.0, maxval=1.0) * (fan1 ** -0.5)
        self.w2 = jax.random.uniform(
            k3, (3, 3, hidden, out_channels), jnp.float32,
            minval=-1.0, maxval=1.0) * (fan2 ** -0.5)
        self.b2 = jax.random.uniform(
            k4, (out_channels,), jnp.float32,
            minval=-1.0, maxval=1.0) * (fan2 ** -0.5)

        self.w1_k = self.w1.reshape(9 * in_channels, hidden)     # (9*Cin, C1)
        self.w2_k = self.w2.reshape(9 * hidden, out_channels)    # (9*C1, C2)
        self.b1_r = self.b1.reshape(1, hidden)
        self.b2_r = self.b2.reshape(1, out_channels)

    def forward_nhwc(self, x_nhwc):
        """NHWC end-to-end path (no relayout passes)."""
        return spatial_cnn_forward(x_nhwc, self.w1_k, self.b1_r,
                                   self.w2_k, self.b2_r)

    def __call__(self, x_nchw):
        # PyTorch-compatible NCHW interface; an NHWC pipeline should call
        # forward_nhwc directly to skip these two relayout passes.
        x = jnp.transpose(x_nchw, (0, 2, 3, 1))
        y = self.forward_nhwc(x)
        return jnp.transpose(y, (0, 3, 1, 2))


def _reference_forward(x_nchw, model):
    """Pure-JAX reference (lax.conv) for verification."""
    def conv(x, w, b):
        # w: (kh, kw, Cin, Cout) -> (O, I, kh, kw) for NCHW/OIHW.
        w_oihw = jnp.transpose(w, (3, 2, 0, 1))
        y = jax.lax.conv_general_dilated(
            x, w_oihw, window_strides=(1, 1), padding=((1, 1), (1, 1)),
            dimension_numbers=("NCHW", "OIHW", "NCHW"))
        return jnp.maximum(y + b[None, :, None, None], 0.0)

    h = conv(x_nchw, model.w1, model.b1)
    return conv(h, model.w2, model.b2)


if __name__ == "__main__":
    key = jax.random.PRNGKey(0)
    # Shapes consistent with the module: batch=2, in_channels=5, spatial=16.
    x = jax.random.normal(key, (2, 5, 16, 16), dtype=jnp.float32)

    model = SpatialCNNPallas(in_channels=5, out_channels=32,
                             key=jax.random.PRNGKey(42))

    out = model(x)
    out = jax.block_until_ready(out)
    assert out.shape == (2, 32, 16, 16), out.shape

    ref = jax.block_until_ready(_reference_forward(x, model))
    assert jnp.allclose(out, ref, atol=1e-4, rtol=1e-4), (
        float(jnp.max(jnp.abs(out - ref))))

    print("KERNEL_OK")
</pallas_src>

<mosaic_0001>
module attributes {stable_mosaic.version = 11 : i64} {
  func.func @_fused_spatial_cnn_kernel(%arg0: i32, %arg1: memref<2x16x16x5xf32, #tpu.memory_space<vmem>>, %arg2: memref<45x16xf32, #tpu.memory_space<vmem>>, %arg3: memref<1x16xf32, #tpu.memory_space<vmem>>, %arg4: memref<144x32xf32, #tpu.memory_space<vmem>>, %arg5: memref<1x32xf32, #tpu.memory_space<vmem>>, %arg6: memref<2x16x16x32xf32, #tpu.memory_space<vmem>>, %arg7: memref<2x18x32x5xf32, #tpu.memory_space<vmem>>, %arg8: memref<2x18x32x16xf32, #tpu.memory_space<vmem>>) attributes {dimension_semantics = [#tpu.dimension_semantics<arbitrary>], iteration_bounds = array<i64: 1>, scalar_prefetch = 0 : i64, scratch_operands = 2 : i64, tpu.core_type = #tpu.core_type<tc>, window_params = [{pipeline_mode = #tpu.pipeline_mode<synchronous>, transform_indices = @transform_0, window_bounds = array<i64: 2, 16, 16, 5>}, {pipeline_mode = #tpu.pipeline_mode<synchronous>, transform_indices = @transform_1, window_bounds = array<i64: 45, 16>}, {pipeline_mode = #tpu.pipeline_mode<synchronous>, transform_indices = @transform_2, window_bounds = array<i64: 1, 16>}, {pipeline_mode = #tpu.pipeline_mode<synchronous>, transform_indices = @transform_3, window_bounds = array<i64: 144, 32>}, {pipeline_mode = #tpu.pipeline_mode<synchronous>, transform_indices = @transform_4, window_bounds = array<i64: 1, 32>}, {pipeline_mode = #tpu.pipeline_mode<synchronous>, transform_indices = @transform_5, window_bounds = array<i64: 2, 16, 16, 32>}]} {
    %c0 = arith.constant 0 : index
    %c0_0 = arith.constant 0 : index
    %c0_1 = arith.constant 0 : index
    %c0_2 = arith.constant 0 : index
    %0 = vector.load %arg1[%c0, %c0_0, %c0_1, %c0_2] : memref<2x16x16x5xf32, #tpu.memory_space<vmem>>, vector<2x16x16x5xf32>
    %cst = arith.constant 0.000000e+00 : f32
    %1 = vector.broadcast %cst : f32 to vector<2x1x18x5xf32>
    %c0_3 = arith.constant 0 : index
    %c0_4 = arith.constant 0 : index
    %c7 = arith.constant 7 : index
    %c0_5 = arith.constant 0 : index
    %2 = vector.load %arg7[%c0_3, %c0_4, %c7, %c0_5] : memref<2x18x32x5xf32, #tpu.memory_space<vmem>>, vector<2x1x18x5xf32>
    tpu.vector_store %arg7[%c0_3, %c0_4, %c7, %c0_5], %1 {strides = array<i32>} : memref<2x18x32x5xf32, #tpu.memory_space<vmem>>, vector<2x1x18x5xf32>,
    %cst_6 = arith.constant 0.000000e+00 : f32
    %3 = vector.broadcast %cst_6 : f32 to vector<2x1x18x5xf32>
    %c0_7 = arith.constant 0 : index
    %c17 = arith.constant 17 : index
    %c7_8 = arith.constant 7 : index
    %c0_9 = arith.constant 0 : index
    %4 = vector.load %arg7[%c0_7, %c17, %c7_8, %c0_9] : memref<2x18x32x5xf32, #tpu.memory_space<vmem>>, vector<2x1x18x5xf32>
    tpu.vector_store %arg7[%c0_7, %c17, %c7_8, %c0_9], %3 {strides = array<i32>} : memref<2x18x32x5xf32, #tpu.memory_space<vmem>>, vector<2x1x18x5xf32>,
    %cst_10 = arith.constant 0.000000e+00 : f32
    %5 = vector.broadcast %cst_10 : f32 to vector<2x18x1x5xf32>
    %c0_11 = arith.constant 0 : index
    %c0_12 = arith.constant 0 : index
    %c7_13 = arith.constant 7 : index
    %c0_14 = arith.constant 0 : index
    %6 = vector.load %arg7[%c0_11, %c0_12, %c7_13, %c0_14] : memref<2x18x32x5xf32, #tpu.memory_space<vmem>>, vector<2x18x1x5xf32>
    tpu.vector_store %arg7[%c0_11, %c0_12, %c7_13, %c0_14], %5 {strides = array<i32>} : memref<2x18x32x5xf32, #tpu.memory_space<vmem>>, vector<2x18x1x5xf32>,
    %cst_15 = arith.constant 0.000000e+00 : f32
    %7 = vector.broadcast %cst_15 : f32 to vector<2x18x1x5xf32>
    %c0_16 = arith.constant 0 : index
    %c0_17 = arith.constant 0 : index
    %c24 = arith.constant 24 : index
    %c0_18 = arith.constant 0 : index
    %8 = vector.load %arg7[%c0_16, %c0_17, %c24, %c0_18] : memref<2x18x32x5xf32, #tpu.memory_space<vmem>>, vector<2x18x1x5xf32>
    tpu.vector_store %arg7[%c0_16, %c0_17, %c24, %c0_18], %7 {strides = array<i32>} : memref<2x18x32x5xf32, #tpu.memory_space<vmem>>, vector<2x18x1x5xf32>,
    %c0_19 = arith.constant 0 : index
    %c1 = arith.constant 1 : index
    %c8 = arith.constant 8 : index
    %c0_20 = arith.constant 0 : index
    %9 = vector.load %arg7[%c0_19, %c1, %c8, %c0_20] : memref<2x18x32x5xf32, #tpu.memory_space<vmem>>, vector<2x16x16x5xf32>
    tpu.vector_store %arg7[%c0_19, %c1, %c8, %c0_20], %0 {strides = array<i32>} : memref<2x18x32x5xf32, #tpu.memory_space<vmem>>, vector<2x16x16x5xf32>,
    %c0_21 = arith.constant 0 : index
    %c0_22 = arith.constant 0 : index
    %c7_23 = arith.constant 7 : index
    %c0_24 = arith.constant 0 : index
    %10 = vector.load %arg7[%c0_21, %c0_22, %c7_23, %c0_24] : memref<2x18x32x5xf32, #tpu.memory_space<vmem>>, vector<2x18x16x5xf32>
    %c0_25 = arith.constant 0 : index
    %c0_26 = arith.constant 0 : index
    %c8_27 = arith.constant 8 : index
    %c0_28 = arith.constant 0 : index
    %11 = vector.load %arg7[%c0_25, %c0_26, %c8_27, %c0_28] : memref<2x18x32x5xf32, #tpu.memory_space<vmem>>, vector<2x18x16x5xf32>
    %c0_29 = arith.constant 0 : index
    %c0_30 = arith.constant 0 : index
    %c9 = arith.constant 9 : index
    %c0_31 = arith.constant 0 : index
    %12 = vector.load %arg7[%c0_29, %c0_30, %c9, %c0_31] : memref<2x18x32x5xf32, #tpu.memory_space<vmem>>, vector<2x18x16x5xf32>
    %13 = vector.extract_strided_slice %10 {offsets = [0, 0, 0, 0], sizes = [2, 16, 16, 5], strides = [1, 1, 1, 1]} : vector<2x18x16x5xf32> to vector<2x16x16x5xf32>
    %14 = vector.shape_cast %13 : vector<2x16x16x5xf32> to vector<512x5xf32>
    %15 = vector.extract_strided_slice %11 {offsets = [0, 0, 0, 0], sizes = [2, 16, 16, 5], strides = [1, 1, 1, 1]} : vector<2x18x16x5xf32> to vector<2x16x16x5xf32>
    %16 = vector.shape_cast %15 : vector<2x16x16x5xf32> to vector<512x5xf32>
    %17 = vector.extract_strided_slice %12 {offsets = [0, 0, 0, 0], sizes = [2, 16, 16, 5], strides = [1, 1, 1, 1]} : vector<2x18x16x5xf32> to vector<2x16x16x5xf32>
    %18 = vector.shape_cast %17 : vector<2x16x16x5xf32> to vector<512x5xf32>
    %19 = vector.extract_strided_slice %10 {offsets = [0, 1, 0, 0], sizes = [2, 16, 16, 5], strides = [1, 1, 1, 1]} : vector<2x18x16x5xf32> to vector<2x16x16x5xf32>
    %20 = vector.shape_cast %19 : vector<2x16x16x5xf32> to vector<512x5xf32>
    %21 = vector.extract_strided_slice %11 {offsets = [0, 1, 0, 0], sizes = [2, 16, 16, 5], strides = [1, 1, 1, 1]} : vector<2x18x16x5xf32> to vector<2x16x16x5xf32>
    %22 = vector.shape_cast %21 : vector<2x16x16x5xf32> to vector<512x5xf32>
    %23 = vector.extract_strided_slice %12 {offsets = [0, 1, 0, 0], sizes = [2, 16, 16, 5], strides = [1, 1, 1, 1]} : vector<2x18x16x5xf32> to vector<2x16x16x5xf32>
    %24 = vector.shape_cast %23 : vector<2x16x16x5xf32> to vector<512x5xf32>
    %25 = vector.extract_strided_slice %10 {offsets = [0, 2, 0, 0], sizes = [2, 16, 16, 5], strides = [1, 1, 1, 1]} : vector<2x18x16x5xf32> to vector<2x16x16x5xf32>
    %26 = vector.shape_cast %25 : vector<2x16x16x5xf32> to vector<512x5xf32>
    %27 = vector.extract_strided_slice %11 {offsets = [0, 2, 0, 0], sizes = [2, 16, 16, 5], strides = [1, 1, 1, 1]} : vector<2x18x16x5xf32> to vector<2x16x16x5xf32>
    %28 = vector.shape_cast %27 : vector<2x16x16x5xf32> to vector<512x5xf32>
    %29 = vector.extract_strided_slice %12 {offsets = [0, 2, 0, 0], sizes = [2, 16, 16, 5], strides = [1, 1, 1, 1]} : vector<2x18x16x5xf32> to vector<2x16x16x5xf32>
    %30 = vector.shape_cast %29 : vector<2x16x16x5xf32> to vector<512x5xf32>
    %31 = tpu.concatenate %14, %16, %18, %20, %22, %24, %26, %28, %30 in 1 : vector<512x5xf32>, vector<512x5xf32>, vector<512x5xf32>, vector<512x5xf32>, vector<512x5xf32>, vector<512x5xf32>, vector<512x5xf32>, vector<512x5xf32>, vector<512x5xf32> -> vector<512x45xf32>
    %c0_32 = arith.constant 0 : index
    %c0_33 = arith.constant 0 : index
    %32 = vector.load %arg2[%c0_32, %c0_33] : memref<45x16xf32, #tpu.memory_space<vmem>>, vector<45x16xf32>
    %cst_34 = arith.constant dense<0.000000e+00> : vector<512x16xf32>
    %33 = tpu.matmul %31, %32, %cst_34 {dimension_numbers = #tpu.dot_dimension_numbers<[1], [0], [0], [1], [0, 0, 1, 1], [], []>} : vector<512x45xf32>, vector<45x16xf32>, vector<512x16xf32> -> vector<512x16xf32>
    %c0_35 = arith.constant 0 : index
    %c0_36 = arith.constant 0 : index
    %34 = vector.load %arg3[%c0_35, %c0_36] : memref<1x16xf32, #tpu.memory_space<vmem>>, vector<1x16xf32>
    %35 = vector.broadcast %34 : vector<1x16xf32> to vector<512x16xf32>
    %36 = arith.addf %33, %35 : vector<512x16xf32>
    %cst_37 = arith.constant 0.000000e+00 : f32
    %37 = vector.broadcast %cst_37 : f32 to vector<512x16xf32>
    %38 = arith.maximumf %36, %37 : vector<512x16xf32>
    %39 = vector.shape_cast %38 : vector<512x16xf32> to vector<2x16x16x16xf32>
    %cst_38 = arith.constant 0.000000e+00 : f32
    %40 = vector.broadcast %cst_38 : f32 to vector<2x1x18x16xf32>
    %c0_39 = arith.constant 0 : index
    %c0_40 = arith.constant 0 : index
    %c7_41 = arith.constant 7 : index
    %c0_42 = arith.constant 0 : index
    %41 = vector.load %arg8[%c0_39, %c0_40, %c7_41, %c0_42] : memref<2x18x32x16xf32, #tpu.memory_space<vmem>>, vector<2x1x18x16xf32>
    tpu.vector_store %arg8[%c0_39, %c0_40, %c7_41, %c0_42], %40 {strides = array<i32>} : memref<2x18x32x16xf32, #tpu.memory_space<vmem>>, vector<2x1x18x16xf32>,
    %cst_43 = arith.constant 0.000000e+00 : f32
    %42 = vector.broadcast %cst_43 : f32 to vector<2x1x18x16xf32>
    %c0_44 = arith.constant 0 : index
    %c17_45 = arith.constant 17 : index
    %c7_46 = arith.constant 7 : index
    %c0_47 = arith.constant 0 : index
    %43 = vector.load %arg8[%c0_44, %c17_45, %c7_46, %c0_47] : memref<2x18x32x16xf32, #tpu.memory_space<vmem>>, vector<2x1x18x16xf32>
    tpu.vector_store %arg8[%c0_44, %c17_45, %c7_46, %c0_47], %42 {strides = array<i32>} : memref<2x18x32x16xf32, #tpu.memory_space<vmem>>, vector<2x1x18x16xf32>,
    %cst_48 = arith.constant 0.000000e+00 : f32
    %44 = vector.broadcast %cst_48 : f32 to vector<2x18x1x16xf32>
    %c0_49 = arith.constant 0 : index
    %c0_50 = arith.constant 0 : index
    %c7_51 = arith.constant 7 : index
    %c0_52 = arith.constant 0 : index
    %45 = vector.load %arg8[%c0_49, %c0_50, %c7_51, %c0_52] : memref<2x18x32x16xf32, #tpu.memory_space<vmem>>, vector<2x18x1x16xf32>
    tpu.vector_store %arg8[%c0_49, %c0_50, %c7_51, %c0_52], %44 {strides = array<i32>} : memref<2x18x32x16xf32, #tpu.memory_space<vmem>>, vector<2x18x1x16xf32>,
    %cst_53 = arith.constant 0.000000e+00 : f32
    %46 = vector.broadcast %cst_53 : f32 to vector<2x18x1x16xf32>
    %c0_54 = arith.constant 0 : index
    %c0_55 = arith.constant 0 : index
    %c24_56 = arith.constant 24 : index
    %c0_57 = arith.constant 0 : index
    %47 = vector.load %arg8[%c0_54, %c0_55, %c24_56, %c0_57] : memref<2x18x32x16xf32, #tpu.memory_space<vmem>>, vector<2x18x1x16xf32>
    tpu.vector_store %arg8[%c0_54, %c0_55, %c24_56, %c0_57], %46 {strides = array<i32>} : memref<2x18x32x16xf32, #tpu.memory_space<vmem>>, vector<2x18x1x16xf32>,
    %c0_58 = arith.constant 0 : index
    %c1_59 = arith.constant 1 : index
    %c8_60 = arith.constant 8 : index
    %c0_61 = arith.constant 0 : index
    %48 = vector.load %arg8[%c0_58, %c1_59, %c8_60, %c0_61] : memref<2x18x32x16xf32, #tpu.memory_space<vmem>>, vector<2x16x16x16xf32>
    tpu.vector_store %arg8[%c0_58, %c1_59, %c8_60, %c0_61], %39 {strides = array<i32>} : memref<2x18x32x16xf32, #tpu.memory_space<vmem>>, vector<2x16x16x16xf32>,
    %c0_62 = arith.constant 0 : index
    %c0_63 = arith.constant 0 : index
    %c7_64 = arith.constant 7 : index
    %c0_65 = arith.constant 0 : index
    %49 = vector.load %arg8[%c0_62, %c0_63, %c7_64, %c0_65] : memref<2x18x32x16xf32, #tpu.memory_space<vmem>>, vector<2x18x16x16xf32>
    %c0_66 = arith.constant 0 : index
    %c0_67 = arith.constant 0 : index
    %c8_68 = arith.constant 8 : index
    %c0_69 = arith.constant 0 : index
    %50 = vector.load %arg8[%c0_66, %c0_67, %c8_68, %c0_69] : memref<2x18x32x16xf32, #tpu.memory_space<vmem>>, vector<2x18x16x16xf32>
    %c0_70 = arith.constant 0 : index
    %c0_71 = arith.constant 0 : index
    %c9_72 = arith.constant 9 : index
    %c0_73 = arith.constant 0 : index
    %51 = vector.load %arg8[%c0_70, %c0_71, %c9_72, %c0_73] : memref<2x18x32x16xf32, #tpu.memory_space<vmem>>, vector<2x18x16x16xf32>
    %52 = vector.extract_strided_slice %49 {offsets = [0, 0, 0, 0], sizes = [2, 16, 16, 16], strides = [1, 1, 1, 1]} : vector<2x18x16x16xf32> to vector<2x16x16x16xf32>
    %53 = vector.shape_cast %52 : vector<2x16x16x16xf32> to vector<512x16xf32>
    %54 = vector.extract_strided_slice %50 {offsets = [0, 0, 0, 0], sizes = [2, 16, 16, 16], strides = [1, 1, 1, 1]} : vector<2x18x16x16xf32> to vector<2x16x16x16xf32>
    %55 = vector.shape_cast %54 : vector<2x16x16x16xf32> to vector<512x16xf32>
    %56 = vector.extract_strided_slice %51 {offsets = [0, 0, 0, 0], sizes = [2, 16, 16, 16], strides = [1, 1, 1, 1]} : vector<2x18x16x16xf32> to vector<2x16x16x16xf32>
    %57 = vector.shape_cast %56 : vector<2x16x16x16xf32> to vector<512x16xf32>
    %58 = vector.extract_strided_slice %49 {offsets = [0, 1, 0, 0], sizes = [2, 16, 16, 16], strides = [1, 1, 1, 1]} : vector<2x18x16x16xf32> to vector<2x16x16x16xf32>
    %59 = vector.shape_cast %58 : vector<2x16x16x16xf32> to vector<512x16xf32>
    %60 = vector.extract_strided_slice %50 {offsets = [0, 1, 0, 0], sizes = [2, 16, 16, 16], strides = [1, 1, 1, 1]} : vector<2x18x16x16xf32> to vector<2x16x16x16xf32>
    %61 = vector.shape_cast %60 : vector<2x16x16x16xf32> to vector<512x16xf32>
    %62 = vector.extract_strided_slice %51 {offsets = [0, 1, 0, 0], sizes = [2, 16, 16, 16], strides = [1, 1, 1, 1]} : vector<2x18x16x16xf32> to vector<2x16x16x16xf32>
    %63 = vector.shape_cast %62 : vector<2x16x16x16xf32> to vector<512x16xf32>
    %64 = vector.extract_strided_slice %49 {offsets = [0, 2, 0, 0], sizes = [2, 16, 16, 16], strides = [1, 1, 1, 1]} : vector<2x18x16x16xf32> to vector<2x16x16x16xf32>
    %65 = vector.shape_cast %64 : vector<2x16x16x16xf32> to vector<512x16xf32>
    %66 = vector.extract_strided_slice %50 {offsets = [0, 2, 0, 0], sizes = [2, 16, 16, 16], strides = [1, 1, 1, 1]} : vector<2x18x16x16xf32> to vector<2x16x16x16xf32>
    %67 = vector.shape_cast %66 : vector<2x16x16x16xf32> to vector<512x16xf32>
    %68 = vector.extract_strided_slice %51 {offsets = [0, 2, 0, 0], sizes = [2, 16, 16, 16], strides = [1, 1, 1, 1]} : vector<2x18x16x16xf32> to vector<2x16x16x16xf32>
    %69 = vector.shape_cast %68 : vector<2x16x16x16xf32> to vector<512x16xf32>
    %70 = tpu.concatenate %53, %55, %57, %59, %61, %63, %65, %67, %69 in 1 : vector<512x16xf32>, vector<512x16xf32>, vector<512x16xf32>, vector<512x16xf32>, vector<512x16xf32>, vector<512x16xf32>, vector<512x16xf32>, vector<512x16xf32>, vector<512x16xf32> -> vector<512x144xf32>
    %c0_74 = arith.constant 0 : index
    %c0_75 = arith.constant 0 : index
    %71 = vector.load %arg4[%c0_74, %c0_75] : memref<144x32xf32, #tpu.memory_space<vmem>>, vector<144x32xf32>
    %cst_76 = arith.constant dense<0.000000e+00> : vector<512x32xf32>
    %72 = tpu.matmul %70, %71, %cst_76 {dimension_numbers = #tpu.dot_dimension_numbers<[1], [0], [0], [1], [0, 0, 1, 1], [], []>} : vector<512x144xf32>, vector<144x32xf32>, vector<512x32xf32> -> vector<512x32xf32>
    %c0_77 = arith.constant 0 : index
    %c0_78 = arith.constant 0 : index
    %73 = vector.load %arg5[%c0_77, %c0_78] : memref<1x32xf32, #tpu.memory_space<vmem>>, vector<1x32xf32>
    %74 = vector.broadcast %73 : vector<1x32xf32> to vector<512x32xf32>
    %75 = arith.addf %72, %74 : vector<512x32xf32>
    %cst_79 = arith.constant 0.000000e+00 : f32
    %76 = vector.broadcast %cst_79 : f32 to vector<512x32xf32>
    %77 = arith.maximumf %75, %76 : vector<512x32xf32>
    %78 = vector.shape_cast %77 : vector<512x32xf32> to vector<2x16x16x32xf32>
    %c0_80 = arith.constant 0 : index
    %c0_81 = arith.constant 0 : index
    %c0_82 = arith.constant 0 : index
    %c0_83 = arith.constant 0 : index
    %79 = vector.load %arg6[%c0_80, %c0_81, %c0_82, %c0_83] : memref<2x16x16x32xf32, #tpu.memory_space<vmem>>, vector<2x16x16x32xf32>
    tpu.vector_store %arg6[%c0_80, %c0_81, %c0_82, %c0_83], %78 {strides = array<i32>} : memref<2x16x16x32xf32, #tpu.memory_space<vmem>>, vector<2x16x16x32xf32>,
    return
  }
  func.func @transform_0(%arg0: i32) -> (i32, i32, i32, i32) {
    %c0_i32 = arith.constant 0 : i32
    %c0_i32_0 = arith.constant 0 : i32
    %c0_i32_1 = arith.constant 0 : i32
    %c0_i32_2 = arith.constant 0 : i32
    %c0_i32_3 = arith.constant 0 : i32
    return %c0_i32, %c0_i32_0, %c0_i32_1, %c0_i32_2 : i32, i32, i32, i32
  }
  func.func @transform_1(%arg0: i32) -> (i32, i32) {
    %c0_i32 = arith.constant 0 : i32
    %c0_i32_0 = arith.constant 0 : i32
    %c0_i32_1 = arith.constant 0 : i32
    return %c0_i32, %c0_i32_0 : i32, i32
  }
  func.func @transform_2(%arg0: i32) -> (i32, i32) {
    %c0_i32 = arith.constant 0 : i32
    %c0_i32_0 = arith.constant 0 : i32
    %c0_i32_1 = arith.constant 0 : i32
    return %c0_i32, %c0_i32_0 : i32, i32
  }
  func.func @transform_3(%arg0: i32) -> (i32, i32) {
    %c0_i32 = arith.constant 0 : i32
    %c0_i32_0 = arith.constant 0 : i32
    %c0_i32_1 = arith.constant 0 : i32
    return %c0_i32, %c0_i32_0 : i32, i32
  }
  func.func @transform_4(%arg0: i32) -> (i32, i32) {
    %c0_i32 = arith.constant 0 : i32
    %c0_i32_0 = arith.constant 0 : i32
    %c0_i32_1 = arith.constant 0 : i32
    return %c0_i32, %c0_i32_0 : i32, i32
  }
  func.func @transform_5(%arg0: i32) -> (i32, i32, i32, i32) {
    %c0_i32 = arith.constant 0 : i32
    %c0_i32_0 = arith.constant 0 : i32
    %c0_i32_1 = arith.constant 0 : i32
    %c0_i32_2 = arith.constant 0 : i32
    %c0_i32_3 = arith.constant 0 : i32
    return %c0_i32, %c0_i32_0, %c0_i32_1, %c0_i32_2 : i32, i32, i32, i32
  }
}

</mosaic_0001>

<bundles_post_ra>
// kernel: tpu_custom_call.1
= control target key start
LH: loop header
LB: loop body
LE: loop exit
PB: predicated region body
PF: predicated region fallthrough
CT: control target
= control target key end

     0   :  { %vm85_vm0 = vcmask 39936   ;;  %vm88_vm1 = vcmask 33792   ;;  %v15108_v2 = vmov 0.0   ;;  %vm100_vm2 = vcmask 32768   ;;  %s8293_s14 = smov 5   ;;  %s15102_s0 = inlined_call_operand.vmem [shape: f32[2,16,16,5], index: 0, kind: input, shape index: {}]   ;;  %s15103_s1 = inlined_call_operand.vmem [shape: f32[45,16], index: 1, kind: input, shape index: {}]   ;;  %s15104_s2 = inlined_call_operand.vmem [shape: f32[1,16], index: 2, kind: input, shape index: {}]   ;;  %s15105_s3 = inlined_call_operand.vmem [shape: f32[144,32], index: 3, kind: input, shape index: {}]   ;;  %s15106_s4 = inlined_call_operand.vmem [shape: f32[1,32], index: 4, kind: input, shape index: {}]   ;;  %s15107_s5 = inlined_call_operand.hbm [shape: f32[2,16,16,32], index: 5, kind: output, shape index: {}]  }
   0x1   :  { %v21_v0 = vld [vmem:[%s15102_s0] sm:$0xff]  ;;  %v22_v1 = vld [vmem:[%s15102_s0 + $0x8] sm:$0xff]  ;;  %86 = vst.msk [vmem:[#allocation2 + $0x7] sm:$0xff] %vm85_vm0, %v15108_v2  ;;  %87 = vst.msk [vmem:[#allocation2 + $0xf] sm:$0xff] %vm85_vm0, %v15108_v2  ;;  %6750 = vmatprep.subr.mxu1 %v15108_v2 }
   0x2   :  { %90 = vst.msk [vmem:[#allocation2 + $0x247] sm:$0xff] %vm85_vm0, %v15108_v2  ;;  %91 = vst.msk [vmem:[#allocation2 + $0x24f] sm:$0xff] %vm85_vm0, %v15108_v2  ;;  %v23_v3 = vld [vmem:[%s15102_s0 + $0x10] sm:$0xff]  ;;  %v24_v4 = vld [vmem:[%s15102_s0 + $0x18] sm:$0xff] }
   0x3   :  { %94 = vst.msk [vmem:[#allocation2 + $0x227] sm:$0xff] %vm85_vm0, %v15108_v2  ;;  %95 = vst.msk [vmem:[#allocation2 + $0x22f] sm:$0xff] %vm85_vm0, %v15108_v2  ;;  %v25_v5 = vld [vmem:[%s15102_s0 + $0x20] sm:$0xff]  ;;  %v8385_v6 = vld [vmem:[%s15102_s0 + $0x28] sm:$0xff] }
   0x4   :  { %97 = vst.msk [vmem:[#allocation2 + $0x467] sm:$0xff] %vm85_vm0, %v15108_v2  ;;  %98 = vst.msk [vmem:[#allocation2 + $0x46f] sm:$0xff] %vm85_vm0, %v15108_v2  ;;  %v8390_v7 = vld [vmem:[%s15102_s0 + $0x30] sm:$0xff]  ;;  %v8395_v8 = vld [vmem:[%s15102_s0 + $0x38] sm:$0xff] }
   0x5   :  { %174 = vst.msk [vmem:[#allocation2 + $0x28] sm:$0xff] %vm85_vm0, %v21_v0  ;;  %175 = vst.msk [vmem:[#allocation2 + $0x30] sm:$0xff] %vm85_vm0, %v22_v1  ;;  %v29_v9 = vld [vmem:[%s15102_s0 + $0x40] sm:$0xff]  ;;  %v30_v10 = vld [vmem:[%s15102_s0 + $0x48] sm:$0xff] }
   0x6   :  { %89 = vst.msk [vmem:[#allocation2 + $0x17] sm:$0x3] %vm88_vm1, %v15108_v2  ;;  %92 = vst.msk [vmem:[#allocation2 + $0x257] sm:$0x3] %vm88_vm1, %v15108_v2  ;;  %v31_v11 = vld [vmem:[%s15102_s0 + $0x50] sm:$0xff]  ;;  %v32_v12 = vld [vmem:[%s15102_s0 + $0x58] sm:$0xff] }
   0x7   :  { %96 = vst.msk [vmem:[#allocation2 + $0x237] sm:$0x3] %vm88_vm1, %v15108_v2  ;;  %99 = vst.msk [vmem:[#allocation2 + $0x477] sm:$0x3] %vm88_vm1, %v15108_v2  ;;  %v33_v13 = vld [vmem:[%s15102_s0 + $0x60] sm:$0xff]  ;;  %v34_v14 = vld [vmem:[%s15102_s0 + $0x68] sm:$0xff] }
   0x8   :  { %176 = vst.msk [vmem:[#allocation2 + $0x48] sm:$0xff] %vm85_vm0, %v23_v3  ;;  %177 = vst.msk [vmem:[#allocation2 + $0x50] sm:$0xff] %vm85_vm0, %v24_v4  ;;  %v35_v15 = vld [vmem:[%s15102_s0 + $0x70] sm:$0xff]  ;;  %v36_v16 = vld [vmem:[%s15102_s0 + $0x78] sm:$0xff] }
   0x9   :  { %178 = vst.msk [vmem:[#allocation2 + $0x68] sm:$0xff] %vm85_vm0, %v25_v5  ;;  %179 = vst.msk [vmem:[#allocation2 + $0x70] sm:$0xff] %vm85_vm0, %v8385_v6  ;;  %v37_v17 = vld [vmem:[%s15102_s0 + $0x80] sm:$0xff]  ;;  %v38_v18 = vld [vmem:[%s15102_s0 + $0x88] sm:$0xff] }
   0xa   :  { %101 = vst.msk [vmem:[#allocation2 + $0x7] sm:$0x1] %vm100_vm2, %v15108_v2  ;;  %102 = vst.msk [vmem:[#allocation2 + $0x27] sm:$0x1] %vm100_vm2, %v15108_v2  ;;  %v39_v19 = vld [vmem:[%s15102_s0 + $0x90] sm:$0xff]  ;;  %v40_v20 = vld [vmem:[%s15102_s0 + $0x98] sm:$0xff] }
   0xb   :  { %103 = vst.msk [vmem:[#allocation2 + $0x47] sm:$0x1] %vm100_vm2, %v15108_v2  ;;  %104 = vst.msk [vmem:[#allocation2 + $0x67] sm:$0x1] %vm100_vm2, %v15108_v2  ;;  %v41_v21 = vld [vmem:[%s15102_s0 + $0xa0] sm:$0xff]  ;;  %v42_v22 = vld [vmem:[%s15102_s0 + $0xa8] sm:$0xff] }
   0xc   :  { %105 = vst.msk [vmem:[#allocation2 + $0x87] sm:$0x1] %vm100_vm2, %v15108_v2  ;;  %106 = vst.msk [vmem:[#allocation2 + $0xa7] sm:$0x1] %vm100_vm2, %v15108_v2  ;;  %v43_v23 = vld [vmem:[%s15102_s0 + $0xb0] sm:$0xff]  ;;  %v310_v24 = vld [vmem:[#allocation2 + $0x8] sm:$0xff] }
   0xd   :  { %107 = vst.msk [vmem:[#allocation2 + $0xc7] sm:$0x1] %vm100_vm2, %v15108_v2  ;;  %108 = vst.msk [vmem:[#allocation2 + $0xe7] sm:$0x1] %vm100_vm2, %v15108_v2  ;;  %v312_v25 = vld [vmem:[#allocation2 + $0x28] sm:$0xff]  ;;  %518 = vrot.lane.b32.xlu0 %v310_v24, %s8293_s14  ;;  %v311_v26 = vld [vmem:[#allocation2 + $0x10] sm:$0xff] }
   0xe   :  { %109 = vst.msk [vmem:[#allocation2 + $0x107] sm:$0x1] %vm100_vm2, %v15108_v2  ;;  %110 = vst.msk [vmem:[#allocation2 + $0x127] sm:$0x1] %vm100_vm2, %v15108_v2  ;;  %522 = vrot.lane.b32.xlu1 %v312_v25, %s8293_s14  ;;  %v313_v27 = vld [vmem:[#allocation2 + $0x30] sm:$0xff]  ;;  %v44_v31 = vld [vmem:[%s15102_s0 + $0xb8] sm:$0xff] }
   0xf   :  { %111 = vst.msk [vmem:[#allocation2 + $0x147] sm:$0x1] %vm100_vm2, %v15108_v2  ;;  %112 = vst.msk [vmem:[#allocation2 + $0x167] sm:$0x1] %vm100_vm2, %v15108_v2  ;;  %v314_v28 = vld [vmem:[#allocation2 + $0x48] sm:$0xff]  ;;  %v315_v29 = vld [vmem:[#allocation2 + $0x50] sm:$0xff] }
  0x10   :  { %113 = vst.msk [vmem:[#allocation2 + $0x187] sm:$0x1] %vm100_vm2, %v15108_v2  ;;  %114 = vst.msk [vmem:[#allocation2 + $0x1a7] sm:$0x1] %vm100_vm2, %v15108_v2  ;;  %v316_v30 = vld [vmem:[#allocation2 + $0x68] sm:$0xff]  ;;  %v45_v32 = vld [vmem:[%s15102_s0 + $0xc0] sm:$0xff] }
  0x11   :  { %115 = vst.msk [vmem:[#allocation2 + $0x1c7] sm:$0x1] %vm100_vm2, %v15108_v2  ;;  %116 = vst.msk [vmem:[#allocation2 + $0x1e7] sm:$0x1] %vm100_vm2, %v15108_v2  ;;  %520 = vrot.lane.b32.xlu0 %v311_v26, %s8293_s14  ;;  %v317_v33 = vld [vmem:[#allocation2 + $0x70] sm:$0xff]  ;;  %v46_v34 = vld [vmem:[%s15102_s0 + $0xc8] sm:$0xff] }
  0x12   :  { %117 = vst.msk [vmem:[#allocation2 + $0x207] sm:$0x1] %vm100_vm2, %v15108_v2  ;;  %118 = vst.msk [vmem:[#allocation2 + $0x227] sm:$0x1] %vm100_vm2, %v15108_v2  ;;  %524 = vrot.lane.b32.xlu1 %v313_v27, %s8293_s14  ;;  %v47_v35 = vld [vmem:[%s15102_s0 + $0xd0] sm:$0xff]  ;;  %v48_v36 = vld [vmem:[%s15102_s0 + $0xd8] sm:$0xff] }
  0x13   :  { %119 = vst.msk [vmem:[#allocation2 + $0x247] sm:$0x1] %vm100_vm2, %v15108_v2  ;;  %120 = vst.msk [vmem:[#allocation2 + $0x267] sm:$0x1] %vm100_vm2, %v15108_v2  ;;  %v49_v37 = vld [vmem:[%s15102_s0 + $0xe0] sm:$0xff]  ;;  %v50_v38 = vld [vmem:[%s15102_s0 + $0xe8] sm:$0xff] }
  0x14   :  { %121 = vst.msk [vmem:[#allocation2 + $0x287] sm:$0x1] %vm100_vm2, %v15108_v2  ;;  %122 = vst.msk [vmem:[#allocation2 + $0x2a7] sm:$0x1] %vm100_vm2, %v15108_v2  ;;  %v53_v39 = vld [vmem:[%s15102_s0 + $0x100] sm:$0xff]  ;;  %v54_v40 = vld [vmem:[%s15102_s0 + $0x108] sm:$0xff] }
  0x15   :  { %123 = vst.msk [vmem:[#allocation2 + $0x2c7] sm:$0x1] %vm100_vm2, %v15108_v2  ;;  %124 = vst.msk [vmem:[#allocation2 + $0x2e7] sm:$0x1] %vm100_vm2, %v15108_v2  ;;  %526 = vrot.lane.b32.xlu0 %v314_v28, %s8293_s14  ;;  %v55_v42 = vld [vmem:[%s15102_s0 + $0x110] sm:$0xff]  ;;  %v56_v43 = vld [vmem:[%s15102_s0 + $0x118] sm:$0xff] }
  0x16   :  { %125 = vst.msk [vmem:[#allocation2 + $0x307] sm:$0x1] %vm100_vm2, %v15108_v2  ;;  %126 = vst.msk [vmem:[#allocation2 + $0x327] sm:$0x1] %vm100_vm2, %v15108_v2  ;;  %528 = vrot.lane.b32.xlu1 %v315_v29, %s8293_s14  ;;  %v57_v44 = vld [vmem:[%s15102_s0 + $0x120] sm:$0xff]  ;;  %v58_v46 = vld [vmem:[%s15102_s0 + $0x128] sm:$0xff] }
  0x17   :  { %127 = vst.msk [vmem:[#allocation2 + $0x347] sm:$0x1] %vm100_vm2, %v15108_v2  ;;  %128 = vst.msk [vmem:[#allocation2 + $0x367] sm:$0x1] %vm100_vm2, %v15108_v2  ;;  %v59_v47 = vld [vmem:[%s15102_s0 + $0x130] sm:$0xff]  ;;  %v60_v48 = vld [vmem:[%s15102_s0 + $0x138] sm:$0xff] }
  0x18   :  { %129 = vst.msk [vmem:[#allocation2 + $0x387] sm:$0x1] %vm100_vm2, %v15108_v2  ;;  %130 = vst.msk [vmem:[#allocation2 + $0x3a7] sm:$0x1] %vm100_vm2, %v15108_v2  ;;  %v61_v49 = vld [vmem:[%s15102_s0 + $0x140] sm:$0xff]  ;;  %v62_v50 = vld [vmem:[%s15102_s0 + $0x148] sm:$0xff] }
  0x19   :  { %131 = vst.msk [vmem:[#allocation2 + $0x3c7] sm:$0x1] %vm100_vm2, %v15108_v2  ;;  %132 = vst.msk [vmem:[#allocation2 + $0x3e7] sm:$0x1] %vm100_vm2, %v15108_v2  ;;  %530 = vrot.lane.b32.xlu0 %v316_v30, %s8293_s14  ;;  %v63_v51 = vld [vmem:[%s15102_s0 + $0x150] sm:$0xff]  ;;  %v64_v52 = vld [vmem:[%s15102_s0 + $0x158] sm:$0xff] }
  0x1a   :  { %133 = vst.msk [vmem:[#allocation2 + $0x407] sm:$0x1] %vm100_vm2, %v15108_v2  ;;  %134 = vst.msk [vmem:[#allocation2 + $0x427] sm:$0x1] %vm100_vm2, %v15108_v2  ;;  %532 = vrot.lane.b32.xlu1 %v317_v33, %s8293_s14  ;;  %v65_v53 = vld [vmem:[%s15102_s0 + $0x160] sm:$0xff]  ;;  %v66_v54 = vld [vmem:[%s15102_s0 + $0x168] sm:$0xff] }
  0x1b   :  { %135 = vst.msk [vmem:[#allocation2 + $0x447] sm:$0x1] %vm100_vm2, %v15108_v2  ;;  %136 = vst.msk [vmem:[#allocation2 + $0x467] sm:$0x1] %vm100_vm2, %v15108_v2  ;;  %v67_v55 = vld [vmem:[%s15102_s0 + $0x170] sm:$0xff]  ;;  %v68_v58 = vld [vmem:[%s15102_s0 + $0x178] sm:$0xff] }
  0x1c   :  { %137 = vst.msk [vmem:[#allocation2 + $0x18] sm:$0x1] %vm100_vm2, %v15108_v2  ;;  %138 = vst.msk [vmem:[#allocation2 + $0x38] sm:$0x1] %vm100_vm2, %v15108_v2  ;;  %v69_v59 = vld [vmem:[%s15102_s0 + $0x180] sm:$0xff]  ;;  %v70_v63 = vld [vmem:[%s15102_s0 + $0x188] sm:$0xff] }
  0x1d   :  { %139 = vst.msk [vmem:[#allocation2 + $0x58] sm:$0x1] %vm100_vm2, %v15108_v2  ;;  %140 = vst.msk [vmem:[#allocation2 + $0x78] sm:$0x1] %vm100_vm2, %v15108_v2  ;;  %v71_v0 = vld [vmem:[%s15102_s0 + $0x190] sm:$0xff]  ;;  %v72_v3 = vld [vmem:[%s15102_s0 + $0x198] sm:$0xff] }
  0x1e   :  { %141 = vst.msk [vmem:[#allocation2 + $0x98] sm:$0x1] %vm100_vm2, %v15108_v2  ;;  %142 = vst.msk [vmem:[#allocation2 + $0xb8] sm:$0x1] %vm100_vm2, %v15108_v2  ;;  %v73_v4 = vld [vmem:[%s15102_s0 + $0x1a0] sm:$0xff]  ;;  %v74_v5 = vld [vmem:[%s15102_s0 + $0x1a8] sm:$0xff] }
  0x1f   :  { %143 = vst.msk [vmem:[#allocation2 + $0xd8] sm:$0x1] %vm100_vm2, %v15108_v2  ;;  %144 = vst.msk [vmem:[#allocation2 + $0xf8] sm:$0x1] %vm100_vm2, %v15108_v2  ;;  %v75_v6 = vld [vmem:[%s15102_s0 + $0x1b0] sm:$0xff] }
  0x20   :  { %145 = vst.msk [vmem:[#allocation2 + $0x118] sm:$0x1] %vm100_vm2, %v15108_v2  ;;  %146 = vst.msk [vmem:[#allocation2 + $0x138] sm:$0x1] %vm100_vm2, %v15108_v2 }
  0x21   :  { %147 = vst.msk [vmem:[#allocation2 + $0x158] sm:$0x1] %vm100_vm2, %v15108_v2  ;;  %148 = vst.msk [vmem:[#allocation2 + $0x178] sm:$0x1] %vm100_vm2, %v15108_v2 }
  0x22   :  { %149 = vst.msk [vmem:[#allocation2 + $0x198] sm:$0x1] %vm100_vm2, %v15108_v2  ;;  %150 = vst.msk [vmem:[#allocation2 + $0x1b8] sm:$0x1] %vm100_vm2, %v15108_v2 }
  0x23   :  { %151 = vst.msk [vmem:[#allocation2 + $0x1d8] sm:$0x1] %vm100_vm2, %v15108_v2  ;;  %152 = vst.msk [vmem:[#allocation2 + $0x1f8] sm:$0x1] %vm100_vm2, %v15108_v2 }
  0x24   :  { %153 = vst.msk [vmem:[#allocation2 + $0x218] sm:$0x1] %vm100_vm2, %v15108_v2  ;;  %154 = vst.msk [vmem:[#allocation2 + $0x238] sm:$0x1] %vm100_vm2, %v15108_v2 }
  0x25   :  { %155 = vst.msk [vmem:[#allocation2 + $0x258] sm:$0x1] %vm100_vm2, %v15108_v2  ;;  %156 = vst.msk [vmem:[#allocation2 + $0x278] sm:$0x1] %vm100_vm2, %v15108_v2 }
  0x26   :  { %157 = vst.msk [vmem:[#allocation2 + $0x298] sm:$0x1] %vm100_vm2, %v15108_v2  ;;  %158 = vst.msk [vmem:[#allocation2 + $0x2b8] sm:$0x1] %vm100_vm2, %v15108_v2 }
  0x27   :  { %159 = vst.msk [vmem:[#allocation2 + $0x2d8] sm:$0x1] %vm100_vm2, %v15108_v2  ;;  %160 = vst.msk [vmem:[#allocation2 + $0x2f8] sm:$0x1] %vm100_vm2, %v15108_v2 }
  0x28   :  { %161 = vst.msk [vmem:[#allocation2 + $0x318] sm:$0x1] %vm100_vm2, %v15108_v2  ;;  %162 = vst.msk [vmem:[#allocation2 + $0x338] sm:$0x1] %vm100_vm2, %v15108_v2 }
  0x29   :  { %163 = vst.msk [vmem:[#allocation2 + $0x358] sm:$0x1] %vm100_vm2, %v15108_v2  ;;  %164 = vst.msk [vmem:[#allocation2 + $0x378] sm:$0x1] %vm100_vm2, %v15108_v2 }
  0x2a   :  { %165 = vst.msk [vmem:[#allocation2 + $0x398] sm:$0x1] %vm100_vm2, %v15108_v2  ;;  %166 = vst.msk [vmem:[#allocation2 + $0x3b8] sm:$0x1] %vm100_vm2, %v15108_v2 }
  0x2b   :  { %167 = vst.msk [vmem:[#allocation2 + $0x3d8] sm:$0x1] %vm100_vm2, %v15108_v2  ;;  %168 = vst.msk [vmem:[#allocation2 + $0x3f8] sm:$0x1] %vm100_vm2, %v15108_v2 }
  0x2c   :  { %169 = vst.msk [vmem:[#allocation2 + $0x418] sm:$0x1] %vm100_vm2, %v15108_v2  ;;  %170 = vst.msk [vmem:[#allocation2 + $0x438] sm:$0x1] %vm100_vm2, %v15108_v2 }
  0x2d   :  { %171 = vst.msk [vmem:[#allocation2 + $0x458] sm:$0x1] %vm100_vm2, %v15108_v2  ;;  %172 = vst.msk [vmem:[#allocation2 + $0x478] sm:$0x1] %vm100_vm2, %v15108_v2 }
  0x2e   :  { %180 = vst.msk [vmem:[#allocation2 + $0x88] sm:$0xff] %vm85_vm0, %v8390_v7  ;;  %181 = vst.msk [vmem:[#allocation2 + $0x90] sm:$0xff] %vm85_vm0, %v8395_v8  ;;  %v76_v7 = vld [vmem:[%s15102_s0 + $0x1b8] sm:$0xff]  ;;  %v77_v8 = vld [vmem:[%s15102_s0 + $0x1c0] sm:$0xff] }
  0x2f   :  { %182 = vst.msk [vmem:[#allocation2 + $0xa8] sm:$0xff] %vm85_vm0, %v29_v9  ;;  %183 = vst.msk [vmem:[#allocation2 + $0xb0] sm:$0xff] %vm85_vm0, %v30_v10  ;;  %v78_v9 = vld [vmem:[%s15102_s0 + $0x1c8] sm:$0xff]  ;;  %v79_v10 = vld [vmem:[%s15102_s0 + $0x1d0] sm:$0xff] }
  0x30   :  { %184 = vst.msk [vmem:[#allocation2 + $0xc8] sm:$0xff] %vm85_vm0, %v31_v11  ;;  %185 = vst.msk [vmem:[#allocation2 + $0xd0] sm:$0xff] %vm85_vm0, %v32_v12  ;;  %v80_v11 = vld [vmem:[%s15102_s0 + $0x1d8] sm:$0xff] }
  0x31   :  { %186 = vst.msk [vmem:[#allocation2 + $0xe8] sm:$0xff] %vm85_vm0, %v33_v13  ;;  %187 = vst.msk [vmem:[#allocation2 + $0xf0] sm:$0xff] %vm85_vm0, %v34_v14  ;;  %v81_v14 = vld [vmem:[%s15102_s0 + $0x1e0] sm:$0xff] }
  0x32   :  { %188 = vst.msk [vmem:[#allocation2 + $0x108] sm:$0xff] %vm85_vm0, %v35_v15  ;;  %189 = vst.msk [vmem:[#allocation2 + $0x110] sm:$0xff] %vm85_vm0, %v36_v16  ;;  %v82_v15 = vld [vmem:[%s15102_s0 + $0x1e8] sm:$0xff] }
  0x33   :  { %190 = vst.msk [vmem:[#allocation2 + $0x128] sm:$0xff] %vm85_vm0, %v37_v17  ;;  %191 = vst.msk [vmem:[#allocation2 + $0x130] sm:$0xff] %vm85_vm0, %v38_v18 }
  0x34   :  { %192 = vst.msk [vmem:[#allocation2 + $0x148] sm:$0xff] %vm85_vm0, %v39_v19  ;;  %193 = vst.msk [vmem:[#allocation2 + $0x150] sm:$0xff] %vm85_vm0, %v40_v20 }
  0x35   :  { %194 = vst.msk [vmem:[#allocation2 + $0x168] sm:$0xff] %vm85_vm0, %v41_v21  ;;  %195 = vst.msk [vmem:[#allocation2 + $0x170] sm:$0xff] %vm85_vm0, %v42_v22  ;;  %v318_v41 = vld [vmem:[#allocation2 + $0x88] sm:$0xff]  ;;  %v319_v45 = vld [vmem:[#allocation2 + $0x90] sm:$0xff] }
  0x36   :  { %196 = vst.msk [vmem:[#allocation2 + $0x188] sm:$0xff] %vm85_vm0, %v43_v23  ;;  %197 = vst.msk [vmem:[#allocation2 + $0x190] sm:$0xff] %vm85_vm0, %v44_v31  ;;  %534 = vrot.lane.b32.xlu0 %v318_v41, %s8293_s14  ;;  %536 = vrot.lane.b32.xlu1 %v319_v45, %s8293_s14  ;;  %v320_v56 = vld [vmem:[#allocation2 + $0xa8] sm:$0xff]  ;;  %v321_v57 = vld [vmem:[#allocation2 + $0xb0] sm:$0xff] }
  0x37   :  { %198 = vst.msk [vmem:[#allocation2 + $0x1a8] sm:$0xff] %vm85_vm0, %v45_v32  ;;  %199 = vst.msk [vmem:[#allocation2 + $0x1b0] sm:$0xff] %vm85_vm0, %v46_v34  ;;  %v322_v60 = vld [vmem:[#allocation2 + $0xc8] sm:$0xff]  ;;  %v323_v61 = vld [vmem:[#allocation2 + $0xd0] sm:$0xff] }
  0x38   :  { %200 = vst.msk [vmem:[#allocation2 + $0x1c8] sm:$0xff] %vm85_vm0, %v47_v35  ;;  %201 = vst.msk [vmem:[#allocation2 + $0x1d0] sm:$0xff] %vm85_vm0, %v48_v36  ;;  %v324_v62 = vld [vmem:[#allocation2 + $0xe8] sm:$0xff]  ;;  %v325_v1 = vld [vmem:[#allocation2 + $0xf0] sm:$0xff] }
  0x39   :  { %202 = vst.msk [vmem:[#allocation2 + $0x1e8] sm:$0xff] %vm85_vm0, %v49_v37  ;;  %203 = vst.msk [vmem:[#allocation2 + $0x1f0] sm:$0xff] %vm85_vm0, %v50_v38  ;;  %v326_v12 = vld [vmem:[#allocation2 + $0x108] sm:$0xff]  ;;  %v327_v13 = vld [vmem:[#allocation2 + $0x110] sm:$0xff] }
  0x3a   :  { %206 = vst.msk [vmem:[#allocation2 + $0x268] sm:$0xff] %vm85_vm0, %v53_v39  ;;  %207 = vst.msk [vmem:[#allocation2 + $0x270] sm:$0xff] %vm85_vm0, %v54_v40  ;;  %538 = vrot.lane.b32.xlu0 %v320_v56, %s8293_s14  ;;  %540 = vrot.lane.b32.xlu1 %v321_v57, %s8293_s14  ;;  %v328_v16 = vld [vmem:[#allocation2 + $0x128] sm:$0xff]  ;;  %v329_v17 = vld [vmem:[#allocation2 + $0x130] sm:$0xff] }
  0x3b   :  { %208 = vst.msk [vmem:[#allocation2 + $0x288] sm:$0xff] %vm85_vm0, %v55_v42  ;;  %209 = vst.msk [vmem:[#allocation2 + $0x290] sm:$0xff] %vm85_vm0, %v56_v43  ;;  %v330_v18 = vld [vmem:[#allocation2 + $0x148] sm:$0xff]  ;;  %v331_v19 = vld [vmem:[#allocation2 + $0x150] sm:$0xff] }
  0x3c   :  { %210 = vst.msk [vmem:[#allocation2 + $0x2a8] sm:$0xff] %vm85_vm0, %v57_v44  ;;  %211 = vst.msk [vmem:[#allocation2 + $0x2b0] sm:$0xff] %vm85_vm0, %v58_v46  ;;  %v332_v20 = vld [vmem:[#allocation2 + $0x168] sm:$0xff]  ;;  %v333_v21 = vld [vmem:[#allocation2 + $0x170] sm:$0xff] }
  0x3d   :  { %212 = vst.msk [vmem:[#allocation2 + $0x2c8] sm:$0xff] %vm85_vm0, %v59_v47  ;;  %213 = vst.msk [vmem:[#allocation2 + $0x2d0] sm:$0xff] %vm85_vm0, %v60_v48  ;;  %v334_v22 = vld [vmem:[#allocation2 + $0x188] sm:$0xff]  ;;  %v335_v23 = vld [vmem:[#allocation2 + $0x190] sm:$0xff] }
  0x3e   :  { %214 = vst.msk [vmem:[#allocation2 + $0x2e8] sm:$0xff] %vm85_vm0, %v61_v49  ;;  %215 = vst.msk [vmem:[#allocation2 + $0x2f0] sm:$0xff] %vm85_vm0, %v62_v50  ;;  %542 = vrot.lane.b32.xlu0 %v322_v60, %s8293_s14  ;;  %544 = vrot.lane.b32.xlu1 %v323_v61, %s8293_s14  ;;  %v336_v24 = vld [vmem:[#allocation2 + $0x1a8] sm:$0xff]  ;;  %v337_v25 = vld [vmem:[#allocation2 + $0x1b0] sm:$0xff] }
  0x3f   :  { %216 = vst.msk [vmem:[#allocation2 + $0x308] sm:$0xff] %vm85_vm0, %v63_v51  ;;  %217 = vst.msk [vmem:[#allocation2 + $0x310] sm:$0xff] %vm85_vm0, %v64_v52  ;;  %v338_v26 = vld [vmem:[#allocation2 + $0x1c8] sm:$0xff]  ;;  %v339_v27 = vld [vmem:[#allocation2 + $0x1d0] sm:$0xff] }
  0x40   :  { %218 = vst.msk [vmem:[#allocation2 + $0x328] sm:$0xff] %vm85_vm0, %v65_v53  ;;  %219 = vst.msk [vmem:[#allocation2 + $0x330] sm:$0xff] %vm85_vm0, %v66_v54 }
  0x41   :  { %220 = vst.msk [vmem:[#allocation2 + $0x348] sm:$0xff] %vm85_vm0, %v67_v55  ;;  %221 = vst.msk [vmem:[#allocation2 + $0x350] sm:$0xff] %vm85_vm0, %v68_v58 }
  0x42   :  { %222 = vst.msk [vmem:[#allocation2 + $0x368] sm:$0xff] %vm85_vm0, %v69_v59  ;;  %223 = vst.msk [vmem:[#allocation2 + $0x370] sm:$0xff] %vm85_vm0, %v70_v63  ;;  %546 = vrot.lane.b32.xlu0 %v324_v62, %s8293_s14  ;;  %548 = vrot.lane.b32.xlu1 %v325_v1, %s8293_s14 }
  0x43   :  { %224 = vst.msk [vmem:[#allocation2 + $0x388] sm:$0xff] %vm85_vm0, %v71_v0  ;;  %225 = vst.msk [vmem:[#allocation2 + $0x390] sm:$0xff] %vm85_vm0, %v72_v3 }
  0x44   :  { %226 = vst.msk [vmem:[#allocation2 + $0x3a8] sm:$0xff] %vm85_vm0, %v73_v4  ;;  %227 = vst.msk [vmem:[#allocation2 + $0x3b0] sm:$0xff] %vm85_vm0, %v74_v5 }
  0x45   :  { %228 = vst.msk [vmem:[#allocation2 + $0x3c8] sm:$0xff] %vm85_vm0, %v75_v6  ;;  %229 = vst.msk [vmem:[#allocation2 + $0x3d0] sm:$0xff] %vm85_vm0, %v76_v7 }
  0x46   :  { %230 = vst.msk [vmem:[#allocation2 + $0x3e8] sm:$0xff] %vm85_vm0, %v77_v8  ;;  %231 = vst.msk [vmem:[#allocation2 + $0x3f0] sm:$0xff] %vm85_vm0, %v78_v9  ;;  %550 = vrot.lane.b32.xlu0 %v326_v12, %s8293_s14  ;;  %552 = vrot.lane.b32.xlu1 %v327_v13, %s8293_s14 }
  0x47   :  { %232 = vst.msk [vmem:[#allocation2 + $0x408] sm:$0xff] %vm85_vm0, %v79_v10  ;;  %233 = vst.msk [vmem:[#allocation2 + $0x410] sm:$0xff] %vm85_vm0, %v80_v11 }
  0x48   :  { %234 = vst.msk [vmem:[#allocation2 + $0x428] sm:$0xff] %vm85_vm0, %v81_v14  ;;  %235 = vst.msk [vmem:[#allocation2 + $0x430] sm:$0xff] %vm85_vm0, %v82_v15 }
  0x4a   :  { %554 = vrot.lane.b32.xlu0 %v328_v16, %s8293_s14  ;;  %556 = vrot.lane.b32.xlu1 %v329_v17, %s8293_s14 }
  0x4e   :  { %558 = vrot.lane.b32.xlu0 %v330_v18, %s8293_s14  ;;  %560 = vrot.lane.b32.xlu1 %v331_v19, %s8293_s14 }
  0x52   :  { %562 = vrot.lane.b32.xlu0 %v332_v20, %s8293_s14  ;;  %564 = vrot.lane.b32.xlu1 %v333_v21, %s8293_s14 }
  0x56   :  { %566 = vrot.lane.b32.xlu0 %v334_v22, %s8293_s14  ;;  %568 = vrot.lane.b32.xlu1 %v335_v23, %s8293_s14 }
  0x5a   :  { %570 = vrot.lane.b32.xlu0 %v336_v24, %s8293_s14  ;;  %572 = vrot.lane.b32.xlu1 %v337_v25, %s8293_s14 }
  0x5b   :  { %10 = vsyncpa [#allocation5], 0  ;;  %v340_v28 = vld [vmem:[#allocation2 + $0x1e8] sm:$0xff]  ;;  %v341_v29 = vld [vmem:[#allocation2 + $0x1f0] sm:$0xff]  ;;  %s8294_s17 = smov 10   ;;  %s8296_s25 = smov 20  }
  0x5c   :  { %v346_v30 = vld [vmem:[#allocation2 + $0x248] sm:$0xff]  ;;  %v347_v31 = vld [vmem:[#allocation2 + $0x250] sm:$0xff]  ;;  %s8297_s26 = smov 25   ;;  %s8298_s27 = smov 30   ;;  %vm2927_vm3 = vcmask 1044480   ;;  %vm2266_vm4 = vcmask 80896  }
  0x5d   :  { %v348_v32 = vld [vmem:[#allocation2 + $0x268] sm:$0xff]  ;;  %v349_v33 = vld [vmem:[#allocation2 + $0x270] sm:$0xff]  ;;  %s8299_s28 = smov 35   ;;  %vm2331_vm5 = vcmask 121856   ;;  %vm2396_vm6 = vcmask 162816   ;;  %vm2461_vm7 = vcmask 203776  }
  0x5e   :  { %574 = vrot.lane.b32.xlu0 %v338_v26, %s8293_s14  ;;  %576 = vrot.lane.b32.xlu1 %v339_v27, %s8293_s14  ;;  %v350_v34 = vld [vmem:[#allocation2 + $0x288] sm:$0xff]  ;;  %v351_v35 = vld [vmem:[#allocation2 + $0x290] sm:$0xff]  ;;  %vm2526_vm8 = vcmask 244736   ;;  %vm2591_vm9 = vcmask 285696   ;;  %vm2656_vm10 = vcmask 326656   ;;  %vm2734_vm11 = vcmask 367616  }
  0x5f   :  { %v352_v36 = vld [vmem:[#allocation2 + $0x2a8] sm:$0xff]  ;;  %v353_v37 = vld [vmem:[#allocation2 + $0x2b0] sm:$0xff]  ;;  %vm3380_vm12 = vcmask 130048   ;;  %vm3395_vm13 = vcmask 122880   ;;  %vm3383_vm14 = vcmask 123904   ;;  %s8303_s19 = smov 48  }
  0x60   :  { %v354_v38 = vld [vmem:[#allocation2 + $0x2c8] sm:$0xff]  ;;  %v355_v39 = vld [vmem:[#allocation2 + $0x2d0] sm:$0xff]  ;;  %s8304_s20 = smov 64   ;;  %s8307_s29 = smov 96   ;;  %vm5365_vm15 = vcmask 261120   ;;  %vm5495_vm1 = vcmask 523264  }
  0x61   :  { %v356_v40 = vld [vmem:[#allocation2 + $0x2e8] sm:$0xff]  ;;  %v357_v41 = vld [vmem:[#allocation2 + $0x2f0] sm:$0xff]  ;;  %vm5560_vm2 = vcmask 654336  }
  0x62   :  { %578 = vrot.lane.b32.xlu0 %v340_v28, %s8293_s14  ;;  %580 = vrot.lane.b32.xlu1 %v341_v29, %s8293_s14  ;;  %v358_v42 = vld [vmem:[#allocation2 + $0x308] sm:$0xff]  ;;  %v359_v43 = vld [vmem:[#allocation2 + $0x310] sm:$0xff] }
  0x63   :  { %v360_v44 = vld [vmem:[#allocation2 + $0x328] sm:$0xff]  ;;  %v361_v45 = vld [vmem:[#allocation2 + $0x330] sm:$0xff] }
  0x64   :  { %v362_v46 = vld [vmem:[#allocation2 + $0x348] sm:$0xff]  ;;  %v363_v47 = vld [vmem:[#allocation2 + $0x350] sm:$0xff] }
  0x65   :  { %v364_v48 = vld [vmem:[#allocation2 + $0x368] sm:$0xff]  ;;  %v365_v49 = vld [vmem:[#allocation2 + $0x370] sm:$0xff] }
  0x66   :  { %582 = vrot.lane.b32.xlu0 %v346_v30, %s8293_s14  ;;  %584 = vrot.lane.b32.xlu1 %v347_v31, %s8293_s14  ;;  %v366_v50 = vld [vmem:[#allocation2 + $0x388] sm:$0xff]  ;;  %v367_v51 = vld [vmem:[#allocation2 + $0x390] sm:$0xff] }
  0x67   :  { %v368_v52 = vld [vmem:[#allocation2 + $0x3a8] sm:$0xff]  ;;  %v369_v53 = vld [vmem:[#allocation2 + $0x3b0] sm:$0xff] }
  0x68   :  { %v370_v54 = vld [vmem:[#allocation2 + $0x3c8] sm:$0xff]  ;;  %v371_v55 = vld [vmem:[#allocation2 + $0x3d0] sm:$0xff] }
  0x69   :  { %v372_v56 = vld [vmem:[#allocation2 + $0x3e8] sm:$0xff]  ;;  %v373_v57 = vld [vmem:[#allocation2 + $0x3f0] sm:$0xff] }
  0x6a   :  { %586 = vrot.lane.b32.xlu0 %v348_v32, %s8293_s14  ;;  %588 = vrot.lane.b32.xlu1 %v349_v33, %s8293_s14  ;;  %v374_v60 = vld [vmem:[#allocation2 + $0x408] sm:$0xff]  ;;  %v375_v61 = vld [vmem:[#allocation2 + $0x410] sm:$0xff] }
  0x6b   :  { %v376_v0 = vld [vmem:[#allocation2 + $0x428] sm:$0xff]  ;;  %v377_v1 = vld [vmem:[#allocation2 + $0x430] sm:$0xff] }
  0x6c   :  { %v382_v5 = vld [vmem:[#allocation2 + $0x9] sm:$0xff]  ;;  %v383_v6 = vld [vmem:[#allocation2 + $0x11] sm:$0xff] }
  0x6d   :  { %v384_v9 = vld [vmem:[#allocation2 + $0x29] sm:$0xff]  ;;  %v385_v10 = vld [vmem:[#allocation2 + $0x31] sm:$0xff] }
  0x6e   :  { %590 = vrot.lane.b32.xlu0 %v350_v34, %s8293_s14  ;;  %592 = vrot.lane.b32.xlu1 %v351_v35, %s8293_s14  ;;  %v386_v13 = vld [vmem:[#allocation2 + $0x49] sm:$0xff]  ;;  %v387_v14 = vld [vmem:[#allocation2 + $0x51] sm:$0xff] }
  0x6f   :  { %v388_v17 = vld [vmem:[#allocation2 + $0x69] sm:$0xff]  ;;  %v389_v18 = vld [vmem:[#allocation2 + $0x71] sm:$0xff] }
  0x70   :  { %v390_v21 = vld [vmem:[#allocation2 + $0x89] sm:$0xff]  ;;  %v391_v22 = vld [vmem:[#allocation2 + $0x91] sm:$0xff] }
  0x71   :  { %v392_v25 = vld [vmem:[#allocation2 + $0xa9] sm:$0xff]  ;;  %v393_v26 = vld [vmem:[#allocation2 + $0xb1] sm:$0xff] }
  0x72   :  { %594 = vrot.lane.b32.xlu0 %v352_v36, %s8293_s14  ;;  %596 = vrot.lane.b32.xlu1 %v353_v37, %s8293_s14  ;;  %v394_v29 = vld [vmem:[#allocation2 + $0xc9] sm:$0xff]  ;;  %v395_v30 = vld [vmem:[#allocation2 + $0xd1] sm:$0xff] }
  0x73   :  { %v396_v33 = vld [vmem:[#allocation2 + $0xe9] sm:$0xff]  ;;  %v8873_v34 = vld [vmem:[#allocation2 + $0xf1] sm:$0xff] }
  0x74   :  { %v8882_v37 = vld [vmem:[#allocation2 + $0x109] sm:$0xff] }
  0x75   :  { %v9004_v2 = vld [vmem:[#allocation2 + $0x289] sm:$0xff] }
  0x76   :  { %598 = vrot.lane.b32.xlu0 %v354_v38, %s8293_s14  ;;  %600 = vrot.lane.b32.xlu1 %v355_v39, %s8293_s14  ;;  %v8884_v38 = vld [vmem:[#allocation2 + $0x111] sm:$0xff] }
  0x7a   :  { %602 = vrot.lane.b32.xlu0 %v356_v40, %s8293_s14  ;;  %604 = vrot.lane.b32.xlu1 %v357_v41, %s8293_s14  ;;  %v8894_v41 = vld [vmem:[#allocation2 + $0x129] sm:$0xff] }
  0x7e   :  { %606 = vrot.lane.b32.xlu0 %v358_v42, %s8293_s14  ;;  %608 = vrot.lane.b32.xlu1 %v359_v43, %s8293_s14  ;;  %v8896_v42 = vld [vmem:[#allocation2 + $0x131] sm:$0xff] }
  0x7f   :  { %v8813_v58 = vpop.permute.xlu0 %518 }
  0x80   :  { %15523 = vst [vmem:[#allocation7_spill] sm:$0xff] %v8813_v58  ;;  %v8815_v59 = vpop.permute.xlu1 %522  ;;  %v9262_v58 = vld [vmem:[#allocation2 + $0x107] sm:$0xff] }
  0x81   :  { %15524 = vst [vmem:[#allocation8_spill] sm:$0xff] %v8815_v59  ;;  %v9252_v59 = vld [vmem:[#allocation2 + $0xef] sm:$0xff]  ;;  %15613 = vst [vmem:[#allocation97_spill] sm:$0xff] %v9262_v58 }
  0x82   :  { %610 = vrot.lane.b32.xlu0 %v360_v44, %s8293_s14  ;;  %612 = vrot.lane.b32.xlu1 %v361_v45, %s8293_s14  ;;  %v8906_v45 = vld [vmem:[#allocation2 + $0x149] sm:$0xff]  ;;  %15610 = vst [vmem:[#allocation94_spill] sm:$0xff] %v9252_v59 }
  0x83   :  { %v8819_v62 = vpop.permute.xlu0 %520 }
  0x84   :  { %15525 = vst [vmem:[#allocation9_spill] sm:$0xff] %v8819_v62  ;;  %v8821_v63 = vpop.permute.xlu1 %524  ;;  %v9250_v62 = vld [vmem:[#allocation2 + $0xe7] sm:$0xff] }
  0x85   :  { %15526 = vst [vmem:[#allocation10_spill] sm:$0xff] %v8821_v63  ;;  %v9240_v63 = vld [vmem:[#allocation2 + $0xcf] sm:$0xff]  ;;  %15609 = vst [vmem:[#allocation93_spill] sm:$0xff] %v9250_v62 }
  0x86   :  { %614 = vrot.lane.b32.xlu0 %v362_v46, %s8293_s14  ;;  %616 = vrot.lane.b32.xlu1 %v363_v47, %s8293_s14  ;;  %v8908_v46 = vld [vmem:[#allocation2 + $0x151] sm:$0xff]  ;;  %15606 = vst [vmem:[#allocation90_spill] sm:$0xff] %v9240_v63 }
  0x87   :  { %v8825_v3 = vpop.permute.xlu0 %526 }
  0x88   :  { %15527 = vst [vmem:[#allocation11_spill] sm:$0xff] %v8825_v3  ;;  %v8827_v4 = vpop.permute.xlu1 %528  ;;  %v9238_v3 = vld [vmem:[#allocation2 + $0xc7] sm:$0xff] }
  0x89   :  { %15528 = vst [vmem:[#allocation12_spill] sm:$0xff] %v8827_v4  ;;  %v9228_v4 = vld [vmem:[#allocation2 + $0xaf] sm:$0xff]  ;;  %15605 = vst [vmem:[#allocation89_spill] sm:$0xff] %v9238_v3 }
  0x8a   :  { %618 = vrot.lane.b32.xlu0 %v364_v48, %s8293_s14  ;;  %620 = vrot.lane.b32.xlu1 %v365_v49, %s8293_s14  ;;  %v8918_v49 = vld [vmem:[#allocation2 + $0x169] sm:$0xff] }
  0x8b   :  { %v8831_v7 = vpop.permute.xlu0 %530 }
  0x8c   :  { %15529 = vst [vmem:[#allocation13_spill] sm:$0xff] %v8831_v7  ;;  %v8833_v8 = vpop.permute.xlu1 %532  ;;  %v9226_v7 = vld [vmem:[#allocation2 + $0xa7] sm:$0xff] }
  0x8d   :  { %15530 = vst [vmem:[#allocation14_spill] sm:$0xff] %v8833_v8  ;;  %v9216_v8 = vld [vmem:[#allocation2 + $0x8f] sm:$0xff] }
  0x8e   :  { %622 = vrot.lane.b32.xlu0 %v366_v50, %s8293_s14  ;;  %624 = vrot.lane.b32.xlu1 %v367_v51, %s8293_s14  ;;  %v8920_v50 = vld [vmem:[#allocation2 + $0x171] sm:$0xff] }
  0x92   :  { %626 = vrot.lane.b32.xlu0 %v368_v52, %s8293_s14  ;;  %628 = vrot.lane.b32.xlu1 %v369_v53, %s8293_s14  ;;  %v8930_v53 = vld [vmem:[#allocation2 + $0x189] sm:$0xff] }
  0x96   :  { %630 = vrot.lane.b32.xlu0 %v370_v54, %s8293_s14  ;;  %632 = vrot.lane.b32.xlu1 %v371_v55, %s8293_s14  ;;  %v8932_v54 = vld [vmem:[#allocation2 + $0x191] sm:$0xff] }
  0x9a   :  { %634 = vrot.lane.b32.xlu0 %v372_v56, %s8293_s14  ;;  %636 = vrot.lane.b32.xlu1 %v373_v57, %s8293_s14  ;;  %v8942_v57 = vld [vmem:[#allocation2 + $0x1a9] sm:$0xff] }
  0x9e   :  { %638 = vrot.lane.b32.xlu0 %v374_v60, %s8293_s14  ;;  %640 = vrot.lane.b32.xlu1 %v375_v61, %s8293_s14  ;;  %v8944_v60 = vld [vmem:[#allocation2 + $0x1b1] sm:$0xff] }
  0xa2   :  { %642 = vrot.lane.b32.xlu0 %v376_v0, %s8293_s14  ;;  %644 = vrot.lane.b32.xlu1 %v377_v1, %s8293_s14  ;;  %v51_v1 = vld [vmem:[%s15102_s0 + $0xf0] sm:$0xff] }
  0xa3   :  { %204 = vst.msk [vmem:[#allocation2 + $0x208] sm:$0xff] %vm85_vm0, %v51_v1 }
  0xa6   :  { %774 = vrot.lane.b32.xlu0 %v382_v5, %s8294_s17  ;;  %776 = vrot.lane.b32.xlu1 %v383_v6, %s8294_s17  ;;  %v52_v5 = vld [vmem:[%s15102_s0 + $0xf8] sm:$0xff]  ;;  %v8962_v6 = vld [vmem:[#allocation2 + $0x1c9] sm:$0xff] }
  0xa7   :  { %205 = vst.msk [vmem:[#allocation2 + $0x210] sm:$0xff] %vm85_vm0, %v52_v5 }
  0xa8   :  { %v8837_v11 = vpop.permute.xlu0 %534  ;;  %v8839_v12 = vpop.permute.xlu1 %536 }
  0xa9   :  { %15531 = vst [vmem:[#allocation15_spill] sm:$0xff] %v8837_v11  ;;  %15532 = vst [vmem:[#allocation16_spill] sm:$0xff] %v8839_v12  ;;  %v241_v12 = vld [vmem:[#allocation2 + $0x2f] sm:$0xff]  ;;  %v9214_v11 = vld [vmem:[#allocation2 + $0x87] sm:$0xff] }
  0xaa   :  { %778 = vrot.lane.b32.xlu0 %v384_v9, %s8294_s17  ;;  %780 = vrot.lane.b32.xlu1 %v385_v10, %s8294_s17  ;;  %v8964_v9 = vld [vmem:[#allocation2 + $0x1d1] sm:$0xff] }
  0xac   :  { %v8843_v15 = vpop.permute.xlu0 %538  ;;  %v8845_v16 = vpop.permute.xlu1 %540 }
  0xad   :  { %15533 = vst [vmem:[#allocation17_spill] sm:$0xff] %v8843_v15  ;;  %15534 = vst [vmem:[#allocation18_spill] sm:$0xff] %v8845_v16  ;;  %v9170_v16 = vld [vmem:[#allocation2 + $0x431] sm:$0xff]  ;;  %v240_v15 = vld [vmem:[#allocation2 + $0x27] sm:$0xff] }
  0xae   :  { %782 = vrot.lane.b32.xlu0 %v386_v13, %s8294_s17  ;;  %784 = vrot.lane.b32.xlu1 %v387_v14, %s8294_s17  ;;  %v8974_v14 = vld [vmem:[#allocation2 + $0x1e9] sm:$0xff] }
  0xb0   :  { %v8849_v19 = vpop.permute.xlu0 %542  ;;  %v8851_v20 = vpop.permute.xlu1 %544 }
  0xb1   :  { %15535 = vst [vmem:[#allocation19_spill] sm:$0xff] %v8849_v19  ;;  %15536 = vst [vmem:[#allocation20_spill] sm:$0xff] %v8851_v20  ;;  %v9168_v19 = vld [vmem:[#allocation2 + $0x429] sm:$0xff] }
  0xb2   :  { %786 = vrot.lane.b32.xlu0 %v388_v17, %s8294_s17  ;;  %788 = vrot.lane.b32.xlu1 %v389_v18, %s8294_s17  ;;  %v8976_v17 = vld [vmem:[#allocation2 + $0x1f1] sm:$0xff] }
  0xb4   :  { %v8855_v23 = vpop.permute.xlu0 %546  ;;  %v8857_v24 = vpop.permute.xlu1 %548 }
  0xb5   :  { %15537 = vst [vmem:[#allocation21_spill] sm:$0xff] %v8855_v23  ;;  %15538 = vst [vmem:[#allocation22_spill] sm:$0xff] %v8857_v24  ;;  %v9158_v24 = vld [vmem:[#allocation2 + $0x411] sm:$0xff] }
  0xb6   :  { %790 = vrot.lane.b32.xlu0 %v390_v21, %s8294_s17  ;;  %792 = vrot.lane.b32.xlu1 %v391_v22, %s8294_s17  ;;  %v418_v22 = vld [vmem:[#allocation2 + $0x249] sm:$0xff] }
  0xb8   :  { %v8861_v27 = vpop.permute.xlu0 %550  ;;  %v8863_v28 = vpop.permute.xlu1 %552 }
  0xb9   :  { %15539 = vst [vmem:[#allocation23_spill] sm:$0xff] %v8861_v27  ;;  %15540 = vst [vmem:[#allocation24_spill] sm:$0xff] %v8863_v28  ;;  %v9156_v27 = vld [vmem:[#allocation2 + $0x409] sm:$0xff] }
  0xba   :  { %794 = vrot.lane.b32.xlu0 %v392_v25, %s8294_s17  ;;  %796 = vrot.lane.b32.xlu1 %v393_v26, %s8294_s17  ;;  %v419_v25 = vld [vmem:[#allocation2 + $0x251] sm:$0xff] }
  0xbc   :  { %v8867_v31 = vpop.permute.xlu0 %554  ;;  %v8869_v32 = vpop.permute.xlu1 %556 }
  0xbd   :  { %15541 = vst [vmem:[#allocation25_spill] sm:$0xff] %v8867_v31  ;;  %15542 = vst [vmem:[#allocation26_spill] sm:$0xff] %v8869_v32 }
  0xbe   :  { %798 = vrot.lane.b32.xlu0 %v394_v29, %s8294_s17  ;;  %800 = vrot.lane.b32.xlu1 %v395_v30, %s8294_s17  ;;  %v8992_v30 = vld [vmem:[#allocation2 + $0x269] sm:$0xff] }
  0xc0   :  { %v8875_v35 = vpop.permute.xlu0 %558  ;;  %v8877_v36 = vpop.permute.xlu1 %560 }
  0xc1   :  { %15543 = vst [vmem:[#allocation27_spill] sm:$0xff] %v8875_v35  ;;  %15544 = vst [vmem:[#allocation28_spill] sm:$0xff] %v8877_v36 }
  0xc2   :  { %802 = vrot.lane.b32.xlu0 %v396_v33, %s8294_s17  ;;  %804 = vrot.lane.b32.xlu1 %v8873_v34, %s8294_s17  ;;  %v8994_v33 = vld [vmem:[#allocation2 + $0x271] sm:$0xff] }
  0xc4   :  { %v8886_v39 = vpop.permute.xlu0 %562  ;;  %v8888_v40 = vpop.permute.xlu1 %564 }
  0xc5   :  { %15545 = vst [vmem:[#allocation29_spill] sm:$0xff] %v8886_v39  ;;  %15546 = vst [vmem:[#allocation30_spill] sm:$0xff] %v8888_v40 }
  0xc6   :  { %806 = vrot.lane.b32.xlu0 %v8882_v37, %s8294_s17  ;;  %808 = vrot.lane.b32.xlu1 %v8884_v38, %s8294_s17 }
  0xc8   :  { %v8898_v43 = vpop.permute.xlu0 %566  ;;  %v8900_v44 = vpop.permute.xlu1 %568 }
  0xc9   :  { %15547 = vst [vmem:[#allocation31_spill] sm:$0xff] %v8898_v43  ;;  %15548 = vst [vmem:[#allocation32_spill] sm:$0xff] %v8900_v44 }
  0xca   :  { %810 = vrot.lane.b32.xlu0 %v8894_v41, %s8294_s17  ;;  %812 = vrot.lane.b32.xlu1 %v8896_v42, %s8294_s17 }
  0xcc   :  { %v8910_v47 = vpop.permute.xlu0 %570  ;;  %v8912_v48 = vpop.permute.xlu1 %572 }
  0xcd   :  { %15549 = vst [vmem:[#allocation33_spill] sm:$0xff] %v8910_v47  ;;  %15550 = vst [vmem:[#allocation34_spill] sm:$0xff] %v8912_v48 }
  0xce   :  { %814 = vrot.lane.b32.xlu0 %v8906_v45, %s8294_s17  ;;  %816 = vrot.lane.b32.xlu1 %v8908_v46, %s8294_s17 }
  0xd0   :  { %v8922_v51 = vpop.permute.xlu0 %574  ;;  %v8924_v52 = vpop.permute.xlu1 %576 }
  0xd1   :  { %15551 = vst [vmem:[#allocation35_spill] sm:$0xff] %v8922_v51  ;;  %15552 = vst [vmem:[#allocation36_spill] sm:$0xff] %v8924_v52 }
  0xd2   :  { %818 = vrot.lane.b32.xlu0 %v8918_v49, %s8294_s17  ;;  %820 = vrot.lane.b32.xlu1 %v8920_v50, %s8294_s17 }
  0xd4   :  { %v8934_v55 = vpop.permute.xlu0 %578  ;;  %v8936_v56 = vpop.permute.xlu1 %580 }
  0xd5   :  { %15553 = vst [vmem:[#allocation37_spill] sm:$0xff] %v8934_v55  ;;  %15554 = vst [vmem:[#allocation38_spill] sm:$0xff] %v8936_v56 }
  0xd6   :  { %822 = vrot.lane.b32.xlu0 %v8930_v53, %s8294_s17  ;;  %824 = vrot.lane.b32.xlu1 %v8932_v54, %s8294_s17 }
  0xd8   :  { %v8946_v61 = vpop.permute.xlu0 %582  ;;  %v8948_v0 = vpop.permute.xlu1 %584 }
  0xd9   :  { %15555 = vst [vmem:[#allocation39_spill] sm:$0xff] %v8946_v61  ;;  %15556 = vst [vmem:[#allocation40_spill] sm:$0xff] %v8948_v0 }
  0xda   :  { %826 = vrot.lane.b32.xlu0 %v8942_v57, %s8294_s17  ;;  %828 = vrot.lane.b32.xlu1 %v8944_v60, %s8294_s17 }
  0xdc   :  { %v8966_v10 = vpop.permute.xlu0 %586  ;;  %v8968_v13 = vpop.permute.xlu1 %588 }
  0xdd   :  { %15557 = vst [vmem:[#allocation41_spill] sm:$0xff] %v8966_v10  ;;  %15558 = vst [vmem:[#allocation42_spill] sm:$0xff] %v8968_v13 }
  0xde   :  { %830 = vrot.lane.b32.xlu0 %v8962_v6, %s8294_s17  ;;  %832 = vrot.lane.b32.xlu1 %v8964_v9, %s8294_s17 }
  0xe0   :  { %v8978_v18 = vpop.permute.xlu0 %590  ;;  %v8980_v21 = vpop.permute.xlu1 %592 }
  0xe1   :  { %15559 = vst [vmem:[#allocation43_spill] sm:$0xff] %v8978_v18  ;;  %15560 = vst [vmem:[#allocation44_spill] sm:$0xff] %v8980_v21 }
  0xe2   :  { %834 = vrot.lane.b32.xlu0 %v8974_v14, %s8294_s17  ;;  %836 = vrot.lane.b32.xlu1 %v8976_v17, %s8294_s17 }
  0xe4   :  { %v8986_v26 = vpop.permute.xlu0 %594  ;;  %v8988_v29 = vpop.permute.xlu1 %596 }
  0xe5   :  { %15561 = vst [vmem:[#allocation45_spill] sm:$0xff] %v8986_v26  ;;  %15562 = vst [vmem:[#allocation46_spill] sm:$0xff] %v8988_v29  ;;  %v9006_v29 = vld [vmem:[#allocation2 + $0x291] sm:$0xff] }
  0xe6   :  { %838 = vrot.lane.b32.xlu0 %v418_v22, %s8294_s17  ;;  %840 = vrot.lane.b32.xlu1 %v419_v25, %s8294_s17 }
  0xe8   :  { %v8996_v1 = vpop.permute.xlu0 %598  ;;  %v8998_v5 = vpop.permute.xlu1 %600 }
  0xe9   :  { %15563 = vst [vmem:[#allocation47_spill] sm:$0xff] %v8996_v1  ;;  %15564 = vst [vmem:[#allocation48_spill] sm:$0xff] %v8998_v5  ;;  %v9016_v5 = vld [vmem:[#allocation2 + $0x2a9] sm:$0xff]  ;;  %v9018_v1 = vld [vmem:[#allocation2 + $0x2b1] sm:$0xff] }
  0xea   :  { %842 = vrot.lane.b32.xlu0 %v8992_v30, %s8294_s17  ;;  %844 = vrot.lane.b32.xlu1 %v8994_v33, %s8294_s17 }
  0xec   :  { %v9008_v22 = vpop.permute.xlu0 %602  ;;  %v9010_v25 = vpop.permute.xlu1 %604 }
  0xed   :  { %15565 = vst [vmem:[#allocation49_spill] sm:$0xff] %v9008_v22  ;;  %15566 = vst [vmem:[#allocation50_spill] sm:$0xff] %v9010_v25  ;;  %v9028_v25 = vld [vmem:[#allocation2 + $0x2c9] sm:$0xff]  ;;  %v9030_v22 = vld [vmem:[#allocation2 + $0x2d1] sm:$0xff] }
  0xee   :  { %846 = vrot.lane.b32.xlu0 %v9004_v2, %s8294_s17  ;;  %848 = vrot.lane.b32.xlu1 %v9006_v29, %s8294_s17 }
  0xf0   :  { %v9020_v26 = vpop.permute.xlu0 %606  ;;  %v9022_v21 = vpop.permute.xlu1 %608 }
  0xf1   :  { %15567 = vst [vmem:[#allocation51_spill] sm:$0xff] %v9020_v26  ;;  %15568 = vst [vmem:[#allocation52_spill] sm:$0xff] %v9022_v21  ;;  %v9040_v21 = vld [vmem:[#allocation2 + $0x2e9] sm:$0xff]  ;;  %v9042_v26 = vld [vmem:[#allocation2 + $0x2f1] sm:$0xff] }
  0xf2   :  { %850 = vrot.lane.b32.xlu0 %v9016_v5, %s8294_s17  ;;  %852 = vrot.lane.b32.xlu1 %v9018_v1, %s8294_s17 }
  0xf4   :  { %v9032_v18 = vpop.permute.xlu0 %610  ;;  %v9034_v13 = vpop.permute.xlu1 %612 }
  0xf5   :  { %15569 = vst [vmem:[#allocation53_spill] sm:$0xff] %v9032_v18  ;;  %15570 = vst [vmem:[#allocation54_spill] sm:$0xff] %v9034_v13  ;;  %v9052_v13 = vld [vmem:[#allocation2 + $0x309] sm:$0xff]  ;;  %v9054_v18 = vld [vmem:[#allocation2 + $0x311] sm:$0xff] }
  0xf6   :  { %854 = vrot.lane.b32.xlu0 %v9028_v25, %s8294_s17  ;;  %856 = vrot.lane.b32.xlu1 %v9030_v22, %s8294_s17 }
  0xf8   :  { %v9044_v10 = vpop.permute.xlu0 %614  ;;  %v9046_v0 = vpop.permute.xlu1 %616 }
  0xf9   :  { %15571 = vst [vmem:[#allocation55_spill] sm:$0xff] %v9044_v10  ;;  %15572 = vst [vmem:[#allocation56_spill] sm:$0xff] %v9046_v0  ;;  %v9064_v0 = vld [vmem:[#allocation2 + $0x329] sm:$0xff]  ;;  %v9066_v10 = vld [vmem:[#allocation2 + $0x331] sm:$0xff] }
  0xfa   :  { %858 = vrot.lane.b32.xlu0 %v9040_v21, %s8294_s17  ;;  %860 = vrot.lane.b32.xlu1 %v9042_v26, %s8294_s17 }
  0xfc   :  { %v9056_v61 = vpop.permute.xlu0 %618  ;;  %v9058_v56 = vpop.permute.xlu1 %620 }
  0xfd   :  { %15573 = vst [vmem:[#allocation57_spill] sm:$0xff] %v9056_v61  ;;  %15574 = vst [vmem:[#allocation58_spill] sm:$0xff] %v9058_v56  ;;  %v9076_v56 = vld [vmem:[#allocation2 + $0x349] sm:$0xff]  ;;  %v9078_v61 = vld [vmem:[#allocation2 + $0x351] sm:$0xff] }
  0xfe   :  { %862 = vrot.lane.b32.xlu0 %v9052_v13, %s8294_s17  ;;  %864 = vrot.lane.b32.xlu1 %v9054_v18, %s8294_s17 }
 0x100   :  { %v9068_v55 = vpop.permute.xlu0 %622  ;;  %v9070_v52 = vpop.permute.xlu1 %624 }
 0x101   :  { %15575 = vst [vmem:[#allocation59_spill] sm:$0xff] %v9068_v55  ;;  %15576 = vst [vmem:[#allocation60_spill] sm:$0xff] %v9070_v52  ;;  %v9088_v52 = vld [vmem:[#allocation2 + $0x369] sm:$0xff]  ;;  %v9090_v55 = vld [vmem:[#allocation2 + $0x371] sm:$0xff] }
 0x102   :  { %866 = vrot.lane.b32.xlu0 %v9064_v0, %s8294_s17  ;;  %868 = vrot.lane.b32.xlu1 %v9066_v10, %s8294_s17 }
 0x104   :  { %v9080_v51 = vpop.permute.xlu0 %626  ;;  %v9082_v48 = vpop.permute.xlu1 %628 }
 0x105   :  { %15577 = vst [vmem:[#allocation61_spill] sm:$0xff] %v9080_v51  ;;  %15578 = vst [vmem:[#allocation62_spill] sm:$0xff] %v9082_v48  ;;  %v9100_v48 = vld [vmem:[#allocation2 + $0x389] sm:$0xff]  ;;  %v9102_v51 = vld [vmem:[#allocation2 + $0x391] sm:$0xff] }
 0x106   :  { %870 = vrot.lane.b32.xlu0 %v9076_v56, %s8294_s17  ;;  %872 = vrot.lane.b32.xlu1 %v9078_v61, %s8294_s17 }
 0x108   :  { %v9092_v47 = vpop.permute.xlu0 %630  ;;  %v9094_v44 = vpop.permute.xlu1 %632 }
 0x109   :  { %15579 = vst [vmem:[#allocation63_spill] sm:$0xff] %v9092_v47  ;;  %15580 = vst [vmem:[#allocation64_spill] sm:$0xff] %v9094_v44  ;;  %v9112_v44 = vld [vmem:[#allocation2 + $0x3a9] sm:$0xff]  ;;  %v9114_v47 = vld [vmem:[#allocation2 + $0x3b1] sm:$0xff] }
 0x10a   :  { %874 = vrot.lane.b32.xlu0 %v9088_v52, %s8294_s17  ;;  %876 = vrot.lane.b32.xlu1 %v9090_v55, %s8294_s17 }
 0x10c   :  { %v9104_v43 = vpop.permute.xlu0 %634  ;;  %v9106_v40 = vpop.permute.xlu1 %636 }
 0x10d   :  { %15581 = vst [vmem:[#allocation65_spill] sm:$0xff] %v9104_v43  ;;  %15582 = vst [vmem:[#allocation66_spill] sm:$0xff] %v9106_v40  ;;  %v9124_v40 = vld [vmem:[#allocation2 + $0x3c9] sm:$0xff]  ;;  %v9126_v43 = vld [vmem:[#allocation2 + $0x3d1] sm:$0xff] }
 0x10e   :  { %878 = vrot.lane.b32.xlu0 %v9100_v48, %s8294_s17  ;;  %880 = vrot.lane.b32.xlu1 %v9102_v51, %s8294_s17 }
 0x110   :  { %v9116_v39 = vpop.permute.xlu0 %638  ;;  %v9118_v36 = vpop.permute.xlu1 %640 }
 0x111   :  { %15583 = vst [vmem:[#allocation67_spill] sm:$0xff] %v9116_v39  ;;  %15584 = vst [vmem:[#allocation68_spill] sm:$0xff] %v9118_v36  ;;  %v9136_v36 = vld [vmem:[#allocation2 + $0x3e9] sm:$0xff]  ;;  %v9138_v39 = vld [vmem:[#allocation2 + $0x3f1] sm:$0xff] }
 0x112   :  { %882 = vrot.lane.b32.xlu0 %v9112_v44, %s8294_s17  ;;  %884 = vrot.lane.b32.xlu1 %v9114_v47, %s8294_s17 }
 0x114   :  { %v9128_v35 = vpop.permute.xlu0 %642  ;;  %v9130_v32 = vpop.permute.xlu1 %644 }
 0x115   :  { %15585 = vst [vmem:[#allocation69_spill] sm:$0xff] %v9128_v35  ;;  %15586 = vst [vmem:[#allocation70_spill] sm:$0xff] %v9130_v32  ;;  %v83_v35 = vld [vmem:[%s15102_s0 + $0x1f0] sm:$0xff]  ;;  %v84_v32 = vld [vmem:[%s15102_s0 + $0x1f8] sm:$0xff]  ;;  %s8295_s0 = smov 15  }
 0x116   :  { %886 = vrot.lane.b32.xlu0 %v9124_v40, %s8294_s17  ;;  %888 = vrot.lane.b32.xlu1 %v9126_v43, %s8294_s17  ;;  %236 = vst.msk [vmem:[#allocation2 + $0x448] sm:$0xff] %vm85_vm0, %v83_v35  ;;  %237 = vst.msk [vmem:[#allocation2 + $0x450] sm:$0xff] %vm85_vm0, %v84_v32 }
 0x118   :  { %v9140_v31 = vpop.permute.xlu0 %774  ;;  %v9142_v28 = vpop.permute.xlu1 %776 }
 0x119   :  { %15587 = vst [vmem:[#allocation71_spill] sm:$0xff] %v9140_v31  ;;  %15588 = vst [vmem:[#allocation72_spill] sm:$0xff] %v9142_v28  ;;  %v9190_v28 = vld [vmem:[#allocation2 + $0x47] sm:$0xff]  ;;  %v9192_v31 = vld [vmem:[#allocation2 + $0x4f] sm:$0xff] }
 0x11a   :  { %890 = vrot.lane.b32.xlu0 %v9136_v36, %s8294_s17  ;;  %892 = vrot.lane.b32.xlu1 %v9138_v39, %s8294_s17 }
 0x11c   :  { %v9160_v23 = vpop.permute.xlu0 %778  ;;  %v9162_v20 = vpop.permute.xlu1 %780 }
 0x11d   :  { %15589 = vst [vmem:[#allocation73_spill] sm:$0xff] %v9160_v23  ;;  %15590 = vst [vmem:[#allocation74_spill] sm:$0xff] %v9162_v20 }
 0x11e   :  { %894 = vrot.lane.b32.xlu0 %v9156_v27, %s8294_s17  ;;  %896 = vrot.lane.b32.xlu1 %v9158_v24, %s8294_s17 }
 0x120   :  { %v9172_v35 = vpop.permute.xlu0 %782  ;;  %v9174_v32 = vpop.permute.xlu1 %784 }
 0x121   :  { %15591 = vst [vmem:[#allocation75_spill] sm:$0xff] %v9172_v35  ;;  %15592 = vst [vmem:[#allocation76_spill] sm:$0xff] %v9174_v32 }
 0x122   :  { %898 = vrot.lane.b32.xlu0 %v9168_v19, %s8294_s17  ;;  %900 = vrot.lane.b32.xlu1 %v9170_v16, %s8294_s17  ;;  %s8301_s17 = smov 16  }
 0x124   :  { %v9180_v23 = vpop.permute.xlu0 %786  ;;  %v9182_v20 = vpop.permute.xlu1 %788 }
 0x125   :  { %15593 = vst [vmem:[#allocation77_spill] sm:$0xff] %v9180_v23  ;;  %15594 = vst [vmem:[#allocation78_spill] sm:$0xff] %v9182_v20 }
 0x126   :  { %1032 = vrot.lane.b32.xlu1 %v241_v12, %s8295_s0  ;;  %1030 = vrot.lane.b32.xlu0 %v240_v15, %s8295_s0  ;;  %v9202_v12 = vld [vmem:[#allocation2 + $0x67] sm:$0xff]  ;;  %v9204_v15 = vld [vmem:[#allocation2 + $0x6f] sm:$0xff] }
 0x128   :  { %v9186_v35 = vpop.permute.xlu0 %790  ;;  %v9188_v32 = vpop.permute.xlu1 %792 }
 0x129   :  { %15595 = vst [vmem:[#allocation79_spill] sm:$0xff] %v9186_v35  ;;  %15596 = vst [vmem:[#allocation80_spill] sm:$0xff] %v9188_v32 }
 0x12a   :  { %1036 = vrot.lane.b32.xlu1 %v9192_v31, %s8295_s0  ;;  %1034 = vrot.lane.b32.xlu0 %v9190_v28, %s8295_s0 }
 0x12c   :  { %v9198_v20 = vpop.permute.xlu0 %794  ;;  %v9200_v23 = vpop.permute.xlu1 %796 }
 0x12d   :  { %15597 = vst [vmem:[#allocation81_spill] sm:$0xff] %v9198_v20  ;;  %15598 = vst [vmem:[#allocation82_spill] sm:$0xff] %v9200_v23 }
 0x12e   :  { %1040 = vrot.lane.b32.xlu1 %v9204_v15, %s8295_s0  ;;  %1038 = vrot.lane.b32.xlu0 %v9202_v12, %s8295_s0 }
 0x130   :  { %v9210_v32 = vpop.permute.xlu0 %798  ;;  %v9212_v35 = vpop.permute.xlu1 %800 }
 0x131   :  { %15599 = vst [vmem:[#allocation83_spill] sm:$0xff] %v9210_v32  ;;  %15600 = vst [vmem:[#allocation84_spill] sm:$0xff] %v9212_v35 }
 0x132   :  { %1044 = vrot.lane.b32.xlu1 %v9216_v8, %s8295_s0  ;;  %1042 = vrot.lane.b32.xlu0 %v9214_v11, %s8295_s0 }
 0x134   :  { %v9222_v23 = vpop.permute.xlu0 %802  ;;  %v9224_v20 = vpop.permute.xlu1 %804 }
 0x135   :  { %15601 = vst [vmem:[#allocation85_spill] sm:$0xff] %v9222_v23  ;;  %15602 = vst [vmem:[#allocation86_spill] sm:$0xff] %v9224_v20 }
 0x136   :  { %1048 = vrot.lane.b32.xlu1 %v9228_v4, %s8295_s0  ;;  %1046 = vrot.lane.b32.xlu0 %v9226_v7, %s8295_s0 }
 0x138   :  { %v9234_v35 = vpop.permute.xlu0 %806  ;;  %v9236_v32 = vpop.permute.xlu1 %808 }
 0x139   :  { %15603 = vst [vmem:[#allocation87_spill] sm:$0xff] %v9234_v35  ;;  %15604 = vst [vmem:[#allocation88_spill] sm:$0xff] %v9236_v32 }
 0x13a   :  { %1052 = vrot.lane.b32.xlu1 %v9240_v63, %s8295_s0  ;;  %1050 = vrot.lane.b32.xlu0 %v9238_v3, %s8295_s0  ;;  %v9264_v3 = vld [vmem:[#allocation2 + $0x10f] sm:$0xff] }
 0x13b   :  { %15614 = vst [vmem:[#allocation98_spill] sm:$0xff] %v9264_v3 }
 0x13c   :  { %v9246_v20 = vpop.permute.xlu0 %810  ;;  %v9248_v23 = vpop.permute.xlu1 %812 }
 0x13d   :  { %15607 = vst [vmem:[#allocation91_spill] sm:$0xff] %v9246_v20  ;;  %15608 = vst [vmem:[#allocation92_spill] sm:$0xff] %v9248_v23 }
 0x13e   :  { %1056 = vrot.lane.b32.xlu1 %v9252_v59, %s8295_s0  ;;  %1054 = vrot.lane.b32.xlu0 %v9250_v62, %s8295_s0  ;;  %v9274_v59 = vld [vmem:[#allocation2 + $0x127] sm:$0xff]  ;;  %v9276_v62 = vld [vmem:[#allocation2 + $0x12f] sm:$0xff] }
 0x13f   :  { %15617 = vst [vmem:[#allocation101_spill] sm:$0xff] %v9274_v59  ;;  %15618 = vst [vmem:[#allocation102_spill] sm:$0xff] %v9276_v62 }
 0x140   :  { %v9258_v32 = vpop.permute.xlu0 %814  ;;  %v9260_v35 = vpop.permute.xlu1 %816 }
 0x141   :  { %15611 = vst [vmem:[#allocation95_spill] sm:$0xff] %v9258_v32  ;;  %15612 = vst [vmem:[#allocation96_spill] sm:$0xff] %v9260_v35 }
 0x142   :  { %1060 = vrot.lane.b32.xlu1 %v9264_v3, %s8295_s0  ;;  %1058 = vrot.lane.b32.xlu0 %v9262_v58, %s8295_s0  ;;  %v9286_v3 = vld [vmem:[#allocation2 + $0x147] sm:$0xff]  ;;  %v9288_v58 = vld [vmem:[#allocation2 + $0x14f] sm:$0xff] }
 0x143   :  { %15621 = vst [vmem:[#allocation105_spill] sm:$0xff] %v9286_v3  ;;  %15622 = vst [vmem:[#allocation106_spill] sm:$0xff] %v9288_v58 }
 0x144   :  { %v9270_v23 = vpop.permute.xlu0 %818  ;;  %v9272_v20 = vpop.permute.xlu1 %820 }
 0x145   :  { %15615 = vst [vmem:[#allocation99_spill] sm:$0xff] %v9270_v23  ;;  %15616 = vst [vmem:[#allocation100_spill] sm:$0xff] %v9272_v20 }
 0x146   :  { %1064 = vrot.lane.b32.xlu1 %v9276_v62, %s8295_s0  ;;  %1062 = vrot.lane.b32.xlu0 %v9274_v59, %s8295_s0  ;;  %v9298_v62 = vld [vmem:[#allocation2 + $0x167] sm:$0xff]  ;;  %v9300_v59 = vld [vmem:[#allocation2 + $0x16f] sm:$0xff] }
 0x147   :  { %15625 = vst [vmem:[#allocation109_spill] sm:$0xff] %v9298_v62  ;;  %15626 = vst [vmem:[#allocation110_spill] sm:$0xff] %v9300_v59 }
 0x148   :  { %v9282_v35 = vpop.permute.xlu0 %822  ;;  %v9284_v32 = vpop.permute.xlu1 %824 }
 0x149   :  { %15619 = vst [vmem:[#allocation103_spill] sm:$0xff] %v9282_v35  ;;  %15620 = vst [vmem:[#allocation104_spill] sm:$0xff] %v9284_v32 }
 0x14a   :  { %1068 = vrot.lane.b32.xlu1 %v9288_v58, %s8295_s0  ;;  %1066 = vrot.lane.b32.xlu0 %v9286_v3, %s8295_s0  ;;  %v9310_v58 = vld [vmem:[#allocation2 + $0x187] sm:$0xff]  ;;  %v9312_v3 = vld [vmem:[#allocation2 + $0x18f] sm:$0xff] }
 0x14b   :  { %15629 = vst [vmem:[#allocation113_spill] sm:$0xff] %v9310_v58  ;;  %15630 = vst [vmem:[#allocation114_spill] sm:$0xff] %v9312_v3 }
 0x14c   :  { %v9294_v20 = vpop.permute.xlu0 %826  ;;  %v9296_v23 = vpop.permute.xlu1 %828 }
 0x14d   :  { %15623 = vst [vmem:[#allocation107_spill] sm:$0xff] %v9294_v20  ;;  %15624 = vst [vmem:[#allocation108_spill] sm:$0xff] %v9296_v23 }
 0x14e   :  { %1072 = vrot.lane.b32.xlu1 %v9300_v59, %s8295_s0  ;;  %1070 = vrot.lane.b32.xlu0 %v9298_v62, %s8295_s0  ;;  %v9322_v59 = vld [vmem:[#allocation2 + $0x1a7] sm:$0xff]  ;;  %v9324_v62 = vld [vmem:[#allocation2 + $0x1af] sm:$0xff] }
 0x14f   :  { %15633 = vst [vmem:[#allocation117_spill] sm:$0xff] %v9322_v59  ;;  %15634 = vst [vmem:[#allocation118_spill] sm:$0xff] %v9324_v62 }
 0x150   :  { %v9306_v32 = vpop.permute.xlu0 %830  ;;  %v9308_v35 = vpop.permute.xlu1 %832 }
 0x151   :  { %15627 = vst [vmem:[#allocation111_spill] sm:$0xff] %v9306_v32  ;;  %15628 = vst [vmem:[#allocation112_spill] sm:$0xff] %v9308_v35 }
 0x152   :  { %1076 = vrot.lane.b32.xlu1 %v9312_v3, %s8295_s0  ;;  %1074 = vrot.lane.b32.xlu0 %v9310_v58, %s8295_s0  ;;  %v9334_v3 = vld [vmem:[#allocation2 + $0x1c7] sm:$0xff]  ;;  %v9336_v58 = vld [vmem:[#allocation2 + $0x1cf] sm:$0xff] }
 0x153   :  { %15637 = vst [vmem:[#allocation121_spill] sm:$0xff] %v9334_v3  ;;  %15638 = vst [vmem:[#allocation122_spill] sm:$0xff] %v9336_v58 }
 0x154   :  { %v9318_v23 = vpop.permute.xlu0 %834  ;;  %v9320_v20 = vpop.permute.xlu1 %836 }
 0x155   :  { %15631 = vst [vmem:[#allocation115_spill] sm:$0xff] %v9318_v23  ;;  %15632 = vst [vmem:[#allocation116_spill] sm:$0xff] %v9320_v20 }
 0x156   :  { %1080 = vrot.lane.b32.xlu1 %v9324_v62, %s8295_s0  ;;  %1078 = vrot.lane.b32.xlu0 %v9322_v59, %s8295_s0  ;;  %v9346_v62 = vld [vmem:[#allocation2 + $0x1e7] sm:$0xff]  ;;  %v9348_v59 = vld [vmem:[#allocation2 + $0x1ef] sm:$0xff] }
 0x157   :  { %15641 = vst [vmem:[#allocation125_spill] sm:$0xff] %v9346_v62  ;;  %15642 = vst [vmem:[#allocation126_spill] sm:$0xff] %v9348_v59 }
 0x158   :  { %v9330_v35 = vpop.permute.xlu0 %838  ;;  %v9332_v32 = vpop.permute.xlu1 %840 }
 0x159   :  { %15635 = vst [vmem:[#allocation119_spill] sm:$0xff] %v9330_v35  ;;  %15636 = vst [vmem:[#allocation120_spill] sm:$0xff] %v9332_v32  ;;  %v9354_v32 = vld [vmem:[#allocation2 + $0x20f] sm:$0xff]  ;;  %v9356_v35 = vld [vmem:[#allocation2 + $0x207] sm:$0xff] }
 0x15a   :  { %1084 = vrot.lane.b32.xlu1 %v9336_v58, %s8295_s0  ;;  %1082 = vrot.lane.b32.xlu0 %v9334_v3, %s8295_s0  ;;  %15643 = vst [vmem:[#allocation127_spill] sm:$0xff] %v9354_v32  ;;  %15644 = vst [vmem:[#allocation128_spill] sm:$0xff] %v9356_v35 }
 0x15c   :  { %v9342_v20 = vpop.permute.xlu0 %842  ;;  %v9344_v23 = vpop.permute.xlu1 %844 }
 0x15d   :  { %15639 = vst [vmem:[#allocation123_spill] sm:$0xff] %v9342_v20  ;;  %15640 = vst [vmem:[#allocation124_spill] sm:$0xff] %v9344_v23 }
 0x15e   :  { %1088 = vrot.lane.b32.xlu1 %v9348_v59, %s8295_s0  ;;  %1086 = vrot.lane.b32.xlu0 %v9346_v62, %s8295_s0  ;;  %v276_v59 = vld [vmem:[#allocation2 + $0x267] sm:$0xff]  ;;  %v277_v62 = vld [vmem:[#allocation2 + $0x26f] sm:$0xff] }
 0x160   :  { %v9358_v58 = vpop.permute.xlu0 %846  ;;  %v9360_v3 = vpop.permute.xlu1 %848 }
 0x161   :  { %15645 = vst [vmem:[#allocation129_spill] sm:$0xff] %v9358_v58  ;;  %15646 = vst [vmem:[#allocation130_spill] sm:$0xff] %v9360_v3  ;;  %v9376_v3 = vld [vmem:[#allocation2 + $0x287] sm:$0xff] }
 0x162   :  { %1092 = vrot.lane.b32.xlu1 %v9354_v32, %s8295_s0  ;;  %1090 = vrot.lane.b32.xlu0 %v9356_v35, %s8295_s0  ;;  %15651 = vst [vmem:[#allocation135_spill] sm:$0xff] %v9376_v3  ;;  %v9378_v32 = vld [vmem:[#allocation2 + $0x28f] sm:$0xff] }
 0x163   :  { %15652 = vst [vmem:[#allocation136_spill] sm:$0xff] %v9378_v32  ;;  %v9562_v35 = vld [vmem:[#allocation2 + $0x50] sm:$0xff] }
 0x164   :  { %v9366_v23 = vpop.permute.xlu0 %850  ;;  %v9368_v20 = vpop.permute.xlu1 %852  ;;  %15713 = vst [vmem:[#allocation197_spill] sm:$0xff] %v9562_v35 }
 0x165   :  { %15647 = vst [vmem:[#allocation131_spill] sm:$0xff] %v9366_v23  ;;  %15648 = vst [vmem:[#allocation132_spill] sm:$0xff] %v9368_v20 }
 0x166   :  { %1096 = vrot.lane.b32.xlu1 %v277_v62, %s8295_s0  ;;  %1094 = vrot.lane.b32.xlu0 %v276_v59, %s8295_s0  ;;  %v9388_v62 = vld [vmem:[#allocation2 + $0x2a7] sm:$0xff]  ;;  %v9390_v59 = vld [vmem:[#allocation2 + $0x2af] sm:$0xff] }
 0x167   :  { %15655 = vst [vmem:[#allocation139_spill] sm:$0xff] %v9388_v62  ;;  %15656 = vst [vmem:[#allocation140_spill] sm:$0xff] %v9390_v59 }
 0x168   :  { %v9372_v63 = vpop.permute.xlu0 %854  ;;  %v9374_v58 = vpop.permute.xlu1 %856 }
 0x169   :  { %15649 = vst [vmem:[#allocation133_spill] sm:$0xff] %v9372_v63  ;;  %15650 = vst [vmem:[#allocation134_spill] sm:$0xff] %v9374_v58 }
 0x16a   :  { %1100 = vrot.lane.b32.xlu1 %v9378_v32, %s8295_s0  ;;  %1098 = vrot.lane.b32.xlu0 %v9376_v3, %s8295_s0  ;;  %v9400_v32 = vld [vmem:[#allocation2 + $0x2c7] sm:$0xff]  ;;  %v9402_v3 = vld [vmem:[#allocation2 + $0x2cf] sm:$0xff] }
 0x16b   :  { %15659 = vst [vmem:[#allocation143_spill] sm:$0xff] %v9400_v32  ;;  %15660 = vst [vmem:[#allocation144_spill] sm:$0xff] %v9402_v3 }
 0x16c   :  { %v9384_v20 = vpop.permute.xlu0 %858  ;;  %v9386_v23 = vpop.permute.xlu1 %860 }
 0x16d   :  { %15653 = vst [vmem:[#allocation137_spill] sm:$0xff] %v9384_v20  ;;  %15654 = vst [vmem:[#allocation138_spill] sm:$0xff] %v9386_v23 }
 0x16e   :  { %1104 = vrot.lane.b32.xlu1 %v9390_v59, %s8295_s0  ;;  %1102 = vrot.lane.b32.xlu0 %v9388_v62, %s8295_s0  ;;  %v9412_v59 = vld [vmem:[#allocation2 + $0x2e7] sm:$0xff]  ;;  %v9414_v62 = vld [vmem:[#allocation2 + $0x2ef] sm:$0xff] }
 0x16f   :  { %15663 = vst [vmem:[#allocation147_spill] sm:$0xff] %v9412_v59  ;;  %15664 = vst [vmem:[#allocation148_spill] sm:$0xff] %v9414_v62 }
 0x170   :  { %v9396_v58 = vpop.permute.xlu0 %862  ;;  %v9398_v63 = vpop.permute.xlu1 %864 }
 0x171   :  { %15657 = vst [vmem:[#allocation141_spill] sm:$0xff] %v9396_v58  ;;  %15658 = vst [vmem:[#allocation142_spill] sm:$0xff] %v9398_v63 }
 0x172   :  { %1108 = vrot.lane.b32.xlu1 %v9402_v3, %s8295_s0  ;;  %1106 = vrot.lane.b32.xlu0 %v9400_v32, %s8295_s0  ;;  %v9424_v3 = vld [vmem:[#allocation2 + $0x307] sm:$0xff]  ;;  %v9426_v32 = vld [vmem:[#allocation2 + $0x30f] sm:$0xff] }
 0x173   :  { %15667 = vst [vmem:[#allocation151_spill] sm:$0xff] %v9424_v3  ;;  %15668 = vst [vmem:[#allocation152_spill] sm:$0xff] %v9426_v32 }
 0x174   :  { %v9408_v23 = vpop.permute.xlu0 %866  ;;  %v9410_v20 = vpop.permute.xlu1 %868 }
 0x175   :  { %15661 = vst [vmem:[#allocation145_spill] sm:$0xff] %v9408_v23  ;;  %15662 = vst [vmem:[#allocation146_spill] sm:$0xff] %v9410_v20 }
 0x176   :  { %1112 = vrot.lane.b32.xlu1 %v9414_v62, %s8295_s0  ;;  %1110 = vrot.lane.b32.xlu0 %v9412_v59, %s8295_s0  ;;  %v9436_v62 = vld [vmem:[#allocation2 + $0x327] sm:$0xff]  ;;  %v9438_v59 = vld [vmem:[#allocation2 + $0x32f] sm:$0xff] }
 0x177   :  { %15671 = vst [vmem:[#allocation155_spill] sm:$0xff] %v9436_v62  ;;  %15672 = vst [vmem:[#allocation156_spill] sm:$0xff] %v9438_v59 }
 0x178   :  { %v9420_v63 = vpop.permute.xlu0 %870  ;;  %v9422_v58 = vpop.permute.xlu1 %872 }
 0x179   :  { %15665 = vst [vmem:[#allocation149_spill] sm:$0xff] %v9420_v63  ;;  %15666 = vst [vmem:[#allocation150_spill] sm:$0xff] %v9422_v58 }
 0x17a   :  { %1116 = vrot.lane.b32.xlu1 %v9426_v32, %s8295_s0  ;;  %1114 = vrot.lane.b32.xlu0 %v9424_v3, %s8295_s0  ;;  %v9448_v32 = vld [vmem:[#allocation2 + $0x347] sm:$0xff]  ;;  %v9450_v3 = vld [vmem:[#allocation2 + $0x34f] sm:$0xff] }
 0x17b   :  { %15675 = vst [vmem:[#allocation159_spill] sm:$0xff] %v9448_v32  ;;  %15676 = vst [vmem:[#allocation160_spill] sm:$0xff] %v9450_v3 }
 0x17c   :  { %v9432_v20 = vpop.permute.xlu0 %874  ;;  %v9434_v23 = vpop.permute.xlu1 %876 }
 0x17d   :  { %15669 = vst [vmem:[#allocation153_spill] sm:$0xff] %v9432_v20  ;;  %15670 = vst [vmem:[#allocation154_spill] sm:$0xff] %v9434_v23 }
 0x17e   :  { %1120 = vrot.lane.b32.xlu1 %v9438_v59, %s8295_s0  ;;  %1118 = vrot.lane.b32.xlu0 %v9436_v62, %s8295_s0  ;;  %v9460_v59 = vld [vmem:[#allocation2 + $0x367] sm:$0xff]  ;;  %v9462_v62 = vld [vmem:[#allocation2 + $0x36f] sm:$0xff] }
 0x17f   :  { %15679 = vst [vmem:[#allocation163_spill] sm:$0xff] %v9460_v59  ;;  %15680 = vst [vmem:[#allocation164_spill] sm:$0xff] %v9462_v62 }
 0x180   :  { %v9444_v58 = vpop.permute.xlu0 %878  ;;  %v9446_v63 = vpop.permute.xlu1 %880 }
 0x181   :  { %15673 = vst [vmem:[#allocation157_spill] sm:$0xff] %v9444_v58  ;;  %15674 = vst [vmem:[#allocation158_spill] sm:$0xff] %v9446_v63 }
 0x182   :  { %1124 = vrot.lane.b32.xlu1 %v9450_v3, %s8295_s0  ;;  %1122 = vrot.lane.b32.xlu0 %v9448_v32, %s8295_s0  ;;  %v9472_v3 = vld [vmem:[#allocation2 + $0x387] sm:$0xff]  ;;  %v9474_v32 = vld [vmem:[#allocation2 + $0x38f] sm:$0xff] }
 0x183   :  { %15683 = vst [vmem:[#allocation167_spill] sm:$0xff] %v9472_v3  ;;  %15684 = vst [vmem:[#allocation168_spill] sm:$0xff] %v9474_v32 }
 0x184   :  { %v9456_v23 = vpop.permute.xlu0 %882  ;;  %v9458_v20 = vpop.permute.xlu1 %884 }
 0x185   :  { %15677 = vst [vmem:[#allocation161_spill] sm:$0xff] %v9456_v23  ;;  %15678 = vst [vmem:[#allocation162_spill] sm:$0xff] %v9458_v20 }
 0x186   :  { %1128 = vrot.lane.b32.xlu1 %v9462_v62, %s8295_s0  ;;  %1126 = vrot.lane.b32.xlu0 %v9460_v59, %s8295_s0  ;;  %v9484_v62 = vld [vmem:[#allocation2 + $0x3a7] sm:$0xff]  ;;  %v9486_v59 = vld [vmem:[#allocation2 + $0x3af] sm:$0xff] }
 0x187   :  { %15687 = vst [vmem:[#allocation171_spill] sm:$0xff] %v9484_v62  ;;  %15688 = vst [vmem:[#allocation172_spill] sm:$0xff] %v9486_v59 }
 0x188   :  { %v9468_v63 = vpop.permute.xlu0 %886  ;;  %v9470_v58 = vpop.permute.xlu1 %888 }
 0x189   :  { %15681 = vst [vmem:[#allocation165_spill] sm:$0xff] %v9468_v63  ;;  %15682 = vst [vmem:[#allocation166_spill] sm:$0xff] %v9470_v58 }
 0x18a   :  { %1132 = vrot.lane.b32.xlu1 %v9474_v32, %s8295_s0  ;;  %1130 = vrot.lane.b32.xlu0 %v9472_v3, %s8295_s0  ;;  %v9496_v32 = vld [vmem:[#allocation2 + $0x3c7] sm:$0xff]  ;;  %v9498_v3 = vld [vmem:[#allocation2 + $0x3cf] sm:$0xff] }
 0x18b   :  { %15691 = vst [vmem:[#allocation175_spill] sm:$0xff] %v9496_v32  ;;  %15692 = vst [vmem:[#allocation176_spill] sm:$0xff] %v9498_v3 }
 0x18c   :  { %v9480_v20 = vpop.permute.xlu0 %890  ;;  %v9482_v23 = vpop.permute.xlu1 %892 }
 0x18d   :  { %15685 = vst [vmem:[#allocation169_spill] sm:$0xff] %v9480_v20  ;;  %15686 = vst [vmem:[#allocation170_spill] sm:$0xff] %v9482_v23 }
 0x18e   :  { %1136 = vrot.lane.b32.xlu1 %v9486_v59, %s8295_s0  ;;  %1134 = vrot.lane.b32.xlu0 %v9484_v62, %s8295_s0  ;;  %v9508_v59 = vld [vmem:[#allocation2 + $0x3e7] sm:$0xff]  ;;  %v9510_v62 = vld [vmem:[#allocation2 + $0x3ef] sm:$0xff] }
 0x18f   :  { %15695 = vst [vmem:[#allocation179_spill] sm:$0xff] %v9508_v59  ;;  %15696 = vst [vmem:[#allocation180_spill] sm:$0xff] %v9510_v62 }
 0x190   :  { %v9492_v58 = vpop.permute.xlu0 %894  ;;  %v9494_v63 = vpop.permute.xlu1 %896 }
 0x191   :  { %15689 = vst [vmem:[#allocation173_spill] sm:$0xff] %v9492_v58  ;;  %15690 = vst [vmem:[#allocation174_spill] sm:$0xff] %v9494_v63 }
 0x192   :  { %1140 = vrot.lane.b32.xlu1 %v9498_v3, %s8295_s0  ;;  %1138 = vrot.lane.b32.xlu0 %v9496_v32, %s8295_s0  ;;  %v9520_v3 = vld [vmem:[#allocation2 + $0x407] sm:$0xff]  ;;  %v9522_v32 = vld [vmem:[#allocation2 + $0x40f] sm:$0xff] }
 0x193   :  { %15699 = vst [vmem:[#allocation183_spill] sm:$0xff] %v9520_v3  ;;  %15700 = vst [vmem:[#allocation184_spill] sm:$0xff] %v9522_v32 }
 0x194   :  { %v9504_v23 = vpop.permute.xlu0 %898  ;;  %v9506_v20 = vpop.permute.xlu1 %900 }
 0x195   :  { %15693 = vst [vmem:[#allocation177_spill] sm:$0xff] %v9504_v23  ;;  %15694 = vst [vmem:[#allocation178_spill] sm:$0xff] %v9506_v20 }
 0x196   :  { %1144 = vrot.lane.b32.xlu1 %v9510_v62, %s8295_s0  ;;  %1142 = vrot.lane.b32.xlu0 %v9508_v59, %s8295_s0  ;;  %v9532_v62 = vld [vmem:[#allocation2 + $0x427] sm:$0xff]  ;;  %v9534_v59 = vld [vmem:[#allocation2 + $0x42f] sm:$0xff] }
 0x197   :  { %15703 = vst [vmem:[#allocation187_spill] sm:$0xff] %v9532_v62  ;;  %15704 = vst [vmem:[#allocation188_spill] sm:$0xff] %v9534_v59 }
 0x198   :  { %v9516_v63 = vpop.permute.xlu1 %1032  ;;  %v9518_v58 = vpop.permute.xlu0 %1030 }
 0x199   :  { %15697 = vst [vmem:[#allocation181_spill] sm:$0xff] %v9516_v63  ;;  %15698 = vst [vmem:[#allocation182_spill] sm:$0xff] %v9518_v58  ;;  %v9540_v58 = vld [vmem:[#allocation2 + $0x44f] sm:$0xff]  ;;  %v9542_v63 = vld [vmem:[#allocation2 + $0x447] sm:$0xff] }
 0x19a   :  { %1148 = vrot.lane.b32.xlu1 %v9522_v32, %s8295_s0  ;;  %1146 = vrot.lane.b32.xlu0 %v9520_v3, %s8295_s0  ;;  %15705 = vst [vmem:[#allocation189_spill] sm:$0xff] %v9540_v58  ;;  %15706 = vst [vmem:[#allocation190_spill] sm:$0xff] %v9542_v63 }
 0x19c   :  { %v9528_v20 = vpop.permute.xlu1 %1036  ;;  %v9530_v23 = vpop.permute.xlu0 %1034 }
 0x19d   :  { %15701 = vst [vmem:[#allocation185_spill] sm:$0xff] %v9528_v20  ;;  %15702 = vst [vmem:[#allocation186_spill] sm:$0xff] %v9530_v23 }
 0x19e   :  { %1152 = vrot.lane.b32.xlu1 %v9534_v59, %s8295_s0  ;;  %1150 = vrot.lane.b32.xlu0 %v9532_v62, %s8295_s0  ;;  %v7925_v59 = vld [vmem:[#allocation2 + $0x30] sm:$0xff]  ;;  %v7926_v62 = vld [vmem:[#allocation2 + $0x28] sm:$0xff] }
 0x1a0   :  { %v9544_v32 = vpop.permute.xlu1 %1040  ;;  %v9546_v3 = vpop.permute.xlu0 %1038 }
 0x1a1   :  { %15707 = vst [vmem:[#allocation191_spill] sm:$0xff] %v9544_v32  ;;  %15708 = vst [vmem:[#allocation192_spill] sm:$0xff] %v9546_v3 }
 0x1a2   :  { %1156 = vrot.lane.b32.xlu1 %v9540_v58, %s8295_s0  ;;  %1154 = vrot.lane.b32.xlu0 %v9542_v63, %s8295_s0  ;;  %v9566_v63 = vld [vmem:[#allocation2 + $0x48] sm:$0xff] }
 0x1a3   :  { %15714 = vst [vmem:[#allocation198_spill] sm:$0xff] %v9566_v63 }
 0x1a4   :  { %v9552_v23 = vpop.permute.xlu1 %1044  ;;  %v9554_v20 = vpop.permute.xlu0 %1042 }
 0x1a5   :  { %15709 = vst [vmem:[#allocation193_spill] sm:$0xff] %v9552_v23  ;;  %15710 = vst [vmem:[#allocation194_spill] sm:$0xff] %v9554_v20  ;;  %v9574_v23 = vld [vmem:[#allocation2 + $0x70] sm:$0xff] }
 0x1a6   :  { %1228 = vrot.lane.b32.xlu1 %v7925_v59, %s8296_s25  ;;  %1226 = vrot.lane.b32.xlu0 %v7926_v62, %s8296_s25  ;;  %15717 = vst [vmem:[#allocation201_spill] sm:$0xff] %v9574_v23  ;;  %v9578_v62 = vld [vmem:[#allocation2 + $0x68] sm:$0xff] }
 0x1a7   :  { %15718 = vst [vmem:[#allocation202_spill] sm:$0xff] %v9578_v62 }
 0x1a8   :  { %v9558_v32 = vpop.permute.xlu1 %1048  ;;  %v9560_v3 = vpop.permute.xlu0 %1046 }
 0x1a9   :  { %15711 = vst [vmem:[#allocation195_spill] sm:$0xff] %v9558_v32  ;;  %15712 = vst [vmem:[#allocation196_spill] sm:$0xff] %v9560_v3 }
 0x1aa   :  { %1232 = vrot.lane.b32.xlu1 %v9562_v35, %s8296_s25  ;;  %1230 = vrot.lane.b32.xlu0 %v9566_v63, %s8296_s25  ;;  %v9586_v35 = vld [vmem:[#allocation2 + $0x90] sm:$0xff] }
 0x1ab   :  { %15721 = vst [vmem:[#allocation205_spill] sm:$0xff] %v9586_v35  ;;  %v9598_v63 = vld [vmem:[#allocation2 + $0xb0] sm:$0xff] }
 0x1ac   :  { %v9570_v20 = vpop.permute.xlu1 %1052  ;;  %v9572_v59 = vpop.permute.xlu0 %1050  ;;  %15725 = vst [vmem:[#allocation209_spill] sm:$0xff] %v9598_v63 }
 0x1ad   :  { %15715 = vst [vmem:[#allocation199_spill] sm:$0xff] %v9570_v20  ;;  %15716 = vst [vmem:[#allocation200_spill] sm:$0xff] %v9572_v59  ;;  %v9590_v59 = vld [vmem:[#allocation2 + $0x88] sm:$0xff] }
 0x1ae   :  { %1236 = vrot.lane.b32.xlu1 %v9574_v23, %s8296_s25  ;;  %1234 = vrot.lane.b32.xlu0 %v9578_v62, %s8296_s25  ;;  %15722 = vst [vmem:[#allocation206_spill] sm:$0xff] %v9590_v59  ;;  %v9610_v62 = vld [vmem:[#allocation2 + $0xd0] sm:$0xff] }
 0x1af   :  { %15729 = vst [vmem:[#allocation213_spill] sm:$0xff] %v9610_v62 }
 0x1b0   :  { %v9582_v3 = vpop.permute.xlu1 %1056  ;;  %v9584_v32 = vpop.permute.xlu0 %1054 }
 0x1b1   :  { %15719 = vst [vmem:[#allocation203_spill] sm:$0xff] %v9582_v3  ;;  %15720 = vst [vmem:[#allocation204_spill] sm:$0xff] %v9584_v32  ;;  %v9602_v32 = vld [vmem:[#allocation2 + $0xa8] sm:$0xff] }
 0x1b2   :  { %1240 = vrot.lane.b32.xlu1 %v9586_v35, %s8296_s25  ;;  %1238 = vrot.lane.b32.xlu0 %v9590_v59, %s8296_s25  ;;  %15726 = vst [vmem:[#allocation210_spill] sm:$0xff] %v9602_v32  ;;  %v9622_v59 = vld [vmem:[#allocation2 + $0xf0] sm:$0xff] }
 0x1b3   :  { %15733 = vst [vmem:[#allocation217_spill] sm:$0xff] %v9622_v59 }
 0x1b4   :  { %v9594_v20 = vpop.permute.xlu1 %1060  ;;  %v9596_v23 = vpop.permute.xlu0 %1058 }
 0x1b5   :  { %15723 = vst [vmem:[#allocation207_spill] sm:$0xff] %v9594_v20  ;;  %15724 = vst [vmem:[#allocation208_spill] sm:$0xff] %v9596_v23  ;;  %v9614_v23 = vld [vmem:[#allocation2 + $0xc8] sm:$0xff] }
 0x1b6   :  { %1244 = vrot.lane.b32.xlu1 %v9598_v63, %s8296_s25  ;;  %1242 = vrot.lane.b32.xlu0 %v9602_v32, %s8296_s25  ;;  %15730 = vst [vmem:[#allocation214_spill] sm:$0xff] %v9614_v23  ;;  %v9634_v32 = vld [vmem:[#allocation2 + $0x110] sm:$0xff] }
 0x1b7   :  { %15737 = vst [vmem:[#allocation221_spill] sm:$0xff] %v9634_v32 }
 0x1b8   :  { %v9606_v3 = vpop.permute.xlu1 %1064  ;;  %v9608_v35 = vpop.permute.xlu0 %1062 }
 0x1b9   :  { %15727 = vst [vmem:[#allocation211_spill] sm:$0xff] %v9606_v3  ;;  %15728 = vst [vmem:[#allocation212_spill] sm:$0xff] %v9608_v35  ;;  %v9626_v35 = vld [vmem:[#allocation2 + $0xe8] sm:$0xff] }
 0x1ba   :  { %1248 = vrot.lane.b32.xlu1 %v9610_v62, %s8296_s25  ;;  %1246 = vrot.lane.b32.xlu0 %v9614_v23, %s8296_s25  ;;  %15734 = vst [vmem:[#allocation218_spill] sm:$0xff] %v9626_v35  ;;  %v9646_v23 = vld [vmem:[#allocation2 + $0x130] sm:$0xff] }
 0x1bb   :  { %15741 = vst [vmem:[#allocation225_spill] sm:$0xff] %v9646_v23 }
 0x1bc   :  { %v9618_v20 = vpop.permute.xlu1 %1068  ;;  %v9620_v63 = vpop.permute.xlu0 %1066 }
 0x1bd   :  { %15731 = vst [vmem:[#allocation215_spill] sm:$0xff] %v9618_v20  ;;  %15732 = vst [vmem:[#allocation216_spill] sm:$0xff] %v9620_v63  ;;  %v9638_v63 = vld [vmem:[#allocation2 + $0x108] sm:$0xff] }
 0x1be   :  { %1252 = vrot.lane.b32.xlu1 %v9622_v59, %s8296_s25  ;;  %1250 = vrot.lane.b32.xlu0 %v9626_v35, %s8296_s25  ;;  %15738 = vst [vmem:[#allocation222_spill] sm:$0xff] %v9638_v63  ;;  %v9658_v35 = vld [vmem:[#allocation2 + $0x150] sm:$0xff] }
 0x1bf   :  { %15745 = vst [vmem:[#allocation229_spill] sm:$0xff] %v9658_v35 }
 0x1c0   :  { %v9630_v3 = vpop.permute.xlu1 %1072  ;;  %v9632_v62 = vpop.permute.xlu0 %1070 }
 0x1c1   :  { %15735 = vst [vmem:[#allocation219_spill] sm:$0xff] %v9630_v3  ;;  %15736 = vst [vmem:[#allocation220_spill] sm:$0xff] %v9632_v62  ;;  %v9650_v62 = vld [vmem:[#allocation2 + $0x128] sm:$0xff] }
 0x1c2   :  { %1256 = vrot.lane.b32.xlu1 %v9634_v32, %s8296_s25  ;;  %1254 = vrot.lane.b32.xlu0 %v9638_v63, %s8296_s25  ;;  %15742 = vst [vmem:[#allocation226_spill] sm:$0xff] %v9650_v62  ;;  %v9670_v63 = vld [vmem:[#allocation2 + $0x170] sm:$0xff] }
 0x1c3   :  { %15749 = vst [vmem:[#allocation233_spill] sm:$0xff] %v9670_v63 }
 0x1c4   :  { %v9642_v20 = vpop.permute.xlu1 %1076  ;;  %v9644_v59 = vpop.permute.xlu0 %1074 }
 0x1c5   :  { %15739 = vst [vmem:[#allocation223_spill] sm:$0xff] %v9642_v20  ;;  %15740 = vst [vmem:[#allocation224_spill] sm:$0xff] %v9644_v59  ;;  %v9662_v59 = vld [vmem:[#allocation2 + $0x148] sm:$0xff] }
 0x1c6   :  { %1260 = vrot.lane.b32.xlu1 %v9646_v23, %s8296_s25  ;;  %1258 = vrot.lane.b32.xlu0 %v9650_v62, %s8296_s25  ;;  %15746 = vst [vmem:[#allocation230_spill] sm:$0xff] %v9662_v59  ;;  %v9682_v62 = vld [vmem:[#allocation2 + $0x190] sm:$0xff] }
 0x1c7   :  { %15753 = vst [vmem:[#allocation237_spill] sm:$0xff] %v9682_v62 }
 0x1c8   :  { %v9654_v3 = vpop.permute.xlu1 %1080  ;;  %v9656_v32 = vpop.permute.xlu0 %1078 }
 0x1c9   :  { %15743 = vst [vmem:[#allocation227_spill] sm:$0xff] %v9654_v3  ;;  %15744 = vst [vmem:[#allocation228_spill] sm:$0xff] %v9656_v32  ;;  %v9674_v32 = vld [vmem:[#allocation2 + $0x168] sm:$0xff] }
 0x1ca   :  { %1264 = vrot.lane.b32.xlu1 %v9658_v35, %s8296_s25  ;;  %1262 = vrot.lane.b32.xlu0 %v9662_v59, %s8296_s25  ;;  %15750 = vst [vmem:[#allocation234_spill] sm:$0xff] %v9674_v32  ;;  %v9694_v59 = vld [vmem:[#allocation2 + $0x1b0] sm:$0xff] }
 0x1cb   :  { %15757 = vst [vmem:[#allocation241_spill] sm:$0xff] %v9694_v59 }
 0x1cc   :  { %v9666_v20 = vpop.permute.xlu1 %1084  ;;  %v9668_v23 = vpop.permute.xlu0 %1082 }
 0x1cd   :  { %15747 = vst [vmem:[#allocation231_spill] sm:$0xff] %v9666_v20  ;;  %15748 = vst [vmem:[#allocation232_spill] sm:$0xff] %v9668_v23  ;;  %v9686_v23 = vld [vmem:[#allocation2 + $0x188] sm:$0xff] }
 0x1ce   :  { %1268 = vrot.lane.b32.xlu1 %v9670_v63, %s8296_s25  ;;  %1266 = vrot.lane.b32.xlu0 %v9674_v32, %s8296_s25  ;;  %15754 = vst [vmem:[#allocation238_spill] sm:$0xff] %v9686_v23  ;;  %v9706_v32 = vld [vmem:[#allocation2 + $0x1d0] sm:$0xff] }
 0x1cf   :  { %15761 = vst [vmem:[#allocation245_spill] sm:$0xff] %v9706_v32 }
 0x1d0   :  { %v9678_v3 = vpop.permute.xlu1 %1088  ;;  %v9680_v35 = vpop.permute.xlu0 %1086 }
 0x1d1   :  { %15751 = vst [vmem:[#allocation235_spill] sm:$0xff] %v9678_v3  ;;  %15752 = vst [vmem:[#allocation236_spill] sm:$0xff] %v9680_v35  ;;  %v9698_v35 = vld [vmem:[#allocation2 + $0x1a8] sm:$0xff] }
 0x1d2   :  { %1272 = vrot.lane.b32.xlu1 %v9682_v62, %s8296_s25  ;;  %1270 = vrot.lane.b32.xlu0 %v9686_v23, %s8296_s25  ;;  %15758 = vst [vmem:[#allocation242_spill] sm:$0xff] %v9698_v35  ;;  %v9718_v23 = vld [vmem:[#allocation2 + $0x1f0] sm:$0xff] }
 0x1d3   :  { %15765 = vst [vmem:[#allocation249_spill] sm:$0xff] %v9718_v23 }
 0x1d4   :  { %v9690_v20 = vpop.permute.xlu1 %1092  ;;  %v9692_v63 = vpop.permute.xlu0 %1090 }
 0x1d5   :  { %15755 = vst [vmem:[#allocation239_spill] sm:$0xff] %v9690_v20  ;;  %15756 = vst [vmem:[#allocation240_spill] sm:$0xff] %v9692_v63  ;;  %v9710_v63 = vld [vmem:[#allocation2 + $0x1c8] sm:$0xff] }
 0x1d6   :  { %1276 = vrot.lane.b32.xlu1 %v9694_v59, %s8296_s25  ;;  %1274 = vrot.lane.b32.xlu0 %v9698_v35, %s8296_s25  ;;  %15762 = vst [vmem:[#allocation246_spill] sm:$0xff] %v9710_v63 }
 0x1d8   :  { %v9702_v3 = vpop.permute.xlu1 %1096  ;;  %v9704_v62 = vpop.permute.xlu0 %1094 }
 0x1d9   :  { %15759 = vst [vmem:[#allocation243_spill] sm:$0xff] %v9702_v3  ;;  %15760 = vst [vmem:[#allocation244_spill] sm:$0xff] %v9704_v62  ;;  %v9722_v62 = vld [vmem:[#allocation2 + $0x1e8] sm:$0xff]  ;;  %v9726_v3 = vld [vmem:[#allocation2 + $0x210] sm:$0xff] }
 0x1da   :  { %1280 = vrot.lane.b32.xlu1 %v9706_v32, %s8296_s25  ;;  %1278 = vrot.lane.b32.xlu0 %v9710_v63, %s8296_s25  ;;  %15766 = vst [vmem:[#allocation250_spill] sm:$0xff] %v9722_v62  ;;  %15767 = vst [vmem:[#allocation251_spill] sm:$0xff] %v9726_v3  ;;  %v9728_v32 = vld [vmem:[#allocation2 + $0x208] sm:$0xff] }
 0x1db   :  { %15768 = vst [vmem:[#allocation252_spill] sm:$0xff] %v9728_v32 }
 0x1dc   :  { %v9714_v20 = vpop.permute.xlu1 %1100  ;;  %v9716_v59 = vpop.permute.xlu0 %1098 }
 0x1dd   :  { %15763 = vst [vmem:[#allocation247_spill] sm:$0xff] %v9714_v20  ;;  %15764 = vst [vmem:[#allocation248_spill] sm:$0xff] %v9716_v59 }
 0x1de   :  { %1284 = vrot.lane.b32.xlu1 %v9718_v23, %s8296_s25  ;;  %1282 = vrot.lane.b32.xlu0 %v9722_v62, %s8296_s25  ;;  %v7955_v23 = vld [vmem:[#allocation2 + $0x270] sm:$0xff]  ;;  %v7956_v62 = vld [vmem:[#allocation2 + $0x268] sm:$0xff] }
 0x1e0   :  { %v9730_v35 = vpop.permute.xlu1 %1104  ;;  %v9732_v63 = vpop.permute.xlu0 %1102 }
 0x1e1   :  { %15769 = vst [vmem:[#allocation253_spill] sm:$0xff] %v9730_v35  ;;  %15770 = vst [vmem:[#allocation254_spill] sm:$0xff] %v9732_v63  ;;  %v9748_v63 = vld [vmem:[#allocation2 + $0x290] sm:$0xff] }
 0x1e2   :  { %1288 = vrot.lane.b32.xlu1 %v9726_v3, %s8296_s25  ;;  %1286 = vrot.lane.b32.xlu0 %v9728_v32, %s8296_s25  ;;  %15775 = vst [vmem:[#allocation259_spill] sm:$0xff] %v9748_v63  ;;  %v9752_v32 = vld [vmem:[#allocation2 + $0x288] sm:$0xff]  ;;  %v9934_v3 = vld [vmem:[#allocation2 + $0x51] sm:$0xff] }
 0x1e3   :  { %15776 = vst [vmem:[#allocation260_spill] sm:$0xff] %v9752_v32  ;;  %15836 = vst [vmem:[#allocation320_spill] sm:$0xff] %v9934_v3 }
 0x1e4   :  { %v9738_v59 = vpop.permute.xlu1 %1108  ;;  %v9740_v20 = vpop.permute.xlu0 %1106 }
 0x1e5   :  { %15771 = vst [vmem:[#allocation255_spill] sm:$0xff] %v9738_v59  ;;  %15772 = vst [vmem:[#allocation256_spill] sm:$0xff] %v9740_v20  ;;  %v9760_v59 = vld [vmem:[#allocation2 + $0x2b0] sm:$0xff] }
 0x1e6   :  { %1292 = vrot.lane.b32.xlu1 %v7955_v23, %s8296_s25  ;;  %1290 = vrot.lane.b32.xlu0 %v7956_v62, %s8296_s25  ;;  %15779 = vst [vmem:[#allocation263_spill] sm:$0xff] %v9760_v59  ;;  %v9764_v62 = vld [vmem:[#allocation2 + $0x2a8] sm:$0xff] }
 0x1e7   :  { %15780 = vst [vmem:[#allocation264_spill] sm:$0xff] %v9764_v62 }
 0x1e8   :  { %v9744_v58 = vpop.permute.xlu1 %1112  ;;  %v9746_v35 = vpop.permute.xlu0 %1110 }
 0x1e9   :  { %15773 = vst [vmem:[#allocation257_spill] sm:$0xff] %v9744_v58  ;;  %15774 = vst [vmem:[#allocation258_spill] sm:$0xff] %v9746_v35 }
 0x1ea   :  { %1296 = vrot.lane.b32.xlu1 %v9748_v63, %s8296_s25  ;;  %1294 = vrot.lane.b32.xlu0 %v9752_v32, %s8296_s25  ;;  %v9772_v63 = vld [vmem:[#allocation2 + $0x2d0] sm:$0xff] }
 0x1eb   :  { %15783 = vst [vmem:[#allocation267_spill] sm:$0xff] %v9772_v63  ;;  %v9784_v32 = vld [vmem:[#allocation2 + $0x2f0] sm:$0xff] }
 0x1ec   :  { %v9756_v20 = vpop.permute.xlu1 %1116  ;;  %v9758_v23 = vpop.permute.xlu0 %1114  ;;  %15787 = vst [vmem:[#allocation271_spill] sm:$0xff] %v9784_v32 }
 0x1ed   :  { %15777 = vst [vmem:[#allocation261_spill] sm:$0xff] %v9756_v20  ;;  %15778 = vst [vmem:[#allocation262_spill] sm:$0xff] %v9758_v23  ;;  %v9776_v23 = vld [vmem:[#allocation2 + $0x2c8] sm:$0xff] }
 0x1ee   :  { %1300 = vrot.lane.b32.xlu1 %v9760_v59, %s8296_s25  ;;  %1298 = vrot.lane.b32.xlu0 %v9764_v62, %s8296_s25  ;;  %15784 = vst [vmem:[#allocation268_spill] sm:$0xff] %v9776_v23  ;;  %v9796_v62 = vld [vmem:[#allocation2 + $0x310] sm:$0xff] }
 0x1ef   :  { %15791 = vst [vmem:[#allocation275_spill] sm:$0xff] %v9796_v62 }
 0x1f0   :  { %v9768_v35 = vpop.permute.xlu1 %1120  ;;  %v9770_v58 = vpop.permute.xlu0 %1118 }
 0x1f1   :  { %15781 = vst [vmem:[#allocation265_spill] sm:$0xff] %v9768_v35  ;;  %15782 = vst [vmem:[#allocation266_spill] sm:$0xff] %v9770_v58  ;;  %v9788_v58 = vld [vmem:[#allocation2 + $0x2e8] sm:$0xff] }
 0x1f2   :  { %1304 = vrot.lane.b32.xlu1 %v9772_v63, %s8296_s25  ;;  %1302 = vrot.lane.b32.xlu0 %v9776_v23, %s8296_s25  ;;  %15788 = vst [vmem:[#allocation272_spill] sm:$0xff] %v9788_v58  ;;  %v9808_v23 = vld [vmem:[#allocation2 + $0x330] sm:$0xff] }
 0x1f3   :  { %15795 = vst [vmem:[#allocation279_spill] sm:$0xff] %v9808_v23 }
 0x1f4   :  { %v9780_v20 = vpop.permute.xlu1 %1124  ;;  %v9782_v59 = vpop.permute.xlu0 %1122 }
 0x1f5   :  { %15785 = vst [vmem:[#allocation269_spill] sm:$0xff] %v9780_v20  ;;  %15786 = vst [vmem:[#allocation270_spill] sm:$0xff] %v9782_v59  ;;  %v9800_v59 = vld [vmem:[#allocation2 + $0x308] sm:$0xff] }
 0x1f6   :  { %1308 = vrot.lane.b32.xlu1 %v9784_v32, %s8296_s25  ;;  %1306 = vrot.lane.b32.xlu0 %v9788_v58, %s8296_s25  ;;  %15792 = vst [vmem:[#allocation276_spill] sm:$0xff] %v9800_v59  ;;  %v9820_v58 = vld [vmem:[#allocation2 + $0x350] sm:$0xff] }
 0x1f7   :  { %15799 = vst [vmem:[#allocation283_spill] sm:$0xff] %v9820_v58 }
 0x1f8   :  { %v9792_v35 = vpop.permute.xlu1 %1128  ;;  %v9794_v63 = vpop.permute.xlu0 %1126 }
 0x1f9   :  { %15789 = vst [vmem:[#allocation273_spill] sm:$0xff] %v9792_v35  ;;  %15790 = vst [vmem:[#allocation274_spill] sm:$0xff] %v9794_v63  ;;  %v9812_v63 = vld [vmem:[#allocation2 + $0x328] sm:$0xff] }
 0x1fa   :  { %1312 = vrot.lane.b32.xlu1 %v9796_v62, %s8296_s25  ;;  %1310 = vrot.lane.b32.xlu0 %v9800_v59, %s8296_s25  ;;  %15796 = vst [vmem:[#allocation280_spill] sm:$0xff] %v9812_v63  ;;  %v9832_v59 = vld [vmem:[#allocation2 + $0x370] sm:$0xff] }
 0x1fb   :  { %15803 = vst [vmem:[#allocation287_spill] sm:$0xff] %v9832_v59 }
 0x1fc   :  { %v9804_v20 = vpop.permute.xlu1 %1132  ;;  %v9806_v32 = vpop.permute.xlu0 %1130 }
 0x1fd   :  { %15793 = vst [vmem:[#allocation277_spill] sm:$0xff] %v9804_v20  ;;  %15794 = vst [vmem:[#allocation278_spill] sm:$0xff] %v9806_v32  ;;  %v9824_v32 = vld [vmem:[#allocation2 + $0x348] sm:$0xff] }
 0x1fe   :  { %1316 = vrot.lane.b32.xlu1 %v9808_v23, %s8296_s25  ;;  %1314 = vrot.lane.b32.xlu0 %v9812_v63, %s8296_s25  ;;  %15800 = vst [vmem:[#allocation284_spill] sm:$0xff] %v9824_v32  ;;  %v9844_v63 = vld [vmem:[#allocation2 + $0x390] sm:$0xff] }
 0x1ff   :  { %15807 = vst [vmem:[#allocation291_spill] sm:$0xff] %v9844_v63 }
 0x200   :  { %v9816_v35 = vpop.permute.xlu1 %1136  ;;  %v9818_v62 = vpop.permute.xlu0 %1134 }
 0x201   :  { %15797 = vst [vmem:[#allocation281_spill] sm:$0xff] %v9816_v35  ;;  %15798 = vst [vmem:[#allocation282_spill] sm:$0xff] %v9818_v62  ;;  %v9836_v62 = vld [vmem:[#allocation2 + $0x368] sm:$0xff] }
 0x202   :  { %1320 = vrot.lane.b32.xlu1 %v9820_v58, %s8296_s25  ;;  %1318 = vrot.lane.b32.xlu0 %v9824_v32, %s8296_s25  ;;  %15804 = vst [vmem:[#allocation288_spill] sm:$0xff] %v9836_v62  ;;  %v9856_v32 = vld [vmem:[#allocation2 + $0x3b0] sm:$0xff] }
 0x203   :  { %15811 = vst [vmem:[#allocation295_spill] sm:$0xff] %v9856_v32 }
 0x204   :  { %v9828_v20 = vpop.permute.xlu1 %1140  ;;  %v9830_v23 = vpop.permute.xlu0 %1138 }
 0x205   :  { %15801 = vst [vmem:[#allocation285_spill] sm:$0xff] %v9828_v20  ;;  %15802 = vst [vmem:[#allocation286_spill] sm:$0xff] %v9830_v23  ;;  %v9848_v23 = vld [vmem:[#allocation2 + $0x388] sm:$0xff] }
 0x206   :  { %1324 = vrot.lane.b32.xlu1 %v9832_v59, %s8296_s25  ;;  %1322 = vrot.lane.b32.xlu0 %v9836_v62, %s8296_s25  ;;  %15808 = vst [vmem:[#allocation292_spill] sm:$0xff] %v9848_v23  ;;  %v9868_v62 = vld [vmem:[#allocation2 + $0x3d0] sm:$0xff] }
 0x207   :  { %15815 = vst [vmem:[#allocation299_spill] sm:$0xff] %v9868_v62 }
 0x208   :  { %v9840_v35 = vpop.permute.xlu1 %1144  ;;  %v9842_v58 = vpop.permute.xlu0 %1142 }
 0x209   :  { %15805 = vst [vmem:[#allocation289_spill] sm:$0xff] %v9840_v35  ;;  %15806 = vst [vmem:[#allocation290_spill] sm:$0xff] %v9842_v58  ;;  %v9860_v58 = vld [vmem:[#allocation2 + $0x3a8] sm:$0xff] }
 0x20a   :  { %1328 = vrot.lane.b32.xlu1 %v9844_v63, %s8296_s25  ;;  %1326 = vrot.lane.b32.xlu0 %v9848_v23, %s8296_s25  ;;  %15812 = vst [vmem:[#allocation296_spill] sm:$0xff] %v9860_v58  ;;  %v9880_v23 = vld [vmem:[#allocation2 + $0x3f0] sm:$0xff] }
 0x20b   :  { %15819 = vst [vmem:[#allocation303_spill] sm:$0xff] %v9880_v23 }
 0x20c   :  { %v9852_v20 = vpop.permute.xlu1 %1148  ;;  %v9854_v59 = vpop.permute.xlu0 %1146 }
 0x20d   :  { %15809 = vst [vmem:[#allocation293_spill] sm:$0xff] %v9852_v20  ;;  %15810 = vst [vmem:[#allocation294_spill] sm:$0xff] %v9854_v59  ;;  %v9872_v59 = vld [vmem:[#allocation2 + $0x3c8] sm:$0xff] }
 0x20e   :  { %1332 = vrot.lane.b32.xlu1 %v9856_v32, %s8296_s25  ;;  %1330 = vrot.lane.b32.xlu0 %v9860_v58, %s8296_s25  ;;  %15816 = vst [vmem:[#allocation300_spill] sm:$0xff] %v9872_v59  ;;  %v9892_v58 = vld [vmem:[#allocation2 + $0x410] sm:$0xff] }
 0x20f   :  { %15823 = vst [vmem:[#allocation307_spill] sm:$0xff] %v9892_v58 }
 0x210   :  { %v9864_v35 = vpop.permute.xlu1 %1152  ;;  %v9866_v63 = vpop.permute.xlu0 %1150 }
 0x211   :  { %15813 = vst [vmem:[#allocation297_spill] sm:$0xff] %v9864_v35  ;;  %15814 = vst [vmem:[#allocation298_spill] sm:$0xff] %v9866_v63  ;;  %v9884_v63 = vld [vmem:[#allocation2 + $0x3e8] sm:$0xff] }
 0x212   :  { %1336 = vrot.lane.b32.xlu1 %v9868_v62, %s8296_s25  ;;  %1334 = vrot.lane.b32.xlu0 %v9872_v59, %s8296_s25  ;;  %15820 = vst [vmem:[#allocation304_spill] sm:$0xff] %v9884_v63  ;;  %v9904_v59 = vld [vmem:[#allocation2 + $0x430] sm:$0xff] }
 0x213   :  { %15827 = vst [vmem:[#allocation311_spill] sm:$0xff] %v9904_v59 }
 0x214   :  { %v9876_v20 = vpop.permute.xlu1 %1156  ;;  %v9878_v32 = vpop.permute.xlu0 %1154 }
 0x215   :  { %15817 = vst [vmem:[#allocation301_spill] sm:$0xff] %v9876_v20  ;;  %15818 = vst [vmem:[#allocation302_spill] sm:$0xff] %v9878_v32  ;;  %v9896_v32 = vld [vmem:[#allocation2 + $0x408] sm:$0xff] }
 0x216   :  { %1340 = vrot.lane.b32.xlu1 %v9880_v23, %s8296_s25  ;;  %1338 = vrot.lane.b32.xlu0 %v9884_v63, %s8296_s25  ;;  %15824 = vst [vmem:[#allocation308_spill] sm:$0xff] %v9896_v32 }
 0x218   :  { %v9888_v35 = vpop.permute.xlu1 %1228  ;;  %v9890_v62 = vpop.permute.xlu0 %1226 }
 0x219   :  { %15821 = vst [vmem:[#allocation305_spill] sm:$0xff] %v9888_v35  ;;  %15822 = vst [vmem:[#allocation306_spill] sm:$0xff] %v9890_v62  ;;  %v9908_v62 = vld [vmem:[#allocation2 + $0x428] sm:$0xff]  ;;  %v9912_v35 = vld [vmem:[#allocation2 + $0x450] sm:$0xff] }
 0x21a   :  { %1344 = vrot.lane.b32.xlu1 %v9892_v58, %s8296_s25  ;;  %1342 = vrot.lane.b32.xlu0 %v9896_v32, %s8296_s25  ;;  %15828 = vst [vmem:[#allocation312_spill] sm:$0xff] %v9908_v62  ;;  %v9914_v58 = vld [vmem:[#allocation2 + $0x448] sm:$0xff] }
 0x21b   :  { %15829 = vst [vmem:[#allocation313_spill] sm:$0xff] %v9914_v58 }
 0x21c   :  { %v9900_v20 = vpop.permute.xlu1 %1232  ;;  %v9902_v23 = vpop.permute.xlu0 %1230 }
 0x21d   :  { %15825 = vst [vmem:[#allocation309_spill] sm:$0xff] %v9900_v20  ;;  %15826 = vst [vmem:[#allocation310_spill] sm:$0xff] %v9902_v23 }
 0x21e   :  { %1348 = vrot.lane.b32.xlu1 %v9904_v59, %s8296_s25  ;;  %1346 = vrot.lane.b32.xlu0 %v9908_v62, %s8296_s25  ;;  %v7985_v59 = vld [vmem:[#allocation2 + $0x31] sm:$0xff]  ;;  %v7986_v62 = vld [vmem:[#allocation2 + $0x29] sm:$0xff] }
 0x220   :  { %v9916_v63 = vpop.permute.xlu1 %1236  ;;  %v9918_v32 = vpop.permute.xlu0 %1234 }
 0x221   :  { %15830 = vst [vmem:[#allocation314_spill] sm:$0xff] %v9916_v63  ;;  %15831 = vst [vmem:[#allocation315_spill] sm:$0xff] %v9918_v32 }
 0x222   :  { %1352 = vrot.lane.b32.xlu1 %v9912_v35, %s8296_s25  ;;  %1350 = vrot.lane.b32.xlu0 %v9914_v58, %s8296_s25  ;;  %v9938_v58 = vld [vmem:[#allocation2 + $0x49] sm:$0xff]  ;;  %s8305_s25 = smov 80  }
 0x223   :  { %15837 = vst [vmem:[#allocation321_spill] sm:$0xff] %v9938_v58 }
 0x224   :  { %v9924_v23 = vpop.permute.xlu1 %1240  ;;  %v9926_v20 = vpop.permute.xlu0 %1238 }
 0x225   :  { %15832 = vst [vmem:[#allocation316_spill] sm:$0xff] %v9924_v23  ;;  %15833 = vst [vmem:[#allocation317_spill] sm:$0xff] %v9926_v20  ;;  %v9946_v23 = vld [vmem:[#allocation2 + $0x71] sm:$0xff] }
 0x226   :  { %1424 = vrot.lane.b32.xlu1 %v7985_v59, %s8297_s26  ;;  %1422 = vrot.lane.b32.xlu0 %v7986_v62, %s8297_s26  ;;  %15840 = vst [vmem:[#allocation324_spill] sm:$0xff] %v9946_v23  ;;  %v9950_v62 = vld [vmem:[#allocation2 + $0x69] sm:$0xff] }
 0x227   :  { %15841 = vst [vmem:[#allocation325_spill] sm:$0xff] %v9950_v62 }
 0x228   :  { %v9930_v63 = vpop.permute.xlu1 %1244  ;;  %v9932_v32 = vpop.permute.xlu0 %1242 }
 0x229   :  { %15834 = vst [vmem:[#allocation318_spill] sm:$0xff] %v9930_v63  ;;  %15835 = vst [vmem:[#allocation319_spill] sm:$0xff] %v9932_v32 }
 0x22a   :  { %1428 = vrot.lane.b32.xlu1 %v9934_v3, %s8297_s26  ;;  %1426 = vrot.lane.b32.xlu0 %v9938_v58, %s8297_s26  ;;  %v9958_v3 = vld [vmem:[#allocation2 + $0x91] sm:$0xff] }
 0x22b   :  { %15844 = vst [vmem:[#allocation328_spill] sm:$0xff] %v9958_v3  ;;  %v9970_v58 = vld [vmem:[#allocation2 + $0xb1] sm:$0xff] }
 0x22c   :  { %v9942_v20 = vpop.permute.xlu1 %1248  ;;  %v9944_v59 = vpop.permute.xlu0 %1246  ;;  %15847 = vst [vmem:[#allocation331_spill] sm:$0xff] %v9970_v58 }
 0x22d   :  { %15838 = vst [vmem:[#allocation322_spill] sm:$0xff] %v9942_v20  ;;  %15839 = vst [vmem:[#allocation323_spill] sm:$0xff] %v9944_v59  ;;  %v9962_v59 = vld [vmem:[#allocation2 + $0x89] sm:$0xff] }
 0x22e   :  { %1432 = vrot.lane.b32.xlu1 %v9946_v23, %s8297_s26  ;;  %1430 = vrot.lane.b32.xlu0 %v9950_v62, %s8297_s26  ;;  %v9982_v62 = vld [vmem:[#allocation2 + $0xd1] sm:$0xff] }
 0x22f   :  { %15850 = vst [vmem:[#allocation334_spill] sm:$0xff] %v9982_v62 }
 0x230   :  { %v9954_v32 = vpop.permute.xlu1 %1252  ;;  %v9956_v63 = vpop.permute.xlu0 %1250 }
 0x231   :  { %15842 = vst [vmem:[#allocation326_spill] sm:$0xff] %v9954_v32  ;;  %15843 = vst [vmem:[#allocation327_spill] sm:$0xff] %v9956_v63  ;;  %v9974_v63 = vld [vmem:[#allocation2 + $0xa9] sm:$0xff] }
 0x232   :  { %1436 = vrot.lane.b32.xlu1 %v9958_v3, %s8297_s26  ;;  %1434 = vrot.lane.b32.xlu0 %v9962_v59, %s8297_s26 }
 0x234   :  { %v9966_v20 = vpop.permute.xlu1 %1256  ;;  %v9968_v23 = vpop.permute.xlu0 %1254 }
 0x235   :  { %15845 = vst [vmem:[#allocation329_spill] sm:$0xff] %v9966_v20  ;;  %15846 = vst [vmem:[#allocation330_spill] sm:$0xff] %v9968_v23  ;;  %v9986_v23 = vld [vmem:[#allocation2 + $0xc9] sm:$0xff] }
 0x236   :  { %1440 = vrot.lane.b32.xlu1 %v9970_v58, %s8297_s26  ;;  %1438 = vrot.lane.b32.xlu0 %v9974_v63, %s8297_s26 }
 0x238   :  { %v9978_v32 = vpop.permute.xlu1 %1260  ;;  %v9980_v3 = vpop.permute.xlu0 %1258 }
 0x239   :  { %15848 = vst [vmem:[#allocation332_spill] sm:$0xff] %v9978_v32  ;;  %15849 = vst [vmem:[#allocation333_spill] sm:$0xff] %v9980_v3  ;;  %v9996_v32 = vld [vmem:[#allocation2 + $0xe9] sm:$0xff] }
 0x23a   :  { %1444 = vrot.lane.b32.xlu1 %v9982_v62, %s8297_s26  ;;  %1442 = vrot.lane.b32.xlu0 %v9986_v23, %s8297_s26 }
 0x23c   :  { %v9990_v20 = vpop.permute.xlu1 %1264  ;;  %v9992_v58 = vpop.permute.xlu0 %1262 }
 0x23d   :  { %15851 = vst [vmem:[#allocation335_spill] sm:$0xff] %v9990_v20  ;;  %15852 = vst [vmem:[#allocation336_spill] sm:$0xff] %v9992_v58 }
 0x23e   :  { %1448 = vrot.lane.b32.xlu1 %v8873_v34, %s8297_s26  ;;  %1446 = vrot.lane.b32.xlu0 %v9996_v32, %s8297_s26 }
 0x240   :  { %v10000_v3 = vpop.permute.xlu1 %1268  ;;  %v10002_v62 = vpop.permute.xlu0 %1266 }
 0x241   :  { %15853 = vst [vmem:[#allocation337_spill] sm:$0xff] %v10000_v3  ;;  %15854 = vst [vmem:[#allocation338_spill] sm:$0xff] %v10002_v62 }
 0x242   :  { %1452 = vrot.lane.b32.xlu1 %v8884_v38, %s8297_s26  ;;  %1450 = vrot.lane.b32.xlu0 %v8882_v37, %s8297_s26 }
 0x244   :  { %v10008_v20 = vpop.permute.xlu1 %1272  ;;  %v10010_v58 = vpop.permute.xlu0 %1270 }
 0x245   :  { %15855 = vst [vmem:[#allocation339_spill] sm:$0xff] %v10008_v20  ;;  %15856 = vst [vmem:[#allocation340_spill] sm:$0xff] %v10010_v58  ;;  %v16030_v58 = vld [vmem:[#allocation233_spill] sm:$0xff] }
 0x246   :  { %1456 = vrot.lane.b32.xlu1 %v8896_v42, %s8297_s26  ;;  %1454 = vrot.lane.b32.xlu0 %v8894_v41, %s8297_s26 }
 0x248   :  { %v10016_v34 = vpop.permute.xlu1 %1276  ;;  %v10018_v3 = vpop.permute.xlu0 %1274 }
 0x249   :  { %15857 = vst [vmem:[#allocation341_spill] sm:$0xff] %v10016_v34  ;;  %15858 = vst [vmem:[#allocation342_spill] sm:$0xff] %v10018_v3  ;;  %v16022_v3 = vld [vmem:[#allocation225_spill] sm:$0xff] }
 0x24a   :  { %1460 = vrot.lane.b32.xlu1 %v8908_v46, %s8297_s26  ;;  %1458 = vrot.lane.b32.xlu0 %v8906_v45, %s8297_s26 }
 0x24c   :  { %v10024_v37 = vpop.permute.xlu1 %1280  ;;  %v10026_v38 = vpop.permute.xlu0 %1278 }
 0x24d   :  { %15859 = vst [vmem:[#allocation343_spill] sm:$0xff] %v10024_v37  ;;  %15860 = vst [vmem:[#allocation344_spill] sm:$0xff] %v10026_v38  ;;  %v16014_v38 = vld [vmem:[#allocation217_spill] sm:$0xff] }
 0x24e   :  { %1464 = vrot.lane.b32.xlu1 %v8920_v50, %s8297_s26  ;;  %1462 = vrot.lane.b32.xlu0 %v8918_v49, %s8297_s26 }
 0x250   :  { %v10032_v41 = vpop.permute.xlu1 %1284  ;;  %v10034_v42 = vpop.permute.xlu0 %1282 }
 0x251   :  { %15861 = vst [vmem:[#allocation345_spill] sm:$0xff] %v10032_v41  ;;  %15862 = vst [vmem:[#allocation346_spill] sm:$0xff] %v10034_v42  ;;  %v16006_v42 = vld [vmem:[#allocation209_spill] sm:$0xff] }
 0x252   :  { %1468 = vrot.lane.b32.xlu1 %v8932_v54, %s8297_s26  ;;  %1466 = vrot.lane.b32.xlu0 %v8930_v53, %s8297_s26 }
 0x254   :  { %v10040_v45 = vpop.permute.xlu1 %1288  ;;  %v10042_v46 = vpop.permute.xlu0 %1286 }
 0x255   :  { %15863 = vst [vmem:[#allocation347_spill] sm:$0xff] %v10040_v45  ;;  %15864 = vst [vmem:[#allocation348_spill] sm:$0xff] %v10042_v46  ;;  %v16001_v46 = vld [vmem:[#allocation201_spill] sm:$0xff] }
 0x256   :  { %1472 = vrot.lane.b32.xlu1 %v8944_v60, %s8297_s26  ;;  %1470 = vrot.lane.b32.xlu0 %v8942_v57, %s8297_s26  ;;  %v10064_v57 = vld [vmem:[#allocation2 + $0x211] sm:$0xff]  ;;  %v10066_v60 = vld [vmem:[#allocation2 + $0x209] sm:$0xff] }
 0x258   :  { %v10048_v49 = vpop.permute.xlu1 %1292  ;;  %v10050_v50 = vpop.permute.xlu0 %1290 }
 0x259   :  { %15865 = vst [vmem:[#allocation349_spill] sm:$0xff] %v10048_v49  ;;  %15866 = vst [vmem:[#allocation350_spill] sm:$0xff] %v10050_v50 }
 0x25a   :  { %1476 = vrot.lane.b32.xlu1 %v8964_v9, %s8297_s26  ;;  %1474 = vrot.lane.b32.xlu0 %v8962_v6, %s8297_s26 }
 0x25c   :  { %v10056_v53 = vpop.permute.xlu1 %1296  ;;  %v10058_v54 = vpop.permute.xlu0 %1294 }
 0x25d   :  { %15867 = vst [vmem:[#allocation351_spill] sm:$0xff] %v10056_v53  ;;  %15868 = vst [vmem:[#allocation352_spill] sm:$0xff] %v10058_v54  ;;  %v272_v54 = vld [vmem:[#allocation2 + $0x227] sm:$0xff] }
 0x25e   :  { %1480 = vrot.lane.b32.xlu1 %v8976_v17, %s8297_s26  ;;  %1478 = vrot.lane.b32.xlu0 %v8974_v14, %s8297_s26 }
 0x260   :  { %v10068_v50 = vpop.permute.xlu1 %1300  ;;  %v10070_v9 = vpop.permute.xlu0 %1298 }
 0x261   :  { %15869 = vst [vmem:[#allocation353_spill] sm:$0xff] %v10068_v50  ;;  %15870 = vst [vmem:[#allocation354_spill] sm:$0xff] %v10070_v9 }
 0x262   :  { %1484 = vrot.lane.b32.xlu1 %v10064_v57, %s8297_s26  ;;  %1482 = vrot.lane.b32.xlu0 %v10066_v60, %s8297_s26 }
 0x264   :  { %v10076_v6 = vpop.permute.xlu1 %1304  ;;  %v10078_v17 = vpop.permute.xlu0 %1302 }
 0x265   :  { %15871 = vst [vmem:[#allocation355_spill] sm:$0xff] %v10076_v6  ;;  %15872 = vst [vmem:[#allocation356_spill] sm:$0xff] %v10078_v17  ;;  %v15939_v17 = vld [vmem:[#allocation127_spill] sm:$0xff] }
 0x266   :  { %1488 = vrot.lane.b32.xlu1 %v8994_v33, %s8297_s26  ;;  %1486 = vrot.lane.b32.xlu0 %v8992_v30, %s8297_s26 }
 0x268   :  { %v10084_v14 = vpop.permute.xlu1 %1308  ;;  %v10086_v50 = vpop.permute.xlu0 %1306 }
 0x269   :  { %15873 = vst [vmem:[#allocation357_spill] sm:$0xff] %v10084_v14  ;;  %15874 = vst [vmem:[#allocation358_spill] sm:$0xff] %v10086_v50  ;;  %v15935_v50 = vld [vmem:[#allocation126_spill] sm:$0xff] }
 0x26a   :  { %1492 = vrot.lane.b32.xlu1 %v9006_v29, %s8297_s26  ;;  %1490 = vrot.lane.b32.xlu0 %v9004_v2, %s8297_s26 }
 0x26c   :  { %v10092_v9 = vpop.permute.xlu1 %1312  ;;  %v10094_v6 = vpop.permute.xlu0 %1310 }
 0x26d   :  { %15875 = vst [vmem:[#allocation359_spill] sm:$0xff] %v10092_v9  ;;  %15876 = vst [vmem:[#allocation360_spill] sm:$0xff] %v10094_v6  ;;  %v15931_v6 = vld [vmem:[#allocation122_spill] sm:$0xff] }
 0x26e   :  { %1496 = vrot.lane.b32.xlu1 %v9018_v1, %s8297_s26  ;;  %1494 = vrot.lane.b32.xlu0 %v9016_v5, %s8297_s26 }
 0x270   :  { %v10100_v30 = vpop.permute.xlu1 %1316  ;;  %v10102_v33 = vpop.permute.xlu0 %1314 }
 0x271   :  { %15877 = vst [vmem:[#allocation361_spill] sm:$0xff] %v10100_v30  ;;  %15878 = vst [vmem:[#allocation362_spill] sm:$0xff] %v10102_v33  ;;  %v15927_v33 = vld [vmem:[#allocation118_spill] sm:$0xff] }
 0x272   :  { %1500 = vrot.lane.b32.xlu1 %v9030_v22, %s8297_s26  ;;  %1498 = vrot.lane.b32.xlu0 %v9028_v25, %s8297_s26 }
 0x274   :  { %v10108_v2 = vpop.permute.xlu1 %1320  ;;  %v10110_v29 = vpop.permute.xlu0 %1318 }
 0x275   :  { %15879 = vst [vmem:[#allocation363_spill] sm:$0xff] %v10108_v2  ;;  %15880 = vst [vmem:[#allocation364_spill] sm:$0xff] %v10110_v29  ;;  %v15923_v29 = vld [vmem:[#allocation114_spill] sm:$0xff] }
 0x276   :  { %1504 = vrot.lane.b32.xlu1 %v9042_v26, %s8297_s26  ;;  %1502 = vrot.lane.b32.xlu0 %v9040_v21, %s8297_s26 }
 0x278   :  { %v10116_v1 = vpop.permute.xlu1 %1324  ;;  %v10118_v5 = vpop.permute.xlu0 %1322 }
 0x279   :  { %15881 = vst [vmem:[#allocation365_spill] sm:$0xff] %v10116_v1  ;;  %15882 = vst [vmem:[#allocation366_spill] sm:$0xff] %v10118_v5  ;;  %v15919_v5 = vld [vmem:[#allocation110_spill] sm:$0xff] }
 0x27a   :  { %1508 = vrot.lane.b32.xlu1 %v9054_v18, %s8297_s26  ;;  %1506 = vrot.lane.b32.xlu0 %v9052_v13, %s8297_s26 }
 0x27c   :  { %v10124_v22 = vpop.permute.xlu1 %1328  ;;  %v10126_v25 = vpop.permute.xlu0 %1326 }
 0x27d   :  { %15883 = vst [vmem:[#allocation367_spill] sm:$0xff] %v10124_v22  ;;  %15884 = vst [vmem:[#allocation368_spill] sm:$0xff] %v10126_v25  ;;  %v15915_v25 = vld [vmem:[#allocation106_spill] sm:$0xff] }
 0x27e   :  { %1512 = vrot.lane.b32.xlu1 %v9066_v10, %s8297_s26  ;;  %1510 = vrot.lane.b32.xlu0 %v9064_v0, %s8297_s26 }
 0x280   :  { %v10132_v21 = vpop.permute.xlu1 %1332  ;;  %v10134_v26 = vpop.permute.xlu0 %1330 }
 0x281   :  { %15885 = vst [vmem:[#allocation369_spill] sm:$0xff] %v10132_v21  ;;  %15886 = vst [vmem:[#allocation370_spill] sm:$0xff] %v10134_v26  ;;  %v15911_v26 = vld [vmem:[#allocation102_spill] sm:$0xff] }
 0x282   :  { %1516 = vrot.lane.b32.xlu1 %v9078_v61, %s8297_s26  ;;  %1514 = vrot.lane.b32.xlu0 %v9076_v56, %s8297_s26 }
 0x284   :  { %v10140_v13 = vpop.permute.xlu1 %1336  ;;  %v10142_v18 = vpop.permute.xlu0 %1334 }
 0x285   :  { %15887 = vst [vmem:[#allocation371_spill] sm:$0xff] %v10140_v13  ;;  %15888 = vst [vmem:[#allocation372_spill] sm:$0xff] %v10142_v18  ;;  %v15907_v18 = vld [vmem:[#allocation98_spill] sm:$0xff] }
 0x286   :  { %1520 = vrot.lane.b32.xlu1 %v9090_v55, %s8297_s26  ;;  %1518 = vrot.lane.b32.xlu0 %v9088_v52, %s8297_s26 }
 0x288   :  { %v10148_v0 = vpop.permute.xlu1 %1340  ;;  %v10150_v10 = vpop.permute.xlu0 %1338 }
 0x289   :  { %15889 = vst [vmem:[#allocation373_spill] sm:$0xff] %v10148_v0  ;;  %15890 = vst [vmem:[#allocation374_spill] sm:$0xff] %v10150_v10  ;;  %v15903_v10 = vld [vmem:[#allocation94_spill] sm:$0xff] }
 0x28a   :  { %1524 = vrot.lane.b32.xlu1 %v9102_v51, %s8297_s26  ;;  %1522 = vrot.lane.b32.xlu0 %v9100_v48, %s8297_s26 }
 0x28c   :  { %v10156_v56 = vpop.permute.xlu1 %1344  ;;  %v10158_v61 = vpop.permute.xlu0 %1342 }
 0x28d   :  { %15891 = vst [vmem:[#allocation375_spill] sm:$0xff] %v10156_v56  ;;  %15892 = vst [vmem:[#allocation376_spill] sm:$0xff] %v10158_v61  ;;  %v15899_v61 = vld [vmem:[#allocation90_spill] sm:$0xff] }
 0x28e   :  { %1528 = vrot.lane.b32.xlu1 %v9114_v47, %s8297_s26  ;;  %1526 = vrot.lane.b32.xlu0 %v9112_v44, %s8297_s26 }
 0x290   :  { %v10164_v52 = vpop.permute.xlu1 %1348  ;;  %v10166_v55 = vpop.permute.xlu0 %1346 }
 0x291   :  { %15893 = vst [vmem:[#allocation377_spill] sm:$0xff] %v10164_v52  ;;  %15894 = vst [vmem:[#allocation378_spill] sm:$0xff] %v10166_v55 }
 0x292   :  { %1532 = vrot.lane.b32.xlu1 %v9126_v43, %s8297_s26  ;;  %1530 = vrot.lane.b32.xlu0 %v9124_v40, %s8297_s26 }
 0x294   :  { %v10172_v48 = vpop.permute.xlu1 %1352  ;;  %v10174_v51 = vpop.permute.xlu0 %1350 }
 0x295   :  { %15895 = vst [vmem:[#allocation379_spill] sm:$0xff] %v10172_v48  ;;  %15896 = vst [vmem:[#allocation380_spill] sm:$0xff] %v10174_v51 }
 0x296   :  { %1536 = vrot.lane.b32.xlu1 %v9138_v39, %s8297_s26  ;;  %1534 = vrot.lane.b32.xlu0 %v9136_v36, %s8297_s26  ;;  %v10196_v36 = vld [vmem:[#allocation2 + $0x451] sm:$0xff]  ;;  %v10198_v39 = vld [vmem:[#allocation2 + $0x449] sm:$0xff] }
 0x298   :  { %v10180_v44 = vpop.permute.xlu1 %1424  ;;  %v10182_v47 = vpop.permute.xlu0 %1422 }
 0x29a   :  { %1540 = vrot.lane.b32.xlu1 %v9158_v24, %s8297_s26  ;;  %1538 = vrot.lane.b32.xlu0 %v9156_v27, %s8297_s26 }
 0x29c   :  { %v10188_v40 = vpop.permute.xlu1 %1428  ;;  %v10190_v43 = vpop.permute.xlu0 %1426 }
 0x29e   :  { %1544 = vrot.lane.b32.xlu1 %v9170_v16, %s8297_s26  ;;  %1542 = vrot.lane.b32.xlu0 %v9168_v19, %s8297_s26 }
 0x2a0   :  { %v10200_v51 = vpop.permute.xlu1 %1432  ;;  %v10202_v24 = vpop.permute.xlu0 %1430 }
 0x2a2   :  { %1548 = vrot.lane.b32.xlu1 %v10196_v36, %s8297_s26  ;;  %1546 = vrot.lane.b32.xlu0 %v10198_v39, %s8297_s26 }
 0x2a4   :  { %v10208_v27 = vpop.permute.xlu1 %1436  ;;  %v10210_v16 = vpop.permute.xlu0 %1434 }
 0x2a6   :  { %1620 = vrot.lane.b32.xlu1 %v9192_v31, %s8298_s27  ;;  %1618 = vrot.lane.b32.xlu0 %v9190_v28, %s8298_s27 }
 0x2a8   :  { %v10216_v19 = vpop.permute.xlu1 %1440  ;;  %v10218_v48 = vpop.permute.xlu0 %1438 }
 0x2aa   :  { %1624 = vrot.lane.b32.xlu1 %v9204_v15, %s8298_s27  ;;  %1622 = vrot.lane.b32.xlu0 %v9202_v12, %s8298_s27 }
 0x2ac   :  { %v10224_v55 = vpop.permute.xlu1 %1444  ;;  %v10226_v52 = vpop.permute.xlu0 %1442 }
 0x2ae   :  { %1628 = vrot.lane.b32.xlu1 %v9216_v8, %s8298_s27  ;;  %1626 = vrot.lane.b32.xlu0 %v9214_v11, %s8298_s27  ;;  %v15900_v8 = vld [vmem:[#allocation89_spill] sm:$0xff] }
 0x2b0   :  { %v10232_v28 = vpop.permute.xlu1 %1448  ;;  %v10234_v31 = vpop.permute.xlu0 %1446 }
 0x2b2   :  { %1632 = vrot.lane.b32.xlu1 %v9228_v4, %s8298_s27  ;;  %1630 = vrot.lane.b32.xlu0 %v9226_v7, %s8298_s27  ;;  %v15904_v4 = vld [vmem:[#allocation93_spill] sm:$0xff] }
 0x2b4   :  { %v10240_v12 = vpop.permute.xlu1 %1452  ;;  %v10242_v15 = vpop.permute.xlu0 %1450 }
 0x2b5   :  { %15897 = vst [vmem:[#allocation381_spill] sm:$0xff] %v10240_v12  ;;  %15898 = vst [vmem:[#allocation382_spill] sm:$0xff] %v10242_v15 }
 0x2b6   :  { %1636 = vrot.lane.b32.xlu1 %v15899_v61, %s8298_s27  ;;  %1634 = vrot.lane.b32.xlu0 %v15900_v8, %s8298_s27  ;;  %v15908_v61 = vld [vmem:[#allocation97_spill] sm:$0xff] }
 0x2b8   :  { %v10248_v11 = vpop.permute.xlu1 %1456  ;;  %v10250_v56 = vpop.permute.xlu0 %1454 }
 0x2b9   :  { %15901 = vst [vmem:[#allocation90_spill] sm:$0xff] %v10248_v11  ;;  %15902 = vst [vmem:[#allocation89_spill] sm:$0xff] %v10250_v56  ;;  %v8038_v11 = vld [vmem:[#allocation2 + $0x2f] sm:$0xff] }
 0x2ba   :  { %1640 = vrot.lane.b32.xlu1 %v15903_v10, %s8298_s27  ;;  %1638 = vrot.lane.b32.xlu0 %v15904_v4, %s8298_s27  ;;  %v15912_v10 = vld [vmem:[#allocation101_spill] sm:$0xff] }
 0x2bc   :  { %v10256_v7 = vpop.permute.xlu1 %1460  ;;  %v10258_v0 = vpop.permute.xlu0 %1458 }
 0x2bd   :  { %15905 = vst [vmem:[#allocation94_spill] sm:$0xff] %v10256_v7  ;;  %15906 = vst [vmem:[#allocation93_spill] sm:$0xff] %v10258_v0  ;;  %v16120_v0 = vld [vmem:[#allocation334_spill] sm:$0xff] }
 0x2be   :  { %1644 = vrot.lane.b32.xlu1 %v15907_v18, %s8298_s27  ;;  %1642 = vrot.lane.b32.xlu0 %v15908_v61, %s8298_s27  ;;  %v15916_v18 = vld [vmem:[#allocation105_spill] sm:$0xff] }
 0x2bf   :  { %v7998_v7 = vld [vmem:[#allocation2 + $0xf1] sm:$0xff] }
 0x2c0   :  { %v10264_v8 = vpop.permute.xlu1 %1464  ;;  %v10266_v13 = vpop.permute.xlu0 %1462 }
 0x2c1   :  { %15909 = vst [vmem:[#allocation98_spill] sm:$0xff] %v10264_v8  ;;  %15910 = vst [vmem:[#allocation97_spill] sm:$0xff] %v10266_v13  ;;  %v16112_v8 = vld [vmem:[#allocation324_spill] sm:$0xff] }
 0x2c2   :  { %1648 = vrot.lane.b32.xlu1 %v15911_v26, %s8298_s27  ;;  %1646 = vrot.lane.b32.xlu0 %v15912_v10, %s8298_s27  ;;  %v15920_v26 = vld [vmem:[#allocation109_spill] sm:$0xff] }
 0x2c4   :  { %v10272_v4 = vpop.permute.xlu1 %1468  ;;  %v10274_v21 = vpop.permute.xlu0 %1466 }
 0x2c5   :  { %15913 = vst [vmem:[#allocation102_spill] sm:$0xff] %v10272_v4  ;;  %15914 = vst [vmem:[#allocation101_spill] sm:$0xff] %v10274_v21  ;;  %v16026_v21 = vld [vmem:[#allocation229_spill] sm:$0xff] }
 0x2c6   :  { %1652 = vrot.lane.b32.xlu1 %v15915_v25, %s8298_s27  ;;  %1650 = vrot.lane.b32.xlu0 %v15916_v18, %s8298_s27  ;;  %v15924_v25 = vld [vmem:[#allocation113_spill] sm:$0xff] }
 0x2c8   :  { %v10280_v61 = vpop.permute.xlu1 %1472  ;;  %v10282_v22 = vpop.permute.xlu0 %1470 }
 0x2c9   :  { %15917 = vst [vmem:[#allocation106_spill] sm:$0xff] %v10280_v61  ;;  %15918 = vst [vmem:[#allocation105_spill] sm:$0xff] %v10282_v22  ;;  %v16018_v22 = vld [vmem:[#allocation221_spill] sm:$0xff] }
 0x2ca   :  { %1656 = vrot.lane.b32.xlu1 %v15919_v5, %s8298_s27  ;;  %1654 = vrot.lane.b32.xlu0 %v15920_v26, %s8298_s27  ;;  %v15928_v5 = vld [vmem:[#allocation117_spill] sm:$0xff] }
 0x2cc   :  { %v10288_v10 = vpop.permute.xlu1 %1476  ;;  %v10290_v1 = vpop.permute.xlu0 %1474 }
 0x2cd   :  { %15921 = vst [vmem:[#allocation110_spill] sm:$0xff] %v10288_v10  ;;  %15922 = vst [vmem:[#allocation109_spill] sm:$0xff] %v10290_v1  ;;  %v16010_v1 = vld [vmem:[#allocation213_spill] sm:$0xff] }
 0x2ce   :  { %1660 = vrot.lane.b32.xlu1 %v15923_v29, %s8298_s27  ;;  %1658 = vrot.lane.b32.xlu0 %v15924_v25, %s8298_s27  ;;  %v15932_v29 = vld [vmem:[#allocation121_spill] sm:$0xff] }
 0x2d0   :  { %v10296_v18 = vpop.permute.xlu1 %1480  ;;  %v10298_v2 = vpop.permute.xlu0 %1478 }
 0x2d1   :  { %15925 = vst [vmem:[#allocation114_spill] sm:$0xff] %v10296_v18  ;;  %15926 = vst [vmem:[#allocation113_spill] sm:$0xff] %v10298_v2  ;;  %v16003_v2 = vld [vmem:[#allocation205_spill] sm:$0xff] }
 0x2d2   :  { %1664 = vrot.lane.b32.xlu1 %v15927_v33, %s8298_s27  ;;  %1662 = vrot.lane.b32.xlu0 %v15928_v5, %s8298_s27  ;;  %v15936_v33 = vld [vmem:[#allocation125_spill] sm:$0xff] }
 0x2d4   :  { %v10304_v26 = vpop.permute.xlu1 %1484  ;;  %v10306_v30 = vpop.permute.xlu0 %1482 }
 0x2d5   :  { %15929 = vst [vmem:[#allocation118_spill] sm:$0xff] %v10304_v26  ;;  %15930 = vst [vmem:[#allocation117_spill] sm:$0xff] %v10306_v30 }
 0x2d6   :  { %1668 = vrot.lane.b32.xlu1 %v15931_v6, %s8298_s27  ;;  %1666 = vrot.lane.b32.xlu0 %v15932_v29, %s8298_s27  ;;  %v15940_v6 = vld [vmem:[#allocation128_spill] sm:$0xff] }
 0x2d7   :  { %v273_v29 = vld [vmem:[#allocation2 + $0x22f] sm:$0xff] }
 0x2d8   :  { %v10312_v25 = vpop.permute.xlu1 %1488  ;;  %v10314_v9 = vpop.permute.xlu0 %1486 }
 0x2d9   :  { %15933 = vst [vmem:[#allocation122_spill] sm:$0xff] %v10312_v25  ;;  %15934 = vst [vmem:[#allocation121_spill] sm:$0xff] %v10314_v9 }
 0x2da   :  { %1672 = vrot.lane.b32.xlu1 %v15935_v50, %s8298_s27  ;;  %1670 = vrot.lane.b32.xlu0 %v15936_v33, %s8298_s27 }
 0x2dc   :  { %v10320_v5 = vpop.permute.xlu1 %1492  ;;  %v10322_v14 = vpop.permute.xlu0 %1490 }
 0x2dd   :  { %15937 = vst [vmem:[#allocation126_spill] sm:$0xff] %v10320_v5  ;;  %15938 = vst [vmem:[#allocation125_spill] sm:$0xff] %v10322_v14  ;;  %v15945_v14 = vld [vmem:[#allocation136_spill] sm:$0xff] }
 0x2de   :  { %1676 = vrot.lane.b32.xlu1 %v15939_v17, %s8298_s27  ;;  %1674 = vrot.lane.b32.xlu0 %v15940_v6, %s8298_s27  ;;  %v15946_v17 = vld [vmem:[#allocation135_spill] sm:$0xff] }
 0x2e0   :  { %v10328_v53 = vpop.permute.xlu1 %1496  ;;  %v10330_v9 = vpop.permute.xlu0 %1494 }
 0x2e1   :  { %15941 = vst [vmem:[#allocation127_spill] sm:$0xff] %v10328_v53  ;;  %15942 = vst [vmem:[#allocation128_spill] sm:$0xff] %v10330_v9  ;;  %v15949_v9 = vld [vmem:[#allocation140_spill] sm:$0xff] }
 0x2e2   :  { %1680 = vrot.lane.b32.xlu1 %v273_v29, %s8298_s27  ;;  %1678 = vrot.lane.b32.xlu0 %v272_v54, %s8298_s27  ;;  %v15950_v29 = vld [vmem:[#allocation139_spill] sm:$0xff] }
 0x2e3   :  { %v308_v53 = vld [vmem:[#allocation2 + $0x467] sm:$0xff] }
 0x2e4   :  { %v10334_v50 = vpop.permute.xlu1 %1500  ;;  %v10336_v33 = vpop.permute.xlu0 %1498 }
 0x2e5   :  { %15943 = vst [vmem:[#allocation383_spill] sm:$0xff] %v10334_v50  ;;  %15944 = vst [vmem:[#allocation384_spill] sm:$0xff] %v10336_v33  ;;  %v15953_v33 = vld [vmem:[#allocation144_spill] sm:$0xff] }
 0x2e6   :  { %1684 = vrot.lane.b32.xlu1 %v15945_v14, %s8298_s27  ;;  %1682 = vrot.lane.b32.xlu0 %v15946_v17, %s8298_s27  ;;  %v15954_v14 = vld [vmem:[#allocation143_spill] sm:$0xff] }
 0x2e8   :  { %v10342_v6 = vpop.permute.xlu1 %1504  ;;  %v10344_v5 = vpop.permute.xlu0 %1502 }
 0x2e9   :  { %15947 = vst [vmem:[#allocation136_spill] sm:$0xff] %v10342_v6  ;;  %15948 = vst [vmem:[#allocation135_spill] sm:$0xff] %v10344_v5  ;;  %v15957_v5 = vld [vmem:[#allocation148_spill] sm:$0xff] }
 0x2ea   :  { %1688 = vrot.lane.b32.xlu1 %v15949_v9, %s8298_s27  ;;  %1686 = vrot.lane.b32.xlu0 %v15950_v29, %s8298_s27  ;;  %v15958_v9 = vld [vmem:[#allocation147_spill] sm:$0xff] }
 0x2ec   :  { %v10350_v54 = vpop.permute.xlu1 %1508  ;;  %v10352_v50 = vpop.permute.xlu0 %1506 }
 0x2ed   :  { %15951 = vst [vmem:[#allocation140_spill] sm:$0xff] %v10350_v54  ;;  %15952 = vst [vmem:[#allocation139_spill] sm:$0xff] %v10352_v50  ;;  %v15961_v50 = vld [vmem:[#allocation152_spill] sm:$0xff] }
 0x2ee   :  { %1692 = vrot.lane.b32.xlu1 %v15953_v33, %s8298_s27  ;;  %1690 = vrot.lane.b32.xlu0 %v15954_v14, %s8298_s27  ;;  %v15962_v33 = vld [vmem:[#allocation151_spill] sm:$0xff] }
 0x2f0   :  { %v10358_v17 = vpop.permute.xlu1 %1512  ;;  %v10360_v6 = vpop.permute.xlu0 %1510 }
 0x2f1   :  { %15955 = vst [vmem:[#allocation144_spill] sm:$0xff] %v10358_v17  ;;  %15956 = vst [vmem:[#allocation143_spill] sm:$0xff] %v10360_v6  ;;  %v15965_v6 = vld [vmem:[#allocation156_spill] sm:$0xff] }
 0x2f2   :  { %1696 = vrot.lane.b32.xlu1 %v15957_v5, %s8298_s27  ;;  %1694 = vrot.lane.b32.xlu0 %v15958_v9, %s8298_s27  ;;  %v15966_v5 = vld [vmem:[#allocation155_spill] sm:$0xff] }
 0x2f4   :  { %v10366_v29 = vpop.permute.xlu1 %1516  ;;  %v10368_v54 = vpop.permute.xlu0 %1514 }
 0x2f5   :  { %15959 = vst [vmem:[#allocation148_spill] sm:$0xff] %v10366_v29  ;;  %15960 = vst [vmem:[#allocation147_spill] sm:$0xff] %v10368_v54  ;;  %v15969_v54 = vld [vmem:[#allocation160_spill] sm:$0xff] }
 0x2f6   :  { %1700 = vrot.lane.b32.xlu1 %v15961_v50, %s8298_s27  ;;  %1698 = vrot.lane.b32.xlu0 %v15962_v33, %s8298_s27  ;;  %v15970_v50 = vld [vmem:[#allocation159_spill] sm:$0xff] }
 0x2f8   :  { %v10374_v14 = vpop.permute.xlu1 %1520  ;;  %v10376_v17 = vpop.permute.xlu0 %1518 }
 0x2f9   :  { %15963 = vst [vmem:[#allocation152_spill] sm:$0xff] %v10374_v14  ;;  %15964 = vst [vmem:[#allocation151_spill] sm:$0xff] %v10376_v17  ;;  %v15973_v17 = vld [vmem:[#allocation164_spill] sm:$0xff] }
 0x2fa   :  { %1704 = vrot.lane.b32.xlu1 %v15965_v6, %s8298_s27  ;;  %1702 = vrot.lane.b32.xlu0 %v15966_v5, %s8298_s27  ;;  %v15974_v6 = vld [vmem:[#allocation163_spill] sm:$0xff] }
 0x2fc   :  { %v10382_v9 = vpop.permute.xlu1 %1524  ;;  %v10384_v29 = vpop.permute.xlu0 %1522 }
 0x2fd   :  { %15967 = vst [vmem:[#allocation156_spill] sm:$0xff] %v10382_v9  ;;  %15968 = vst [vmem:[#allocation155_spill] sm:$0xff] %v10384_v29  ;;  %v15977_v29 = vld [vmem:[#allocation168_spill] sm:$0xff] }
 0x2fe   :  { %1708 = vrot.lane.b32.xlu1 %v15969_v54, %s8298_s27  ;;  %1706 = vrot.lane.b32.xlu0 %v15970_v50, %s8298_s27  ;;  %v15978_v54 = vld [vmem:[#allocation167_spill] sm:$0xff] }
 0x300   :  { %v10390_v33 = vpop.permute.xlu1 %1528  ;;  %v10392_v14 = vpop.permute.xlu0 %1526 }
 0x301   :  { %15971 = vst [vmem:[#allocation160_spill] sm:$0xff] %v10390_v33  ;;  %15972 = vst [vmem:[#allocation159_spill] sm:$0xff] %v10392_v14  ;;  %v15981_v14 = vld [vmem:[#allocation172_spill] sm:$0xff] }
 0x302   :  { %1712 = vrot.lane.b32.xlu1 %v15973_v17, %s8298_s27  ;;  %1710 = vrot.lane.b32.xlu0 %v15974_v6, %s8298_s27  ;;  %v15982_v17 = vld [vmem:[#allocation171_spill] sm:$0xff] }
 0x304   :  { %v10398_v5 = vpop.permute.xlu1 %1532  ;;  %v10400_v9 = vpop.permute.xlu0 %1530 }
 0x305   :  { %15975 = vst [vmem:[#allocation164_spill] sm:$0xff] %v10398_v5  ;;  %15976 = vst [vmem:[#allocation163_spill] sm:$0xff] %v10400_v9  ;;  %v15985_v9 = vld [vmem:[#allocation176_spill] sm:$0xff] }
 0x306   :  { %1716 = vrot.lane.b32.xlu1 %v15977_v29, %s8298_s27  ;;  %1714 = vrot.lane.b32.xlu0 %v15978_v54, %s8298_s27  ;;  %v15986_v29 = vld [vmem:[#allocation175_spill] sm:$0xff] }
 0x308   :  { %v10406_v50 = vpop.permute.xlu1 %1536  ;;  %v10408_v33 = vpop.permute.xlu0 %1534 }
 0x309   :  { %15979 = vst [vmem:[#allocation168_spill] sm:$0xff] %v10406_v50  ;;  %15980 = vst [vmem:[#allocation167_spill] sm:$0xff] %v10408_v33  ;;  %v15989_v33 = vld [vmem:[#allocation180_spill] sm:$0xff] }
 0x30a   :  { %1720 = vrot.lane.b32.xlu1 %v15981_v14, %s8298_s27  ;;  %1718 = vrot.lane.b32.xlu0 %v15982_v17, %s8298_s27  ;;  %v15990_v14 = vld [vmem:[#allocation179_spill] sm:$0xff] }
 0x30c   :  { %v10414_v6 = vpop.permute.xlu1 %1540  ;;  %v10416_v5 = vpop.permute.xlu0 %1538 }
 0x30d   :  { %15983 = vst [vmem:[#allocation172_spill] sm:$0xff] %v10414_v6  ;;  %15984 = vst [vmem:[#allocation171_spill] sm:$0xff] %v10416_v5  ;;  %v15993_v5 = vld [vmem:[#allocation184_spill] sm:$0xff] }
 0x30e   :  { %1724 = vrot.lane.b32.xlu1 %v15985_v9, %s8298_s27  ;;  %1722 = vrot.lane.b32.xlu0 %v15986_v29, %s8298_s27  ;;  %v15994_v9 = vld [vmem:[#allocation183_spill] sm:$0xff] }
 0x310   :  { %v10422_v54 = vpop.permute.xlu1 %1544  ;;  %v10424_v50 = vpop.permute.xlu0 %1542 }
 0x311   :  { %15987 = vst [vmem:[#allocation176_spill] sm:$0xff] %v10422_v54  ;;  %15988 = vst [vmem:[#allocation175_spill] sm:$0xff] %v10424_v50  ;;  %v15995_v50 = vld [vmem:[#allocation188_spill] sm:$0xff] }
 0x312   :  { %1728 = vrot.lane.b32.xlu1 %v15989_v33, %s8298_s27  ;;  %1726 = vrot.lane.b32.xlu0 %v15990_v14, %s8298_s27  ;;  %v15996_v33 = vld [vmem:[#allocation187_spill] sm:$0xff] }
 0x314   :  { %v10430_v17 = vpop.permute.xlu1 %1548  ;;  %v10432_v6 = vpop.permute.xlu0 %1546 }
 0x315   :  { %15991 = vst [vmem:[#allocation180_spill] sm:$0xff] %v10430_v17  ;;  %15992 = vst [vmem:[#allocation179_spill] sm:$0xff] %v10432_v6  ;;  %v15997_v6 = vld [vmem:[#allocation189_spill] sm:$0xff] }
 0x316   :  { %1732 = vrot.lane.b32.xlu1 %v15993_v5, %s8298_s27  ;;  %1730 = vrot.lane.b32.xlu0 %v15994_v9, %s8298_s27  ;;  %v15998_v5 = vld [vmem:[#allocation190_spill] sm:$0xff]  ;;  %v309_v9 = vld [vmem:[#allocation2 + $0x46f] sm:$0xff] }
 0x318   :  { %v10438_v29 = vpop.permute.xlu1 %1620  ;;  %v10440_v54 = vpop.permute.xlu0 %1618 }
 0x31a   :  { %1736 = vrot.lane.b32.xlu1 %v15995_v50, %s8298_s27  ;;  %1734 = vrot.lane.b32.xlu0 %v15996_v33, %s8298_s27 }
 0x31c   :  { %v10446_v14 = vpop.permute.xlu1 %1624  ;;  %v10448_v17 = vpop.permute.xlu0 %1622 }
 0x31e   :  { %1740 = vrot.lane.b32.xlu1 %v15997_v6, %s8298_s27  ;;  %1738 = vrot.lane.b32.xlu0 %v15998_v5, %s8298_s27  ;;  %v15999_v6 = vld [vmem:[#allocation197_spill] sm:$0xff]  ;;  %v16000_v5 = vld [vmem:[#allocation198_spill] sm:$0xff] }
 0x320   :  { %v10454_v25 = vpop.permute.xlu1 %1628  ;;  %v10456_v49 = vpop.permute.xlu0 %1626 }
 0x322   :  { %1744 = vrot.lane.b32.xlu1 %v309_v9, %s8298_s27  ;;  %1742 = vrot.lane.b32.xlu0 %v308_v53, %s8298_s27  ;;  %v16002_v53 = vld [vmem:[#allocation202_spill] sm:$0xff] }
 0x324   :  { %v10460_v50 = vpop.permute.xlu1 %1632  ;;  %v10462_v33 = vpop.permute.xlu0 %1630 }
 0x326   :  { %1816 = vrot.lane.b32.xlu1 %v15999_v6, %s8299_s28  ;;  %1814 = vrot.lane.b32.xlu0 %v16000_v5, %s8299_s28  ;;  %v16004_v6 = vld [vmem:[#allocation206_spill] sm:$0xff] }
 0x328   :  { %v10468_v30 = vpop.permute.xlu1 %1636  ;;  %v10470_v26 = vpop.permute.xlu0 %1634 }
 0x32a   :  { %1820 = vrot.lane.b32.xlu1 %v16001_v46, %s8299_s28  ;;  %1818 = vrot.lane.b32.xlu0 %v16002_v53, %s8299_s28  ;;  %v16007_v46 = vld [vmem:[#allocation210_spill] sm:$0xff] }
 0x32c   :  { %v10476_v9 = vpop.permute.xlu1 %1640  ;;  %v10478_v45 = vpop.permute.xlu0 %1638 }
 0x32e   :  { %1824 = vrot.lane.b32.xlu1 %v16003_v2, %s8299_s28  ;;  %1822 = vrot.lane.b32.xlu0 %v16004_v6, %s8299_s28  ;;  %v16011_v2 = vld [vmem:[#allocation214_spill] sm:$0xff] }
 0x330   :  { %v10484_v5 = vpop.permute.xlu1 %1644  ;;  %v10486_v18 = vpop.permute.xlu0 %1642 }
 0x331   :  { %16005 = vst [vmem:[#allocation184_spill] sm:$0xff] %v10486_v18 }
 0x332   :  { %1828 = vrot.lane.b32.xlu1 %v16006_v42, %s8299_s28  ;;  %1826 = vrot.lane.b32.xlu0 %v16007_v46, %s8299_s28  ;;  %v16015_v42 = vld [vmem:[#allocation218_spill] sm:$0xff] }
 0x334   :  { %v10492_v53 = vpop.permute.xlu1 %1648  ;;  %v10494_v41 = vpop.permute.xlu0 %1646 }
 0x335   :  { %16008 = vst [vmem:[#allocation183_spill] sm:$0xff] %v10492_v53  ;;  %16009 = vst [vmem:[#allocation188_spill] sm:$0xff] %v10494_v41  ;;  %v16172_v41 = vld [vmem:[#allocation12_spill] sm:$0xff] }
 0x336   :  { %1832 = vrot.lane.b32.xlu1 %v16010_v1, %s8299_s28  ;;  %1830 = vrot.lane.b32.xlu0 %v16011_v2, %s8299_s28  ;;  %v16019_v1 = vld [vmem:[#allocation222_spill] sm:$0xff]  ;;  %v8042_v53 = vld [vmem:[#allocation2 + $0x6f] sm:$0xff] }
 0x338   :  { %v10500_v6 = vpop.permute.xlu1 %1652  ;;  %v10502_v10 = vpop.permute.xlu0 %1650 }
 0x339   :  { %16012 = vst [vmem:[#allocation187_spill] sm:$0xff] %v10500_v6  ;;  %16013 = vst [vmem:[#allocation189_spill] sm:$0xff] %v10502_v10  ;;  %v7999_v10 = vld [vmem:[#allocation2 + $0x111] sm:$0xff] }
 0x33a   :  { %1836 = vrot.lane.b32.xlu1 %v16014_v38, %s8299_s28  ;;  %1834 = vrot.lane.b32.xlu0 %v16015_v42, %s8299_s28  ;;  %v16023_v38 = vld [vmem:[#allocation226_spill] sm:$0xff] }
 0x33c   :  { %v10508_v46 = vpop.permute.xlu1 %1656  ;;  %v10510_v37 = vpop.permute.xlu0 %1654 }
 0x33d   :  { %16016 = vst [vmem:[#allocation190_spill] sm:$0xff] %v10508_v46  ;;  %16017 = vst [vmem:[#allocation197_spill] sm:$0xff] %v10510_v37  ;;  %v16114_v37 = vld [vmem:[#allocation328_spill] sm:$0xff]  ;;  %v16117_v46 = vld [vmem:[#allocation331_spill] sm:$0xff] }
 0x33e   :  { %1840 = vrot.lane.b32.xlu1 %v16018_v22, %s8299_s28  ;;  %1838 = vrot.lane.b32.xlu0 %v16019_v1, %s8299_s28  ;;  %v16027_v22 = vld [vmem:[#allocation230_spill] sm:$0xff] }
 0x340   :  { %v10516_v2 = vpop.permute.xlu1 %1660  ;;  %v10518_v61 = vpop.permute.xlu0 %1658 }
 0x341   :  { %16020 = vst [vmem:[#allocation198_spill] sm:$0xff] %v10516_v2  ;;  %16021 = vst [vmem:[#allocation201_spill] sm:$0xff] %v10518_v61  ;;  %v380_v61 = vld [vmem:[#allocation2 + $0x468] sm:$0xff]  ;;  %v16109_v2 = vmov 0.0  }
 0x342   :  { %1844 = vrot.lane.b32.xlu1 %v16022_v3, %s8299_s28  ;;  %1842 = vrot.lane.b32.xlu0 %v16023_v38, %s8299_s28  ;;  %v16031_v3 = vld [vmem:[#allocation234_spill] sm:$0xff] }
 0x344   :  { %v10524_v42 = vpop.permute.xlu1 %1664  ;;  %v10526_v34 = vpop.permute.xlu0 %1662 }
 0x345   :  { %16024 = vst [vmem:[#allocation202_spill] sm:$0xff] %v10524_v42  ;;  %16025 = vst [vmem:[#allocation205_spill] sm:$0xff] %v10526_v34  ;;  %v16034_v34 = vld [vmem:[#allocation237_spill] sm:$0xff] }
 0x346   :  { %1848 = vrot.lane.b32.xlu1 %v16026_v21, %s8299_s28  ;;  %1846 = vrot.lane.b32.xlu0 %v16027_v22, %s8299_s28  ;;  %v16035_v21 = vld [vmem:[#allocation238_spill] sm:$0xff] }
 0x348   :  { %v10532_v1 = vpop.permute.xlu1 %1668  ;;  %v10534_v4 = vpop.permute.xlu0 %1666 }
 0x349   :  { %16028 = vst [vmem:[#allocation206_spill] sm:$0xff] %v10532_v1  ;;  %16029 = vst [vmem:[#allocation209_spill] sm:$0xff] %v10534_v4  ;;  %v16038_v4 = vld [vmem:[#allocation241_spill] sm:$0xff] }
 0x34a   :  { %1852 = vrot.lane.b32.xlu1 %v16030_v58, %s8299_s28  ;;  %1850 = vrot.lane.b32.xlu0 %v16031_v3, %s8299_s28  ;;  %v16039_v58 = vld [vmem:[#allocation242_spill] sm:$0xff] }
 0x34c   :  { %v10540_v38 = vpop.permute.xlu1 %1672  ;;  %v10542_v42 = vpop.permute.xlu0 %1670 }
 0x34d   :  { %16032 = vst [vmem:[#allocation210_spill] sm:$0xff] %v10540_v38  ;;  %16033 = vst [vmem:[#allocation213_spill] sm:$0xff] %v10542_v42  ;;  %v16042_v42 = vld [vmem:[#allocation245_spill] sm:$0xff] }
 0x34e   :  { %1856 = vrot.lane.b32.xlu1 %v16034_v34, %s8299_s28  ;;  %1854 = vrot.lane.b32.xlu0 %v16035_v21, %s8299_s28  ;;  %v16043_v34 = vld [vmem:[#allocation246_spill] sm:$0xff] }
 0x350   :  { %v10548_v22 = vpop.permute.xlu1 %1676  ;;  %v10550_v1 = vpop.permute.xlu0 %1674 }
 0x351   :  { %16036 = vst [vmem:[#allocation214_spill] sm:$0xff] %v10548_v22  ;;  %16037 = vst [vmem:[#allocation217_spill] sm:$0xff] %v10550_v1  ;;  %v16046_v1 = vld [vmem:[#allocation249_spill] sm:$0xff] }
 0x352   :  { %1860 = vrot.lane.b32.xlu1 %v16038_v4, %s8299_s28  ;;  %1858 = vrot.lane.b32.xlu0 %v16039_v58, %s8299_s28  ;;  %v16047_v4 = vld [vmem:[#allocation250_spill] sm:$0xff] }
 0x354   :  { %v10556_v3 = vpop.permute.xlu1 %1680  ;;  %v10558_v38 = vpop.permute.xlu0 %1678 }
 0x355   :  { %16040 = vst [vmem:[#allocation218_spill] sm:$0xff] %v10556_v3  ;;  %16041 = vst [vmem:[#allocation221_spill] sm:$0xff] %v10558_v38  ;;  %v16050_v38 = vld [vmem:[#allocation251_spill] sm:$0xff] }
 0x356   :  { %1864 = vrot.lane.b32.xlu1 %v16042_v42, %s8299_s28  ;;  %1862 = vrot.lane.b32.xlu0 %v16043_v34, %s8299_s28  ;;  %v16051_v42 = vld [vmem:[#allocation252_spill] sm:$0xff]  ;;  %v345_v34 = vld [vmem:[#allocation2 + $0x230] sm:$0xff] }
 0x358   :  { %v10564_v21 = vpop.permute.xlu1 %1684  ;;  %v10566_v22 = vpop.permute.xlu0 %1682 }
 0x359   :  { %16044 = vst [vmem:[#allocation222_spill] sm:$0xff] %v10564_v21  ;;  %16045 = vst [vmem:[#allocation225_spill] sm:$0xff] %v10566_v22  ;;  %v344_v21 = vld [vmem:[#allocation2 + $0x228] sm:$0xff] }
 0x35a   :  { %1868 = vrot.lane.b32.xlu1 %v16046_v1, %s8299_s28  ;;  %1866 = vrot.lane.b32.xlu0 %v16047_v4, %s8299_s28 }
 0x35c   :  { %v10572_v58 = vpop.permute.xlu1 %1688  ;;  %v10574_v3 = vpop.permute.xlu0 %1686 }
 0x35d   :  { %16048 = vst [vmem:[#allocation226_spill] sm:$0xff] %v10572_v58  ;;  %16049 = vst [vmem:[#allocation229_spill] sm:$0xff] %v10574_v3  ;;  %v16056_v3 = vld [vmem:[#allocation259_spill] sm:$0xff] }
 0x35e   :  { %1872 = vrot.lane.b32.xlu1 %v16050_v38, %s8299_s28  ;;  %1870 = vrot.lane.b32.xlu0 %v16051_v42, %s8299_s28  ;;  %v16057_v38 = vld [vmem:[#allocation260_spill] sm:$0xff] }
 0x360   :  { %v10580_v20 = vpop.permute.xlu1 %1692  ;;  %v10582_v22 = vpop.permute.xlu0 %1690 }
 0x361   :  { %16052 = vst [vmem:[#allocation230_spill] sm:$0xff] %v10580_v20  ;;  %16053 = vst [vmem:[#allocation233_spill] sm:$0xff] %v10582_v22  ;;  %v16060_v22 = vld [vmem:[#allocation263_spill] sm:$0xff]  ;;  %v381_v20 = vld [vmem:[#allocation2 + $0x470] sm:$0xff] }
 0x362   :  { %1876 = vrot.lane.b32.xlu1 %v345_v34, %s8299_s28  ;;  %1874 = vrot.lane.b32.xlu0 %v344_v21, %s8299_s28  ;;  %v16061_v34 = vld [vmem:[#allocation264_spill] sm:$0xff] }
 0x364   :  { %v10586_v1 = vpop.permute.xlu1 %1696  ;;  %v10588_v4 = vpop.permute.xlu0 %1694 }
 0x365   :  { %16054 = vst [vmem:[#allocation234_spill] sm:$0xff] %v10586_v1  ;;  %16055 = vst [vmem:[#allocation237_spill] sm:$0xff] %v10588_v4  ;;  %v16064_v4 = vld [vmem:[#allocation267_spill] sm:$0xff] }
 0x366   :  { %1880 = vrot.lane.b32.xlu1 %v16056_v3, %s8299_s28  ;;  %1878 = vrot.lane.b32.xlu0 %v16057_v38, %s8299_s28  ;;  %v16065_v3 = vld [vmem:[#allocation268_spill] sm:$0xff] }
 0x368   :  { %v10594_v42 = vpop.permute.xlu1 %1700  ;;  %v10596_v58 = vpop.permute.xlu0 %1698 }
 0x369   :  { %16058 = vst [vmem:[#allocation238_spill] sm:$0xff] %v10594_v42  ;;  %16059 = vst [vmem:[#allocation241_spill] sm:$0xff] %v10596_v58  ;;  %v16068_v58 = vld [vmem:[#allocation271_spill] sm:$0xff] }
 0x36a   :  { %1884 = vrot.lane.b32.xlu1 %v16060_v22, %s8299_s28  ;;  %1882 = vrot.lane.b32.xlu0 %v16061_v34, %s8299_s28  ;;  %v16069_v22 = vld [vmem:[#allocation272_spill] sm:$0xff] }
 0x36c   :  { %v10602_v21 = vpop.permute.xlu1 %1704  ;;  %v10604_v1 = vpop.permute.xlu0 %1702 }
 0x36d   :  { %16062 = vst [vmem:[#allocation242_spill] sm:$0xff] %v10602_v21  ;;  %16063 = vst [vmem:[#allocation245_spill] sm:$0xff] %v10604_v1  ;;  %v16072_v1 = vld [vmem:[#allocation275_spill] sm:$0xff] }
 0x36e   :  { %1888 = vrot.lane.b32.xlu1 %v16064_v4, %s8299_s28  ;;  %1886 = vrot.lane.b32.xlu0 %v16065_v3, %s8299_s28  ;;  %v16073_v4 = vld [vmem:[#allocation276_spill] sm:$0xff] }
 0x370   :  { %v10610_v38 = vpop.permute.xlu1 %1708  ;;  %v10612_v42 = vpop.permute.xlu0 %1706 }
 0x371   :  { %16066 = vst [vmem:[#allocation246_spill] sm:$0xff] %v10610_v38  ;;  %16067 = vst [vmem:[#allocation249_spill] sm:$0xff] %v10612_v42  ;;  %v16076_v42 = vld [vmem:[#allocation279_spill] sm:$0xff] }
 0x372   :  { %1892 = vrot.lane.b32.xlu1 %v16068_v58, %s8299_s28  ;;  %1890 = vrot.lane.b32.xlu0 %v16069_v22, %s8299_s28  ;;  %v16077_v58 = vld [vmem:[#allocation280_spill] sm:$0xff] }
 0x374   :  { %v10618_v34 = vpop.permute.xlu1 %1712  ;;  %v10620_v21 = vpop.permute.xlu0 %1710 }
 0x375   :  { %16070 = vst [vmem:[#allocation250_spill] sm:$0xff] %v10618_v34  ;;  %16071 = vst [vmem:[#allocation251_spill] sm:$0xff] %v10620_v21  ;;  %v16080_v21 = vld [vmem:[#allocation283_spill] sm:$0xff] }
 0x376   :  { %1896 = vrot.lane.b32.xlu1 %v16072_v1, %s8299_s28  ;;  %1894 = vrot.lane.b32.xlu0 %v16073_v4, %s8299_s28  ;;  %v16081_v1 = vld [vmem:[#allocation284_spill] sm:$0xff] }
 0x378   :  { %v10626_v3 = vpop.permute.xlu1 %1716  ;;  %v10628_v38 = vpop.permute.xlu0 %1714 }
 0x379   :  { %16074 = vst [vmem:[#allocation252_spill] sm:$0xff] %v10626_v3  ;;  %16075 = vst [vmem:[#allocation259_spill] sm:$0xff] %v10628_v38  ;;  %v16084_v38 = vld [vmem:[#allocation287_spill] sm:$0xff] }
 0x37a   :  { %1900 = vrot.lane.b32.xlu1 %v16076_v42, %s8299_s28  ;;  %1898 = vrot.lane.b32.xlu0 %v16077_v58, %s8299_s28  ;;  %v16085_v42 = vld [vmem:[#allocation288_spill] sm:$0xff] }
 0x37c   :  { %v10634_v22 = vpop.permute.xlu1 %1720  ;;  %v10636_v34 = vpop.permute.xlu0 %1718 }
 0x37d   :  { %16078 = vst [vmem:[#allocation260_spill] sm:$0xff] %v10634_v22  ;;  %16079 = vst [vmem:[#allocation263_spill] sm:$0xff] %v10636_v34  ;;  %v16088_v34 = vld [vmem:[#allocation291_spill] sm:$0xff] }
 0x37e   :  { %1904 = vrot.lane.b32.xlu1 %v16080_v21, %s8299_s28  ;;  %1902 = vrot.lane.b32.xlu0 %v16081_v1, %s8299_s28  ;;  %v16089_v21 = vld [vmem:[#allocation292_spill] sm:$0xff] }
 0x380   :  { %v10642_v4 = vpop.permute.xlu1 %1724  ;;  %v10644_v3 = vpop.permute.xlu0 %1722 }
 0x381   :  { %16082 = vst [vmem:[#allocation264_spill] sm:$0xff] %v10642_v4  ;;  %16083 = vst [vmem:[#allocation267_spill] sm:$0xff] %v10644_v3  ;;  %v16092_v3 = vld [vmem:[#allocation295_spill] sm:$0xff] }
 0x382   :  { %1908 = vrot.lane.b32.xlu1 %v16084_v38, %s8299_s28  ;;  %1906 = vrot.lane.b32.xlu0 %v16085_v42, %s8299_s28  ;;  %v16093_v38 = vld [vmem:[#allocation296_spill] sm:$0xff] }
 0x384   :  { %v10650_v58 = vpop.permute.xlu1 %1728  ;;  %v10652_v22 = vpop.permute.xlu0 %1726 }
 0x385   :  { %16086 = vst [vmem:[#allocation268_spill] sm:$0xff] %v10650_v58  ;;  %16087 = vst [vmem:[#allocation271_spill] sm:$0xff] %v10652_v22  ;;  %v16096_v22 = vld [vmem:[#allocation299_spill] sm:$0xff] }
 0x386   :  { %1912 = vrot.lane.b32.xlu1 %v16088_v34, %s8299_s28  ;;  %1910 = vrot.lane.b32.xlu0 %v16089_v21, %s8299_s28  ;;  %v16097_v34 = vld [vmem:[#allocation300_spill] sm:$0xff] }
 0x387   :  { %v2726_v21 = vld [vmem:[%s15103_s1 + $0x28] sm:$0x1f] }
 0x388   :  { %v10658_v1 = vpop.permute.xlu1 %1732  ;;  %v10660_v4 = vpop.permute.xlu0 %1730  ;;  %6642 = vmatprep.subr.msk.mxu0 %vm2927_vm3, %v2726_v21 }
 0x389   :  { %16090 = vst [vmem:[#allocation272_spill] sm:$0xff] %v10658_v1  ;;  %16091 = vst [vmem:[#allocation275_spill] sm:$0xff] %v10660_v4  ;;  %6643 = vmatpush3.msk.msra.mxu0 %vm2927_vm3, %v2726_v21  ;;  %v2723_v21 = vld [vmem:[%s15103_s1 + $0x10] sm:$0xff]  ;;  %vm5625_vm3 = vcmask 785408  }
 0x38a   :  { %1916 = vrot.lane.b32.xlu1 %v16092_v3, %s8299_s28  ;;  %1914 = vrot.lane.b32.xlu0 %v16093_v38, %s8299_s28  ;;  %v2725_v38 = vld [vmem:[%s15103_s1 + $0x20] sm:$0xff] }
 0x38b   :  { %6644 = vmatprep.subr.mxu0 %v2725_v38 }
 0x38c   :  { %v10666_v42 = vpop.permute.xlu1 %1736  ;;  %v10668_v58 = vpop.permute.xlu0 %1734  ;;  %6645 = vmatpush3.msra.mxu0 %v2725_v38  ;;  %v2722_v38 = vld [vmem:[%s15103_s1 + $0x8] sm:$0xff] }
 0x38d   :  { %16094 = vst [vmem:[#allocation276_spill] sm:$0xff] %v10666_v42  ;;  %16095 = vst [vmem:[#allocation279_spill] sm:$0xff] %v10668_v58  ;;  %v2724_v58 = vld [vmem:[%s15103_s1 + $0x18] sm:$0xff] }
 0x38e   :  { %1920 = vrot.lane.b32.xlu1 %v16096_v22, %s8299_s28  ;;  %1918 = vrot.lane.b32.xlu0 %v16097_v34, %s8299_s28  ;;  %v16100_v22 = vld [vmem:[#allocation303_spill] sm:$0xff]  ;;  %v16101_v34 = vld [vmem:[#allocation304_spill] sm:$0xff] }
 0x38f   :  { %6646 = vmatprep.subr.mxu0 %v2724_v58 }
 0x390   :  { %v10677_v3 = vpop.permute.xlu1 %1740  ;;  %v10679_v4 = vpop.permute.xlu0 %1738  ;;  %6647 = vmatpush3.msra.mxu0 %v2724_v58  ;;  %v2721_v58 = vld [vmem:[%s15103_s1] sm:$0xff]  ;;  %s8300_s1 = smov 40  }
 0x391   :  { %16098 = vst [vmem:[#allocation280_spill] sm:$0xff] %v10677_v3  ;;  %16099 = vst [vmem:[#allocation283_spill] sm:$0xff] %v10679_v4  ;;  %6648 = vmatprep.subr.mxu0 %v2723_v21 }
 0x392   :  { %1924 = vrot.lane.b32.xlu1 %v16100_v22, %s8299_s28  ;;  %1922 = vrot.lane.b32.xlu0 %v16101_v34, %s8299_s28  ;;  %v16104_v22 = vld [vmem:[#allocation307_spill] sm:$0xff]  ;;  %v16105_v34 = vld [vmem:[#allocation308_spill] sm:$0xff] }
 0x393   :  { %6649 = vmatpush3.msra.mxu0 %v2723_v21  ;;  %v16108_v21 = vld [vmem:[#allocation313_spill] sm:$0xff] }
 0x394   :  { %v10691_v3 = vpop.permute.xlu1 %1744  ;;  %v10693_v4 = vpop.permute.xlu0 %1742  ;;  %6650 = vmatprep.subr.mxu0 %v2722_v38 }
 0x395   :  { %16102 = vst [vmem:[#allocation284_spill] sm:$0xff] %v10691_v3  ;;  %16103 = vst [vmem:[#allocation287_spill] sm:$0xff] %v10693_v4  ;;  %6651 = vmatpush3.msra.mxu0 %v2722_v38 }
 0x396   :  { %1928 = vrot.lane.b32.xlu1 %v16104_v22, %s8299_s28  ;;  %1926 = vrot.lane.b32.xlu0 %v16105_v34, %s8299_s28  ;;  %v16106_v22 = vld [vmem:[#allocation311_spill] sm:$0xff]  ;;  %v16107_v34 = vld [vmem:[#allocation312_spill] sm:$0xff] }
 0x397   :  { %6652 = vmatprep.subr.mxu0 %v2721_v58 }
 0x398   :  { %v10705_v3 = vpop.permute.xlu1 %1816  ;;  %v10707_v4 = vpop.permute.xlu0 %1814  ;;  %6653 = vmatpush3.msra.mxu0 %v2721_v58 }
 0x399   :  { %5912 = vmatprep.subr.mxu0 %v16109_v2 }
 0x39a   :  { %1932 = vrot.lane.b32.xlu1 %v16106_v22, %s8299_s28  ;;  %1930 = vrot.lane.b32.xlu0 %v16107_v34, %s8299_s28 }
 0x39c   :  { %v10716_v42 = vpop.permute.xlu1 %1820  ;;  %v10718_v1 = vpop.permute.xlu0 %1818 }
 0x39e   :  { %1936 = vrot.lane.b32.xlu1 %v9912_v35, %s8299_s28  ;;  %1934 = vrot.lane.b32.xlu0 %v16108_v21, %s8299_s28  ;;  %v16110_v35 = vld [vmem:[#allocation320_spill] sm:$0xff]  ;;  %v16111_v21 = vld [vmem:[#allocation321_spill] sm:$0xff] }
 0x3a0   :  { %v10725_v22 = vpop.permute.xlu1 %1824  ;;  %v10727_v34 = vpop.permute.xlu0 %1822 }
 0x3a2   :  { %1940 = vrot.lane.b32.xlu1 %v381_v20, %s8299_s28  ;;  %1938 = vrot.lane.b32.xlu0 %v380_v61, %s8299_s28  ;;  %v16113_v20 = vld [vmem:[#allocation325_spill] sm:$0xff]  ;;  %s8306_s28 = smov 112  }
 0x3a4   :  { %v10731_v38 = vpop.permute.xlu1 %1828  ;;  %v10733_v58 = vpop.permute.xlu0 %1826 }
 0x3a6   :  { %2012 = vrot.lane.b32.xlu1 %v16110_v35, %s8300_s1  ;;  %2010 = vrot.lane.b32.xlu0 %v16111_v21, %s8300_s1 }
 0x3a8   :  { %v10739_v2 = vpop.permute.xlu1 %1832  ;;  %v10741_v13 = vpop.permute.xlu0 %1830 }
 0x3aa   :  { %2016 = vrot.lane.b32.xlu1 %v16112_v8, %s8300_s1  ;;  %2014 = vrot.lane.b32.xlu0 %v16113_v20, %s8300_s1 }
 0x3ac   :  { %v10747_v61 = vpop.permute.xlu1 %1836  ;;  %v10749_v62 = vpop.permute.xlu0 %1834 }
 0x3ae   :  { %2020 = vrot.lane.b32.xlu1 %v16114_v37, %s8300_s1  ;;  %2018 = vrot.lane.b32.xlu0 %v9962_v59, %s8300_s1 }
 0x3b0   :  { %v10755_v35 = vpop.permute.xlu1 %1840  ;;  %v10757_v21 = vpop.permute.xlu0 %1838 }
 0x3b1   :  { %16115 = vst [vmem:[#allocation288_spill] sm:$0xff] %v10755_v35  ;;  %16116 = vst [vmem:[#allocation291_spill] sm:$0xff] %v10757_v21  ;;  %v16180_v21 = vld [vmem:[#allocation182_spill] sm:$0xff] }
 0x3b2   :  { %2024 = vrot.lane.b32.xlu1 %v16117_v46, %s8300_s1  ;;  %2022 = vrot.lane.b32.xlu0 %v9974_v63, %s8300_s1 }
 0x3b4   :  { %v10763_v8 = vpop.permute.xlu1 %1844  ;;  %v10765_v20 = vpop.permute.xlu0 %1842 }
 0x3b5   :  { %16118 = vst [vmem:[#allocation292_spill] sm:$0xff] %v10763_v8  ;;  %16119 = vst [vmem:[#allocation295_spill] sm:$0xff] %v10765_v20  ;;  %v16171_v8 = vld [vmem:[#allocation11_spill] sm:$0xff] }
 0x3b6   :  { %2028 = vrot.lane.b32.xlu1 %v16120_v0, %s8300_s1  ;;  %2026 = vrot.lane.b32.xlu0 %v9986_v23, %s8300_s1  ;;  %v8000_v0 = vld [vmem:[#allocation2 + $0x109] sm:$0xff] }
 0x3b8   :  { %v10771_v59 = vpop.permute.xlu1 %1848  ;;  %v10773_v37 = vpop.permute.xlu0 %1846 }
 0x3b9   :  { %16121 = vst [vmem:[#allocation296_spill] sm:$0xff] %v10771_v59  ;;  %16122 = vst [vmem:[#allocation299_spill] sm:$0xff] %v10773_v37  ;;  %v8001_v37 = vld [vmem:[#allocation2 + $0x131] sm:$0xff] }
 0x3ba   :  { %2032 = vrot.lane.b32.xlu1 %v7998_v7, %s8300_s1  ;;  %2030 = vrot.lane.b32.xlu0 %v9996_v32, %s8300_s1  ;;  %v8002_v7 = vld [vmem:[#allocation2 + $0x129] sm:$0xff] }
 0x3bc   :  { %v10778_v63 = vpop.permute.xlu1 %1852  ;;  %v10780_v46 = vpop.permute.xlu0 %1850 }
 0x3bd   :  { %16123 = vst [vmem:[#allocation300_spill] sm:$0xff] %v10778_v63  ;;  %16124 = vst [vmem:[#allocation303_spill] sm:$0xff] %v10780_v46  ;;  %v8003_v46 = vld [vmem:[#allocation2 + $0x151] sm:$0xff] }
 0x3be   :  { %2036 = vrot.lane.b32.xlu1 %v7999_v10, %s8300_s1  ;;  %2034 = vrot.lane.b32.xlu0 %v8000_v0, %s8300_s1  ;;  %v8004_v10 = vld [vmem:[#allocation2 + $0x149] sm:$0xff] }
 0x3c0   :  { %v10784_v23 = vpop.permute.xlu1 %1856  ;;  %v10786_v59 = vpop.permute.xlu0 %1854 }
 0x3c1   :  { %16125 = vst [vmem:[#allocation304_spill] sm:$0xff] %v10784_v23  ;;  %16126 = vst [vmem:[#allocation307_spill] sm:$0xff] %v10786_v59  ;;  %v8005_v59 = vld [vmem:[#allocation2 + $0x171] sm:$0xff] }
 0x3c2   :  { %2040 = vrot.lane.b32.xlu1 %v8001_v37, %s8300_s1  ;;  %2038 = vrot.lane.b32.xlu0 %v8002_v7, %s8300_s1  ;;  %v8006_v37 = vld [vmem:[#allocation2 + $0x169] sm:$0xff] }
 0x3c4   :  { %v10790_v32 = vpop.permute.xlu1 %1860  ;;  %v10792_v63 = vpop.permute.xlu0 %1858 }
 0x3c5   :  { %16127 = vst [vmem:[#allocation308_spill] sm:$0xff] %v10790_v32  ;;  %16128 = vst [vmem:[#allocation311_spill] sm:$0xff] %v10792_v63  ;;  %v8007_v63 = vld [vmem:[#allocation2 + $0x191] sm:$0xff] }
 0x3c6   :  { %2044 = vrot.lane.b32.xlu1 %v8003_v46, %s8300_s1  ;;  %2042 = vrot.lane.b32.xlu0 %v8004_v10, %s8300_s1  ;;  %v8008_v46 = vld [vmem:[#allocation2 + $0x189] sm:$0xff] }
 0x3c8   :  { %v10796_v0 = vpop.permute.xlu1 %1864  ;;  %v10798_v23 = vpop.permute.xlu0 %1862 }
 0x3c9   :  { %16129 = vst [vmem:[#allocation312_spill] sm:$0xff] %v10796_v0  ;;  %16130 = vst [vmem:[#allocation313_spill] sm:$0xff] %v10798_v23  ;;  %v8009_v23 = vld [vmem:[#allocation2 + $0x1b1] sm:$0xff] }
 0x3ca   :  { %2048 = vrot.lane.b32.xlu1 %v8005_v59, %s8300_s1  ;;  %2046 = vrot.lane.b32.xlu0 %v8006_v37, %s8300_s1  ;;  %v8010_v59 = vld [vmem:[#allocation2 + $0x1a9] sm:$0xff] }
 0x3cc   :  { %v10802_v7 = vpop.permute.xlu1 %1868  ;;  %v10804_v32 = vpop.permute.xlu0 %1866 }
 0x3cd   :  { %16131 = vst [vmem:[#allocation320_spill] sm:$0xff] %v10802_v7  ;;  %16132 = vst [vmem:[#allocation321_spill] sm:$0xff] %v10804_v32  ;;  %v8011_v32 = vld [vmem:[#allocation2 + $0x1d1] sm:$0xff] }
 0x3ce   :  { %2052 = vrot.lane.b32.xlu1 %v8007_v63, %s8300_s1  ;;  %2050 = vrot.lane.b32.xlu0 %v8008_v46, %s8300_s1  ;;  %v8012_v63 = vld [vmem:[#allocation2 + $0x1c9] sm:$0xff] }
 0x3d0   :  { %v10808_v10 = vpop.permute.xlu1 %1872  ;;  %v10810_v0 = vpop.permute.xlu0 %1870 }
 0x3d1   :  { %16133 = vst [vmem:[#allocation324_spill] sm:$0xff] %v10808_v10  ;;  %16134 = vst [vmem:[#allocation325_spill] sm:$0xff] %v10810_v0  ;;  %v8013_v0 = vld [vmem:[#allocation2 + $0x1f1] sm:$0xff] }
 0x3d2   :  { %2056 = vrot.lane.b32.xlu1 %v8009_v23, %s8300_s1  ;;  %2054 = vrot.lane.b32.xlu0 %v8010_v59, %s8300_s1  ;;  %v8014_v23 = vld [vmem:[#allocation2 + $0x1e9] sm:$0xff] }
 0x3d4   :  { %v10814_v37 = vpop.permute.xlu1 %1876  ;;  %v10816_v7 = vpop.permute.xlu0 %1874 }
 0x3d5   :  { %16135 = vst [vmem:[#allocation328_spill] sm:$0xff] %v10814_v37  ;;  %16136 = vst [vmem:[#allocation331_spill] sm:$0xff] %v10816_v7  ;;  %v8037_v7 = vld [vmem:[#allocation2 + $0x27] sm:$0xff] }
 0x3d6   :  { %2060 = vrot.lane.b32.xlu1 %v8011_v32, %s8300_s1  ;;  %2058 = vrot.lane.b32.xlu0 %v8012_v63, %s8300_s1  ;;  %v417_v32 = vld [vmem:[#allocation2 + $0x231] sm:$0xff]  ;;  %v416_v63 = vld [vmem:[#allocation2 + $0x229] sm:$0xff] }
 0x3d8   :  { %v10820_v46 = vpop.permute.xlu1 %1880  ;;  %v10822_v10 = vpop.permute.xlu0 %1878 }
 0x3d9   :  { %16137 = vst [vmem:[#allocation334_spill] sm:$0xff] %v10820_v46  ;;  %16138 = vst [vmem:[#allocation385_spill] sm:$0xff] %v10822_v10 }
 0x3da   :  { %2064 = vrot.lane.b32.xlu1 %v8013_v0, %s8300_s1  ;;  %2062 = vrot.lane.b32.xlu0 %v8014_v23, %s8300_s1 }
 0x3dc   :  { %v10826_v59 = vpop.permute.xlu1 %1884  ;;  %v10828_v37 = vpop.permute.xlu0 %1882 }
 0x3dd   :  { %16139 = vst [vmem:[#allocation386_spill] sm:$0xff] %v10826_v59  ;;  %16140 = vst [vmem:[#allocation387_spill] sm:$0xff] %v10828_v37  ;;  %v8015_v37 = vld [vmem:[#allocation2 + $0x291] sm:$0xff] }
 0x3de   :  { %2068 = vrot.lane.b32.xlu1 %v10064_v57, %s8300_s1  ;;  %2066 = vrot.lane.b32.xlu0 %v10066_v60, %s8300_s1  ;;  %v8016_v57 = vld [vmem:[#allocation2 + $0x289] sm:$0xff] }
 0x3e0   :  { %v10834_v46 = vpop.permute.xlu1 %1888  ;;  %v10836_v10 = vpop.permute.xlu0 %1886 }
 0x3e1   :  { %16141 = vst [vmem:[#allocation388_spill] sm:$0xff] %v10834_v46  ;;  %16142 = vst [vmem:[#allocation389_spill] sm:$0xff] %v10836_v10  ;;  %v8017_v46 = vld [vmem:[#allocation2 + $0x2b1] sm:$0xff] }
 0x3e2   :  { %2072 = vrot.lane.b32.xlu1 %v417_v32, %s8300_s1  ;;  %2070 = vrot.lane.b32.xlu0 %v416_v63, %s8300_s1  ;;  %v8018_v32 = vld [vmem:[#allocation2 + $0x2a9] sm:$0xff] }
 0x3e3   :  { %v239_v10 = vld [vmem:[#allocation2 + $0xf] sm:$0xff] }
 0x3e4   :  { %v10840_v0 = vpop.permute.xlu1 %1892  ;;  %v10842_v23 = vpop.permute.xlu0 %1890 }
 0x3e5   :  { %16143 = vst [vmem:[#allocation390_spill] sm:$0xff] %v10840_v0  ;;  %16144 = vst [vmem:[#allocation391_spill] sm:$0xff] %v10842_v23  ;;  %v8019_v23 = vld [vmem:[#allocation2 + $0x2d1] sm:$0xff] }
 0x3e6   :  { %2076 = vrot.lane.b32.xlu1 %v8015_v37, %s8300_s1  ;;  %2074 = vrot.lane.b32.xlu0 %v8016_v57, %s8300_s1  ;;  %v8020_v37 = vld [vmem:[#allocation2 + $0x2c9] sm:$0xff] }
 0x3e8   :  { %v10846_v60 = vpop.permute.xlu1 %1896  ;;  %v10848_v59 = vpop.permute.xlu0 %1894 }
 0x3e9   :  { %16145 = vst [vmem:[#allocation392_spill] sm:$0xff] %v10846_v60  ;;  %16146 = vst [vmem:[#allocation393_spill] sm:$0xff] %v10848_v59  ;;  %v8021_v59 = vld [vmem:[#allocation2 + $0x2f1] sm:$0xff] }
 0x3ea   :  { %2080 = vrot.lane.b32.xlu1 %v8017_v46, %s8300_s1  ;;  %2078 = vrot.lane.b32.xlu0 %v8018_v32, %s8300_s1  ;;  %v8022_v46 = vld [vmem:[#allocation2 + $0x2e9] sm:$0xff] }
 0x3ec   :  { %v10852_v63 = vpop.permute.xlu1 %1900  ;;  %v10854_v0 = vpop.permute.xlu0 %1898 }
 0x3ed   :  { %16147 = vst [vmem:[#allocation394_spill] sm:$0xff] %v10852_v63  ;;  %16148 = vst [vmem:[#allocation395_spill] sm:$0xff] %v10854_v0  ;;  %v8023_v0 = vld [vmem:[#allocation2 + $0x311] sm:$0xff] }
 0x3ee   :  { %2084 = vrot.lane.b32.xlu1 %v8019_v23, %s8300_s1  ;;  %2082 = vrot.lane.b32.xlu0 %v8020_v37, %s8300_s1  ;;  %v8024_v23 = vld [vmem:[#allocation2 + $0x309] sm:$0xff] }
 0x3f0   :  { %v10858_v57 = vpop.permute.xlu1 %1904  ;;  %v10860_v60 = vpop.permute.xlu0 %1902 }
 0x3f1   :  { %16149 = vst [vmem:[#allocation396_spill] sm:$0xff] %v10858_v57  ;;  %16150 = vst [vmem:[#allocation397_spill] sm:$0xff] %v10860_v60  ;;  %v8025_v60 = vld [vmem:[#allocation2 + $0x331] sm:$0xff] }
 0x3f2   :  { %2088 = vrot.lane.b32.xlu1 %v8021_v59, %s8300_s1  ;;  %2086 = vrot.lane.b32.xlu0 %v8022_v46, %s8300_s1  ;;  %v8026_v59 = vld [vmem:[#allocation2 + $0x329] sm:$0xff] }
 0x3f4   :  { %v10864_v32 = vpop.permute.xlu1 %1908  ;;  %v10866_v63 = vpop.permute.xlu0 %1906 }
 0x3f5   :  { %16151 = vst [vmem:[#allocation398_spill] sm:$0xff] %v10864_v32  ;;  %16152 = vst [vmem:[#allocation399_spill] sm:$0xff] %v10866_v63  ;;  %v8027_v63 = vld [vmem:[#allocation2 + $0x351] sm:$0xff] }
 0x3f6   :  { %2092 = vrot.lane.b32.xlu1 %v8023_v0, %s8300_s1  ;;  %2090 = vrot.lane.b32.xlu0 %v8024_v23, %s8300_s1  ;;  %v8028_v0 = vld [vmem:[#allocation2 + $0x349] sm:$0xff] }
 0x3f8   :  { %v10870_v37 = vpop.permute.xlu1 %1912  ;;  %v10872_v57 = vpop.permute.xlu0 %1910 }
 0x3f9   :  { %16153 = vst [vmem:[#allocation400_spill] sm:$0xff] %v10870_v37  ;;  %16154 = vst [vmem:[#allocation401_spill] sm:$0xff] %v10872_v57  ;;  %v8029_v57 = vld [vmem:[#allocation2 + $0x371] sm:$0xff] }
 0x3fa   :  { %2096 = vrot.lane.b32.xlu1 %v8025_v60, %s8300_s1  ;;  %2094 = vrot.lane.b32.xlu0 %v8026_v59, %s8300_s1  ;;  %v8030_v60 = vld [vmem:[#allocation2 + $0x369] sm:$0xff] }
 0x3fc   :  { %v10876_v46 = vpop.permute.xlu1 %1916  ;;  %v10878_v32 = vpop.permute.xlu0 %1914 }
 0x3fd   :  { %16155 = vst [vmem:[#allocation402_spill] sm:$0xff] %v10876_v46  ;;  %16156 = vst [vmem:[#allocation403_spill] sm:$0xff] %v10878_v32  ;;  %v8031_v32 = vld [vmem:[#allocation2 + $0x391] sm:$0xff] }
 0x3fe   :  { %2100 = vrot.lane.b32.xlu1 %v8027_v63, %s8300_s1  ;;  %2098 = vrot.lane.b32.xlu0 %v8028_v0, %s8300_s1  ;;  %v8032_v63 = vld [vmem:[#allocation2 + $0x389] sm:$0xff] }
 0x400   :  { %v10882_v23 = vpop.permute.xlu1 %1920  ;;  %v10884_v37 = vpop.permute.xlu0 %1918 }
 0x401   :  { %16157 = vst [vmem:[#allocation404_spill] sm:$0xff] %v10882_v23  ;;  %16158 = vst [vmem:[#allocation405_spill] sm:$0xff] %v10884_v37  ;;  %v8033_v37 = vld [vmem:[#allocation2 + $0x3b1] sm:$0xff] }
 0x402   :  { %2104 = vrot.lane.b32.xlu1 %v8029_v57, %s8300_s1  ;;  %2102 = vrot.lane.b32.xlu0 %v8030_v60, %s8300_s1  ;;  %v8034_v57 = vld [vmem:[#allocation2 + $0x3a9] sm:$0xff] }
 0x404   :  { %v10888_v59 = vpop.permute.xlu1 %1924  ;;  %v10890_v46 = vpop.permute.xlu0 %1922 }
 0x405   :  { %16159 = vst [vmem:[#allocation406_spill] sm:$0xff] %v10888_v59  ;;  %16160 = vst [vmem:[#allocation407_spill] sm:$0xff] %v10890_v46  ;;  %v238_v46 = vld [vmem:[#allocation2 + $0x7] sm:$0xff] }
 0x406   :  { %2108 = vrot.lane.b32.xlu1 %v8031_v32, %s8300_s1  ;;  %2106 = vrot.lane.b32.xlu0 %v8032_v63, %s8300_s1  ;;  %v8035_v32 = vld [vmem:[#allocation2 + $0x3d1] sm:$0xff]  ;;  %v8036_v63 = vld [vmem:[#allocation2 + $0x3c9] sm:$0xff] }
 0x408   :  { %v10894_v0 = vpop.permute.xlu1 %1928  ;;  %v10896_v23 = vpop.permute.xlu0 %1926 }
 0x409   :  { %16161 = vst [vmem:[#allocation408_spill] sm:$0xff] %v10894_v0  ;;  %16162 = vst [vmem:[#allocation409_spill] sm:$0xff] %v10896_v23  ;;  %v16165_v0 = vld [vmem:[#allocation7_spill] sm:$0xff] }
 0x40a   :  { %2112 = vrot.lane.b32.xlu1 %v8033_v37, %s8300_s1  ;;  %2110 = vrot.lane.b32.xlu0 %v8034_v57, %s8300_s1  ;;  %v2202_v23 = vsel %vm85_vm0, %v238_v46, %v16165_v0  ;;  %v16166_v37 = vld [vmem:[#allocation8_spill] sm:$0xff] }
 0x40b   :  { %v2204_v6 = vsel %vm85_vm0, %v8037_v7, %v16166_v37  ;;  %v8040_v0 = vld [vmem:[#allocation2 + $0x4f] sm:$0xff]  ;;  %v8041_v37 = vld [vmem:[#allocation2 + $0x67] sm:$0xff] }
 0x40c   :  { %v10900_v60 = vpop.permute.xlu1 %1932  ;;  %v10902_v59 = vpop.permute.xlu0 %1930  ;;  %v2207_v7 = vsel %vm85_vm0, %v8040_v0, %v16172_v41  ;;  %v16176_v0 = vld [vmem:[#allocation71_spill] sm:$0xff] }
 0x40d   :  { %16163 = vst [vmem:[#allocation410_spill] sm:$0xff] %v10900_v60  ;;  %16164 = vst [vmem:[#allocation411_spill] sm:$0xff] %v10902_v59  ;;  %v16169_v59 = vld [vmem:[#allocation9_spill] sm:$0xff] }
 0x40e   :  { %2116 = vrot.lane.b32.xlu1 %v8035_v32, %s8300_s1  ;;  %2114 = vrot.lane.b32.xlu0 %v8036_v63, %s8300_s1  ;;  %v2203_v56 = vsel %vm85_vm0, %v239_v10, %v16169_v59  ;;  %v16170_v32 = vld [vmem:[#allocation10_spill] sm:$0xff]  ;;  %v8039_v63 = vld [vmem:[#allocation2 + $0x47] sm:$0xff] }
 0x40f   :  { %v2205_v20 = vsel %vm85_vm0, %v8038_v11, %v16170_v32  ;;  %v2206_v46 = vsel %vm85_vm0, %v8039_v63, %v16171_v8  ;;  %v16174_v10 = vld [vmem:[#allocation14_spill] sm:$0xff]  ;;  %v8044_v8 = vld [vmem:[#allocation2 + $0x3e9] sm:$0xff]  ;;  %v16175_v63 = vld [vmem:[#allocation15_spill] sm:$0xff] }
 0x410   :  { %v10910_v57 = vpop.permute.xlu1 %1936  ;;  %v10912_v60 = vpop.permute.xlu0 %1934  ;;  %v10928_v59 = vsel %vm85_vm0, %v8042_v53, %v16174_v10  ;;  %v8043_v11 = vld [vmem:[#allocation2 + $0x3f1] sm:$0xff]  ;;  %v8045_v32 = vld [vmem:[#allocation2 + $0x87] sm:$0xff] }
 0x411   :  { %16167 = vst [vmem:[#allocation7_spill] sm:$0xff] %v10910_v57  ;;  %16168 = vst [vmem:[#allocation8_spill] sm:$0xff] %v10912_v60  ;;  %v16173_v57 = vld [vmem:[#allocation13_spill] sm:$0xff]  ;;  %v10934_v41 = vsel %vm85_vm0, %v8045_v32, %v16175_v63  ;;  %v16178_v10 = vld [vmem:[#allocation16_spill] sm:$0xff] }
 0x412   :  { %v10924_v60 = vsel %vm85_vm0, %v8041_v37, %v16173_v57  ;;  %2120 = vrot.lane.b32.xlu1 %v8043_v11, %s8300_s1  ;;  %2118 = vrot.lane.b32.xlu0 %v8044_v8, %s8300_s1  ;;  %v2267_v57 = vsel %vm2266_vm4, %v2202_v23, %v16176_v0  ;;  %v16177_v37 = vld [vmem:[#allocation72_spill] sm:$0xff]  ;;  %v16179_v11 = vld [vmem:[#allocation181_spill] sm:$0xff] }
 0x413   :  { %v2268_v15 = vsel %vm2266_vm4, %v2203_v56, %v16177_v37  ;;  %v8046_v53 = vld [vmem:[#allocation2 + $0x8f] sm:$0xff]  ;;  %v2332_v35 = vsel %vm2331_vm5, %v2267_v57, %v16180_v21  ;;  %v8047_v23 = vld [vmem:[#allocation2 + $0xa7] sm:$0xff] }
 0x414   :  { %v10942_v12 = vsel %vm85_vm0, %v8046_v53, %v16178_v10  ;;  %v2333_v8 = vsel %vm2331_vm5, %v2268_v15, %v16179_v11  ;;  %v10948_v32 = vpop.permute.xlu1 %1940  ;;  %v10950_v63 = vpop.permute.xlu0 %1938  ;;  %v16182_v0 = vld [vmem:[#allocation17_spill] sm:$0xff]  ;;  %v16184_v10 = vld [vmem:[#allocation306_spill] sm:$0xff] }
 0x415   :  { %16181 = vst [vmem:[#allocation9_spill] sm:$0xff] %v10950_v63  ;;  %v10954_v56 = vsel %vm85_vm0, %v8047_v23, %v16182_v0  ;;  %v16183_v37 = vld [vmem:[#allocation305_spill] sm:$0xff]  ;;  %v2397_v18 = vsel %vm2396_vm6, %v2332_v35, %v16184_v10  ;;  %v16185_v15 = vld [vmem:[#allocation74_spill] sm:$0xff] }
 0x416   :  { %v2398_v53 = vsel %vm2396_vm6, %v2333_v8, %v16183_v37  ;;  %v2270_v21 = vsel %vm2266_vm4, %v2205_v20, %v16185_v15  ;;  %v2462_v11 = vsel %vm2461_vm7, %v2397_v18, %v10182_v47  ;;  %v8048_v63 = vld [vmem:[#allocation2 + $0x411] sm:$0xff]  ;;  %v8049_v23 = vld [vmem:[#allocation2 + $0x409] sm:$0xff] }
 0x417   :  { %v2463_v57 = vsel %vm2461_vm7, %v2398_v53, %v10180_v44  ;;  %2124 = vrot.lane.b32.xlu1 %v8048_v63, %s8300_s1  ;;  %2122 = vrot.lane.b32.xlu0 %v8049_v23, %s8300_s1  ;;  %v16186_v8 = vld [vmem:[#allocation73_spill] sm:$0xff]  ;;  %v2527_v44 = vsel %vm2526_vm8, %v2462_v11, %v10440_v54  ;;  %v16188_v47 = vld [vmem:[#allocation186_spill] sm:$0xff] }
 0x418   :  { %v2269_v35 = vsel %vm2266_vm4, %v2204_v6, %v16186_v8  ;;  %v16187_v0 = vld [vmem:[#allocation185_spill] sm:$0xff]  ;;  %v2528_v20 = vsel %vm2526_vm8, %v2463_v57, %v10438_v29  ;;  %v2592_v53 = vsel %vm2591_vm9, %v2527_v44, %v10707_v4  ;;  %v2013_v10 = vpop.permute.xlu1 %2012  ;;  %v2011_v6 = vpop.permute.xlu0 %2010  ;;  %v16190_v23 = vld [vmem:[#allocation310_spill] sm:$0xff] }
 0x419   :  { %v2335_v37 = vsel %vm2331_vm5, %v2270_v21, %v16187_v0  ;;  %v2334_v18 = vsel %vm2331_vm5, %v2269_v35, %v16188_v47  ;;  %v2593_v63 = vsel %vm2591_vm9, %v2528_v20, %v10705_v3  ;;  %v16189_v15 = vld [vmem:[#allocation309_spill] sm:$0xff]  ;;  %v2657_v57 = vsel %vm2656_vm10, %v2592_v53, %v2011_v6  ;;  %v16191_v8 = vld [vmem:[#allocation18_spill] sm:$0xff]  ;;  %v16192_v20 = vld [vmem:[#allocation75_spill] sm:$0xff] }
 0x41a   :  { %v2400_v21 = vsel %vm2396_vm6, %v2335_v37, %v16189_v15  ;;  %v2399_v29 = vsel %vm2396_vm6, %v2334_v18, %v16190_v23  ;;  %v2658_v54 = vsel %vm2656_vm10, %v2593_v63, %v2013_v10  ;;  %v8050_v11 = vld [vmem:[#allocation2 + $0xaf] sm:$0xff]  ;;  %v2271_v44 = vsel %vm2266_vm4, %v2206_v46, %v16192_v20  ;;  %6654 = vmatprep.mubr.msk.f32.mxu0 %vm2734_vm11, %v2657_v57  ;;  %v16197_v23 = vld [vmem:[#allocation315_spill] sm:$0xff] }
 0x41b   :  { %v10990_v3 = vsel %vm85_vm0, %v8050_v11, %v16191_v8  ;;  %v2465_v4 = vsel %vm2461_vm7, %v2400_v21, %v10188_v40  ;;  %v2464_v35 = vsel %vm2461_vm7, %v2399_v29, %v10190_v43  ;;  %v8051_v0 = vld [vmem:[#allocation2 + $0x431] sm:$0xff]  ;;  %v8052_v37 = vld [vmem:[#allocation2 + $0x429] sm:$0xff]  ;;  %v16194_v43 = vld [vmem:[#allocation191_spill] sm:$0xff]  ;;  %6655 = vmatmul.mubr.msk.f32.vlgmr.msra.gmra.mxu0 %vm2734_vm11, %v2658_v54 }
 0x41c   :  { %2128 = vrot.lane.b32.xlu1 %v8051_v0, %s8300_s1  ;;  %2126 = vrot.lane.b32.xlu0 %v8052_v37, %s8300_s1  ;;  %v16193_v47 = vld [vmem:[#allocation76_spill] sm:$0xff]  ;;  %v2530_v63 = vsel %vm2526_vm8, %v2465_v4, %v10446_v14  ;;  %v2529_v40 = vsel %vm2526_vm8, %v2464_v35, %v10448_v17  ;;  %v2017_v14 = vpop.permute.xlu1 %2016  ;;  %v2015_v15 = vpop.permute.xlu0 %2014  ;;  %v16196_v21 = vld [vmem:[#allocation314_spill] sm:$0xff]  ;;  %v16198_v4 = vld [vmem:[#allocation19_spill] sm:$0xff] }
 0x41d   :  { %v2272_v18 = vsel %vm2266_vm4, %v2207_v7, %v16193_v47  ;;  %v16195_v10 = vld [vmem:[#allocation192_spill] sm:$0xff]  ;;  %v2595_v46 = vsel %vm2591_vm9, %v2530_v63, %v10716_v42  ;;  %v2594_v7 = vsel %vm2591_vm9, %v2529_v40, %v10718_v1  ;;  %v16199_v35 = vld [vmem:[#allocation77_spill] sm:$0xff]  ;;  %v16200_v37 = vld [vmem:[#allocation78_spill] sm:$0xff] }
 0x41e   :  { %v2337_v53 = vsel %vm2331_vm5, %v2272_v18, %v16194_v43  ;;  %v2336_v6 = vsel %vm2331_vm5, %v2271_v44, %v16195_v10  ;;  %v2660_v57 = vsel %vm2656_vm10, %v2595_v46, %v2017_v14  ;;  %v2659_v11 = vsel %vm2656_vm10, %v2594_v7, %v2015_v15  ;;  %v8053_v8 = vld [vmem:[#allocation2 + $0xc7] sm:$0xff]  ;;  %v16201_v47 = vld [vmem:[#allocation193_spill] sm:$0xff]  ;;  %v16202_v18 = vld [vmem:[#allocation194_spill] sm:$0xff] }
 0x41f   :  { %v2402_v17 = vsel %vm2396_vm6, %v2337_v53, %v16196_v21  ;;  %v2401_v29 = vsel %vm2396_vm6, %v2336_v6, %v16197_v23  ;;  %v11024_v42 = vsel %vm85_vm0, %v8053_v8, %v16198_v4  ;;  %v2273_v0 = vsel %vm2266_vm4, %v10924_v60, %v16199_v35  ;;  %6657 = vmatprep.mubr.msk.f32.mxu0 %vm2734_vm11, %v2659_v11  ;;  %v452_v44 = vld [vmem:[#allocation2 + $0x469] sm:$0xff]  ;;  %v16206_v21 = vld [vmem:[#allocation79_spill] sm:$0xff] }
 0x420   :  { %v2467_v1 = vsel %vm2461_vm7, %v2402_v17, %v10200_v51  ;;  %v2466_v54 = vsel %vm2461_vm7, %v2401_v29, %v10202_v24  ;;  %2132 = vrot.lane.b32.xlu1 %v10196_v36, %s8300_s1  ;;  %2130 = vrot.lane.b32.xlu0 %v10198_v39, %s8300_s1  ;;  %v2274_v20 = vsel %vm2266_vm4, %v10928_v59, %v16200_v37  ;;  %v453_v36 = vld [vmem:[#allocation2 + $0x471] sm:$0xff]  ;;  %v16203_v40 = vld [vmem:[#allocation316_spill] sm:$0xff]  ;;  %v16211_v35 = vld [vmem:[#allocation319_spill] sm:$0xff] }
 0x421   :  { %v2532_v51 = vsel %vm2526_vm8, %v2467_v1, %v10454_v25  ;;  %v2531_v24 = vsel %vm2526_vm8, %v2466_v54, %v10456_v49  ;;  %v2339_v39 = vsel %vm2331_vm5, %v2274_v20, %v16201_v47  ;;  %v2338_v60 = vsel %vm2331_vm5, %v2273_v0, %v16202_v18  ;;  %6658 = vmatmul.mubr.msk.f32.gmra.mxu0 %vm2734_vm11, %v2660_v57  ;;  %v2021_v25 = vpop.permute.xlu1 %2020  ;;  %v2019_v49 = vpop.permute.xlu0 %2018  ;;  %v16204_v53 = vld [vmem:[#allocation317_spill] sm:$0xff]  ;;  %v16205_v14 = vld [vmem:[#allocation20_spill] sm:$0xff]  ;;  %v16210_v54 = vld [vmem:[#allocation318_spill] sm:$0xff] }
 0x422   :  { %v2597_v63 = vsel %vm2591_vm9, %v2532_v51, %v10725_v22  ;;  %v2596_v59 = vsel %vm2591_vm9, %v2531_v24, %v10727_v34  ;;  %v2404_v43 = vsel %vm2396_vm6, %v2339_v39, %v16203_v40  ;;  %v2403_v10 = vsel %vm2396_vm6, %v2338_v60, %v16204_v53  ;;  %v8054_v7 = vld [vmem:[#allocation2 + $0xcf] sm:$0xff]  ;;  %v8055_v51 = vld [vmem:[#allocation2 + $0xe7] sm:$0xff] }
 0x423   :  { %v2662_v6 = vsel %vm2656_vm10, %v2597_v63, %v2021_v25  ;;  %v2661_v46 = vsel %vm2656_vm10, %v2596_v59, %v2019_v49  ;;  %v2215_v22 = vsel %vm85_vm0, %v8054_v7, %v16205_v14  ;;  %v2469_v34 = vsel %vm2461_vm7, %v2404_v43, %v10208_v27  ;;  %v16207_v23 = vld [vmem:[#allocation80_spill] sm:$0xff]  ;;  %v16212_v24 = vld [vmem:[#allocation21_spill] sm:$0xff]  ;;  %v16215_v63 = vld [vmem:[#allocation82_spill] sm:$0xff] }
 0x424   :  { %v2468_v15 = vsel %vm2461_vm7, %v2403_v10, %v10210_v16  ;;  %2136 = vrot.lane.b32.xlu1 %v453_v36, %s8300_s1  ;;  %2134 = vrot.lane.b32.xlu0 %v452_v44, %s8300_s1  ;;  %v2275_v17 = vsel %vm2266_vm4, %v10934_v41, %v16206_v21  ;;  %v2276_v29 = vsel %vm2266_vm4, %v10942_v12, %v16207_v23  ;;  %v16208_v16 = vld [vmem:[#allocation195_spill] sm:$0xff]  ;;  %v16209_v8 = vld [vmem:[#allocation196_spill] sm:$0xff]  ;;  %v16214_v18 = vld [vmem:[#allocation81_spill] sm:$0xff] }
 0x425   :  { %v2534_v57 = vsel %vm2526_vm8, %v2469_v34, %v10460_v50  ;;  %v2533_v27 = vsel %vm2526_vm8, %v2468_v15, %v10462_v33  ;;  %6660 = vmatprep.mubr.msk.f32.mxu0 %vm2734_vm11, %v2661_v46  ;;  %v2341_v11 = vsel %vm2331_vm5, %v2276_v29, %v16208_v16  ;;  %v2340_v4 = vsel %vm2331_vm5, %v2275_v17, %v16209_v8  ;;  %v2025_v50 = vpop.permute.xlu1 %2024  ;;  %v2023_v1 = vpop.permute.xlu0 %2022  ;;  %v8056_v36 = vld [vmem:[#allocation2 + $0xef] sm:$0xff]  ;;  %v8057_v34 = vld [vmem:[#allocation2 + $0x107] sm:$0xff] }
 0x426   :  { %v2599_v41 = vsel %vm2591_vm9, %v2534_v57, %v10731_v38  ;;  %v2598_v12 = vsel %vm2591_vm9, %v2533_v27, %v10733_v58  ;;  %6661 = vmatmul.mubr.msk.f32.gmra.mxu0 %vm2734_vm11, %v2662_v6  ;;  %v2406_v33 = vsel %vm2396_vm6, %v2341_v11, %v16210_v54  ;;  %v2405_v0 = vsel %vm2396_vm6, %v2340_v4, %v16211_v35  ;;  %v16213_v58 = vld [vmem:[#allocation22_spill] sm:$0xff]  ;;  %v16220_v15 = vld [vmem:[#allocation23_spill] sm:$0xff]  ;;  %v8058_v21 = vld [vmem:[#allocation2 + $0x10f] sm:$0xff] }
 0x427   :  { %v2664_v37 = vsel %vm2656_vm10, %v2599_v41, %v2025_v50  ;;  %v2663_v20 = vsel %vm2656_vm10, %v2598_v12, %v2023_v1  ;;  %v2216_v38 = vsel %vm85_vm0, %v8055_v51, %v16212_v24  ;;  %v2217_v44 = vsel %vm85_vm0, %v8056_v36, %v16213_v58  ;;  %v16222_v57 = vld [vmem:[#allocation83_spill] sm:$0xff]  ;;  %v16223_v16 = vld [vmem:[#allocation84_spill] sm:$0xff] }
 0x428   :  { %v2471_v47 = vsel %vm2461_vm7, %v2406_v33, %v10216_v19  ;;  %v2470_v39 = vsel %vm2461_vm7, %v2405_v0, %v10218_v48  ;;  %6663 = vmatprep.mubr.msk.f32.mxu0 %vm2734_vm11, %v2663_v20  ;;  %v2277_v60 = vsel %vm2266_vm4, %v10954_v56, %v16214_v18  ;;  %v2278_v59 = vsel %vm2266_vm4, %v10990_v3, %v16215_v63  ;;  %v16216_v19 = vld [vmem:[#allocation199_spill] sm:$0xff]  ;;  %v16217_v48 = vld [vmem:[#allocation200_spill] sm:$0xff]  ;;  %v16228_v20 = vld [vmem:[#allocation25_spill] sm:$0xff] }
 0x429   :  { %v2536_v25 = vsel %vm2526_vm8, %v2471_v47, %v10468_v30  ;;  %v2535_v49 = vsel %vm2526_vm8, %v2470_v39, %v10470_v26  ;;  %v2343_v40 = vsel %vm2331_vm5, %v2278_v59, %v16216_v19  ;;  %v2342_v43 = vsel %vm2331_vm5, %v2277_v60, %v16217_v48  ;;  %v2029_v3 = vpop.permute.xlu1 %2028  ;;  %v2027_v10 = vpop.permute.xlu0 %2026  ;;  %v16218_v30 = vld [vmem:[#allocation322_spill] sm:$0xff]  ;;  %v16219_v26 = vld [vmem:[#allocation323_spill] sm:$0xff]  ;;  %v16225_v12 = vld [vmem:[#allocation204_spill] sm:$0xff] }
 0x42a   :  { %v2601_v53 = vsel %vm2591_vm9, %v2536_v25, %v10739_v2  ;;  %v2600_v56 = vsel %vm2591_vm9, %v2535_v49, %v10741_v13  ;;  %6664 = vmatmul.mubr.msk.f32.gmra.mxu0 %vm2734_vm11, %v2664_v37  ;;  %v2408_v6 = vsel %vm2396_vm6, %v2343_v40, %v16218_v30  ;;  %v2407_v46 = vsel %vm2396_vm6, %v2342_v43, %v16219_v26  ;;  %v16221_v13 = vld [vmem:[#allocation24_spill] sm:$0xff]  ;;  %v16224_v41 = vld [vmem:[#allocation203_spill] sm:$0xff]  ;;  %v16230_v47 = vld [vmem:[#allocation85_spill] sm:$0xff] }
 0x42b   :  { %v2666_v7 = vsel %vm2656_vm10, %v2601_v53, %v2029_v3  ;;  %v2665_v14 = vsel %vm2656_vm10, %v2600_v56, %v2027_v10  ;;  %v2218_v2 = vsel %vm85_vm0, %v8057_v34, %v16220_v15  ;;  %v2219_v17 = vsel %vm85_vm0, %v8058_v21, %v16221_v13  ;;  %v8059_v37 = vld [vmem:[#allocation2 + $0x127] sm:$0xff]  ;;  %v8060_v51 = vld [vmem:[#allocation2 + $0x12f] sm:$0xff]  ;;  %v16231_v18 = vld [vmem:[#allocation86_spill] sm:$0xff] }
 0x42c   :  { %v2473_v23 = vsel %vm2461_vm7, %v2408_v6, %v10224_v55  ;;  %v2472_v29 = vsel %vm2461_vm7, %v2407_v46, %v10226_v52  ;;  %6666 = vmatprep.mubr.msk.f32.mxu0 %vm2734_vm11, %v2665_v14  ;;  %v2279_v27 = vsel %vm2266_vm4, %v11024_v42, %v16222_v57  ;;  %v2280_v11 = vsel %vm2266_vm4, %v2215_v22, %v16223_v16  ;;  %v16232_v59 = vld [vmem:[#allocation184_spill] sm:$0xff]  ;;  %v16233_v49 = vld [vmem:[#allocation207_spill] sm:$0xff]  ;;  %v16238_v3 = vld [vmem:[#allocation330_spill] sm:$0xff] }
 0x42d   :  { %v2538_v8 = vsel %vm2526_vm8, %v2473_v23, %v10476_v9  ;;  %v2537_v4 = vsel %vm2526_vm8, %v2472_v29, %v10478_v45  ;;  %v2345_v55 = vsel %vm2331_vm5, %v2280_v11, %v16224_v41  ;;  %v2344_v52 = vsel %vm2331_vm5, %v2279_v27, %v16225_v12  ;;  %v2033_v22 = vpop.permute.xlu1 %2032  ;;  %v2031_v1 = vpop.permute.xlu0 %2030  ;;  %v16226_v9 = vld [vmem:[#allocation326_spill] sm:$0xff]  ;;  %v16227_v45 = vld [vmem:[#allocation327_spill] sm:$0xff]  ;;  %v16234_v19 = vld [vmem:[#allocation208_spill] sm:$0xff] }
 0x42e   :  { %v2603_v50 = vsel %vm2591_vm9, %v2538_v8, %v10747_v61  ;;  %v2602_v42 = vsel %vm2591_vm9, %v2537_v4, %v10749_v62  ;;  %6667 = vmatmul.mubr.msk.f32.gmra.mxu0 %vm2734_vm11, %v2666_v7  ;;  %v2410_v54 = vsel %vm2396_vm6, %v2345_v55, %v16226_v9  ;;  %v2409_v33 = vsel %vm2396_vm6, %v2344_v52, %v16227_v45  ;;  %v16229_v62 = vld [vmem:[#allocation26_spill] sm:$0xff]  ;;  %v16235_v40 = vld [vmem:[#allocation288_spill] sm:$0xff]  ;;  %v16236_v43 = vld [vmem:[#allocation291_spill] sm:$0xff] }
 0x42f   :  { %v2668_v35 = vsel %vm2656_vm10, %v2603_v50, %v2033_v22  ;;  %v2667_v0 = vsel %vm2656_vm10, %v2602_v42, %v2031_v1  ;;  %v2220_v61 = vsel %vm85_vm0, %v8059_v37, %v16228_v20  ;;  %v2221_v24 = vsel %vm85_vm0, %v8060_v51, %v16229_v62  ;;  %v8061_v26 = vld [vmem:[#allocation2 + $0x147] sm:$0xff]  ;;  %v8062_v14 = vld [vmem:[#allocation2 + $0x14f] sm:$0xff]  ;;  %v16242_v23 = vld [vmem:[#allocation382_spill] sm:$0xff] }
 0x430   :  { %v2475_v36 = vsel %vm2461_vm7, %v2410_v54, %v10232_v28  ;;  %v2474_v58 = vsel %vm2461_vm7, %v2409_v33, %v10234_v31  ;;  %6669 = vmatprep.mubr.msk.f32.mxu0 %vm2734_vm11, %v2667_v0  ;;  %v2281_v39 = vsel %vm2266_vm4, %v2216_v38, %v16230_v47  ;;  %v2282_v60 = vsel %vm2266_vm4, %v2217_v44, %v16231_v18  ;;  %v16239_v46 = vld [vmem:[#allocation27_spill] sm:$0xff]  ;;  %v16240_v34 = vld [vmem:[#allocation28_spill] sm:$0xff]  ;;  %v16241_v21 = vld [vmem:[#allocation381_spill] sm:$0xff] }
 0x431   :  { %v2540_v63 = vsel %vm2526_vm8, %v2475_v36, %v10484_v5  ;;  %v2539_v25 = vsel %vm2526_vm8, %v2474_v58, %v16232_v59  ;;  %v2347_v28 = vsel %vm2331_vm5, %v2282_v60, %v16233_v49  ;;  %v2346_v31 = vsel %vm2331_vm5, %v2281_v39, %v16234_v19  ;;  %v2037_v44 = vpop.permute.xlu1 %2036  ;;  %v2035_v53 = vpop.permute.xlu0 %2034  ;;  %v16237_v5 = vld [vmem:[#allocation329_spill] sm:$0xff]  ;;  %v16243_v57 = vld [vmem:[#allocation87_spill] sm:$0xff]  ;;  %v16244_v16 = vld [vmem:[#allocation88_spill] sm:$0xff] }
 0x432   :  { %v2605_v48 = vsel %vm2591_vm9, %v2540_v63, %v16235_v40  ;;  %v2604_v38 = vsel %vm2591_vm9, %v2539_v25, %v16236_v43  ;;  %6670 = vmatmul.mubr.msk.f32.gmra.mxu0 %vm2734_vm11, %v2668_v35  ;;  %v2412_v56 = vsel %vm2396_vm6, %v2347_v28, %v16237_v5  ;;  %v2411_v10 = vsel %vm2396_vm6, %v2346_v31, %v16238_v3  ;;  %v16245_v8 = vld [vmem:[#allocation183_spill] sm:$0xff]  ;;  %v16246_v41 = vld [vmem:[#allocation188_spill] sm:$0xff]  ;;  %v16252_v35 = vld [vmem:[#allocation333_spill] sm:$0xff] }
 0x433   :  { %v2670_v30 = vsel %vm2656_vm10, %v2605_v48, %v2037_v44  ;;  %v2669_v6 = vsel %vm2656_vm10, %v2604_v38, %v2035_v53  ;;  %v2222_v7 = vsel %vm85_vm0, %v8061_v26, %v16239_v46  ;;  %v2223_v15 = vsel %vm85_vm0, %v8062_v14, %v16240_v34  ;;  %v16247_v12 = vld [vmem:[#allocation211_spill] sm:$0xff]  ;;  %v16248_v50 = vld [vmem:[#allocation212_spill] sm:$0xff]  ;;  %v16253_v62 = vld [vmem:[#allocation29_spill] sm:$0xff] }
 0x434   :  { %v2477_v13 = vsel %vm2461_vm7, %v2412_v56, %v16241_v21  ;;  %v2476_v29 = vsel %vm2461_vm7, %v2411_v10, %v16242_v23  ;;  %6672 = vmatprep.mubr.msk.f32.mxu0 %vm2734_vm11, %v2669_v6  ;;  %v2283_v27 = vsel %vm2266_vm4, %v2218_v2, %v16243_v57  ;;  %v2284_v11 = vsel %vm2266_vm4, %v2219_v17, %v16244_v16  ;;  %v16249_v22 = vld [vmem:[#allocation292_spill] sm:$0xff]  ;;  %v16250_v9 = vld [vmem:[#allocation295_spill] sm:$0xff]  ;;  %v16254_v47 = vld [vmem:[#allocation30_spill] sm:$0xff] }
 0x435   :  { %v2542_v4 = vsel %vm2526_vm8, %v2477_v13, %v16245_v8  ;;  %v2541_v55 = vsel %vm2526_vm8, %v2476_v29, %v16246_v41  ;;  %v2349_v52 = vsel %vm2331_vm5, %v2284_v11, %v16247_v12  ;;  %v2348_v42 = vsel %vm2331_vm5, %v2283_v27, %v16248_v50  ;;  %v2041_v17 = vpop.permute.xlu1 %2040  ;;  %v2039_v54 = vpop.permute.xlu0 %2038  ;;  %v16251_v45 = vld [vmem:[#allocation332_spill] sm:$0xff]  ;;  %v16255_v18 = vld [vmem:[#allocation90_spill] sm:$0xff]  ;;  %v16256_v63 = vld [vmem:[#allocation89_spill] sm:$0xff] }
 0x436   :  { %v2607_v1 = vsel %vm2591_vm9, %v2542_v4, %v16249_v22  ;;  %v2606_v2 = vsel %vm2591_vm9, %v2541_v55, %v16250_v9  ;;  %6673 = vmatmul.mubr.msk.f32.gmra.mxu0 %vm2734_vm11, %v2670_v30  ;;  %v2414_v33 = vsel %vm2396_vm6, %v2349_v52, %v16251_v45  ;;  %v2413_v0 = vsel %vm2396_vm6, %v2348_v42, %v16252_v35  ;;  %v8063_v51 = vld [vmem:[#allocation2 + $0x167] sm:$0xff]  ;;  %v8064_v58 = vld [vmem:[#allocation2 + $0x16f] sm:$0xff]  ;;  %v16269_v11 = vld [vmem:[#allocation94_spill] sm:$0xff] }
 0x437   :  { %v2672_v37 = vsel %vm2656_vm10, %v2607_v1, %v2041_v17  ;;  %v2671_v20 = vsel %vm2656_vm10, %v2606_v2, %v2039_v54  ;;  %v2224_v36 = vsel %vm85_vm0, %v8063_v51, %v16253_v62  ;;  %v2225_v39 = vsel %vm85_vm0, %v8064_v58, %v16254_v47  ;;  %v16257_v25 = vld [vmem:[#allocation91_spill] sm:$0xff]  ;;  %v16258_v28 = vld [vmem:[#allocation92_spill] sm:$0xff]  ;;  %v16260_v48 = vld [vmem:[#allocation189_spill] sm:$0xff] }
 0x438   :  { %v2479_v60 = vsel %vm2461_vm7, %v2414_v33, %v16255_v18  ;;  %v2478_v59 = vsel %vm2461_vm7, %v2413_v0, %v16256_v63  ;;  %6675 = vmatprep.mubr.msk.f32.mxu0 %vm2734_vm11, %v2671_v20  ;;  %v2285_v49 = vsel %vm2266_vm4, %v2220_v61, %v16257_v25  ;;  %v2286_v19 = vsel %vm2266_vm4, %v2221_v24, %v16258_v28  ;;  %v16259_v31 = vld [vmem:[#allocation187_spill] sm:$0xff]  ;;  %v16262_v53 = vld [vmem:[#allocation216_spill] sm:$0xff]  ;;  %v16270_v4 = vld [vmem:[#allocation93_spill] sm:$0xff] }
 0x439   :  { %v2544_v40 = vsel %vm2526_vm8, %v2479_v60, %v16259_v31  ;;  %v2543_v43 = vsel %vm2526_vm8, %v2478_v59, %v16260_v48  ;;  %v16261_v38 = vld [vmem:[#allocation215_spill] sm:$0xff]  ;;  %v2350_v5 = vsel %vm2331_vm5, %v2285_v49, %v16262_v53  ;;  %v16263_v56 = vld [vmem:[#allocation296_spill] sm:$0xff]  ;;  %v2045_v24 = vpop.permute.xlu1 %2044  ;;  %v2043_v30 = vpop.permute.xlu0 %2042  ;;  %v16273_v42 = vld [vmem:[#allocation190_spill] sm:$0xff] }
 0x43a   :  { %v2351_v44 = vsel %vm2331_vm5, %v2286_v19, %v16261_v38  ;;  %v2609_v3 = vsel %vm2591_vm9, %v2544_v40, %v16263_v56  ;;  %v16264_v10 = vld [vmem:[#allocation299_spill] sm:$0xff]  ;;  %6676 = vmatmul.mubr.msk.f32.gmra.mxu0 %vm2734_vm11, %v2672_v37  ;;  %v16266_v46 = vld [vmem:[#allocation336_spill] sm:$0xff]  ;;  %v16274_v1 = vld [vmem:[#allocation197_spill] sm:$0xff] }
 0x43b   :  { %v2608_v61 = vsel %vm2591_vm9, %v2543_v43, %v16264_v10  ;;  %v16265_v6 = vld [vmem:[#allocation335_spill] sm:$0xff]  ;;  %v2415_v14 = vsel %vm2396_vm6, %v2350_v5, %v16266_v46  ;;  %v2674_v34 = vsel %vm2656_vm10, %v2609_v3, %v2045_v24  ;;  %v8066_v57 = vld [vmem:[#allocation2 + $0x18f] sm:$0xff]  ;;  %v16280_v62 = vld [vmem:[#allocation338_spill] sm:$0xff] }
 0x43c   :  { %v2416_v26 = vsel %vm2396_vm6, %v2351_v44, %v16265_v6  ;;  %v2673_v21 = vsel %vm2656_vm10, %v2608_v61, %v2043_v30  ;;  %v8065_v13 = vld [vmem:[#allocation2 + $0x187] sm:$0xff]  ;;  %v2480_v41 = vsel %vm2461_vm7, %v2415_v14, %v16270_v4  ;;  %v16279_v20 = vld [vmem:[#allocation337_spill] sm:$0xff]  ;;  %v16282_v49 = vld [vmem:[#allocation34_spill] sm:$0xff] }
 0x43d   :  { %v16267_v23 = vld [vmem:[#allocation31_spill] sm:$0xff]  ;;  %v16268_v27 = vld [vmem:[#allocation32_spill] sm:$0xff]  ;;  %v2481_v8 = vsel %vm2461_vm7, %v2416_v26, %v16269_v11  ;;  %6678 = vmatprep.mubr.msk.f32.mxu0 %vm2734_vm11, %v2673_v21  ;;  %v2545_v9 = vsel %vm2526_vm8, %v2480_v41, %v16274_v1  ;;  %v2047_v37 = vpop.permute.xlu0 %2046  ;;  %v16281_v63 = vld [vmem:[#allocation33_spill] sm:$0xff] }
 0x43e   :  { %v2226_v29 = vsel %vm85_vm0, %v8065_v13, %v16267_v23  ;;  %v2227_v16 = vsel %vm85_vm0, %v8066_v57, %v16268_v27  ;;  %v16271_v55 = vld [vmem:[#allocation95_spill] sm:$0xff]  ;;  %v16272_v52 = vld [vmem:[#allocation96_spill] sm:$0xff]  ;;  %v2546_v22 = vsel %vm2526_vm8, %v2481_v8, %v16273_v42  ;;  %6679 = vmatmul.mubr.msk.f32.gmra.mxu0 %vm2734_vm11, %v2674_v34  ;;  %v16283_v19 = vld [vmem:[#allocation98_spill] sm:$0xff] }
 0x43f   :  { %v2287_v12 = vsel %vm2266_vm4, %v2222_v7, %v16271_v55  ;;  %v2288_v50 = vsel %vm2266_vm4, %v2223_v15, %v16272_v52  ;;  %v16275_v2 = vld [vmem:[#allocation219_spill] sm:$0xff]  ;;  %v16276_v54 = vld [vmem:[#allocation220_spill] sm:$0xff]  ;;  %v2049_v15 = vpop.permute.xlu1 %2048  ;;  %v16284_v40 = vld [vmem:[#allocation97_spill] sm:$0xff] }
 0x440   :  { %v2353_v17 = vsel %vm2331_vm5, %v2288_v50, %v16275_v2  ;;  %v2352_v45 = vsel %vm2331_vm5, %v2287_v12, %v16276_v54  ;;  %v16277_v33 = vld [vmem:[#allocation300_spill] sm:$0xff]  ;;  %v16278_v0 = vld [vmem:[#allocation303_spill] sm:$0xff]  ;;  %v16287_v5 = vld [vmem:[#allocation198_spill] sm:$0xff] }
 0x441   :  { %v2611_v35 = vsel %vm2591_vm9, %v2546_v22, %v16277_v33  ;;  %v2610_v7 = vsel %vm2591_vm9, %v2545_v9, %v16278_v0  ;;  %v2418_v51 = vsel %vm2396_vm6, %v2353_v17, %v16279_v20  ;;  %v2417_v58 = vsel %vm2396_vm6, %v2352_v45, %v16280_v62  ;;  %v8067_v60 = vld [vmem:[#allocation2 + $0x1a7] sm:$0xff]  ;;  %v8068_v25 = vld [vmem:[#allocation2 + $0x1af] sm:$0xff]  ;;  %v2051_v34 = vpop.permute.xlu0 %2050  ;;  %v16297_v50 = vld [vmem:[#allocation102_spill] sm:$0xff] }
 0x442   :  { %v2676_v47 = vsel %vm2656_vm10, %v2611_v35, %v2049_v15  ;;  %v2675_v18 = vsel %vm2656_vm10, %v2610_v7, %v2047_v37  ;;  %v2228_v59 = vsel %vm85_vm0, %v8067_v60, %v16281_v63  ;;  %v2229_v28 = vsel %vm85_vm0, %v8068_v25, %v16282_v49  ;;  %v16285_v43 = vld [vmem:[#allocation99_spill] sm:$0xff]  ;;  %v16286_v44 = vld [vmem:[#allocation100_spill] sm:$0xff]  ;;  %v16288_v3 = vld [vmem:[#allocation201_spill] sm:$0xff] }
 0x443   :  { %v2483_v31 = vsel %vm2461_vm7, %v2418_v51, %v16283_v19  ;;  %v2482_v48 = vsel %vm2461_vm7, %v2417_v58, %v16284_v40  ;;  %6681 = vmatprep.mubr.msk.f32.mxu0 %vm2734_vm11, %v2675_v18  ;;  %v2289_v38 = vsel %vm2266_vm4, %v2224_v36, %v16285_v43  ;;  %v2290_v53 = vsel %vm2266_vm4, %v2225_v39, %v16286_v44  ;;  %v16289_v61 = vld [vmem:[#allocation223_spill] sm:$0xff]  ;;  %v16290_v30 = vld [vmem:[#allocation224_spill] sm:$0xff]  ;;  %v2053_v39 = vpop.permute.xlu1 %2052  ;;  %v16298_v22 = vld [vmem:[#allocation101_spill] sm:$0xff] }
 0x444   :  { %v2548_v56 = vsel %vm2526_vm8, %v2483_v31, %v16287_v5  ;;  %v2547_v10 = vsel %vm2526_vm8, %v2482_v48, %v16288_v3  ;;  %v2355_v24 = vsel %vm2331_vm5, %v2290_v53, %v16289_v61  ;;  %v2354_v6 = vsel %vm2331_vm5, %v2289_v38, %v16290_v30  ;;  %v16291_v26 = vld [vmem:[#allocation304_spill] sm:$0xff]  ;;  %v16292_v14 = vld [vmem:[#allocation307_spill] sm:$0xff]  ;;  %6682 = vmatmul.mubr.msk.f32.gmra.mxu0 %vm2734_vm11, %v2676_v47  ;;  %v16301_v45 = vld [vmem:[#allocation202_spill] sm:$0xff] }
 0x445   :  { %v2613_v46 = vsel %vm2591_vm9, %v2548_v56, %v16291_v26  ;;  %v2612_v36 = vsel %vm2591_vm9, %v2547_v10, %v16292_v14  ;;  %v16293_v21 = vld [vmem:[#allocation339_spill] sm:$0xff]  ;;  %v16294_v23 = vld [vmem:[#allocation340_spill] sm:$0xff]  ;;  %v16302_v35 = vld [vmem:[#allocation205_spill] sm:$0xff]  ;;  %v2055_v47 = vpop.permute.xlu0 %2054 }
 0x446   :  { %v2420_v13 = vsel %vm2396_vm6, %v2355_v24, %v16293_v21  ;;  %v2419_v57 = vsel %vm2396_vm6, %v2354_v6, %v16294_v23  ;;  %v2678_v27 = vsel %vm2656_vm10, %v2613_v46, %v2053_v39  ;;  %v2677_v11 = vsel %vm2656_vm10, %v2612_v36, %v2051_v34  ;;  %v8069_v8 = vld [vmem:[#allocation2 + $0x1c7] sm:$0xff]  ;;  %v8070_v55 = vld [vmem:[#allocation2 + $0x1cf] sm:$0xff]  ;;  %v16308_v63 = vld [vmem:[#allocation342_spill] sm:$0xff] }
 0x447   :  { %v16295_v4 = vld [vmem:[#allocation35_spill] sm:$0xff]  ;;  %v16296_v12 = vld [vmem:[#allocation36_spill] sm:$0xff]  ;;  %v2485_v42 = vsel %vm2461_vm7, %v2420_v13, %v16297_v50  ;;  %v2484_v1 = vsel %vm2461_vm7, %v2419_v57, %v16298_v22  ;;  %6684 = vmatprep.mubr.msk.f32.mxu0 %vm2734_vm11, %v2677_v11  ;;  %v16307_v18 = vld [vmem:[#allocation341_spill] sm:$0xff] }
 0x448   :  { %v2230_v41 = vsel %vm85_vm0, %v8069_v8, %v16295_v4  ;;  %v2231_v52 = vsel %vm85_vm0, %v8070_v55, %v16296_v12  ;;  %v16299_v9 = vld [vmem:[#allocation103_spill] sm:$0xff]  ;;  %v16300_v17 = vld [vmem:[#allocation104_spill] sm:$0xff]  ;;  %v2550_v33 = vsel %vm2526_vm8, %v2485_v42, %v16301_v45  ;;  %v2549_v0 = vsel %vm2526_vm8, %v2484_v1, %v16302_v35  ;;  %6685 = vmatmul.mubr.msk.f32.gmra.mxu0 %vm2734_vm11, %v2678_v27  ;;  %v16309_v40 = vld [vmem:[#allocation37_spill] sm:$0xff] }
 0x449   :  { %v2291_v2 = vsel %vm2266_vm4, %v2226_v29, %v16299_v9  ;;  %v2292_v54 = vsel %vm2266_vm4, %v2227_v16, %v16300_v17  ;;  %v16303_v7 = vld [vmem:[#allocation227_spill] sm:$0xff]  ;;  %v16304_v37 = vld [vmem:[#allocation228_spill] sm:$0xff]  ;;  %v2057_v16 = vpop.permute.xlu1 %2056  ;;  %v16310_v38 = vld [vmem:[#allocation38_spill] sm:$0xff]  ;;  %v2059_v8 = vpop.permute.xlu0 %2058 }
 0x44a   :  { %v2357_v15 = vsel %vm2331_vm5, %v2292_v54, %v16303_v7  ;;  %v2356_v20 = vsel %vm2331_vm5, %v2291_v2, %v16304_v37  ;;  %v16305_v51 = vld [vmem:[#allocation308_spill] sm:$0xff]  ;;  %v16306_v58 = vld [vmem:[#allocation311_spill] sm:$0xff]  ;;  %v16311_v53 = vld [vmem:[#allocation106_spill] sm:$0xff] }
 0x44b   :  { %v2615_v62 = vsel %vm2591_vm9, %v2550_v33, %v16305_v51  ;;  %v2614_v29 = vsel %vm2591_vm9, %v2549_v0, %v16306_v58  ;;  %v2422_v60 = vsel %vm2396_vm6, %v2357_v15, %v16307_v18  ;;  %v2421_v25 = vsel %vm2396_vm6, %v2356_v20, %v16308_v63  ;;  %v8071_v31 = vld [vmem:[#allocation2 + $0x1e7] sm:$0xff]  ;;  %v8072_v43 = vld [vmem:[#allocation2 + $0x1ef] sm:$0xff]  ;;  %v16315_v46 = vld [vmem:[#allocation206_spill] sm:$0xff] }
 0x44c   :  { %v2680_v49 = vsel %vm2656_vm10, %v2615_v62, %v2057_v16  ;;  %v2679_v19 = vsel %vm2656_vm10, %v2614_v29, %v2055_v47  ;;  %v2232_v48 = vsel %vm85_vm0, %v8071_v31, %v16309_v40  ;;  %v2233_v44 = vsel %vm85_vm0, %v8072_v43, %v16310_v38  ;;  %v16312_v56 = vld [vmem:[#allocation105_spill] sm:$0xff]  ;;  %v274_v10 = vld [vmem:[#allocation2 + $0x247] sm:$0xff]  ;;  %v16325_v54 = vld [vmem:[#allocation110_spill] sm:$0xff] }
 0x44d   :  { %v2487_v5 = vsel %vm2461_vm7, %v2422_v60, %v16311_v53  ;;  %v2486_v3 = vsel %vm2461_vm7, %v2421_v25, %v16312_v56  ;;  %6687 = vmatprep.mubr.msk.f32.mxu0 %vm2734_vm11, %v2679_v19  ;;  %v275_v61 = vld [vmem:[#allocation2 + $0x24f] sm:$0xff]  ;;  %v16313_v24 = vld [vmem:[#allocation107_spill] sm:$0xff]  ;;  %v16329_v20 = vld [vmem:[#allocation210_spill] sm:$0xff] }
 0x44e   :  { %v2293_v30 = vsel %vm2266_vm4, %v2228_v59, %v16313_v24  ;;  %v16314_v6 = vld [vmem:[#allocation108_spill] sm:$0xff]  ;;  %v2552_v14 = vsel %vm2526_vm8, %v2487_v5, %v16315_v46  ;;  %v16316_v36 = vld [vmem:[#allocation209_spill] sm:$0xff]  ;;  %v16317_v34 = vld [vmem:[#allocation231_spill] sm:$0xff]  ;;  %6688 = vmatmul.mubr.msk.f32.gmra.mxu0 %vm2734_vm11, %v2680_v49  ;;  %v2063_v49 = vpop.permute.xlu0 %2062 }
 0x44f   :  { %v2294_v26 = vsel %vm2266_vm4, %v2229_v28, %v16314_v6  ;;  %v2551_v39 = vsel %vm2526_vm8, %v2486_v3, %v16316_v36  ;;  %v16318_v13 = vld [vmem:[#allocation232_spill] sm:$0xff]  ;;  %v16320_v11 = vld [vmem:[#allocation313_spill] sm:$0xff]  ;;  %v2061_v28 = vpop.permute.xlu1 %2060  ;;  %v16321_v4 = vld [vmem:[#allocation343_spill] sm:$0xff] }
 0x450   :  { %v2359_v21 = vsel %vm2331_vm5, %v2294_v26, %v16317_v34  ;;  %v2358_v23 = vsel %vm2331_vm5, %v2293_v30, %v16318_v13  ;;  %v16319_v57 = vld [vmem:[#allocation312_spill] sm:$0xff]  ;;  %v2616_v59 = vsel %vm2591_vm9, %v2551_v39, %v16320_v11  ;;  %v16323_v1 = vld [vmem:[#allocation39_spill] sm:$0xff]  ;;  %v16326_v33 = vld [vmem:[#allocation109_spill] sm:$0xff] }
 0x451   :  { %v2617_v27 = vsel %vm2591_vm9, %v2552_v14, %v16319_v57  ;;  %v2424_v55 = vsel %vm2396_vm6, %v2359_v21, %v16321_v4  ;;  %v16322_v12 = vld [vmem:[#allocation344_spill] sm:$0xff]  ;;  %v2681_v22 = vsel %vm2656_vm10, %v2616_v59, %v2059_v8  ;;  %v2234_v9 = vsel %vm85_vm0, %v274_v10, %v16323_v1  ;;  %v16327_v0 = vld [vmem:[#allocation111_spill] sm:$0xff]  ;;  %v16330_v62 = vld [vmem:[#allocation213_spill] sm:$0xff] }
 0x452   :  { %v2423_v50 = vsel %vm2396_vm6, %v2358_v23, %v16322_v12  ;;  %v2682_v42 = vsel %vm2656_vm10, %v2617_v27, %v2061_v28  ;;  %v16324_v2 = vld [vmem:[#allocation40_spill] sm:$0xff]  ;;  %v2489_v45 = vsel %vm2461_vm7, %v2424_v55, %v16325_v54  ;;  %6690 = vmatprep.mubr.msk.f32.mxu0 %vm2734_vm11, %v2681_v22  ;;  %v2295_v7 = vsel %vm2266_vm4, %v2230_v41, %v16327_v0  ;;  %v16331_v29 = vld [vmem:[#allocation235_spill] sm:$0xff]  ;;  %v16334_v25 = vld [vmem:[#allocation321_spill] sm:$0xff]  ;;  %v2067_v12 = vpop.permute.xlu0 %2066 }
 0x453   :  { %v2235_v17 = vsel %vm85_vm0, %v275_v61, %v16324_v2  ;;  %v2488_v35 = vsel %vm2461_vm7, %v2423_v50, %v16326_v33  ;;  %v16328_v15 = vld [vmem:[#allocation112_spill] sm:$0xff]  ;;  %v2554_v51 = vsel %vm2526_vm8, %v2489_v45, %v16329_v20  ;;  %6691 = vmatmul.mubr.msk.f32.gmra.mxu0 %vm2734_vm11, %v2682_v42  ;;  %v16335_v19 = vld [vmem:[#allocation345_spill] sm:$0xff]  ;;  %v16336_v40 = vld [vmem:[#allocation346_spill] sm:$0xff] }
 0x454   :  { %v2296_v37 = vsel %vm2266_vm4, %v2231_v52, %v16328_v15  ;;  %v2553_v58 = vsel %vm2526_vm8, %v2488_v35, %v16330_v62  ;;  %v16332_v47 = vld [vmem:[#allocation236_spill] sm:$0xff]  ;;  %v2065_v52 = vpop.permute.xlu1 %2064  ;;  %v16337_v56 = vld [vmem:[#allocation41_spill] sm:$0xff]  ;;  %v16338_v61 = vld [vmem:[#allocation42_spill] sm:$0xff] }
 0x455   :  { %v2361_v16 = vsel %vm2331_vm5, %v2296_v37, %v16331_v29  ;;  %v2360_v18 = vsel %vm2331_vm5, %v2295_v7, %v16332_v47  ;;  %v16333_v60 = vld [vmem:[#allocation320_spill] sm:$0xff]  ;;  %v2618_v41 = vsel %vm2591_vm9, %v2553_v58, %v16334_v25  ;;  %v16339_v30 = vld [vmem:[#allocation114_spill] sm:$0xff]  ;;  %v16340_v26 = vld [vmem:[#allocation113_spill] sm:$0xff] }
 0x456   :  { %v2619_v63 = vsel %vm2591_vm9, %v2554_v51, %v16333_v60  ;;  %v2426_v31 = vsel %vm2396_vm6, %v2361_v16, %v16335_v19  ;;  %v2425_v43 = vsel %vm2396_vm6, %v2360_v18, %v16336_v40  ;;  %v2683_v53 = vsel %vm2656_vm10, %v2618_v41, %v2063_v49  ;;  %v8073_v5 = vld [vmem:[#allocation2 + $0x267] sm:$0xff]  ;;  %v8074_v10 = vld [vmem:[#allocation2 + $0x26f] sm:$0xff]  ;;  %v16343_v21 = vld [vmem:[#allocation214_spill] sm:$0xff] }
 0x457   :  { %v2684_v38 = vsel %vm2656_vm10, %v2619_v63, %v2065_v52  ;;  %v2236_v3 = vsel %vm85_vm0, %v8073_v5, %v16337_v56  ;;  %v2237_v24 = vsel %vm85_vm0, %v8074_v10, %v16338_v61  ;;  %v2491_v6 = vsel %vm2461_vm7, %v2426_v31, %v16339_v30  ;;  %6693 = vmatprep.mubr.msk.f32.mxu0 %vm2734_vm11, %v2683_v53  ;;  %v16341_v14 = vld [vmem:[#allocation115_spill] sm:$0xff]  ;;  %v16342_v39 = vld [vmem:[#allocation116_spill] sm:$0xff]  ;;  %v16344_v23 = vld [vmem:[#allocation217_spill] sm:$0xff] }
 0x458   :  { %v2490_v46 = vsel %vm2461_vm7, %v2425_v43, %v16340_v26  ;;  %v2297_v36 = vsel %vm2266_vm4, %v2232_v48, %v16341_v14  ;;  %v2298_v34 = vsel %vm2266_vm4, %v2233_v44, %v16342_v39  ;;  %v2556_v13 = vsel %vm2526_vm8, %v2491_v6, %v16343_v21  ;;  %v16345_v27 = vld [vmem:[#allocation239_spill] sm:$0xff]  ;;  %v16346_v59 = vld [vmem:[#allocation240_spill] sm:$0xff]  ;;  %v16348_v55 = vld [vmem:[#allocation325_spill] sm:$0xff]  ;;  %6694 = vmatmul.mubr.msk.f32.gmra.mxu0 %vm2734_vm11, %v2684_v38  ;;  %v2069_v44 = vpop.permute.xlu1 %2068  ;;  %v2071_v38 = vpop.permute.xlu0 %2070 }
 0x459   :  { %v2555_v57 = vsel %vm2526_vm8, %v2490_v46, %v16344_v23  ;;  %v2363_v11 = vsel %vm2331_vm5, %v2298_v34, %v16345_v27  ;;  %v2362_v28 = vsel %vm2331_vm5, %v2297_v36, %v16346_v59  ;;  %v16347_v8 = vld [vmem:[#allocation324_spill] sm:$0xff]  ;;  %v16349_v50 = vld [vmem:[#allocation347_spill] sm:$0xff]  ;;  %v16353_v37 = vld [vmem:[#allocation118_spill] sm:$0xff] }
 0x45a   :  { %v2621_v4 = vsel %vm2591_vm9, %v2556_v13, %v16347_v8  ;;  %v2620_v48 = vsel %vm2591_vm9, %v2555_v57, %v16348_v55  ;;  %v2428_v42 = vsel %vm2396_vm6, %v2363_v11, %v16349_v50  ;;  %v16350_v22 = vld [vmem:[#allocation348_spill] sm:$0xff]  ;;  %v16351_v33 = vld [vmem:[#allocation43_spill] sm:$0xff]  ;;  %v16354_v51 = vld [vmem:[#allocation117_spill] sm:$0xff] }
 0x45b   :  { %v2427_v1 = vsel %vm2396_vm6, %v2362_v28, %v16350_v22  ;;  %v2686_v2 = vsel %vm2656_vm10, %v2621_v4, %v2069_v44  ;;  %v2685_v54 = vsel %vm2656_vm10, %v2620_v48, %v2067_v12  ;;  %v8075_v45 = vld [vmem:[#allocation2 + $0x287] sm:$0xff]  ;;  %v8076_v0 = vld [vmem:[#allocation2 + $0x28f] sm:$0xff]  ;;  %v2493_v20 = vsel %vm2461_vm7, %v2428_v42, %v16353_v37  ;;  %v16357_v18 = vld [vmem:[#allocation218_spill] sm:$0xff] }
 0x45c   :  { %v2238_v35 = vsel %vm85_vm0, %v8075_v45, %v16351_v33  ;;  %v16352_v7 = vld [vmem:[#allocation44_spill] sm:$0xff]  ;;  %v2492_v62 = vsel %vm2461_vm7, %v2427_v1, %v16354_v51  ;;  %6696 = vmatprep.mubr.msk.f32.mxu0 %vm2734_vm11, %v2685_v54  ;;  %v16355_v58 = vld [vmem:[#allocation119_spill] sm:$0xff]  ;;  %v2558_v60 = vsel %vm2526_vm8, %v2493_v20, %v16357_v18  ;;  %v16358_v63 = vld [vmem:[#allocation221_spill] sm:$0xff] }
 0x45d   :  { %v2239_v15 = vsel %vm85_vm0, %v8076_v0, %v16352_v7  ;;  %v2299_v29 = vsel %vm2266_vm4, %v2234_v9, %v16355_v58  ;;  %v16356_v16 = vld [vmem:[#allocation120_spill] sm:$0xff]  ;;  %v2557_v25 = vsel %vm2526_vm8, %v2492_v62, %v16358_v63  ;;  %v16359_v41 = vld [vmem:[#allocation243_spill] sm:$0xff]  ;;  %6697 = vmatmul.mubr.msk.f32.gmra.mxu0 %vm2734_vm11, %v2686_v2  ;;  %v16363_v53 = vld [vmem:[#allocation349_spill] sm:$0xff]  ;;  %v2075_v2 = vpop.permute.xlu0 %2074 }
 0x45e   :  { %v2300_v47 = vsel %vm2266_vm4, %v2235_v17, %v16356_v16  ;;  %v16360_v49 = vld [vmem:[#allocation244_spill] sm:$0xff]  ;;  %v16362_v43 = vld [vmem:[#allocation331_spill] sm:$0xff]  ;;  %v2073_v17 = vpop.permute.xlu1 %2072  ;;  %v16364_v56 = vld [vmem:[#allocation350_spill] sm:$0xff] }
 0x45f   :  { %v2365_v52 = vsel %vm2331_vm5, %v2300_v47, %v16359_v41  ;;  %v2364_v19 = vsel %vm2331_vm5, %v2299_v29, %v16360_v49  ;;  %v16361_v31 = vld [vmem:[#allocation328_spill] sm:$0xff]  ;;  %v2622_v9 = vsel %vm2591_vm9, %v2557_v25, %v16362_v43  ;;  %v16365_v26 = vld [vmem:[#allocation45_spill] sm:$0xff]  ;;  %v16366_v36 = vld [vmem:[#allocation46_spill] sm:$0xff] }
 0x460   :  { %v2623_v40 = vsel %vm2591_vm9, %v2558_v60, %v16361_v31  ;;  %v2430_v5 = vsel %vm2396_vm6, %v2365_v52, %v16363_v53  ;;  %v2429_v10 = vsel %vm2396_vm6, %v2364_v19, %v16364_v56  ;;  %v2687_v30 = vsel %vm2656_vm10, %v2622_v9, %v2071_v38  ;;  %v8077_v6 = vld [vmem:[#allocation2 + $0x2a7] sm:$0xff]  ;;  %v8078_v14 = vld [vmem:[#allocation2 + $0x2af] sm:$0xff]  ;;  %v16367_v34 = vld [vmem:[#allocation122_spill] sm:$0xff] }
 0x461   :  { %v2688_v61 = vsel %vm2656_vm10, %v2623_v40, %v2073_v17  ;;  %v2240_v46 = vsel %vm85_vm0, %v8077_v6, %v16365_v26  ;;  %v2241_v39 = vsel %vm85_vm0, %v8078_v14, %v16366_v36  ;;  %v2495_v21 = vsel %vm2461_vm7, %v2430_v5, %v16367_v34  ;;  %v16368_v13 = vld [vmem:[#allocation121_spill] sm:$0xff]  ;;  %6699 = vmatprep.mubr.msk.f32.mxu0 %vm2734_vm11, %v2687_v30  ;;  %v16369_v57 = vld [vmem:[#allocation123_spill] sm:$0xff]  ;;  %v16370_v11 = vld [vmem:[#allocation124_spill] sm:$0xff] }
 0x462   :  { %v2494_v23 = vsel %vm2461_vm7, %v2429_v10, %v16368_v13  ;;  %v2301_v27 = vsel %vm2266_vm4, %v2236_v3, %v16369_v57  ;;  %v2302_v59 = vsel %vm2266_vm4, %v2237_v24, %v16370_v11  ;;  %v16371_v28 = vld [vmem:[#allocation222_spill] sm:$0xff]  ;;  %v16372_v4 = vld [vmem:[#allocation225_spill] sm:$0xff]  ;;  %v16373_v48 = vld [vmem:[#allocation247_spill] sm:$0xff]  ;;  %6700 = vmatmul.mubr.msk.f32.gmra.mxu0 %vm2734_vm11, %v2688_v61  ;;  %v2077_v24 = vpop.permute.xlu1 %2076  ;;  %v2079_v61 = vpop.permute.xlu0 %2078 }
 0x463   :  { %v2560_v8 = vsel %vm2526_vm8, %v2495_v21, %v16371_v28  ;;  %v2559_v55 = vsel %vm2526_vm8, %v2494_v23, %v16372_v4  ;;  %v2367_v44 = vsel %vm2331_vm5, %v2302_v59, %v16373_v48  ;;  %v16374_v12 = vld [vmem:[#allocation248_spill] sm:$0xff]  ;;  %v16375_v42 = vld [vmem:[#allocation334_spill] sm:$0xff]  ;;  %v16376_v1 = vld [vmem:[#allocation385_spill] sm:$0xff] }
 0x464   :  { %v2366_v50 = vsel %vm2331_vm5, %v2301_v27, %v16374_v12  ;;  %v2625_v22 = vsel %vm2591_vm9, %v2560_v8, %v16375_v42  ;;  %v2624_v3 = vsel %vm2591_vm9, %v2559_v55, %v16376_v1  ;;  %v16377_v54 = vld [vmem:[#allocation351_spill] sm:$0xff]  ;;  %v16378_v33 = vld [vmem:[#allocation352_spill] sm:$0xff]  ;;  %v16381_v47 = vld [vmem:[#allocation126_spill] sm:$0xff] }
 0x465   :  { %v2432_v45 = vsel %vm2396_vm6, %v2367_v44, %v16377_v54  ;;  %v2431_v0 = vsel %vm2396_vm6, %v2366_v50, %v16378_v33  ;;  %v2690_v7 = vsel %vm2656_vm10, %v2625_v22, %v2077_v24  ;;  %v2689_v37 = vsel %vm2656_vm10, %v2624_v3, %v2075_v2  ;;  %v8079_v20 = vld [vmem:[#allocation2 + $0x2c7] sm:$0xff]  ;;  %v8080_v58 = vld [vmem:[#allocation2 + $0x2cf] sm:$0xff]  ;;  %v16384_v52 = vld [vmem:[#allocation130_spill] sm:$0xff] }
 0x466   :  { %v16379_v51 = vld [vmem:[#allocation47_spill] sm:$0xff]  ;;  %v16380_v29 = vld [vmem:[#allocation48_spill] sm:$0xff]  ;;  %v2497_v18 = vsel %vm2461_vm7, %v2432_v45, %v16381_v47  ;;  %v16382_v60 = vld [vmem:[#allocation125_spill] sm:$0xff]  ;;  %6702 = vmatprep.mubr.msk.f32.mxu0 %vm2734_vm11, %v2689_v37  ;;  %v2304_v49 = vsel %vm2266_vm4, %v2239_v15, %v16384_v52  ;;  %v2081_v15 = vpop.permute.xlu1 %2080  ;;  %v2083_v24 = vpop.permute.xlu0 %2082  ;;  %v16403_v2 = vmov 0.0  }
 0x467   :  { %v11515_v62 = vsel %vm85_vm0, %v8079_v20, %v16379_v51  ;;  %v11519_v16 = vsel %vm85_vm0, %v8080_v58, %v16380_v29  ;;  %v2496_v63 = vsel %vm2461_vm7, %v2431_v0, %v16382_v60  ;;  %v16383_v25 = vld [vmem:[#allocation129_spill] sm:$0xff]  ;;  %v16385_v19 = vld [vmem:[#allocation226_spill] sm:$0xff]  ;;  %v16390_v10 = vld [vmem:[#allocation387_spill] sm:$0xff]  ;;  %6703 = vmatmul.mubr.msk.f32.gmra.mxu0 %vm2734_vm11, %v2690_v7  ;;  %3381 = vst.msk [vmem:[#allocation3 + $0x7] sm:$0xff] %vm3380_vm12, %v16403_v2 }
 0x468   :  { %v2303_v41 = vsel %vm2266_vm4, %v2238_v35, %v16383_v25  ;;  %v2562_v31 = vsel %vm2526_vm8, %v2497_v18, %v16385_v19  ;;  %v16386_v40 = vld [vmem:[#allocation229_spill] sm:$0xff]  ;;  %v16388_v38 = vld [vmem:[#allocation254_spill] sm:$0xff]  ;;  %v16393_v21 = vld [vmem:[#allocation131_spill] sm:$0xff]  ;;  %3382 = vst.msk [vmem:[#allocation3 + $0xf] sm:$0xff] %vm3380_vm12, %v16403_v2 }
 0x469   :  { %v2561_v43 = vsel %vm2526_vm8, %v2496_v63, %v16386_v40  ;;  %v16387_v9 = vld [vmem:[#allocation253_spill] sm:$0xff]  ;;  %v2368_v53 = vsel %vm2331_vm5, %v2303_v41, %v16388_v38  ;;  %v16389_v5 = vld [vmem:[#allocation386_spill] sm:$0xff]  ;;  %v2305_v13 = vsel %vm2266_vm4, %v2240_v46, %v16393_v21  ;;  %v16394_v23 = vld [vmem:[#allocation132_spill] sm:$0xff]  ;;  %3385 = vst.msk [vmem:[#allocation3 + $0x247] sm:$0xff] %vm3380_vm12, %v16403_v2 }
 0x46a   :  { %v2369_v17 = vsel %vm2331_vm5, %v2304_v49, %v16387_v9  ;;  %v2627_v56 = vsel %vm2591_vm9, %v2562_v31, %v16389_v5  ;;  %v2626_v35 = vsel %vm2591_vm9, %v2561_v43, %v16390_v10  ;;  %v16391_v30 = vld [vmem:[#allocation353_spill] sm:$0xff]  ;;  %v16392_v26 = vld [vmem:[#allocation354_spill] sm:$0xff]  ;;  %v2306_v57 = vsel %vm2266_vm4, %v2241_v39, %v16394_v23  ;;  %v16395_v27 = vld [vmem:[#allocation127_spill] sm:$0xff]  ;;  %v2085_v3 = vpop.permute.xlu1 %2084  ;;  %3386 = vst.msk [vmem:[#allocation3 + $0x24f] sm:$0xff] %vm3380_vm12, %v16403_v2  ;;  %v2087_v10 = vpop.permute.xlu0 %2086 }
 0x46b   :  { %v2434_v6 = vsel %vm2396_vm6, %v2369_v17, %v16391_v30  ;;  %v2433_v14 = vsel %vm2396_vm6, %v2368_v53, %v16392_v26  ;;  %v2692_v36 = vsel %vm2656_vm10, %v2627_v56, %v2081_v15  ;;  %v2691_v34 = vsel %vm2656_vm10, %v2626_v35, %v2079_v61  ;;  %v16396_v59 = vld [vmem:[#allocation128_spill] sm:$0xff]  ;;  %v16397_v8 = vld [vmem:[#allocation255_spill] sm:$0xff]  ;;  %v16398_v55 = vld [vmem:[#allocation230_spill] sm:$0xff]  ;;  %3389 = vst.msk [vmem:[#allocation3 + $0x227] sm:$0xff] %vm3380_vm12, %v16403_v2 }
 0x46c   :  { %v2499_v11 = vsel %vm2461_vm7, %v2434_v6, %v16395_v27  ;;  %v2498_v28 = vsel %vm2461_vm7, %v2433_v14, %v16396_v59  ;;  %6705 = vmatprep.mubr.msk.f32.mxu0 %vm2734_vm11, %v2691_v34  ;;  %v2371_v4 = vsel %vm2331_vm5, %v2306_v57, %v16397_v8  ;;  %v16399_v44 = vld [vmem:[#allocation233_spill] sm:$0xff]  ;;  %v16400_v12 = vld [vmem:[#allocation256_spill] sm:$0xff]  ;;  %3390 = vst.msk [vmem:[#allocation3 + $0x22f] sm:$0xff] %vm3380_vm12, %v16403_v2  ;;  %3392 = vst.msk [vmem:[#allocation3 + $0x467] sm:$0xff] %vm3380_vm12, %v16403_v2 }
 0x46d   :  { %v2564_v48 = vsel %vm2526_vm8, %v2499_v11, %v16398_v55  ;;  %v2563_v46 = vsel %vm2526_vm8, %v2498_v28, %v16399_v44  ;;  %v2370_v39 = vsel %vm2331_vm5, %v2305_v13, %v16400_v12  ;;  %v16401_v50 = vld [vmem:[#allocation388_spill] sm:$0xff]  ;;  %v16402_v22 = vld [vmem:[#allocation389_spill] sm:$0xff]  ;;  %6706 = vmatmul.mubr.msk.f32.gmra.mxu0 %vm2734_vm11, %v2692_v36  ;;  %3393 = vst.msk [vmem:[#allocation3 + $0x46f] sm:$0xff] %vm3380_vm12, %v16403_v2  ;;  %v16404_v54 = vld [vmem:[#allocation355_spill] sm:$0xff] }
 0x46e   :  { %v2629_v42 = vsel %vm2591_vm9, %v2564_v48, %v16401_v50  ;;  %v2628_v1 = vsel %vm2591_vm9, %v2563_v46, %v16402_v22  ;;  %v11589_v45 = vsel %vm2396_vm6, %v2371_v4, %v16404_v54  ;;  %v16405_v33 = vld [vmem:[#allocation356_spill] sm:$0xff]  ;;  %3434 = vst.msk [vmem:[#allocation3 + $0x58] sm:$0x1] %vm3395_vm13, %v16403_v2  ;;  %3396 = vst.msk [vmem:[#allocation3 + $0x7] sm:$0x1] %vm3395_vm13, %v16403_v2  ;;  %v16406_v51 = vld [vmem:[#allocation49_spill] sm:$0xff]  ;;  %v2089_v56 = vpop.permute.xlu1 %2088 }
 0x46f   :  { %v11593_v0 = vsel %vm2396_vm6, %v2370_v39, %v16405_v33  ;;  %v11596_v7 = vsel %vm2656_vm10, %v2629_v42, %v2085_v3  ;;  %v11599_v37 = vsel %vm2656_vm10, %v2628_v1, %v2083_v24  ;;  %3397 = vst.msk [vmem:[#allocation3 + $0x27] sm:$0x1] %vm3395_vm13, %v16403_v2  ;;  %3398 = vst.msk [vmem:[#allocation3 + $0x47] sm:$0x1] %vm3395_vm13, %v16403_v2  ;;  %v8081_v20 = vld [vmem:[#allocation2 + $0x2e7] sm:$0xff]  ;;  %v16409_v63 = vld [vmem:[#allocation133_spill] sm:$0xff]  ;;  %v2091_v33 = vpop.permute.xlu0 %2090 }
 0x470   :  { %3399 = vst.msk [vmem:[#allocation3 + $0x67] sm:$0x1] %vm3395_vm13, %v16403_v2  ;;  %3400 = vst.msk [vmem:[#allocation3 + $0x87] sm:$0x1] %vm3395_vm13, %v16403_v2  ;;  %v2244_v58 = vsel %vm85_vm0, %v8081_v20, %v16406_v51  ;;  %v16407_v29 = vld [vmem:[#allocation383_spill] sm:$0xff]  ;;  %v16408_v18 = vld [vmem:[#allocation384_spill] sm:$0xff]  ;;  %6708 = vmatprep.mubr.msk.f32.mxu0 %vm2734_vm11, %v11599_v37  ;;  %v2307_v25 = vsel %vm2266_vm4, %v11515_v62, %v16409_v63 }
 0x471   :  { %3401 = vst.msk [vmem:[#allocation3 + $0xa7] sm:$0x1] %vm3395_vm13, %v16403_v2  ;;  %3402 = vst.msk [vmem:[#allocation3 + $0xc7] sm:$0x1] %vm3395_vm13, %v16403_v2  ;;  %v2501_v47 = vsel %vm2461_vm7, %v11589_v45, %v16407_v29  ;;  %v2500_v60 = vsel %vm2461_vm7, %v11593_v0, %v16408_v18  ;;  %v16410_v41 = vld [vmem:[#allocation134_spill] sm:$0xff]  ;;  %v16412_v31 = vld [vmem:[#allocation237_spill] sm:$0xff]  ;;  %6709 = vmatmul.mubr.msk.f32.gmra.mxu0 %vm2734_vm11, %v11596_v7 }
 0x472   :  { %3403 = vst.msk [vmem:[#allocation3 + $0xe7] sm:$0x1] %vm3395_vm13, %v16403_v2  ;;  %3404 = vst.msk [vmem:[#allocation3 + $0x107] sm:$0x1] %vm3395_vm13, %v16403_v2  ;;  %v2308_v52 = vsel %vm2266_vm4, %v11519_v16, %v16410_v41  ;;  %v16411_v49 = vld [vmem:[#allocation234_spill] sm:$0xff]  ;;  %v2565_v40 = vsel %vm2526_vm8, %v2500_v60, %v16412_v31  ;;  %v16413_v43 = vld [vmem:[#allocation257_spill] sm:$0xff]  ;;  %v2093_v45 = vpop.permute.xlu1 %2092 }
 0x473   :  { %3405 = vst.msk [vmem:[#allocation3 + $0x127] sm:$0x1] %vm3395_vm13, %v16403_v2  ;;  %3406 = vst.msk [vmem:[#allocation3 + $0x147] sm:$0x1] %vm3395_vm13, %v16403_v2  ;;  %v2566_v19 = vsel %vm2526_vm8, %v2501_v47, %v16411_v49  ;;  %v2373_v62 = vsel %vm2331_vm5, %v2308_v52, %v16413_v43  ;;  %v16414_v9 = vld [vmem:[#allocation258_spill] sm:$0xff]  ;;  %v16416_v53 = vld [vmem:[#allocation391_spill] sm:$0xff] }
 0x474   :  { %3407 = vst.msk [vmem:[#allocation3 + $0x167] sm:$0x1] %vm3395_vm13, %v16403_v2  ;;  %3408 = vst.msk [vmem:[#allocation3 + $0x187] sm:$0x1] %vm3395_vm13, %v16403_v2  ;;  %v2372_v16 = vsel %vm2331_vm5, %v2307_v25, %v16414_v9  ;;  %v16415_v17 = vld [vmem:[#allocation390_spill] sm:$0xff]  ;;  %v2630_v5 = vsel %vm2591_vm9, %v2565_v40, %v16416_v53  ;;  %v16417_v35 = vld [vmem:[#allocation357_spill] sm:$0xff] }
 0x475   :  { %3409 = vst.msk [vmem:[#allocation3 + $0x1a7] sm:$0x1] %vm3395_vm13, %v16403_v2  ;;  %3410 = vst.msk [vmem:[#allocation3 + $0x1c7] sm:$0x1] %vm3395_vm13, %v16403_v2  ;;  %v2631_v38 = vsel %vm2591_vm9, %v2566_v19, %v16415_v17  ;;  %v2438_v15 = vsel %vm2396_vm6, %v2373_v62, %v16417_v35  ;;  %v16418_v61 = vld [vmem:[#allocation358_spill] sm:$0xff]  ;;  %v2695_v26 = vsel %vm2656_vm10, %v2630_v5, %v2087_v10  ;;  %v8082_v14 = vld [vmem:[#allocation2 + $0x2ef] sm:$0xff] }
 0x476   :  { %3411 = vst.msk [vmem:[#allocation3 + $0x1e7] sm:$0x1] %vm3395_vm13, %v16403_v2  ;;  %3412 = vst.msk [vmem:[#allocation3 + $0x207] sm:$0x1] %vm3395_vm13, %v16403_v2  ;;  %v2437_v30 = vsel %vm2396_vm6, %v2372_v16, %v16418_v61  ;;  %v2696_v6 = vsel %vm2656_vm10, %v2631_v38, %v2089_v56  ;;  %v16419_v36 = vld [vmem:[#allocation50_spill] sm:$0xff]  ;;  %v8083_v21 = vld [vmem:[#allocation2 + $0x307] sm:$0xff]  ;;  %6711 = vmatprep.mubr.msk.f32.mxu0 %vm2734_vm11, %v2695_v26  ;;  %v2095_v26 = vpop.permute.xlu0 %2094 }
 0x477   :  { %3413 = vst.msk [vmem:[#allocation3 + $0x227] sm:$0x1] %vm3395_vm13, %v16403_v2  ;;  %3414 = vst.msk [vmem:[#allocation3 + $0x247] sm:$0x1] %vm3395_vm13, %v16403_v2  ;;  %v2245_v34 = vsel %vm85_vm0, %v8082_v14, %v16419_v36  ;;  %v16420_v13 = vld [vmem:[#allocation51_spill] sm:$0xff]  ;;  %v16421_v57 = vld [vmem:[#allocation136_spill] sm:$0xff]  ;;  %6712 = vmatmul.mubr.msk.f32.gmra.mxu0 %vm2734_vm11, %v2696_v6  ;;  %v2097_v6 = vpop.permute.xlu1 %2096 }
 0x478   :  { %3415 = vst.msk [vmem:[#allocation3 + $0x267] sm:$0x1] %vm3395_vm13, %v16403_v2  ;;  %3416 = vst.msk [vmem:[#allocation3 + $0x287] sm:$0x1] %vm3395_vm13, %v16403_v2  ;;  %v2246_v23 = vsel %vm85_vm0, %v8083_v21, %v16420_v13  ;;  %v2503_v27 = vsel %vm2461_vm7, %v2438_v15, %v16421_v57  ;;  %v16422_v11 = vld [vmem:[#allocation135_spill] sm:$0xff]  ;;  %v16423_v28 = vld [vmem:[#allocation137_spill] sm:$0xff] }
 0x479   :  { %3417 = vst.msk [vmem:[#allocation3 + $0x2a7] sm:$0x1] %vm3395_vm13, %v16403_v2  ;;  %3418 = vst.msk [vmem:[#allocation3 + $0x2c7] sm:$0x1] %vm3395_vm13, %v16403_v2  ;;  %v2502_v59 = vsel %vm2461_vm7, %v2437_v30, %v16422_v11  ;;  %v2309_v8 = vsel %vm2266_vm4, %v2244_v58, %v16423_v28  ;;  %v16424_v4 = vld [vmem:[#allocation138_spill] sm:$0xff]  ;;  %v16426_v46 = vld [vmem:[#allocation241_spill] sm:$0xff] }
 0x47a   :  { %3419 = vst.msk [vmem:[#allocation3 + $0x2e7] sm:$0x1] %vm3395_vm13, %v16403_v2  ;;  %3420 = vst.msk [vmem:[#allocation3 + $0x307] sm:$0x1] %vm3395_vm13, %v16403_v2  ;;  %v2310_v55 = vsel %vm2266_vm4, %v2245_v34, %v16424_v4  ;;  %v16425_v48 = vld [vmem:[#allocation238_spill] sm:$0xff]  ;;  %v2567_v12 = vsel %vm2526_vm8, %v2502_v59, %v16426_v46  ;;  %v16427_v39 = vld [vmem:[#allocation261_spill] sm:$0xff] }
 0x47b   :  { %3421 = vst.msk [vmem:[#allocation3 + $0x327] sm:$0x1] %vm3395_vm13, %v16403_v2  ;;  %3422 = vst.msk [vmem:[#allocation3 + $0x347] sm:$0x1] %vm3395_vm13, %v16403_v2  ;;  %v2568_v44 = vsel %vm2526_vm8, %v2503_v27, %v16425_v48  ;;  %v2375_v50 = vsel %vm2331_vm5, %v2310_v55, %v16427_v39  ;;  %v16428_v42 = vld [vmem:[#allocation262_spill] sm:$0xff]  ;;  %v16429_v1 = vld [vmem:[#allocation392_spill] sm:$0xff] }
 0x47c   :  { %3423 = vst.msk [vmem:[#allocation3 + $0x367] sm:$0x1] %vm3395_vm13, %v16403_v2  ;;  %3424 = vst.msk [vmem:[#allocation3 + $0x387] sm:$0x1] %vm3395_vm13, %v16403_v2  ;;  %v2374_v22 = vsel %vm2331_vm5, %v2309_v8, %v16428_v42  ;;  %v2633_v3 = vsel %vm2591_vm9, %v2568_v44, %v16429_v1  ;;  %v16430_v24 = vld [vmem:[#allocation393_spill] sm:$0xff]  ;;  %v16431_v0 = vld [vmem:[#allocation359_spill] sm:$0xff] }
 0x47d   :  { %3425 = vst.msk [vmem:[#allocation3 + $0x3a7] sm:$0x1] %vm3395_vm13, %v16403_v2  ;;  %3426 = vst.msk [vmem:[#allocation3 + $0x3c7] sm:$0x1] %vm3395_vm13, %v16403_v2  ;;  %v2632_v54 = vsel %vm2591_vm9, %v2567_v12, %v16430_v24  ;;  %v2440_v7 = vsel %vm2396_vm6, %v2375_v50, %v16431_v0  ;;  %v16432_v37 = vld [vmem:[#allocation360_spill] sm:$0xff]  ;;  %v2698_v51 = vsel %vm2656_vm10, %v2633_v3, %v2093_v45  ;;  %v16434_v60 = vld [vmem:[#allocation141_spill] sm:$0xff] }
 0x47e   :  { %3427 = vst.msk [vmem:[#allocation3 + $0x3e7] sm:$0x1] %vm3395_vm13, %v16403_v2  ;;  %3428 = vst.msk [vmem:[#allocation3 + $0x407] sm:$0x1] %vm3395_vm13, %v16403_v2  ;;  %v2439_v20 = vsel %vm2396_vm6, %v2374_v22, %v16432_v37  ;;  %v2697_v58 = vsel %vm2656_vm10, %v2632_v54, %v2091_v33  ;;  %v8084_v29 = vld [vmem:[#allocation2 + $0x30f] sm:$0xff]  ;;  %v2311_v63 = vsel %vm2266_vm4, %v2246_v23, %v16434_v60  ;;  %v16436_v52 = vld [vmem:[#allocation139_spill] sm:$0xff] }
 0x47f   :  { %3429 = vst.msk [vmem:[#allocation3 + $0x427] sm:$0x1] %vm3395_vm13, %v16403_v2  ;;  %3430 = vst.msk [vmem:[#allocation3 + $0x447] sm:$0x1] %vm3395_vm13, %v16403_v2  ;;  %v16433_v47 = vld [vmem:[#allocation52_spill] sm:$0xff]  ;;  %v2504_v49 = vsel %vm2461_vm7, %v2439_v20, %v16436_v52  ;;  %6714 = vmatprep.mubr.msk.f32.mxu0 %vm2734_vm11, %v2697_v58  ;;  %v16437_v40 = vld [vmem:[#allocation142_spill] sm:$0xff]  ;;  %v2099_v58 = vpop.permute.xlu0 %2098 }
 0x480   :  { %3431 = vst.msk [vmem:[#allocation3 + $0x467] sm:$0x1] %vm3395_vm13, %v16403_v2  ;;  %3433 = vst.msk [vmem:[#allocation3 + $0x38] sm:$0x1] %vm3395_vm13, %v16403_v2  ;;  %v2247_v18 = vsel %vm85_vm0, %v8084_v29, %v16433_v47  ;;  %v16435_v25 = vld [vmem:[#allocation140_spill] sm:$0xff]  ;;  %v16438_v62 = vld [vmem:[#allocation242_spill] sm:$0xff]  ;;  %6715 = vmatmul.mubr.msk.f32.gmra.mxu0 %vm2734_vm11, %v2698_v51  ;;  %v2101_v51 = vpop.permute.xlu1 %2100 }
 0x481   :  { %3435 = vst.msk [vmem:[#allocation3 + $0x78] sm:$0x1] %vm3395_vm13, %v16403_v2  ;;  %3436 = vst.msk [vmem:[#allocation3 + $0x98] sm:$0x1] %vm3395_vm13, %v16403_v2  ;;  %v2505_v41 = vsel %vm2461_vm7, %v2440_v7, %v16435_v25  ;;  %v3605_v19 = vld [vmem:[#allocation3 + $0x8] sm:$0xff]  ;;  %v2312_v43 = vsel %vm2266_vm4, %v2247_v18, %v16437_v40  ;;  %v16439_v16 = vld [vmem:[#allocation245_spill] sm:$0xff] }
 0x482   :  { %3437 = vst.msk [vmem:[#allocation3 + $0xb8] sm:$0x1] %vm3395_vm13, %v16403_v2  ;;  %3438 = vst.msk [vmem:[#allocation3 + $0xd8] sm:$0x1] %vm3395_vm13, %v16403_v2  ;;  %v2570_v9 = vsel %vm2526_vm8, %v2505_v41, %v16438_v62  ;;  %v2569_v17 = vsel %vm2526_vm8, %v2504_v49, %v16439_v16  ;;  %v16440_v53 = vld [vmem:[#allocation265_spill] sm:$0xff]  ;;  %v16441_v56 = vld [vmem:[#allocation266_spill] sm:$0xff] }
 0x483   :  { %3439 = vst.msk [vmem:[#allocation3 + $0xf8] sm:$0x1] %vm3395_vm13, %v16403_v2  ;;  %3440 = vst.msk [vmem:[#allocation3 + $0x118] sm:$0x1] %vm3395_vm13, %v16403_v2  ;;  %v2377_v5 = vsel %vm2331_vm5, %v2312_v43, %v16440_v53  ;;  %v2376_v10 = vsel %vm2331_vm5, %v2311_v63, %v16441_v56  ;;  %v16442_v35 = vld [vmem:[#allocation394_spill] sm:$0xff]  ;;  %v16443_v61 = vld [vmem:[#allocation395_spill] sm:$0xff] }
 0x484   :  { %3441 = vst.msk [vmem:[#allocation3 + $0x138] sm:$0x1] %vm3395_vm13, %v16403_v2  ;;  %3442 = vst.msk [vmem:[#allocation3 + $0x158] sm:$0x1] %vm3395_vm13, %v16403_v2  ;;  %v2635_v15 = vsel %vm2591_vm9, %v2570_v9, %v16442_v35  ;;  %v2634_v30 = vsel %vm2591_vm9, %v2569_v17, %v16443_v61  ;;  %v16444_v14 = vld [vmem:[#allocation361_spill] sm:$0xff]  ;;  %v16445_v34 = vld [vmem:[#allocation362_spill] sm:$0xff] }
 0x485   :  { %3443 = vst.msk [vmem:[#allocation3 + $0x178] sm:$0x1] %vm3395_vm13, %v16403_v2  ;;  %3444 = vst.msk [vmem:[#allocation3 + $0x198] sm:$0x1] %vm3395_vm13, %v16403_v2  ;;  %v2442_v36 = vsel %vm2396_vm6, %v2377_v5, %v16444_v14  ;;  %v2441_v21 = vsel %vm2396_vm6, %v2376_v10, %v16445_v34  ;;  %v2700_v13 = vsel %vm2656_vm10, %v2635_v15, %v2097_v6  ;;  %v8085_v57 = vld [vmem:[#allocation2 + $0x327] sm:$0xff]  ;;  %v16446_v27 = vld [vmem:[#allocation53_spill] sm:$0xff] }
 0x486   :  { %3445 = vst.msk [vmem:[#allocation3 + $0x1b8] sm:$0x1] %vm3395_vm13, %v16403_v2  ;;  %3446 = vst.msk [vmem:[#allocation3 + $0x1d8] sm:$0x1] %vm3395_vm13, %v16403_v2  ;;  %v2699_v23 = vsel %vm2656_vm10, %v2634_v30, %v2095_v26  ;;  %v2248_v11 = vsel %vm85_vm0, %v8085_v57, %v16446_v27  ;;  %v8086_v59 = vld [vmem:[#allocation2 + $0x32f] sm:$0xff]  ;;  %v16447_v28 = vld [vmem:[#allocation54_spill] sm:$0xff] }
 0x487   :  { %3447 = vst.msk [vmem:[#allocation3 + $0x1f8] sm:$0x1] %vm3395_vm13, %v16403_v2  ;;  %3448 = vst.msk [vmem:[#allocation3 + $0x218] sm:$0x1] %vm3395_vm13, %v16403_v2  ;;  %v2249_v8 = vsel %vm85_vm0, %v8086_v59, %v16447_v28  ;;  %v16448_v4 = vld [vmem:[#allocation144_spill] sm:$0xff]  ;;  %v16449_v48 = vld [vmem:[#allocation143_spill] sm:$0xff]  ;;  %6717 = vmatprep.mubr.msk.f32.mxu0 %vm2734_vm11, %v2699_v23  ;;  %v2103_v23 = vpop.permute.xlu0 %2102 }
 0x488   :  { %3451 = vst.msk [vmem:[#allocation3 + $0x278] sm:$0x1] %vm3395_vm13, %v16403_v2  ;;  %3452 = vst.msk [vmem:[#allocation3 + $0x298] sm:$0x1] %vm3395_vm13, %v16403_v2  ;;  %v2507_v55 = vsel %vm2461_vm7, %v2442_v36, %v16448_v4  ;;  %v2506_v44 = vsel %vm2461_vm7, %v2441_v21, %v16449_v48  ;;  %v16450_v46 = vld [vmem:[#allocation145_spill] sm:$0xff]  ;;  %v16451_v39 = vld [vmem:[#allocation146_spill] sm:$0xff]  ;;  %6718 = vmatmul.mubr.msk.f32.gmra.mxu0 %vm2734_vm11, %v2700_v13  ;;  %v2105_v13 = vpop.permute.xlu1 %2104 }
 0x489   :  { %3453 = vst.msk [vmem:[#allocation3 + $0x2b8] sm:$0x1] %vm3395_vm13, %v16403_v2  ;;  %3454 = vst.msk [vmem:[#allocation3 + $0x2d8] sm:$0x1] %vm3395_vm13, %v16403_v2  ;;  %v2313_v12 = vsel %vm2266_vm4, %v2248_v11, %v16450_v46  ;;  %v2314_v50 = vsel %vm2266_vm4, %v2249_v8, %v16451_v39  ;;  %v16452_v42 = vld [vmem:[#allocation246_spill] sm:$0xff]  ;;  %v16453_v1 = vld [vmem:[#allocation249_spill] sm:$0xff] }
 0x48a   :  { %3455 = vst.msk [vmem:[#allocation3 + $0x2f8] sm:$0x1] %vm3395_vm13, %v16403_v2  ;;  %3456 = vst.msk [vmem:[#allocation3 + $0x318] sm:$0x1] %vm3395_vm13, %v16403_v2  ;;  %v2572_v22 = vsel %vm2526_vm8, %v2507_v55, %v16452_v42  ;;  %v2571_v3 = vsel %vm2526_vm8, %v2506_v44, %v16453_v1  ;;  %v16454_v24 = vld [vmem:[#allocation269_spill] sm:$0xff]  ;;  %v16455_v45 = vld [vmem:[#allocation270_spill] sm:$0xff] }
 0x48b   :  { %3457 = vst.msk [vmem:[#allocation3 + $0x338] sm:$0x1] %vm3395_vm13, %v16403_v2  ;;  %3458 = vst.msk [vmem:[#allocation3 + $0x358] sm:$0x1] %vm3395_vm13, %v16403_v2  ;;  %v2379_v54 = vsel %vm2331_vm5, %v2314_v50, %v16454_v24  ;;  %v2378_v33 = vsel %vm2331_vm5, %v2313_v12, %v16455_v45  ;;  %v16456_v0 = vld [vmem:[#allocation396_spill] sm:$0xff]  ;;  %v16457_v37 = vld [vmem:[#allocation397_spill] sm:$0xff] }
 0x48c   :  { %3459 = vst.msk [vmem:[#allocation3 + $0x378] sm:$0x1] %vm3395_vm13, %v16403_v2  ;;  %3460 = vst.msk [vmem:[#allocation3 + $0x398] sm:$0x1] %vm3395_vm13, %v16403_v2  ;;  %v2637_v7 = vsel %vm2591_vm9, %v2572_v22, %v16456_v0  ;;  %v2636_v20 = vsel %vm2591_vm9, %v2571_v3, %v16457_v37  ;;  %v16458_v29 = vld [vmem:[#allocation363_spill] sm:$0xff]  ;;  %v16459_v18 = vld [vmem:[#allocation364_spill] sm:$0xff] }
 0x48d   :  { %3461 = vst.msk [vmem:[#allocation3 + $0x3b8] sm:$0x1] %vm3395_vm13, %v16403_v2  ;;  %3462 = vst.msk [vmem:[#allocation3 + $0x3d8] sm:$0x1] %vm3395_vm13, %v16403_v2  ;;  %v2444_v47 = vsel %vm2396_vm6, %v2379_v54, %v16458_v29  ;;  %v2443_v60 = vsel %vm2396_vm6, %v2378_v33, %v16459_v18  ;;  %v2702_v63 = vsel %vm2656_vm10, %v2637_v7, %v2101_v51  ;;  %v8087_v41 = vld [vmem:[#allocation2 + $0x347] sm:$0xff]  ;;  %v16464_v17 = vld [vmem:[#allocation149_spill] sm:$0xff] }
 0x48e   :  { %3463 = vst.msk [vmem:[#allocation3 + $0x3f8] sm:$0x1] %vm3395_vm13, %v16403_v2  ;;  %3464 = vst.msk [vmem:[#allocation3 + $0x418] sm:$0x1] %vm3395_vm13, %v16403_v2  ;;  %v2701_v25 = vsel %vm2656_vm10, %v2636_v20, %v2099_v58  ;;  %v16460_v52 = vld [vmem:[#allocation55_spill] sm:$0xff]  ;;  %v16462_v43 = vld [vmem:[#allocation148_spill] sm:$0xff] }
 0x48f   :  { %3465 = vst.msk [vmem:[#allocation3 + $0x438] sm:$0x1] %vm3395_vm13, %v16403_v2  ;;  %3466 = vst.msk [vmem:[#allocation3 + $0x458] sm:$0x1] %vm3395_vm13, %v16403_v2  ;;  %v2250_v49 = vsel %vm85_vm0, %v8087_v41, %v16460_v52  ;;  %v2509_v62 = vsel %vm2461_vm7, %v2444_v47, %v16462_v43  ;;  %v16463_v9 = vld [vmem:[#allocation147_spill] sm:$0xff]  ;;  %6720 = vmatprep.mubr.msk.f32.mxu0 %vm2734_vm11, %v2701_v25  ;;  %v16465_v53 = vld [vmem:[#allocation150_spill] sm:$0xff]  ;;  %v2107_v25 = vpop.permute.xlu0 %2106 }
 0x490   :  { %3384 = vst.msk [vmem:[#allocation3 + $0x17] sm:$0x3] %vm3383_vm14, %v16403_v2  ;;  %3387 = vst.msk [vmem:[#allocation3 + $0x257] sm:$0x3] %vm3383_vm14, %v16403_v2  ;;  %v2508_v16 = vsel %vm2461_vm7, %v2443_v60, %v16463_v9  ;;  %v16466_v56 = vld [vmem:[#allocation250_spill] sm:$0xff]  ;;  %v16467_v35 = vld [vmem:[#allocation251_spill] sm:$0xff]  ;;  %6721 = vmatmul.mubr.msk.f32.gmra.mxu0 %vm2734_vm11, %v2702_v63  ;;  %v2109_v63 = vpop.permute.xlu1 %2108 }
 0x491   :  { %3391 = vst.msk [vmem:[#allocation3 + $0x237] sm:$0x3] %vm3383_vm14, %v16403_v2  ;;  %3394 = vst.msk [vmem:[#allocation3 + $0x477] sm:$0x3] %vm3383_vm14, %v16403_v2  ;;  %v2574_v10 = vsel %vm2526_vm8, %v2509_v62, %v16466_v56  ;;  %v2573_v15 = vsel %vm2526_vm8, %v2508_v16, %v16467_v35  ;;  %v16468_v61 = vld [vmem:[#allocation273_spill] sm:$0xff]  ;;  %v16469_v6 = vld [vmem:[#allocation274_spill] sm:$0xff] }
 0x492   :  { %3432 = vst.msk [vmem:[#allocation3 + $0x18] sm:$0x1] %vm3395_vm13, %v16403_v2  ;;  %3449 = vst.msk [vmem:[#allocation3 + $0x238] sm:$0x1] %vm3395_vm13, %v16403_v2  ;;  %v16470_v14 = vld [vmem:[#allocation398_spill] sm:$0xff]  ;;  %v16471_v34 = vld [vmem:[#allocation399_spill] sm:$0xff] }
 0x493   :  { %3450 = vst.msk [vmem:[#allocation3 + $0x258] sm:$0x1] %vm3395_vm13, %v16403_v2  ;;  %3467 = vst.msk [vmem:[#allocation3 + $0x478] sm:$0x1] %vm3395_vm13, %v16403_v2  ;;  %v2639_v36 = vsel %vm2591_vm9, %v2574_v10, %v16470_v14  ;;  %v2638_v21 = vsel %vm2591_vm9, %v2573_v15, %v16471_v34  ;;  %v16472_v57 = vld [vmem:[#allocation365_spill] sm:$0xff]  ;;  %v16473_v11 = vld [vmem:[#allocation366_spill] sm:$0xff] }
 0x494   :  { %v2704_v28 = vsel %vm2656_vm10, %v2639_v36, %v2105_v13  ;;  %v2703_v8 = vsel %vm2656_vm10, %v2638_v21, %v2103_v23  ;;  %v8089_v4 = vld [vmem:[#allocation2 + $0x367] sm:$0xff]  ;;  %v16474_v55 = vld [vmem:[#allocation57_spill] sm:$0xff]  ;;  %v16475_v46 = vld [vmem:[#allocation58_spill] sm:$0xff] }
 0x495   :  { %v2252_v48 = vsel %vm85_vm0, %v8089_v4, %v16474_v55  ;;  %v8090_v44 = vld [vmem:[#allocation2 + $0x36f] sm:$0xff]  ;;  %v16477_v42 = vld [vmem:[#allocation151_spill] sm:$0xff]  ;;  %6723 = vmatprep.mubr.msk.f32.mxu0 %vm2734_vm11, %v2703_v8  ;;  %v16479_v24 = vld [vmem:[#allocation154_spill] sm:$0xff]  ;;  %v2111_v8 = vpop.permute.xlu0 %2110 }
 0x496   :  { %v2253_v12 = vsel %vm85_vm0, %v8090_v44, %v16475_v46  ;;  %v16476_v39 = vld [vmem:[#allocation152_spill] sm:$0xff]  ;;  %v16478_v1 = vld [vmem:[#allocation153_spill] sm:$0xff]  ;;  %v16481_v0 = vld [vmem:[#allocation259_spill] sm:$0xff]  ;;  %6724 = vmatmul.mubr.msk.f32.gmra.mxu0 %vm2734_vm11, %v2704_v28  ;;  %v2113_v28 = vpop.permute.xlu1 %2112 }
 0x497   :  { %v3606_v31 = vld [vmem:[#allocation3 + $0x10] sm:$0xff]  ;;  %v2317_v3 = vsel %vm2266_vm4, %v2252_v48, %v16478_v1  ;;  %v2318_v54 = vsel %vm2266_vm4, %v2253_v12, %v16479_v24  ;;  %v16480_v45 = vld [vmem:[#allocation252_spill] sm:$0xff]  ;;  %v16483_v51 = vld [vmem:[#allocation278_spill] sm:$0xff] }
 0x498   :  { %v6805_v38 = vpack.i.bf16 %v3606_v31, %v3605_v19  ;;  %v8088_v19 = vld [vmem:[#allocation2 + $0x34f] sm:$0xff]  ;;  %v2382_v58 = vsel %vm2331_vm5, %v2317_v3, %v16483_v51  ;;  %v16486_v41 = vld [vmem:[#allocation367_spill] sm:$0xff]  ;;  %v16497_v13 = vld [vmem:[#allocation282_spill] sm:$0xff] }
 0x499   :  { %v16461_v31 = vld [vmem:[#allocation56_spill] sm:$0xff]  ;;  %v16482_v37 = vld [vmem:[#allocation277_spill] sm:$0xff]  ;;  %v16488_v62 = vld [vmem:[#allocation59_spill] sm:$0xff] }
 0x49a   :  { %6806 = vrot.lane.b32.xlu0 %v6805_v38, %s8301_s17  ;;  %v2251_v40 = vsel %vm85_vm0, %v8088_v19, %v16461_v31  ;;  %v2315_v38 = vsel %vm2266_vm4, %v2250_v49, %v16464_v17  ;;  %v2383_v20 = vsel %vm2331_vm5, %v2318_v54, %v16482_v37  ;;  %v16484_v29 = vld [vmem:[#allocation400_spill] sm:$0xff]  ;;  %v16485_v18 = vld [vmem:[#allocation401_spill] sm:$0xff]  ;;  %v16491_v56 = vld [vmem:[#allocation155_spill] sm:$0xff] }
 0x49b   :  { %v2316_v5 = vsel %vm2266_vm4, %v2251_v40, %v16465_v53  ;;  %v2380_v26 = vsel %vm2331_vm5, %v2315_v38, %v16469_v6  ;;  %v2448_v52 = vsel %vm2396_vm6, %v2383_v20, %v16486_v41  ;;  %v16487_v49 = vld [vmem:[#allocation368_spill] sm:$0xff]  ;;  %v16492_v35 = vld [vmem:[#allocation157_spill] sm:$0xff]  ;;  %v16495_v14 = vld [vmem:[#allocation263_spill] sm:$0xff] }
 0x49c   :  { %v2381_v30 = vsel %vm2331_vm5, %v2316_v5, %v16468_v61  ;;  %v2445_v59 = vsel %vm2396_vm6, %v2380_v26, %v16473_v11  ;;  %v2447_v19 = vsel %vm2396_vm6, %v2382_v58, %v16487_v49  ;;  %v8091_v43 = vld [vmem:[#allocation2 + $0x387] sm:$0xff]  ;;  %v8092_v16 = vld [vmem:[#allocation2 + $0x38f] sm:$0xff]  ;;  %v16493_v61 = vld [vmem:[#allocation158_spill] sm:$0xff] }
 0x49d   :  { %v2446_v27 = vsel %vm2396_vm6, %v2381_v30, %v16472_v57  ;;  %v2510_v22 = vsel %vm2461_vm7, %v2445_v59, %v16477_v42  ;;  %v2254_v9 = vsel %vm85_vm0, %v8091_v43, %v16488_v62  ;;  %v16489_v17 = vld [vmem:[#allocation60_spill] sm:$0xff]  ;;  %v2512_v10 = vsel %vm2461_vm7, %v2447_v19, %v16491_v56  ;;  %v16496_v34 = vld [vmem:[#allocation281_spill] sm:$0xff]  ;;  %v16498_v57 = vld [vmem:[#allocation402_spill] sm:$0xff] }
 0x49e   :  { %v2511_v50 = vsel %vm2461_vm7, %v2446_v27, %v16476_v39  ;;  %v2575_v7 = vsel %vm2526_vm8, %v2510_v22, %v16481_v0  ;;  %v2255_v38 = vsel %vm85_vm0, %v8092_v16, %v16489_v17  ;;  %v16490_v53 = vld [vmem:[#allocation156_spill] sm:$0xff]  ;;  %v2319_v15 = vsel %vm2266_vm4, %v2254_v9, %v16492_v35  ;;  %v16499_v11 = vld [vmem:[#allocation403_spill] sm:$0xff]  ;;  %v16500_v4 = vld [vmem:[#allocation369_spill] sm:$0xff] }
 0x49f   :  { %v2576_v33 = vsel %vm2526_vm8, %v2511_v50, %v16480_v45  ;;  %v2640_v60 = vsel %vm2591_vm9, %v2575_v7, %v16485_v18  ;;  %v2513_v5 = vsel %vm2461_vm7, %v2448_v52, %v16490_v53  ;;  %v2320_v30 = vsel %vm2266_vm4, %v2255_v38, %v16493_v61  ;;  %v16494_v6 = vld [vmem:[#allocation260_spill] sm:$0xff]  ;;  %v16501_v48 = vld [vmem:[#allocation370_spill] sm:$0xff]  ;;  %v16502_v50 = vld [vmem:[#allocation61_spill] sm:$0xff] }
 0x4a0   :  { %v2641_v47 = vsel %vm2591_vm9, %v2576_v33, %v16484_v29  ;;  %v2705_v40 = vsel %vm2656_vm10, %v2640_v60, %v2107_v25  ;;  %v2578_v26 = vsel %vm2526_vm8, %v2513_v5, %v16494_v6  ;;  %v2577_v36 = vsel %vm2526_vm8, %v2512_v10, %v16495_v14  ;;  %v8093_v39 = vld [vmem:[#allocation2 + $0x3a7] sm:$0xff]  ;;  %v8094_v22 = vld [vmem:[#allocation2 + $0x3af] sm:$0xff]  ;;  %v16503_v1 = vld [vmem:[#allocation62_spill] sm:$0xff] }
 0x4a1   :  { %v2706_v31 = vsel %vm2656_vm10, %v2641_v47, %v2109_v63  ;;  %6726 = vmatprep.mubr.msk.f32.mxu0 %vm2734_vm11, %v2705_v40  ;;  %v2385_v21 = vsel %vm2331_vm5, %v2320_v30, %v16496_v34  ;;  %v2384_v23 = vsel %vm2331_vm5, %v2319_v15, %v16497_v13  ;;  %v2643_v27 = vsel %vm2591_vm9, %v2578_v26, %v16498_v57  ;;  %v16504_v24 = vld [vmem:[#allocation160_spill] sm:$0xff]  ;;  %v16505_v45 = vld [vmem:[#allocation159_spill] sm:$0xff]  ;;  %v16506_v0 = vld [vmem:[#allocation161_spill] sm:$0xff]  ;;  %v2115_v40 = vpop.permute.xlu0 %2114 }
 0x4a2   :  { %v2642_v59 = vsel %vm2591_vm9, %v2577_v36, %v16499_v11  ;;  %6727 = vmatmul.mubr.msk.f32.gmra.mxu0 %vm2734_vm11, %v2706_v31  ;;  %v2450_v55 = vsel %vm2396_vm6, %v2385_v21, %v16500_v4  ;;  %v2449_v44 = vsel %vm2396_vm6, %v2384_v23, %v16501_v48  ;;  %v2708_v46 = vsel %vm2656_vm10, %v2643_v27, %v2113_v28  ;;  %v16507_v37 = vld [vmem:[#allocation162_spill] sm:$0xff]  ;;  %v16508_v51 = vld [vmem:[#allocation264_spill] sm:$0xff]  ;;  %v16509_v29 = vld [vmem:[#allocation267_spill] sm:$0xff]  ;;  %v2117_v31 = vpop.permute.xlu1 %2116 }
 0x4a3   :  { %v2707_v12 = vsel %vm2656_vm10, %v2642_v59, %v2111_v8  ;;  %v2256_v42 = vsel %vm85_vm0, %v8093_v39, %v16502_v50  ;;  %v2257_v3 = vsel %vm85_vm0, %v8094_v22, %v16503_v1  ;;  %v2515_v54 = vsel %vm2461_vm7, %v2450_v55, %v16504_v24  ;;  %v16510_v18 = vld [vmem:[#allocation285_spill] sm:$0xff]  ;;  %v16511_v63 = vld [vmem:[#allocation286_spill] sm:$0xff]  ;;  %v16512_v41 = vld [vmem:[#allocation404_spill] sm:$0xff] }
 0x4a4   :  { %v2514_v33 = vsel %vm2461_vm7, %v2449_v44, %v16505_v45  ;;  %6729 = vmatprep.mubr.msk.f32.mxu0 %vm2734_vm11, %v2707_v12  ;;  %v2321_v7 = vsel %vm2266_vm4, %v2256_v42, %v16506_v0  ;;  %v2322_v20 = vsel %vm2266_vm4, %v2257_v3, %v16507_v37  ;;  %v2580_v58 = vsel %vm2526_vm8, %v2515_v54, %v16508_v51  ;;  %v16513_v49 = vld [vmem:[#allocation405_spill] sm:$0xff]  ;;  %v16514_v43 = vld [vmem:[#allocation371_spill] sm:$0xff]  ;;  %v16515_v9 = vld [vmem:[#allocation372_spill] sm:$0xff] }
 0x4a5   :  { %v2579_v47 = vsel %vm2526_vm8, %v2514_v33, %v16509_v29  ;;  %v2387_v60 = vsel %vm2331_vm5, %v2322_v20, %v16510_v18  ;;  %v2386_v25 = vsel %vm2331_vm5, %v2321_v7, %v16511_v63  ;;  %v2645_v52 = vsel %vm2591_vm9, %v2580_v58, %v16512_v41  ;;  %v8095_v53 = vld [vmem:[#allocation2 + $0x3c7] sm:$0xff]  ;;  %v8096_v10 = vld [vmem:[#allocation2 + $0x3cf] sm:$0xff]  ;;  %v16521_v34 = vld [vmem:[#allocation166_spill] sm:$0xff]  ;;  %v2119_v12 = vpop.permute.xlu0 %2118 }
 0x4a6   :  { %v2644_v19 = vsel %vm2591_vm9, %v2579_v47, %v16513_v49  ;;  %6730 = vmatmul.mubr.msk.f32.gmra.mxu0 %vm2734_vm11, %v2708_v46  ;;  %v2452_v62 = vsel %vm2396_vm6, %v2387_v60, %v16514_v43  ;;  %v2451_v16 = vsel %vm2396_vm6, %v2386_v25, %v16515_v9  ;;  %v2710_v17 = vsel %vm2656_vm10, %v2645_v52, %v2117_v31  ;;  %v16516_v5 = vld [vmem:[#allocation63_spill] sm:$0xff]  ;;  %v16517_v35 = vld [vmem:[#allocation64_spill] sm:$0xff]  ;;  %v16520_v14 = vld [vmem:[#allocation165_spill] sm:$0xff]  ;;  %v2121_v46 = vpop.permute.xlu1 %2120 }
 0x4a7   :  { %v2709_v38 = vsel %vm2656_vm10, %v2644_v19, %v2115_v40  ;;  %v2258_v56 = vsel %vm85_vm0, %v8095_v53, %v16516_v5  ;;  %v2259_v15 = vsel %vm85_vm0, %v8096_v10, %v16517_v35  ;;  %v16518_v61 = vld [vmem:[#allocation164_spill] sm:$0xff]  ;;  %v16519_v6 = vld [vmem:[#allocation163_spill] sm:$0xff]  ;;  %v16524_v11 = vld [vmem:[#allocation289_spill] sm:$0xff] }
 0x4a8   :  { %v2517_v30 = vsel %vm2461_vm7, %v2452_v62, %v16518_v61  ;;  %v2516_v26 = vsel %vm2461_vm7, %v2451_v16, %v16519_v6  ;;  %6732 = vmatprep.mubr.msk.f32.mxu0 %vm2734_vm11, %v2709_v38  ;;  %v2323_v36 = vsel %vm2266_vm4, %v2258_v56, %v16520_v14  ;;  %v2324_v21 = vsel %vm2266_vm4, %v2259_v15, %v16521_v34  ;;  %v16522_v13 = vld [vmem:[#allocation268_spill] sm:$0xff]  ;;  %v16523_v57 = vld [vmem:[#allocation271_spill] sm:$0xff]  ;;  %v16525_v28 = vld [vmem:[#allocation290_spill] sm:$0xff] }
 0x4a9   :  { %v2582_v23 = vsel %vm2526_vm8, %v2517_v30, %v16522_v13  ;;  %v2581_v27 = vsel %vm2526_vm8, %v2516_v26, %v16523_v57  ;;  %v2389_v59 = vsel %vm2331_vm5, %v2324_v21, %v16524_v11  ;;  %v2388_v8 = vsel %vm2331_vm5, %v2323_v36, %v16525_v28  ;;  %v16526_v4 = vld [vmem:[#allocation406_spill] sm:$0xff]  ;;  %v16527_v48 = vld [vmem:[#allocation407_spill] sm:$0xff]  ;;  %v16528_v39 = vld [vmem:[#allocation373_spill] sm:$0xff]  ;;  %v2123_v38 = vpop.permute.xlu0 %2122 }
 0x4aa   :  { %v2647_v55 = vsel %vm2591_vm9, %v2582_v23, %v16526_v4  ;;  %v2646_v44 = vsel %vm2591_vm9, %v2581_v27, %v16527_v48  ;;  %6733 = vmatmul.mubr.msk.f32.gmra.mxu0 %vm2734_vm11, %v2710_v17  ;;  %v2454_v50 = vsel %vm2396_vm6, %v2389_v59, %v16528_v39  ;;  %v16529_v42 = vld [vmem:[#allocation374_spill] sm:$0xff]  ;;  %v8097_v24 = vld [vmem:[#allocation2 + $0x3e7] sm:$0xff]  ;;  %v16530_v54 = vld [vmem:[#allocation65_spill] sm:$0xff]  ;;  %v2125_v17 = vpop.permute.xlu1 %2124 }
 0x4ab   :  { %v2453_v22 = vsel %vm2396_vm6, %v2388_v8, %v16529_v42  ;;  %v2712_v1 = vsel %vm2656_vm10, %v2647_v55, %v2121_v46  ;;  %v2711_v3 = vsel %vm2656_vm10, %v2646_v44, %v2119_v12  ;;  %v2260_v45 = vsel %vm85_vm0, %v8097_v24, %v16530_v54  ;;  %v8098_v33 = vld [vmem:[#allocation2 + $0x3ef] sm:$0xff]  ;;  %v16531_v0 = vld [vmem:[#allocation66_spill] sm:$0xff]  ;;  %v16533_v51 = vld [vmem:[#allocation167_spill] sm:$0xff] }
 0x4ac   :  { %v2261_v7 = vsel %vm85_vm0, %v8098_v33, %v16531_v0  ;;  %v16532_v37 = vld [vmem:[#allocation168_spill] sm:$0xff]  ;;  %v2518_v58 = vsel %vm2461_vm7, %v2453_v22, %v16533_v51  ;;  %6735 = vmatprep.mubr.msk.f32.mxu0 %vm2734_vm11, %v2711_v3  ;;  %v16534_v29 = vld [vmem:[#allocation169_spill] sm:$0xff]  ;;  %v16535_v18 = vld [vmem:[#allocation170_spill] sm:$0xff] }
 0x4ad   :  { %v2519_v20 = vsel %vm2461_vm7, %v2454_v50, %v16532_v37  ;;  %v2325_v47 = vsel %vm2266_vm4, %v2260_v45, %v16534_v29  ;;  %v2326_v60 = vsel %vm2266_vm4, %v2261_v7, %v16535_v18  ;;  %v16536_v63 = vld [vmem:[#allocation272_spill] sm:$0xff]  ;;  %v16537_v41 = vld [vmem:[#allocation275_spill] sm:$0xff]  ;;  %v16538_v49 = vld [vmem:[#allocation293_spill] sm:$0xff]  ;;  %v2127_v3 = vpop.permute.xlu0 %2126 }
 0x4ae   :  { %v2584_v25 = vsel %vm2526_vm8, %v2519_v20, %v16536_v63  ;;  %v2583_v52 = vsel %vm2526_vm8, %v2518_v58, %v16537_v41  ;;  %v2391_v19 = vsel %vm2331_vm5, %v2326_v60, %v16538_v49  ;;  %v16539_v31 = vld [vmem:[#allocation294_spill] sm:$0xff]  ;;  %v16540_v43 = vld [vmem:[#allocation408_spill] sm:$0xff]  ;;  %v16541_v9 = vld [vmem:[#allocation409_spill] sm:$0xff]  ;;  %6736 = vmatmul.mubr.msk.f32.gmra.mxu0 %vm2734_vm11, %v2712_v1  ;;  %v2129_v1 = vpop.permute.xlu1 %2128 }
 0x4af   :  { %v2390_v40 = vsel %vm2331_vm5, %v2325_v47, %v16539_v31  ;;  %v2649_v62 = vsel %vm2591_vm9, %v2584_v25, %v16540_v43  ;;  %v2648_v16 = vsel %vm2591_vm9, %v2583_v52, %v16541_v9  ;;  %v16542_v53 = vld [vmem:[#allocation375_spill] sm:$0xff]  ;;  %v16543_v56 = vld [vmem:[#allocation376_spill] sm:$0xff]  ;;  %v16548_v57 = vld [vmem:[#allocation173_spill] sm:$0xff] }
 0x4b0   :  { %v2456_v5 = vsel %vm2396_vm6, %v2391_v19, %v16542_v53  ;;  %v2455_v10 = vsel %vm2396_vm6, %v2390_v40, %v16543_v56  ;;  %v2714_v35 = vsel %vm2656_vm10, %v2649_v62, %v2125_v17  ;;  %v2713_v15 = vsel %vm2656_vm10, %v2648_v16, %v2123_v38  ;;  %v8099_v61 = vld [vmem:[#allocation2 + $0x407] sm:$0xff]  ;;  %v8100_v26 = vld [vmem:[#allocation2 + $0x40f] sm:$0xff]  ;;  %v16549_v11 = vld [vmem:[#allocation174_spill] sm:$0xff] }
 0x4b1   :  { %v16544_v30 = vld [vmem:[#allocation67_spill] sm:$0xff]  ;;  %v16545_v14 = vld [vmem:[#allocation68_spill] sm:$0xff]  ;;  %6738 = vmatprep.mubr.msk.f32.mxu0 %vm2734_vm11, %v2713_v15  ;;  %v16552_v48 = vld [vmem:[#allocation297_spill] sm:$0xff]  ;;  %v2131_v15 = vpop.permute.xlu0 %2130 }
 0x4b2   :  { %v2262_v6 = vsel %vm85_vm0, %v8099_v61, %v16544_v30  ;;  %v2263_v36 = vsel %vm85_vm0, %v8100_v26, %v16545_v14  ;;  %v16546_v34 = vld [vmem:[#allocation172_spill] sm:$0xff]  ;;  %v16547_v13 = vld [vmem:[#allocation171_spill] sm:$0xff]  ;;  %v16553_v46 = vld [vmem:[#allocation298_spill] sm:$0xff]  ;;  %6739 = vmatmul.mubr.msk.f32.gmra.mxu0 %vm2734_vm11, %v2714_v35  ;;  %v2133_v35 = vpop.permute.xlu1 %2132 }
 0x4b3   :  { %v2521_v21 = vsel %vm2461_vm7, %v2456_v5, %v16546_v34  ;;  %v2520_v23 = vsel %vm2461_vm7, %v2455_v10, %v16547_v13  ;;  %v2327_v27 = vsel %vm2266_vm4, %v2262_v6, %v16548_v57  ;;  %v2328_v59 = vsel %vm2266_vm4, %v2263_v36, %v16549_v11  ;;  %v16550_v28 = vld [vmem:[#allocation276_spill] sm:$0xff]  ;;  %v16551_v4 = vld [vmem:[#allocation279_spill] sm:$0xff]  ;;  %v16554_v39 = vld [vmem:[#allocation410_spill] sm:$0xff] }
 0x4b4   :  { %v2586_v8 = vsel %vm2526_vm8, %v2521_v21, %v16550_v28  ;;  %v2585_v55 = vsel %vm2526_vm8, %v2520_v23, %v16551_v4  ;;  %v2393_v44 = vsel %vm2331_vm5, %v2328_v59, %v16552_v48  ;;  %v2392_v12 = vsel %vm2331_vm5, %v2327_v27, %v16553_v46  ;;  %v16555_v42 = vld [vmem:[#allocation411_spill] sm:$0xff]  ;;  %v16556_v24 = vld [vmem:[#allocation377_spill] sm:$0xff]  ;;  %v16557_v45 = vld [vmem:[#allocation378_spill] sm:$0xff] }
 0x4b5   :  { %v2651_v50 = vsel %vm2591_vm9, %v2586_v8, %v16554_v39  ;;  %v2650_v22 = vsel %vm2591_vm9, %v2585_v55, %v16555_v42  ;;  %v2458_v54 = vsel %vm2396_vm6, %v2393_v44, %v16556_v24  ;;  %v2457_v33 = vsel %vm2396_vm6, %v2392_v12, %v16557_v45  ;;  %v8101_v37 = vld [vmem:[#allocation2 + $0x427] sm:$0xff]  ;;  %v16558_v20 = vld [vmem:[#allocation69_spill] sm:$0xff]  ;;  %v16559_v29 = vld [vmem:[#allocation70_spill] sm:$0xff]  ;;  %v2135_v48 = vpop.permute.xlu0 %2134 }
 0x4b6   :  { %v2716_v0 = vsel %vm2656_vm10, %v2651_v50, %v2129_v1  ;;  %v2715_v7 = vsel %vm2656_vm10, %v2650_v22, %v2127_v3  ;;  %v2264_v51 = vsel %vm85_vm0, %v8101_v37, %v16558_v20  ;;  %v8102_v58 = vld [vmem:[#allocation2 + $0x42f] sm:$0xff]  ;;  %v16561_v63 = vld [vmem:[#allocation175_spill] sm:$0xff]  ;;  %v16563_v49 = vld [vmem:[#allocation178_spill] sm:$0xff]  ;;  %v2137_v55 = vpop.permute.xlu1 %2136 }
 0x4b7   :  { %v2265_v47 = vsel %vm85_vm0, %v8102_v58, %v16559_v29  ;;  %v16560_v18 = vld [vmem:[#allocation176_spill] sm:$0xff]  ;;  %v2522_v25 = vsel %vm2461_vm7, %v2457_v33, %v16561_v63  ;;  %6741 = vmatprep.mubr.msk.f32.mxu0 %vm2734_vm11, %v2715_v7  ;;  %v16562_v41 = vld [vmem:[#allocation177_spill] sm:$0xff]  ;;  %v16565_v43 = vld [vmem:[#allocation283_spill] sm:$0xff]  ;;  %vm5430_vm0 = vcmask 392192  }
 0x4b8   :  { %v2523_v60 = vsel %vm2461_vm7, %v2458_v54, %v16560_v18  ;;  %v2329_v52 = vsel %vm2266_vm4, %v2264_v51, %v16562_v41  ;;  %v2330_v19 = vsel %vm2266_vm4, %v2265_v47, %v16563_v49  ;;  %v16564_v31 = vld [vmem:[#allocation280_spill] sm:$0xff]  ;;  %v2587_v62 = vsel %vm2526_vm8, %v2522_v25, %v16565_v43  ;;  %v16566_v9 = vld [vmem:[#allocation301_spill] sm:$0xff]  ;;  %v16567_v17 = vld [vmem:[#allocation302_spill] sm:$0xff]  ;;  %6742 = vmatmul.mubr.msk.f32.gmra.mxu0 %vm2734_vm11, %v2716_v0 }
 0x4b9   :  { %v2588_v40 = vsel %vm2526_vm8, %v2523_v60, %v16564_v31  ;;  %v2395_v16 = vsel %vm2331_vm5, %v2330_v19, %v16566_v9  ;;  %v2394_v38 = vsel %vm2331_vm5, %v2329_v52, %v16567_v17  ;;  %v16568_v53 = vld [vmem:[#allocation7_spill] sm:$0xff]  ;;  %v16569_v56 = vld [vmem:[#allocation8_spill] sm:$0xff]  ;;  %v16576_v8 = vld [vmem:[#allocation9_spill] sm:$0xff]  ;;  %vm5690_vm4 = vcmask 916480  }
 0x4ba   :  { %v2653_v5 = vsel %vm2591_vm9, %v2588_v40, %v16568_v53  ;;  %v2652_v10 = vsel %vm2591_vm9, %v2587_v62, %v16569_v56  ;;  %v16570_v61 = vld [vmem:[#allocation379_spill] sm:$0xff]  ;;  %v16571_v6 = vld [vmem:[#allocation380_spill] sm:$0xff] }
 0x4bb   :  { %v2460_v30 = vsel %vm2396_vm6, %v2395_v16, %v16570_v61  ;;  %v2459_v26 = vsel %vm2396_vm6, %v2394_v38, %v16571_v6  ;;  %v2718_v14 = vsel %vm2656_vm10, %v2653_v5, %v2133_v35  ;;  %v2717_v36 = vsel %vm2656_vm10, %v2652_v10, %v2131_v15  ;;  %v16572_v34 = vld [vmem:[#allocation180_spill] sm:$0xff]  ;;  %v16573_v13 = vld [vmem:[#allocation179_spill] sm:$0xff] }
 0x4bc   :  { %v2525_v21 = vsel %vm2461_vm7, %v2460_v30, %v16572_v34  ;;  %v2524_v23 = vsel %vm2461_vm7, %v2459_v26, %v16573_v13  ;;  %6744 = vmatprep.mubr.msk.f32.mxu0 %vm2734_vm11, %v2717_v36  ;;  %v16574_v57 = vld [vmem:[#allocation284_spill] sm:$0xff]  ;;  %v16575_v11 = vld [vmem:[#allocation287_spill] sm:$0xff] }
 0x4bd   :  { %v2590_v27 = vsel %vm2526_vm8, %v2525_v21, %v16574_v57  ;;  %v2589_v59 = vsel %vm2526_vm8, %v2524_v23, %v16575_v11  ;;  %6745 = vmatmul.mubr.msk.f32.gmra.mxu0 %vm2734_vm11, %v2718_v14  ;;  %v12157_v12 = vld [vmem:[%s15104_s2] ss:$0 sm:$0xff]  ;;  %s8302_s2 = smov 32  }
 0x4be   :  { %v2655_v28 = vsel %vm2591_vm9, %v2590_v27, %v10948_v32  ;;  %v2654_v4 = vsel %vm2591_vm9, %v2589_v59, %v16576_v8 }
 0x4bf   :  { %v2720_v44 = vsel %vm2656_vm10, %v2655_v28, %v2137_v55  ;;  %v2719_v46 = vsel %vm2656_vm10, %v2654_v4, %v2135_v48 }
 0x4c0   :  { %6747 = vmatprep.mubr.msk.f32.mxu0 %vm2734_vm11, %v2719_v46 }
 0x4c1   :  { %6748 = vmatmul.mubr.msk.f32.gmra.mxu0 %vm2734_vm11, %v2720_v44 }
 0x4db   :  { %v6656_v32 = vpop.f32.mrf.mxu0 }
 0x4dc   :  { %v3003_v39 = vadd.f32 %v6656_v32, %v12157_v12 }
 0x4dd   :  { %v2997_v50 = vpop.f32.mrf.mxu0 }
 0x4de   :  { %v3317_v42 = vmax.f32 %v3003_v39, 0.0  ;;  %v2998_v22 = vadd.f32 %v12157_v12, %v2997_v50 }
 0x4e0   :  { %3470 = vst.msk [vmem:[#allocation3 + $0x30] sm:$0xff] %vm3380_vm12, %v3317_v42  ;;  %v3316_v3 = vmax.f32 %v2998_v22, 0.0 }
 0x4e1   :  { %v6659_v1 = vpop.f32.mrf.mxu0 }
 0x4e2   :  { %v3013_v24 = vadd.f32 %v6659_v1, %v12157_v12  ;;  %3469 = vst.msk [vmem:[#allocation3 + $0x28] sm:$0xff] %vm3380_vm12, %v3316_v3 }
 0x4e3   :  { %v3007_v54 = vpop.f32.mrf.mxu0 }
 0x4e4   :  { %v3319_v45 = vmax.f32 %v3013_v24, 0.0  ;;  %v3008_v33 = vadd.f32 %v12157_v12, %v3007_v54 }
 0x4e6   :  { %v6662_v0 = vpop.f32.mrf.mxu0  ;;  %3472 = vst.msk [vmem:[#allocation3 + $0x50] sm:$0xff] %vm3380_vm12, %v3319_v45  ;;  %v3318_v7 = vmax.f32 %v3008_v33, 0.0 }
 0x4e7   :  { %v3023_v37 = vadd.f32 %v6662_v0, %v12157_v12  ;;  %v3608_v25 = vld [vmem:[#allocation3 + $0x30] sm:$0xff] }
 0x4e8   :  { %v3017_v20 = vpop.f32.mrf.mxu0  ;;  %3471 = vst.msk [vmem:[#allocation3 + $0x48] sm:$0xff] %vm3380_vm12, %v3318_v7 }
 0x4e9   :  { %v3321_v51 = vmax.f32 %v3023_v37, 0.0  ;;  %v3018_v58 = vadd.f32 %v12157_v12, %v3017_v20  ;;  %v3607_v63 = vld [vmem:[#allocation3 + $0x28] sm:$0xff] }
 0x4ea   :  { %v6665_v29 = vpop.f32.mrf.mxu0  ;;  %v12173_v49 = vpack.i.bf16 %v3608_v25, %v3607_v63 }
 0x4eb   :  { %3474 = vst.msk [vmem:[#allocation3 + $0x70] sm:$0xff] %vm3380_vm12, %v3321_v51  ;;  %v3320_v47 = vmax.f32 %v3018_v58, 0.0  ;;  %v3033_v18 = vadd.f32 %v6665_v29, %v12157_v12 }
 0x4ec   :  { %v3027_v60 = vpop.f32.mrf.mxu0  ;;  %6811 = vrot.lane.b32.xlu1 %v12173_v49, %s8301_s17 }
 0x4ed   :  { %3473 = vst.msk [vmem:[#allocation3 + $0x68] sm:$0xff] %vm3380_vm12, %v3320_v47  ;;  %v3323_v41 = vmax.f32 %v3033_v18, 0.0  ;;  %v3028_v52 = vadd.f32 %v12157_v12, %v3027_v60  ;;  %v3610_v16 = vld [vmem:[#allocation3 + $0x50] sm:$0xff] }
 0x4ee   :  { %v6668_v19 = vpop.f32.mrf.mxu0 }
 0x4ef   :  { %3476 = vst.msk [vmem:[#allocation3 + $0x90] sm:$0xff] %vm3380_vm12, %v3323_v41  ;;  %v3322_v31 = vmax.f32 %v3028_v52, 0.0  ;;  %v3043_v40 = vadd.f32 %v6668_v19, %v12157_v12  ;;  %v12179_v62 = vld [vmem:[#allocation3 + $0x49] sm:$0xff] }
 0x4f0   :  { %v3037_v43 = vpop.f32.mrf.mxu0  ;;  %v3609_v9 = vld [vmem:[#allocation3 + $0x48] sm:$0xff]  ;;  %6508 = vmatprep.mubr.msk.f32.mxu0 %vm3380_vm12, %v12179_v62 }
 0x4f1   :  { %3475 = vst.msk [vmem:[#allocation3 + $0x88] sm:$0xff] %vm3380_vm12, %v3322_v31  ;;  %v3325_v17 = vmax.f32 %v3043_v40, 0.0  ;;  %v3038_v38 = vadd.f32 %v12157_v12, %v3037_v43  ;;  %v6815_v53 = vpack.i.bf16 %v3610_v16, %v3609_v9 }
 0x4f2   :  { %v6671_v5 = vpop.f32.mrf.mxu0  ;;  %v3612_v61 = vld [vmem:[#allocation3 + $0x70] sm:$0xff] }
 0x4f3   :  { %3478 = vst.msk [vmem:[#allocation3 + $0xb0] sm:$0xff] %vm3380_vm12, %v3325_v17  ;;  %v3324_v56 = vmax.f32 %v3038_v38, 0.0  ;;  %v3053_v10 = vadd.f32 %v6671_v5, %v12157_v12  ;;  %6816 = vrot.lane.b32.xlu0 %v6815_v53, %s8301_s17 }
 0x4f4   :  { %v3047_v35 = vpop.f32.mrf.mxu0  ;;  %v3611_v15 = vld [vmem:[#allocation3 + $0x68] sm:$0xff] }
 0x4f5   :  { %3477 = vst.msk [vmem:[#allocation3 + $0xa8] sm:$0xff] %vm3380_vm12, %v3324_v56  ;;  %v3327_v30 = vmax.f32 %v3053_v10, 0.0  ;;  %v3048_v6 = vadd.f32 %v12157_v12, %v3047_v35  ;;  %v6820_v26 = vpack.i.bf16 %v3612_v61, %v3611_v15 }
 0x4f6   :  { %v6674_v14 = vpop.f32.mrf.mxu0  ;;  %v3614_v23 = vld [vmem:[#allocation3 + $0x90] sm:$0xff] }
 0x4f7   :  { %3480 = vst.msk [vmem:[#allocation3 + $0xd0] sm:$0xff] %vm3380_vm12, %v3327_v30  ;;  %v3326_v36 = vmax.f32 %v3048_v6, 0.0  ;;  %v3063_v34 = vadd.f32 %v6674_v14, %v12157_v12  ;;  %6821 = vrot.lane.b32.xlu1 %v6820_v26, %s8301_s17 }
 0x4f8   :  { %v3057_v21 = vpop.f32.mrf.mxu0  ;;  %v3613_v13 = vld [vmem:[#allocation3 + $0x88] sm:$0xff] }
 0x4f9   :  { %3479 = vst.msk [vmem:[#allocation3 + $0xc8] sm:$0xff] %vm3380_vm12, %v3326_v36  ;;  %v3329_v57 = vmax.f32 %v3063_v34, 0.0  ;;  %v3058_v27 = vadd.f32 %v12157_v12, %v3057_v21  ;;  %v6825_v11 = vpack.i.bf16 %v3614_v23, %v3613_v13 }
 0x4fa   :  { %v6677_v59 = vpop.f32.mrf.mxu0  ;;  %v3616_v48 = vld [vmem:[#allocation3 + $0xb0] sm:$0xff] }
 0x4fb   :  { %3482 = vst.msk [vmem:[#allocation3 + $0xf0] sm:$0xff] %vm3380_vm12, %v3329_v57  ;;  %v3328_v28 = vmax.f32 %v3058_v27, 0.0  ;;  %v3073_v8 = vadd.f32 %v6677_v59, %v12157_v12  ;;  %6826 = vrot.lane.b32.xlu0 %v6825_v11, %s8301_s17 }
 0x4fc   :  { %v3067_v4 = vpop.f32.mrf.mxu0  ;;  %v3615_v55 = vld [vmem:[#allocation3 + $0xa8] sm:$0xff] }
 0x4fd   :  { %3481 = vst.msk [vmem:[#allocation3 + $0xe8] sm:$0xff] %vm3380_vm12, %v3328_v28  ;;  %v3331_v44 = vmax.f32 %v3073_v8, 0.0  ;;  %v3068_v46 = vadd.f32 %v12157_v12, %v3067_v4  ;;  %v6830_v32 = vpack.i.bf16 %v3616_v48, %v3615_v55 }
 0x4fe   :  { %v6680_v39 = vpop.f32.mrf.mxu0  ;;  %v3618_v3 = vld [vmem:[#allocation3 + $0xd0] sm:$0xff] }
 0x4ff   :  { %3484 = vst.msk [vmem:[#allocation3 + $0x110] sm:$0xff] %vm3380_vm12, %v3331_v44  ;;  %v3330_v50 = vmax.f32 %v3068_v46, 0.0  ;;  %v3083_v42 = vadd.f32 %v6680_v39, %v12157_v12  ;;  %6831 = vrot.lane.b32.xlu1 %v6830_v32, %s8301_s17 }
 0x500   :  { %v3077_v22 = vpop.f32.mrf.mxu0  ;;  %v3617_v1 = vld [vmem:[#allocation3 + $0xc8] sm:$0xff] }
 0x501   :  { %3483 = vst.msk [vmem:[#allocation3 + $0x108] sm:$0xff] %vm3380_vm12, %v3330_v50  ;;  %v3333_v24 = vmax.f32 %v3083_v42, 0.0  ;;  %v3078_v54 = vadd.f32 %v12157_v12, %v3077_v22  ;;  %v6835_v45 = vpack.i.bf16 %v3618_v3, %v3617_v1 }
 0x502   :  { %v3620_v51 = vld [vmem:[#allocation3 + $0xf0] sm:$0xff] }
 0x503   :  { %3486 = vst.msk [vmem:[#allocation3 + $0x130] sm:$0xff] %vm3380_vm12, %v3333_v24  ;;  %v3332_v0 = vmax.f32 %v3078_v54, 0.0  ;;  %6836 = vrot.lane.b32.xlu0 %v6835_v45, %s8301_s17 }
 0x504   :  { %v6683_v33 = vpop.f32.mrf.mxu0  ;;  %v3619_v20 = vld [vmem:[#allocation3 + $0xe8] sm:$0xff] }
 0x505   :  { %v3093_v7 = vadd.f32 %v6683_v33, %v12157_v12  ;;  %3485 = vst.msk [vmem:[#allocation3 + $0x128] sm:$0xff] %vm3380_vm12, %v3332_v0  ;;  %v6840_v47 = vpack.i.bf16 %v3620_v51, %v3619_v20 }
 0x506   :  { %v3087_v37 = vpop.f32.mrf.mxu0  ;;  %v3622_v52 = vld [vmem:[#allocation3 + $0x110] sm:$0xff] }
 0x507   :  { %v3335_v58 = vmax.f32 %v3093_v7, 0.0  ;;  %v3088_v29 = vadd.f32 %v12157_v12, %v3087_v37  ;;  %6841 = vrot.lane.b32.xlu1 %v6840_v47, %s8301_s17  ;;  %v3641_v47 = vld [vmem:[#allocation3 + $0x248] sm:$0xff] }
 0x508   :  { %v6686_v18 = vpop.f32.mrf.mxu0  ;;  %v3621_v41 = vld [vmem:[#allocation3 + $0x108] sm:$0xff] }
 0x509   :  { %3488 = vst.msk [vmem:[#allocation3 + $0x150] sm:$0xff] %vm3380_vm12, %v3335_v58  ;;  %v3334_v60 = vmax.f32 %v3088_v29, 0.0  ;;  %v3103_v63 = vadd.f32 %v6686_v18, %v12157_v12  ;;  %v6845_v40 = vpack.i.bf16 %v3622_v52, %v3621_v41  ;;  %v3642_v41 = vld [vmem:[#allocation3 + $0x250] sm:$0xff] }
 0x50a   :  { %v3097_v25 = vpop.f32.mrf.mxu0  ;;  %v3624_v53 = vld [vmem:[#allocation3 + $0x130] sm:$0xff] }
 0x50b   :  { %3487 = vst.msk [vmem:[#allocation3 + $0x148] sm:$0xff] %vm3380_vm12, %v3334_v60  ;;  %v3337_v19 = vmax.f32 %v3103_v63, 0.0  ;;  %v3098_v31 = vadd.f32 %v12157_v12, %v3097_v25  ;;  %6846 = vrot.lane.b32.xlu0 %v6845_v40, %s8301_s17 }
 0x50c   :  { %v3623_v38 = vld [vmem:[#allocation3 + $0x128] sm:$0xff] }
 0x50d   :  { %3490 = vst.msk [vmem:[#allocation3 + $0x170] sm:$0xff] %vm3380_vm12, %v3337_v19  ;;  %v3336_v9 = vmax.f32 %v3098_v31, 0.0  ;;  %v6850_v10 = vpack.i.bf16 %v3624_v53, %v3623_v38 }
 0x50e   :  { %v6689_v43 = vpop.f32.mrf.mxu0 }
 0x50f   :  { %v3113_v16 = vadd.f32 %v6689_v43, %v12157_v12  ;;  %3489 = vst.msk [vmem:[#allocation3 + $0x168] sm:$0xff] %vm3380_vm12, %v3336_v9  ;;  %6851 = vrot.lane.b32.xlu1 %v6850_v10, %s8301_s17 }
 0x510   :  { %v3107_v17 = vpop.f32.mrf.mxu0  ;;  %v3626_v26 = vld [vmem:[#allocation3 + $0x150] sm:$0xff] }
 0x511   :  { %v3339_v5 = vmax.f32 %v3113_v16, 0.0  ;;  %v3108_v56 = vadd.f32 %v12157_v12, %v3107_v17  ;;  %v6885_v17 = vpack.i.bf16 %v3642_v41, %v3641_v47 }
 0x512   :  { %v3625_v6 = vld [vmem:[#allocation3 + $0x148] sm:$0xff] }
 0x513   :  { %v6692_v35 = vpop.f32.mrf.mxu0  ;;  %3492 = vst.msk [vmem:[#allocation3 + $0x190] sm:$0xff] %vm3380_vm12, %v3339_v5  ;;  %v3338_v15 = vmax.f32 %v3108_v56, 0.0  ;;  %v6855_v34 = vpack.i.bf16 %v3626_v26, %v3625_v6 }
 0x514   :  { %v3123_v61 = vadd.f32 %v6692_v35, %v12157_v12  ;;  %v12225_v13 = vld [vmem:[#allocation3 + $0x171] sm:$0xff] }
 0x515   :  { %v3117_v30 = vpop.f32.mrf.mxu0  ;;  %3491 = vst.msk [vmem:[#allocation3 + $0x188] sm:$0xff] %vm3380_vm12, %v3338_v15  ;;  %6527 = vmatprep.mubr.msk.f32.mxu1 %vm3380_vm12, %v12225_v13  ;;  %6856 = vrot.lane.b32.xlu0 %v6855_v34, %s8301_s17  ;;  %v12232_v59 = vld [vmem:[#allocation3 + $0x170] sm:$0xff] }
 0x516   :  { %v3341_v14 = vmax.f32 %v3123_v61, 0.0  ;;  %v3118_v36 = vadd.f32 %v12157_v12, %v3117_v30  ;;  %v3627_v11 = vld [vmem:[#allocation3 + $0x168] sm:$0xff] }
 0x517   :  { %v12237_v4 = vpack.i.bf16 %v12232_v59, %v3627_v11 }
 0x518   :  { %v6695_v21 = vpop.f32.mrf.mxu0  ;;  %3494 = vst.msk [vmem:[#allocation3 + $0x1b0] sm:$0xff] %vm3380_vm12, %v3341_v14  ;;  %v3340_v23 = vmax.f32 %v3118_v36, 0.0 }
 0x519   :  { %v3133_v57 = vadd.f32 %v6695_v21, %v12157_v12  ;;  %6861 = vrot.lane.b32.xlu1 %v12237_v4, %s8301_s17 }
 0x51a   :  { %v3127_v27 = vpop.f32.mrf.mxu0  ;;  %3493 = vst.msk [vmem:[#allocation3 + $0x1a8] sm:$0xff] %vm3380_vm12, %v3340_v23  ;;  %v12245_v39 = vld [vmem:[#allocation3 + $0x190] sm:$0xff] }
 0x51b   :  { %v3343_v28 = vmax.f32 %v3133_v57, 0.0  ;;  %v3128_v8 = vadd.f32 %v12157_v12, %v3127_v27 }
 0x51c   :  { %v12243_v32 = vld [vmem:[#allocation3 + $0x188] sm:$0xff] }
 0x51d   :  { %v6698_v55 = vpop.f32.mrf.mxu0  ;;  %3496 = vst.msk [vmem:[#allocation3 + $0x1d0] sm:$0xff] %vm3380_vm12, %v3343_v28  ;;  %v3342_v48 = vmax.f32 %v3128_v8, 0.0  ;;  %v12251_v22 = vpack.i.bf16 %v12245_v39, %v12243_v32 }
 0x51e   :  { %v3143_v44 = vadd.f32 %v6698_v55, %v12157_v12 }
 0x51f   :  { %v3137_v46 = vpop.f32.mrf.mxu0  ;;  %3495 = vst.msk [vmem:[#allocation3 + $0x1c8] sm:$0xff] %vm3380_vm12, %v3342_v48  ;;  %6866 = vrot.lane.b32.xlu0 %v12251_v22, %s8301_s17  ;;  %v12261_v0 = vld [vmem:[#allocation3 + $0x1b0] sm:$0xff] }
 0x520   :  { %v3345_v50 = vmax.f32 %v3143_v44, 0.0  ;;  %v3138_v42 = vadd.f32 %v12157_v12, %v3137_v46 }
 0x521   :  { %v12259_v33 = vld [vmem:[#allocation3 + $0x1a8] sm:$0xff] }
 0x522   :  { %v6701_v1 = vpop.f32.mrf.mxu0  ;;  %3498 = vst.msk [vmem:[#allocation3 + $0x1f0] sm:$0xff] %vm3380_vm12, %v3345_v50  ;;  %v3344_v24 = vmax.f32 %v3138_v42, 0.0  ;;  %v12267_v20 = vpack.i.bf16 %v12261_v0, %v12259_v33 }
 0x523   :  { %v3153_v54 = vadd.f32 %v6701_v1, %v12157_v12 }
 0x524   :  { %v3147_v45 = vpop.f32.mrf.mxu0  ;;  %3497 = vst.msk [vmem:[#allocation3 + $0x1e8] sm:$0xff] %vm3380_vm12, %v3344_v24  ;;  %6871 = vrot.lane.b32.xlu1 %v12267_v20, %s8301_s17  ;;  %v12277_v25 = vld [vmem:[#allocation3 + $0x1d0] sm:$0xff] }
 0x525   :  { %v3347_v7 = vmax.f32 %v3153_v54, 0.0  ;;  %v3148_v37 = vadd.f32 %v12157_v12, %v3147_v45 }
 0x526   :  { %v12275_v63 = vld [vmem:[#allocation3 + $0x1c8] sm:$0xff] }
 0x527   :  { %v6704_v51 = vpop.f32.mrf.mxu0  ;;  %3500 = vst.msk [vmem:[#allocation3 + $0x210] sm:$0xff] %vm3380_vm12, %v3347_v7  ;;  %v3346_v58 = vmax.f32 %v3148_v37, 0.0  ;;  %v12283_v31 = vpack.i.bf16 %v12277_v25, %v12275_v63 }
 0x528   :  { %v3163_v29 = vadd.f32 %v6704_v51, %v12157_v12 }
 0x529   :  { %v3157_v60 = vpop.f32.mrf.mxu0  ;;  %3499 = vst.msk [vmem:[#allocation3 + $0x208] sm:$0xff] %vm3380_vm12, %v3346_v58  ;;  %6876 = vrot.lane.b32.xlu0 %v12283_v31, %s8301_s17  ;;  %v3636_v5 = vld [vmem:[#allocation3 + $0x1f0] sm:$0xff] }
 0x52a   :  { %v3349_v52 = vmax.f32 %v3163_v29, 0.0  ;;  %v3158_v19 = vadd.f32 %v12157_v12, %v3157_v60 }
 0x52b   :  { %v12291_v53 = vld [vmem:[#allocation3 + $0x1e8] sm:$0xff] }
 0x52c   :  { %3502 = vst.msk [vmem:[#allocation3 + $0x270] sm:$0xff] %vm3380_vm12, %v3349_v52  ;;  %v3348_v9 = vmax.f32 %v3158_v19, 0.0  ;;  %v12296_v35 = vpack.i.bf16 %v3636_v5, %v12291_v53 }
 0x52d   :  { %v6707_v40 = vpop.f32.mrf.mxu0  ;;  %6886 = vrot.lane.b32.xlu0 %v6885_v17, %s8301_s17 }
 0x52e   :  { %v3173_v16 = vadd.f32 %v6707_v40, %v12157_v12  ;;  %3501 = vst.msk [vmem:[#allocation3 + $0x268] sm:$0xff] %vm3380_vm12, %v3348_v9  ;;  %6881 = vrot.lane.b32.xlu1 %v12296_v35, %s8301_s17 }
 0x52f   :  { %v3167_v38 = vpop.f32.mrf.mxu0 }
 0x530   :  { %v3351_v56 = vmax.f32 %v3173_v16, 0.0  ;;  %v3168_v10 = vadd.f32 %v12157_v12, %v3167_v38 }
 0x531   :  { %v6710_v15 = vpop.f32.mrf.mxu0 }
 0x532   :  { %3504 = vst.msk [vmem:[#allocation3 + $0x290] sm:$0xff] %vm3380_vm12, %v3351_v56  ;;  %v3350_v61 = vmax.f32 %v3168_v10, 0.0  ;;  %v3183_v30 = vadd.f32 %v6710_v15, %v12157_v12 }
 0x533   :  { %v3177_v26 = vpop.f32.mrf.mxu0  ;;  %v3644_v11 = vld [vmem:[#allocation3 + $0x270] sm:$0xff] }
 0x534   :  { %3503 = vst.msk [vmem:[#allocation3 + $0x288] sm:$0xff] %vm3380_vm12, %v3350_v61  ;;  %v3353_v14 = vmax.f32 %v3183_v30, 0.0  ;;  %v3178_v36 = vadd.f32 %v12157_v12, %v3177_v26  ;;  %v3690_v30 = vld [vmem:[#allocation3 + $0xd1] sm:$0xff] }
 0x535   :  { %v3643_v27 = vld [vmem:[#allocation3 + $0x268] sm:$0xff]  ;;  %v12522_v6 = vld [vmem:[#allocation3 + $0x271] sm:$0xff] }
 0x536   :  { %3506 = vst.msk [vmem:[#allocation3 + $0x2b0] sm:$0xff] %vm3380_vm12, %v3353_v14  ;;  %v3352_v21 = vmax.f32 %v3178_v36, 0.0  ;;  %v12311_v55 = vpack.i.bf16 %v3644_v11, %v3643_v27 }
 0x537   :  { %v6713_v34 = vpop.f32.mrf.mxu0 }
 0x538   :  { %v3193_v23 = vadd.f32 %v6713_v34, %v12157_v12  ;;  %3505 = vst.msk [vmem:[#allocation3 + $0x2a8] sm:$0xff] %vm3380_vm12, %v3352_v21  ;;  %6891 = vrot.lane.b32.xlu1 %v12311_v55, %s8301_s17 }
 0x539   :  { %v3187_v57 = vpop.f32.mrf.mxu0  ;;  %v12317_v1 = vld [vmem:[#allocation3 + $0x290] sm:$0xff] }
 0x53a   :  { %v3355_v28 = vmax.f32 %v3193_v23, 0.0  ;;  %v3188_v8 = vadd.f32 %v12157_v12, %v3187_v57  ;;  %v12524_v43 = vld [vmem:[#allocation3 + $0x291] sm:$0xff] }
 0x53b   :  { %v3645_v42 = vld [vmem:[#allocation3 + $0x288] sm:$0xff] }
 0x53c   :  { %3508 = vst.msk [vmem:[#allocation3 + $0x2d0] sm:$0xff] %vm3380_vm12, %v3355_v28  ;;  %v3354_v44 = vmax.f32 %v3188_v8, 0.0  ;;  %v12322_v45 = vpack.i.bf16 %v12317_v1, %v3645_v42  ;;  %v3689_v28 = vld [vmem:[#allocation3 + $0xc9] sm:$0xff] }
 0x53d   :  { %v12330_v47 = vld [vmem:[#allocation3 + $0x2b0] sm:$0xff] }
 0x53e   :  { %3507 = vst.msk [vmem:[#allocation3 + $0x2c8] sm:$0xff] %vm3380_vm12, %v3354_v44  ;;  %6896 = vrot.lane.b32.xlu0 %v12322_v45, %s8301_s17  ;;  %16577 = vst [vmem:[#allocation10_spill] sm:$0xff] %v12330_v47  ;;  %v12518_v16 = vld [vmem:[#allocation3 + $0x289] sm:$0xff] }
 0x53f   :  { %v12328_v29 = vld [vmem:[#allocation3 + $0x2a8] sm:$0xff] }
 0x540   :  { %v6716_v48 = vpop.f32.mrf.mxu0  ;;  %v12336_v52 = vpack.i.bf16 %v12330_v47, %v12328_v29 }
 0x541   :  { %v3203_v46 = vadd.f32 %v6716_v48, %v12157_v12 }
 0x542   :  { %v3197_v50 = vpop.f32.mrf.mxu0  ;;  %6901 = vrot.lane.b32.xlu1 %v12336_v52, %s8301_s17 }
 0x543   :  { %v3357_v24 = vmax.f32 %v3203_v46, 0.0  ;;  %v3198_v54 = vadd.f32 %v12157_v12, %v3197_v50  ;;  %v12346_v5 = vld [vmem:[#allocation3 + $0x2d0] sm:$0xff] }
 0x544   :  { %16579 = vst [vmem:[#allocation12_spill] sm:$0xff] %v12346_v5 }
 0x545   :  { %3510 = vst.msk [vmem:[#allocation3 + $0x2f0] sm:$0xff] %vm3380_vm12, %v3357_v24  ;;  %v3356_v37 = vmax.f32 %v3198_v54, 0.0  ;;  %v12344_v38 = vld [vmem:[#allocation3 + $0x2c8] sm:$0xff] }
 0x546   :  { %16578 = vst [vmem:[#allocation11_spill] sm:$0xff] %v12344_v38  ;;  %v12352_v15 = vpack.i.bf16 %v12346_v5, %v12344_v38  ;;  %v12770_v5 = vld [vmem:[#allocation3 + $0x28f] sm:$0xff] }
 0x547   :  { %3509 = vst.msk [vmem:[#allocation3 + $0x2e8] sm:$0xff] %vm3380_vm12, %v3356_v37  ;;  %v3687_v37 = vld [vmem:[#allocation3 + $0xa9] sm:$0xff] }
 0x548   :  { %v6719_v7 = vpop.f32.mrf.mxu0  ;;  %6906 = vrot.lane.b32.xlu0 %v12352_v15, %s8301_s17 }
 0x549   :  { %v3213_v51 = vadd.f32 %v6719_v7, %v12157_v12 }
 0x54a   :  { %v3207_v58 = vpop.f32.mrf.mxu0 }
 0x54b   :  { %v3359_v60 = vmax.f32 %v3213_v51, 0.0  ;;  %v3208_v41 = vadd.f32 %v12157_v12, %v3207_v58 }
 0x54c   :  { %v12362_v21 = vld [vmem:[#allocation3 + $0x2f0] sm:$0xff] }
 0x54d   :  { %3512 = vst.msk [vmem:[#allocation3 + $0x310] sm:$0xff] %vm3380_vm12, %v3359_v60  ;;  %v3358_v40 = vmax.f32 %v3208_v41, 0.0  ;;  %16581 = vst [vmem:[#allocation14_spill] sm:$0xff] %v12362_v21 }
 0x54e   :  { %v12360_v34 = vld [vmem:[#allocation3 + $0x2e8] sm:$0xff] }
 0x54f   :  { %3511 = vst.msk [vmem:[#allocation3 + $0x308] sm:$0xff] %vm3380_vm12, %v3358_v40  ;;  %16580 = vst [vmem:[#allocation13_spill] sm:$0xff] %v12360_v34  ;;  %v12368_v27 = vpack.i.bf16 %v12362_v21, %v12360_v34  ;;  %v12758_v21 = vld [vmem:[#allocation3 + $0x20f] sm:$0xff]  ;;  %v12772_v34 = vld [vmem:[#allocation3 + $0x2a7] sm:$0xff] }
 0x550   :  { %v6722_v19 = vpop.f32.mrf.mxu0 }
 0x551   :  { %v3223_v9 = vadd.f32 %v6722_v19, %v12157_v12  ;;  %16582 = vst [vmem:[#allocation15_spill] sm:$0xff] %v12368_v27  ;;  %6911 = vrot.lane.b32.xlu1 %v12368_v27, %s8301_s17  ;;  %v12756_v27 = vld [vmem:[#allocation3 + $0x207] sm:$0xff] }
 0x552   :  { %v3217_v17 = vpop.f32.mrf.mxu0 }
 0x553   :  { %v3361_v56 = vmax.f32 %v3223_v9, 0.0  ;;  %v3218_v10 = vadd.f32 %v12157_v12, %v3217_v17 }
 0x554   :  { %v12378_v50 = vld [vmem:[#allocation3 + $0x310] sm:$0xff] }
 0x555   :  { %3514 = vst.msk [vmem:[#allocation3 + $0x330] sm:$0xff] %vm3380_vm12, %v3361_v56  ;;  %v3360_v26 = vmax.f32 %v3218_v10, 0.0  ;;  %16584 = vst [vmem:[#allocation72_spill] sm:$0xff] %v12378_v50 }
 0x556   :  { %v6725_v61 = vpop.f32.mrf.mxu0  ;;  %v12376_v46 = vld [vmem:[#allocation3 + $0x308] sm:$0xff] }
 0x557   :  { %v3233_v14 = vadd.f32 %v6725_v61, %v12157_v12  ;;  %3513 = vst.msk [vmem:[#allocation3 + $0x328] sm:$0xff] %vm3380_vm12, %v3360_v26  ;;  %16583 = vst [vmem:[#allocation71_spill] sm:$0xff] %v12376_v46  ;;  %v12384_v54 = vpack.i.bf16 %v12378_v50, %v12376_v46  ;;  %v7200_v46 = vpack.i.bf16 %v12758_v21, %v12756_v27  ;;  %v12806_v47 = vld [vmem:[#allocation3 + $0x30f] sm:$0xff] }
 0x558   :  { %v3227_v36 = vpop.f32.mrf.mxu0  ;;  %16673 = vst [vmem:[#allocation31_spill] sm:$0xff] %v12806_v47 }
 0x559   :  { %v3363_v23 = vmax.f32 %v3233_v14, 0.0  ;;  %v3228_v57 = vadd.f32 %v12157_v12, %v3227_v36  ;;  %16585 = vst [vmem:[#allocation16_spill] sm:$0xff] %v12384_v54  ;;  %6916 = vrot.lane.b32.xlu0 %v12384_v54, %s8301_s17 }
 0x55b   :  { %3516 = vst.msk [vmem:[#allocation3 + $0x350] sm:$0xff] %vm3380_vm12, %v3363_v23  ;;  %v3362_v8 = vmax.f32 %v3228_v57, 0.0 }
 0x55c   :  { %v12394_v19 = vld [vmem:[#allocation3 + $0x330] sm:$0xff] }
 0x55d   :  { %3515 = vst.msk [vmem:[#allocation3 + $0x348] sm:$0xff] %vm3380_vm12, %v3362_v8  ;;  %16587 = vst [vmem:[#allocation182_spill] sm:$0xff] %v12394_v19 }
 0x55e   :  { %v12392_v41 = vld [vmem:[#allocation3 + $0x328] sm:$0xff] }
 0x55f   :  { %16586 = vst [vmem:[#allocation181_spill] sm:$0xff] %v12392_v41  ;;  %v12400_v17 = vpack.i.bf16 %v12394_v19, %v12392_v41  ;;  %v12744_v41 = vld [vmem:[#allocation3 + $0x1ef] sm:$0xff]  ;;  %v12808_v38 = vld [vmem:[#allocation3 + $0x327] sm:$0xff] }
 0x560   :  { %16674 = vst [vmem:[#allocation32_spill] sm:$0xff] %v12808_v38 }
 0x561   :  { %16588 = vst [vmem:[#allocation17_spill] sm:$0xff] %v12400_v17  ;;  %6921 = vrot.lane.b32.xlu1 %v12400_v17, %s8301_s17 }
 0x562   :  { %v6728_v11 = vpop.f32.mrf.mxu0  ;;  %v3658_v23 = vld [vmem:[#allocation3 + $0x350] sm:$0xff] }
 0x563   :  { %v3243_v48 = vadd.f32 %v6728_v11, %v12157_v12 }
 0x564   :  { %v3237_v44 = vpop.f32.mrf.mxu0  ;;  %v12408_v36 = vld [vmem:[#allocation3 + $0x348] sm:$0xff] }
 0x565   :  { %v3365_v42 = vmax.f32 %v3243_v48, 0.0  ;;  %v3238_v24 = vadd.f32 %v12157_v12, %v3237_v44  ;;  %16589 = vst [vmem:[#allocation305_spill] sm:$0xff] %v12408_v36  ;;  %v12413_v8 = vpack.i.bf16 %v3658_v23, %v12408_v36 }
 0x566   :  { %v6731_v7 = vpop.f32.mrf.mxu0 }
 0x567   :  { %3518 = vst.msk [vmem:[#allocation3 + $0x370] sm:$0xff] %vm3380_vm12, %v3365_v42  ;;  %v3364_v51 = vmax.f32 %v3238_v24, 0.0  ;;  %v3253_v58 = vadd.f32 %v6731_v7, %v12157_v12  ;;  %16590 = vst [vmem:[#allocation306_spill] sm:$0xff] %v12413_v8  ;;  %6926 = vrot.lane.b32.xlu0 %v12413_v8, %s8301_s17 }
 0x568   :  { %v3247_v60 = vpop.f32.mrf.mxu0 }
 0x569   :  { %3517 = vst.msk [vmem:[#allocation3 + $0x368] sm:$0xff] %vm3380_vm12, %v3364_v51  ;;  %v3367_v40 = vmax.f32 %v3253_v58, 0.0  ;;  %v3248_v9 = vadd.f32 %v12157_v12, %v3247_v60 }
 0x56a   :  { %v6734_v56 = vpop.f32.mrf.mxu0 }
 0x56b   :  { %3520 = vst.msk [vmem:[#allocation3 + $0x390] sm:$0xff] %vm3380_vm12, %v3367_v40  ;;  %v3366_v61 = vmax.f32 %v3248_v9, 0.0  ;;  %v3263_v26 = vadd.f32 %v6734_v56, %v12157_v12 }
 0x56c   :  { %v3257_v14 = vpop.f32.mrf.mxu0 }
 0x56d   :  { %3519 = vst.msk [vmem:[#allocation3 + $0x388] sm:$0xff] %vm3380_vm12, %v3366_v61  ;;  %v3369_v57 = vmax.f32 %v3263_v26, 0.0  ;;  %v3258_v11 = vadd.f32 %v12157_v12, %v3257_v14 }
 0x56e   :  { %v6737_v48 = vpop.f32.mrf.mxu0  ;;  %v3660_v58 = vld [vmem:[#allocation3 + $0x370] sm:$0xff] }
 0x56f   :  { %3522 = vst.msk [vmem:[#allocation3 + $0x3b0] sm:$0xff] %vm3380_vm12, %v3369_v57  ;;  %v3368_v42 = vmax.f32 %v3258_v11, 0.0  ;;  %v3273_v24 = vadd.f32 %v6737_v48, %v12157_v12 }
 0x570   :  { %v3267_v7 = vpop.f32.mrf.mxu0  ;;  %v3659_v51 = vld [vmem:[#allocation3 + $0x368] sm:$0xff] }
 0x571   :  { %3521 = vst.msk [vmem:[#allocation3 + $0x3a8] sm:$0xff] %vm3380_vm12, %v3368_v42  ;;  %v3371_v60 = vmax.f32 %v3273_v24, 0.0  ;;  %v3268_v40 = vadd.f32 %v12157_v12, %v3267_v7  ;;  %v12423_v9 = vpack.i.bf16 %v3660_v58, %v3659_v51  ;;  %v12574_v19 = vld [vmem:[#allocation3 + $0x369] sm:$0xff] }
 0x572   :  { %v6740_v56 = vpop.f32.mrf.mxu0  ;;  %v3662_v57 = vld [vmem:[#allocation3 + $0x390] sm:$0xff]  ;;  %16610 = vst [vmem:[#allocation317_spill] sm:$0xff] %v12574_v19 }
 0x573   :  { %16591 = vst [vmem:[#allocation74_spill] sm:$0xff] %v12423_v9  ;;  %3524 = vst.msk [vmem:[#allocation3 + $0x3d0] sm:$0xff] %vm3380_vm12, %v3371_v60  ;;  %v3370_v61 = vmax.f32 %v3268_v40, 0.0  ;;  %v3283_v26 = vadd.f32 %v6740_v56, %v12157_v12  ;;  %6931 = vrot.lane.b32.xlu1 %v12423_v9, %s8301_s17  ;;  %v12568_v9 = vpop.permute.xlu0 %6806 }
 0x574   :  { %v3277_v14 = vpop.f32.mrf.mxu0  ;;  %v3661_v23 = vld [vmem:[#allocation3 + $0x388] sm:$0xff]  ;;  %16609 = vst [vmem:[#allocation316_spill] sm:$0xff] %v12568_v9 }
 0x575   :  { %3523 = vst.msk [vmem:[#allocation3 + $0x3c8] sm:$0xff] %vm3380_vm12, %v3370_v61  ;;  %v3373_v11 = vmax.f32 %v3283_v26, 0.0  ;;  %v3278_v48 = vadd.f32 %v12157_v12, %v3277_v14  ;;  %v12431_v42 = vpack.i.bf16 %v3662_v57, %v3661_v23  ;;  %v12576_v36 = vld [vmem:[#allocation3 + $0x389] sm:$0xff] }
 0x576   :  { %v3664_v40 = vld [vmem:[#allocation3 + $0x3b0] sm:$0xff]  ;;  %16611 = vst [vmem:[#allocation20_spill] sm:$0xff] %v12576_v36 }
 0x577   :  { %16592 = vst [vmem:[#allocation73_spill] sm:$0xff] %v12431_v42  ;;  %3526 = vst.msk [vmem:[#allocation3 + $0x3f0] sm:$0xff] %vm3380_vm12, %v3373_v11  ;;  %v3372_v7 = vmax.f32 %v3278_v48, 0.0  ;;  %6936 = vrot.lane.b32.xlu0 %v12431_v42, %s8301_s17  ;;  %v12560_v42 = vld [vmem:[#allocation3 + $0x349] sm:$0xff] }
 0x578   :  { %v6743_v24 = vpop.f32.mrf.mxu0  ;;  %v3663_v60 = vld [vmem:[#allocation3 + $0x3a8] sm:$0xff]  ;;  %16606 = vst [vmem:[#allocation78_spill] sm:$0xff] %v12560_v42 }
 0x579   :  { %v3293_v51 = vadd.f32 %v6743_v24, %v12157_v12  ;;  %3525 = vst.msk [vmem:[#allocation3 + $0x3e8] sm:$0xff] %vm3380_vm12, %v3372_v7  ;;  %v12439_v26 = vpack.i.bf16 %v3664_v40, %v3663_v60  ;;  %v12588_v54 = vld [vmem:[#allocation3 + $0x3a9] sm:$0xff] }
 0x57a   :  { %v3287_v58 = vpop.f32.mrf.mxu0  ;;  %v3666_v24 = vld [vmem:[#allocation3 + $0x3d0] sm:$0xff]  ;;  %16614 = vst [vmem:[#allocation195_spill] sm:$0xff] %v12588_v54 }
 0x57b   :  { %v3375_v56 = vmax.f32 %v3293_v51, 0.0  ;;  %v3288_v61 = vadd.f32 %v12157_v12, %v3287_v58  ;;  %16593 = vst [vmem:[#allocation185_spill] sm:$0xff] %v12439_v26  ;;  %6941 = vrot.lane.b32.xlu1 %v12439_v26, %s8301_s17  ;;  %v12558_v26 = vld [vmem:[#allocation3 + $0x329] sm:$0xff] }
 0x57c   :  { %v3665_v48 = vld [vmem:[#allocation3 + $0x3c8] sm:$0xff]  ;;  %16605 = vst [vmem:[#allocation77_spill] sm:$0xff] %v12558_v26 }
 0x57d   :  { %v6746_v14 = vpop.f32.mrf.mxu0  ;;  %3528 = vst.msk [vmem:[#allocation3 + $0x410] sm:$0xff] %vm3380_vm12, %v3375_v56  ;;  %v3374_v23 = vmax.f32 %v3288_v61, 0.0  ;;  %v12447_v58 = vpack.i.bf16 %v3666_v24, %v3665_v48  ;;  %v3677_v24 = vld [vmem:[#allocation3 + $0x9] sm:$0xff] }
 0x57e   :  { %v3303_v57 = vadd.f32 %v6746_v14, %v12157_v12  ;;  %v3668_v44 = vld [vmem:[#allocation3 + $0x3f0] sm:$0xff] }
 0x57f   :  { %v3297_v11 = vpop.f32.mrf.mxu0  ;;  %3527 = vst.msk [vmem:[#allocation3 + $0x408] sm:$0xff] %vm3380_vm12, %v3374_v23  ;;  %16594 = vst [vmem:[#allocation186_spill] sm:$0xff] %v12447_v58  ;;  %6946 = vrot.lane.b32.xlu0 %v12447_v58, %s8301_s17 }
 0x580   :  { %v3377_v7 = vmax.f32 %v3303_v57, 0.0  ;;  %v3298_v51 = vadd.f32 %v12157_v12, %v3297_v11  ;;  %v3667_v14 = vld [vmem:[#allocation3 + $0x3e8] sm:$0xff] }
 0x581   :  { %v6749_v60 = vpop.f32.mrf.mxu0  ;;  %v12455_v11 = vpack.i.bf16 %v3668_v44, %v3667_v14  ;;  %v3682_v14 = vld [vmem:[#allocation3 + $0x51] sm:$0xff] }
 0x582   :  { %3530 = vst.msk [vmem:[#allocation3 + $0x430] sm:$0xff] %vm3380_vm12, %v3377_v7  ;;  %v3376_v40 = vmax.f32 %v3298_v51, 0.0  ;;  %v3313_v56 = vadd.f32 %v6749_v60, %v12157_v12  ;;  %v3678_v60 = vld [vmem:[#allocation3 + $0x11] sm:$0xff] }
 0x583   :  { %v3307_v61 = vpop.f32.mrf.mxu0  ;;  %16595 = vst [vmem:[#allocation309_spill] sm:$0xff] %v12455_v11  ;;  %6951 = vrot.lane.b32.xlu1 %v12455_v11, %s8301_s17 }
 0x584   :  { %3529 = vst.msk [vmem:[#allocation3 + $0x428] sm:$0xff] %vm3380_vm12, %v3376_v40  ;;  %v3379_v23 = vmax.f32 %v3313_v56, 0.0  ;;  %v3308_v57 = vadd.f32 %v12157_v12, %v3307_v61  ;;  %v3670_v51 = vld [vmem:[#allocation3 + $0x410] sm:$0xff]  ;;  %v6965_v12 = vpack.i.bf16 %v3678_v60, %v3677_v24 }
 0x585   :  { %v3679_v61 = vld [vmem:[#allocation3 + $0x29] sm:$0xff]  ;;  %v3684_v24 = vld [vmem:[#allocation3 + $0x71] sm:$0xff] }
 0x586   :  { %3532 = vst.msk [vmem:[#allocation3 + $0x450] sm:$0xff] %vm3380_vm12, %v3379_v23  ;;  %v3378_v48 = vmax.f32 %v3308_v57, 0.0  ;;  %v3669_v7 = vld [vmem:[#allocation3 + $0x408] sm:$0xff]  ;;  %v3680_v23 = vld [vmem:[#allocation3 + $0x31] sm:$0xff]  ;;  %v6975_v57 = vpack.i.bf16 %v3682_v14, %v12179_v62 }
 0x587   :  { %v12461_v10 = vpack.i.bf16 %v3670_v51, %v3669_v7  ;;  %v3683_v7 = vld [vmem:[#allocation3 + $0x69] sm:$0xff]  ;;  %v3686_v60 = vld [vmem:[#allocation3 + $0x91] sm:$0xff] }
 0x588   :  { %3531 = vst.msk [vmem:[#allocation3 + $0x448] sm:$0xff] %vm3380_vm12, %v3378_v48  ;;  %v6970_v48 = vpack.i.bf16 %v3680_v23, %v3679_v61  ;;  %v3685_v51 = vld [vmem:[#allocation3 + $0x89] sm:$0xff]  ;;  %v6995_v61 = vpack.i.bf16 %v3690_v30, %v3689_v28 }
 0x589   :  { %16596 = vst [vmem:[#allocation310_spill] sm:$0xff] %v12461_v10  ;;  %6956 = vrot.lane.b32.xlu0 %v12461_v10, %s8301_s17  ;;  %v3672_v40 = vld [vmem:[#allocation3 + $0x430] sm:$0xff] }
 0x58a   :  { %v3691_v14 = vld [vmem:[#allocation3 + $0xe9] sm:$0xff] }
 0x58b   :  { %v3671_v44 = vld [vmem:[#allocation3 + $0x428] sm:$0xff] }
 0x58c   :  { %v12465_v56 = vpack.i.bf16 %v3672_v40, %v3671_v44  ;;  %v6980_v44 = vpack.i.bf16 %v3684_v24, %v3683_v7  ;;  %v6985_v40 = vpack.i.bf16 %v3686_v60, %v3685_v51  ;;  %v3693_v23 = vld [vmem:[#allocation3 + $0x109] sm:$0xff] }
 0x58d   :  { %6966 = vrot.lane.b32.xlu0 %v6965_v12, %s8302_s2  ;;  %v3688_v12 = vld [vmem:[#allocation3 + $0xb1] sm:$0xff]  ;;  %v3695_v24 = vld [vmem:[#allocation3 + $0x129] sm:$0xff] }
 0x58e   :  { %16597 = vst [vmem:[#allocation18_spill] sm:$0xff] %v12465_v56  ;;  %6961 = vrot.lane.b32.xlu1 %v12465_v56, %s8301_s17  ;;  %v6990_v62 = vpack.i.bf16 %v3688_v12, %v3687_v37  ;;  %v3697_v60 = vld [vmem:[#allocation3 + $0x149] sm:$0xff] }
 0x58f   :  { %v12482_v37 = vld [vmem:[#allocation3 + $0x189] sm:$0xff] }
 0x590   :  { %v12484_v12 = vld [vmem:[#allocation3 + $0x169] sm:$0xff] }
 0x591   :  { %6976 = vrot.lane.b32.xlu0 %v6975_v57, %s8302_s2  ;;  %v3692_v57 = vld [vmem:[#allocation3 + $0xf1] sm:$0xff]  ;;  %v12544_v56 = vld [vmem:[#allocation3 + $0x2e9] sm:$0xff] }
 0x592   :  { %6971 = vrot.lane.b32.xlu1 %v6970_v48, %s8302_s2  ;;  %v3694_v48 = vld [vmem:[#allocation3 + $0x111] sm:$0xff]  ;;  %v7000_v7 = vpack.i.bf16 %v3692_v57, %v3691_v14  ;;  %v12496_v57 = vld [vmem:[#allocation3 + $0x1c9] sm:$0xff]  ;;  %16601 = vst [vmem:[#allocation192_spill] sm:$0xff] %v12544_v56 }
 0x593   :  { %v7005_v51 = vpack.i.bf16 %v3694_v48, %v3693_v23  ;;  %v12494_v23 = vld [vmem:[#allocation3 + $0x1a9] sm:$0xff] }
 0x594   :  { %v3713_v48 = vld [vmem:[#allocation3 + $0x249] sm:$0xff] }
 0x595   :  { %6986 = vrot.lane.b32.xlu0 %v6985_v40, %s8302_s2  ;;  %v12479_v40 = vld [vmem:[#allocation3 + $0x151] sm:$0xff]  ;;  %v12546_v10 = vld [vmem:[#allocation3 + $0x309] sm:$0xff] }
 0x596   :  { %6981 = vrot.lane.b32.xlu1 %v6980_v44, %s8302_s2  ;;  %v3696_v44 = vld [vmem:[#allocation3 + $0x131] sm:$0xff]  ;;  %v7015_v28 = vpack.i.bf16 %v12479_v40, %v3697_v60  ;;  %16602 = vst [vmem:[#allocation314_spill] sm:$0xff] %v12546_v10 }
 0x597   :  { %v7010_v30 = vpack.i.bf16 %v3696_v44, %v3695_v24  ;;  %v3714_v24 = vld [vmem:[#allocation3 + $0x251] sm:$0xff]  ;;  %v12508_v44 = vld [vmem:[#allocation3 + $0x1e9] sm:$0xff] }
 0x599   :  { %6996 = vrot.lane.b32.xlu0 %v6995_v61, %s8302_s2  ;;  %v7020_v61 = vpack.i.bf16 %v12225_v13, %v12484_v12 }
 0x59a   :  { %6991 = vrot.lane.b32.xlu1 %v6990_v62, %s8302_s2  ;;  %v12488_v62 = vld [vmem:[#allocation3 + $0x191] sm:$0xff] }
 0x59b   :  { %v7025_v14 = vpack.i.bf16 %v12488_v62, %v12482_v37 }
 0x59d   :  { %7006 = vrot.lane.b32.xlu0 %v7005_v51, %s8302_s2  ;;  %v12502_v51 = vld [vmem:[#allocation3 + $0x1d1] sm:$0xff] }
 0x59e   :  { %7001 = vrot.lane.b32.xlu1 %v7000_v7, %s8302_s2  ;;  %v12500_v7 = vld [vmem:[#allocation3 + $0x1b1] sm:$0xff]  ;;  %v7035_v60 = vpack.i.bf16 %v12502_v51, %v12496_v57 }
 0x59f   :  { %v7030_v13 = vpack.i.bf16 %v12500_v7, %v12494_v23 }
 0x5a1   :  { %7016 = vrot.lane.b32.xlu0 %v7015_v28, %s8302_s2  ;;  %v12512_v28 = vld [vmem:[#allocation3 + $0x1f1] sm:$0xff] }
 0x5a2   :  { %7011 = vrot.lane.b32.xlu1 %v7010_v30, %s8302_s2  ;;  %v7045_v30 = vpack.i.bf16 %v3714_v24, %v3713_v48  ;;  %v7055_v24 = vpack.i.bf16 %v12524_v43, %v12518_v16 }
 0x5a5   :  { %7026 = vrot.lane.b32.xlu0 %v7025_v14, %s8302_s2  ;;  %v12516_v14 = vld [vmem:[#allocation3 + $0x269] sm:$0xff] }
 0x5a6   :  { %7021 = vrot.lane.b32.xlu1 %v7020_v61, %s8302_s2  ;;  %v7040_v61 = vpack.i.bf16 %v12512_v28, %v12508_v44  ;;  %v7050_v48 = vpack.i.bf16 %v12522_v6, %v12516_v14 }
 0x5a9   :  { %7036 = vrot.lane.b32.xlu0 %v7035_v60, %s8302_s2  ;;  %v12532_v60 = vld [vmem:[#allocation3 + $0x2c9] sm:$0xff] }
 0x5aa   :  { %7031 = vrot.lane.b32.xlu1 %v7030_v13, %s8302_s2  ;;  %v12530_v13 = vld [vmem:[#allocation3 + $0x2a9] sm:$0xff]  ;;  %16598 = vst [vmem:[#allocation75_spill] sm:$0xff] %v12532_v60 }
 0x5ad   :  { %7046 = vrot.lane.b32.xlu0 %v7045_v30, %s8302_s2  ;;  %v12538_v30 = vld [vmem:[#allocation3 + $0x2d1] sm:$0xff] }
 0x5ae   :  { %7041 = vrot.lane.b32.xlu1 %v7040_v61, %s8302_s2  ;;  %v12536_v61 = vld [vmem:[#allocation3 + $0x2b1] sm:$0xff]  ;;  %16600 = vst [vmem:[#allocation191_spill] sm:$0xff] %v12538_v30  ;;  %v7065_v3 = vpack.i.bf16 %v12538_v30, %v12532_v60  ;;  %v12790_v30 = vld [vmem:[#allocation3 + $0x2e7] sm:$0xff] }
 0x5af   :  { %16599 = vst [vmem:[#allocation76_spill] sm:$0xff] %v12536_v61  ;;  %v7060_v18 = vpack.i.bf16 %v12536_v61, %v12530_v13  ;;  %16668 = vst [vmem:[#allocation216_spill] sm:$0xff] %v12790_v30  ;;  %v12792_v60 = vld [vmem:[#allocation3 + $0x2ef] sm:$0xff] }
 0x5b0   :  { %16669 = vst [vmem:[#allocation296_spill] sm:$0xff] %v12792_v60 }
 0x5b1   :  { %7056 = vrot.lane.b32.xlu0 %v7055_v24, %s8302_s2  ;;  %v12552_v24 = vld [vmem:[#allocation3 + $0x311] sm:$0xff] }
 0x5b2   :  { %7051 = vrot.lane.b32.xlu1 %v7050_v48, %s8302_s2  ;;  %v12550_v48 = vld [vmem:[#allocation3 + $0x2f1] sm:$0xff]  ;;  %16604 = vst [vmem:[#allocation19_spill] sm:$0xff] %v12552_v24  ;;  %v7075_v58 = vpack.i.bf16 %v12552_v24, %v12546_v10  ;;  %v3743_v24 = vld [vmem:[#allocation3 + $0x429] sm:$0xff] }
 0x5b3   :  { %16603 = vst [vmem:[#allocation315_spill] sm:$0xff] %v12550_v48  ;;  %v7070_v11 = vpack.i.bf16 %v12550_v48, %v12544_v56  ;;  %v3571_v10 = vld [vmem:[#allocation3 + $0x267] sm:$0xff]  ;;  %v3572_v48 = vld [vmem:[#allocation3 + $0x26f] sm:$0xff] }
 0x5b4   :  { %v12774_v56 = vld [vmem:[#allocation3 + $0x2af] sm:$0xff] }
 0x5b5   :  { %7066 = vrot.lane.b32.xlu0 %v7065_v3, %s8302_s2  ;;  %v12566_v3 = vld [vmem:[#allocation3 + $0x351] sm:$0xff]  ;;  %16663 = vst [vmem:[#allocation91_spill] sm:$0xff] %v12774_v56 }
 0x5b6   :  { %7061 = vrot.lane.b32.xlu1 %v7060_v18, %s8302_s2  ;;  %v12564_v18 = vld [vmem:[#allocation3 + $0x331] sm:$0xff]  ;;  %16608 = vst [vmem:[#allocation194_spill] sm:$0xff] %v12566_v3  ;;  %v7085_v17 = vpack.i.bf16 %v12566_v3, %v12560_v42  ;;  %v12590_v3 = vld [vmem:[#allocation3 + $0x3c9] sm:$0xff]  ;;  %v12592_v42 = vpop.permute.xlu0 %6816 }
 0x5b7   :  { %16607 = vst [vmem:[#allocation193_spill] sm:$0xff] %v12564_v18  ;;  %v7080_v8 = vpack.i.bf16 %v12564_v18, %v12558_v26  ;;  %16615 = vst [vmem:[#allocation196_spill] sm:$0xff] %v12590_v3  ;;  %v12600_v26 = vpop.permute.xlu1 %6811 }
 0x5b8   :  { %16616 = vst [vmem:[#allocation318_spill] sm:$0xff] %v12592_v42  ;;  %16619 = vst [vmem:[#allocation22_spill] sm:$0xff] %v12600_v26 }
 0x5b9   :  { %7076 = vrot.lane.b32.xlu0 %v7075_v58, %s8302_s2  ;;  %v12580_v58 = vld [vmem:[#allocation3 + $0x371] sm:$0xff] }
 0x5ba   :  { %7071 = vrot.lane.b32.xlu1 %v7070_v11, %s8302_s2  ;;  %16612 = vst [vmem:[#allocation79_spill] sm:$0xff] %v12580_v58  ;;  %v12582_v11 = vld [vmem:[#allocation3 + $0x391] sm:$0xff]  ;;  %v7090_v9 = vpack.i.bf16 %v12580_v58, %v12574_v19  ;;  %v3741_v58 = vld [vmem:[#allocation3 + $0x409] sm:$0xff]  ;;  %v12608_v42 = vpop.permute.xlu0 %6826 }
 0x5bb   :  { %16613 = vst [vmem:[#allocation80_spill] sm:$0xff] %v12582_v11  ;;  %v7095_v18 = vpack.i.bf16 %v12582_v11, %v12576_v36  ;;  %v12606_v11 = vld [vmem:[#allocation3 + $0x3e9] sm:$0xff]  ;;  %16621 = vst [vmem:[#allocation82_spill] sm:$0xff] %v12608_v42  ;;  %v12616_v26 = vpop.permute.xlu1 %6821 }
 0x5bc   :  { %16620 = vst [vmem:[#allocation81_spill] sm:$0xff] %v12606_v11  ;;  %16624 = vst [vmem:[#allocation322_spill] sm:$0xff] %v12616_v26 }
 0x5bd   :  { %7086 = vrot.lane.b32.xlu0 %v7085_v17, %s8302_s2  ;;  %v12596_v17 = vld [vmem:[#allocation3 + $0x3b1] sm:$0xff] }
 0x5be   :  { %7081 = vrot.lane.b32.xlu1 %v7080_v8, %s8302_s2  ;;  %16617 = vst [vmem:[#allocation319_spill] sm:$0xff] %v12596_v17  ;;  %v12598_v8 = vld [vmem:[#allocation3 + $0x3d1] sm:$0xff]  ;;  %v7100_v19 = vpack.i.bf16 %v12596_v17, %v12588_v54  ;;  %v12621_v50 = vpop.permute.xlu0 %6836 }
 0x5bf   :  { %16618 = vst [vmem:[#allocation21_spill] sm:$0xff] %v12598_v8  ;;  %v7105_v36 = vpack.i.bf16 %v12598_v8, %v12590_v3  ;;  %v3535_v8 = vld [vmem:[#allocation3 + $0x27] sm:$0xff]  ;;  %v3536_v17 = vld [vmem:[#allocation3 + $0x2f] sm:$0xff]  ;;  %16625 = vst [vmem:[#allocation323_spill] sm:$0xff] %v12621_v50  ;;  %v12629_v42 = vpop.permute.xlu1 %6831 }
 0x5c0   :  { %16628 = vst [vmem:[#allocation83_spill] sm:$0xff] %v12629_v42  ;;  %v12652_v42 = vld [vmem:[#allocation3 + $0xa7] sm:$0xff] }
 0x5c1   :  { %7096 = vrot.lane.b32.xlu0 %v7095_v18, %s8302_s2  ;;  %v12614_v18 = vld [vmem:[#allocation3 + $0x411] sm:$0xff]  ;;  %16636 = vst [vmem:[#allocation85_spill] sm:$0xff] %v12652_v42 }
 0x5c2   :  { %7091 = vrot.lane.b32.xlu1 %v7090_v9, %s8302_s2  ;;  %v12612_v9 = vld [vmem:[#allocation3 + $0x3f1] sm:$0xff]  ;;  %16623 = vst [vmem:[#allocation200_spill] sm:$0xff] %v12614_v18  ;;  %v7115_v3 = vpack.i.bf16 %v12614_v18, %v3741_v58  ;;  %v12634_v58 = vld [vmem:[#allocation3 + $0x67] sm:$0xff]  ;;  %v12638_v50 = vpop.permute.xlu0 %6846 }
 0x5c3   :  { %16622 = vst [vmem:[#allocation199_spill] sm:$0xff] %v12612_v9  ;;  %v7110_v54 = vpack.i.bf16 %v12612_v9, %v12606_v11  ;;  %v7125_v11 = vpack.i.bf16 %v3536_v17, %v3535_v8  ;;  %v12632_v9 = vld [vmem:[#allocation3 + $0x4f] sm:$0xff]  ;;  %16630 = vst [vmem:[#allocation203_spill] sm:$0xff] %v12634_v58 }
 0x5c4   :  { %16629 = vst [vmem:[#allocation84_spill] sm:$0xff] %v12632_v9  ;;  %v12636_v18 = vld [vmem:[#allocation3 + $0x6f] sm:$0xff]  ;;  %16632 = vst [vmem:[#allocation326_spill] sm:$0xff] %v12638_v50 }
 0x5c5   :  { %7106 = vrot.lane.b32.xlu0 %v7105_v36, %s8302_s2  ;;  %v12627_v36 = vld [vmem:[#allocation3 + $0x47] sm:$0xff]  ;;  %16631 = vst [vmem:[#allocation204_spill] sm:$0xff] %v12636_v18  ;;  %v12650_v8 = vld [vmem:[#allocation3 + $0x8f] sm:$0xff] }
 0x5c6   :  { %7101 = vrot.lane.b32.xlu1 %v7100_v19, %s8302_s2  ;;  %v12625_v19 = vld [vmem:[#allocation3 + $0x431] sm:$0xff]  ;;  %16627 = vst [vmem:[#allocation24_spill] sm:$0xff] %v12627_v36  ;;  %v7130_v17 = vpack.i.bf16 %v12632_v9, %v12627_v36  ;;  %16635 = vst [vmem:[#allocation26_spill] sm:$0xff] %v12650_v8  ;;  %v12670_v9 = vld [vmem:[#allocation3 + $0xe7] sm:$0xff] }
 0x5c7   :  { %16626 = vst [vmem:[#allocation23_spill] sm:$0xff] %v12625_v19  ;;  %v7120_v26 = vpack.i.bf16 %v12625_v19, %v3743_v24  ;;  %v7135_v24 = vpack.i.bf16 %v12636_v18, %v12634_v58  ;;  %v12654_v50 = vld [vmem:[#allocation3 + $0xaf] sm:$0xff]  ;;  %16642 = vst [vmem:[#allocation291_spill] sm:$0xff] %v12670_v9 }
 0x5c8   :  { %16637 = vst [vmem:[#allocation86_spill] sm:$0xff] %v12654_v50  ;;  %v7145_v19 = vpack.i.bf16 %v12654_v50, %v12652_v42  ;;  %v12668_v58 = vld [vmem:[#allocation3 + $0xcf] sm:$0xff] }
 0x5c9   :  { %7116 = vrot.lane.b32.xlu0 %v7115_v3, %s8302_s2  ;;  %v12644_v3 = vpop.permute.xlu1 %6841  ;;  %16641 = vst [vmem:[#allocation288_spill] sm:$0xff] %v12668_v58  ;;  %v12672_v36 = vld [vmem:[#allocation3 + $0xef] sm:$0xff] }
 0x5ca   :  { %7111 = vrot.lane.b32.xlu1 %v7110_v54, %s8302_s2  ;;  %v12642_v54 = vld [vmem:[#allocation3 + $0x87] sm:$0xff]  ;;  %16634 = vst [vmem:[#allocation25_spill] sm:$0xff] %v12644_v3  ;;  %16643 = vst [vmem:[#allocation329_spill] sm:$0xff] %v12672_v36  ;;  %v12686_v42 = vld [vmem:[#allocation3 + $0x10f] sm:$0xff] }
 0x5cb   :  { %16633 = vst [vmem:[#allocation327_spill] sm:$0xff] %v12642_v54  ;;  %v7140_v18 = vpack.i.bf16 %v12650_v8, %v12642_v54  ;;  %16647 = vst [vmem:[#allocation381_spill] sm:$0xff] %v12686_v42  ;;  %v12688_v8 = vld [vmem:[#allocation3 + $0x127] sm:$0xff]  ;;  %v12690_v54 = vld [vmem:[#allocation3 + $0x12f] sm:$0xff] }
 0x5cc   :  { %16648 = vst [vmem:[#allocation382_spill] sm:$0xff] %v12688_v8  ;;  %16649 = vst [vmem:[#allocation87_spill] sm:$0xff] %v12690_v54 }
 0x5cd   :  { %7126 = vrot.lane.b32.xlu0 %v7125_v11, %s8303_s19  ;;  %v12660_v11 = vld [vmem:[#allocation3 + $0xc7] sm:$0xff]  ;;  %v12662_v3 = vpop.permute.xlu1 %6851 }
 0x5ce   :  { %7121 = vrot.lane.b32.xlu1 %v7120_v26, %s8302_s2  ;;  %v12656_v26 = vpop.permute.xlu0 %6856  ;;  %16639 = vst [vmem:[#allocation207_spill] sm:$0xff] %v12660_v11  ;;  %16640 = vst [vmem:[#allocation208_spill] sm:$0xff] %v12662_v3  ;;  %v7155_v3 = vpack.i.bf16 %v12672_v36, %v12670_v9  ;;  %v7150_v50 = vpack.i.bf16 %v12668_v58, %v12660_v11  ;;  %v12704_v9 = vld [vmem:[#allocation3 + $0x14f] sm:$0xff]  ;;  %v12706_v58 = vld [vmem:[#allocation3 + $0x167] sm:$0xff] }
 0x5cf   :  { %16638 = vst [vmem:[#allocation184_spill] sm:$0xff] %v12656_v26  ;;  %16653 = vst [vmem:[#allocation211_spill] sm:$0xff] %v12704_v9  ;;  %v12708_v11 = vld [vmem:[#allocation3 + $0x16f] sm:$0xff] }
 0x5d0   :  { %16654 = vst [vmem:[#allocation212_spill] sm:$0xff] %v12706_v58 }
 0x5d1   :  { %7136 = vrot.lane.b32.xlu0 %v7135_v24, %s8303_s19  ;;  %v12678_v24 = vld [vmem:[#allocation3 + $0x107] sm:$0xff] }
 0x5d2   :  { %7131 = vrot.lane.b32.xlu1 %v7130_v17, %s8303_s19  ;;  %v12674_v26 = vpop.permute.xlu0 %6866  ;;  %16645 = vst [vmem:[#allocation27_spill] sm:$0xff] %v12678_v24  ;;  %v12680_v17 = vpop.permute.xlu1 %6861  ;;  %v7160_v36 = vpack.i.bf16 %v12686_v42, %v12678_v24  ;;  %v12724_v42 = vld [vmem:[#allocation3 + $0x1a7] sm:$0xff]  ;;  %v12726_v24 = vld [vmem:[#allocation3 + $0x1af] sm:$0xff] }
 0x5d3   :  { %16644 = vst [vmem:[#allocation330_spill] sm:$0xff] %v12674_v26  ;;  %16646 = vst [vmem:[#allocation28_spill] sm:$0xff] %v12680_v17  ;;  %v7165_v17 = vpack.i.bf16 %v12690_v54, %v12688_v8  ;;  %v12722_v8 = vld [vmem:[#allocation3 + $0x18f] sm:$0xff] }
 0x5d5   :  { %7146 = vrot.lane.b32.xlu0 %v7145_v19, %s8303_s19 }
 0x5d6   :  { %7141 = vrot.lane.b32.xlu1 %v7140_v18, %s8303_s19  ;;  %v12692_v26 = vpop.permute.xlu0 %6876  ;;  %v12696_v18 = vld [vmem:[#allocation3 + $0x147] sm:$0xff]  ;;  %v12698_v19 = vpop.permute.xlu1 %6871 }
 0x5d7   :  { %16650 = vst [vmem:[#allocation88_spill] sm:$0xff] %v12692_v26  ;;  %16651 = vst [vmem:[#allocation183_spill] sm:$0xff] %v12696_v18  ;;  %v7170_v54 = vpack.i.bf16 %v12704_v9, %v12696_v18  ;;  %v12742_v9 = vld [vmem:[#allocation3 + $0x1e7] sm:$0xff] }
 0x5d8   :  { %16652 = vst [vmem:[#allocation188_spill] sm:$0xff] %v12698_v19  ;;  %v7175_v19 = vpack.i.bf16 %v12708_v11, %v12706_v58  ;;  %v12740_v58 = vld [vmem:[#allocation3 + $0x1cf] sm:$0xff] }
 0x5d9   :  { %7156 = vrot.lane.b32.xlu0 %v7155_v3, %s8303_s19 }
 0x5da   :  { %7151 = vrot.lane.b32.xlu1 %v7150_v50, %s8303_s19  ;;  %v12710_v26 = vpop.permute.xlu0 %6886  ;;  %v12714_v50 = vld [vmem:[#allocation3 + $0x187] sm:$0xff]  ;;  %v12716_v3 = vpop.permute.xlu1 %6881 }
 0x5db   :  { %16655 = vst [vmem:[#allocation292_spill] sm:$0xff] %v12710_v26  ;;  %16656 = vst [vmem:[#allocation295_spill] sm:$0xff] %v12716_v3  ;;  %v7185_v3 = vpack.i.bf16 %v12726_v24, %v12724_v42  ;;  %v7180_v18 = vpack.i.bf16 %v12722_v8, %v12714_v50 }
 0x5dd   :  { %7166 = vrot.lane.b32.xlu0 %v7165_v17, %s8303_s19 }
 0x5de   :  { %7161 = vrot.lane.b32.xlu1 %v7160_v36, %s8303_s19  ;;  %v12730_v36 = vld [vmem:[#allocation3 + $0x1c7] sm:$0xff]  ;;  %v12732_v17 = vpop.permute.xlu1 %6891  ;;  %v12734_v26 = vpop.permute.xlu0 %6896 }
 0x5df   :  { %16657 = vst [vmem:[#allocation332_spill] sm:$0xff] %v12732_v17  ;;  %16658 = vst [vmem:[#allocation333_spill] sm:$0xff] %v12734_v26  ;;  %v7195_v26 = vpack.i.bf16 %v12744_v41, %v12742_v9  ;;  %v7190_v17 = vpack.i.bf16 %v12740_v58, %v12730_v36 }
 0x5e1   :  { %7176 = vrot.lane.b32.xlu0 %v7175_v19, %s8303_s19 }
 0x5e2   :  { %7171 = vrot.lane.b32.xlu1 %v7170_v54, %s8303_s19  ;;  %v12748_v54 = vpop.permute.xlu1 %6901  ;;  %v12750_v19 = vpop.permute.xlu0 %6906 }
 0x5e3   :  { %16659 = vst [vmem:[#allocation29_spill] sm:$0xff] %v12748_v54  ;;  %16660 = vst [vmem:[#allocation30_spill] sm:$0xff] %v12750_v19  ;;  %v7205_v54 = vpack.i.bf16 %v3572_v48, %v3571_v10  ;;  %v7215_v10 = vpack.i.bf16 %v12774_v56, %v12772_v34  ;;  %v12810_v56 = vld [vmem:[#allocation3 + $0x32f] sm:$0xff] }
 0x5e4   :  { %16675 = vst [vmem:[#allocation94_spill] sm:$0xff] %v12810_v56 }
 0x5e5   :  { %7186 = vrot.lane.b32.xlu0 %v7185_v3, %s8303_s19 }
 0x5e6   :  { %7181 = vrot.lane.b32.xlu1 %v7180_v18, %s8303_s19  ;;  %v12762_v18 = vld [vmem:[#allocation3 + $0x287] sm:$0xff]  ;;  %v12764_v3 = vpop.permute.xlu1 %6911  ;;  %v12766_v19 = vpop.permute.xlu0 %6916 }
 0x5e7   :  { %16661 = vst [vmem:[#allocation90_spill] sm:$0xff] %v12764_v3  ;;  %16662 = vst [vmem:[#allocation89_spill] sm:$0xff] %v12766_v19  ;;  %v7210_v48 = vpack.i.bf16 %v12770_v5, %v12762_v18  ;;  %v12788_v19 = vld [vmem:[#allocation3 + $0x2cf] sm:$0xff] }
 0x5e8   :  { %16667 = vst [vmem:[#allocation215_spill] sm:$0xff] %v12788_v19 }
 0x5e9   :  { %7196 = vrot.lane.b32.xlu0 %v7195_v26, %s8303_s19  ;;  %v12778_v26 = vld [vmem:[#allocation3 + $0x2c7] sm:$0xff] }
 0x5ea   :  { %7191 = vrot.lane.b32.xlu1 %v7190_v17, %s8303_s19  ;;  %16664 = vst [vmem:[#allocation92_spill] sm:$0xff] %v12778_v26  ;;  %v12780_v17 = vpop.permute.xlu1 %6921  ;;  %v12782_v3 = vpop.permute.xlu0 %6926  ;;  %v7220_v61 = vpack.i.bf16 %v12788_v19, %v12778_v26  ;;  %v12826_v19 = vld [vmem:[#allocation3 + $0x367] sm:$0xff]  ;;  %v12828_v26 = vld [vmem:[#allocation3 + $0x36f] sm:$0xff] }
 0x5eb   :  { %16665 = vst [vmem:[#allocation187_spill] sm:$0xff] %v12780_v17  ;;  %16666 = vst [vmem:[#allocation189_spill] sm:$0xff] %v12782_v3  ;;  %v7225_v17 = vpack.i.bf16 %v12792_v60, %v12790_v30  ;;  %v12824_v30 = vld [vmem:[#allocation3 + $0x34f] sm:$0xff] }
 0x5ec   :  { %16679 = vst [vmem:[#allocation190_spill] sm:$0xff] %v12824_v30  ;;  %16680 = vst [vmem:[#allocation197_spill] sm:$0xff] %v12826_v19 }
 0x5ed   :  { %7206 = vrot.lane.b32.xlu0 %v7205_v54, %s8303_s19  ;;  %16681 = vst [vmem:[#allocation219_spill] sm:$0xff] %v12828_v26 }
 0x5ee   :  { %7201 = vrot.lane.b32.xlu1 %v7200_v46, %s8303_s19  ;;  %v12796_v46 = vld [vmem:[#allocation3 + $0x307] sm:$0xff]  ;;  %v12798_v54 = vpop.permute.xlu1 %6931  ;;  %v12800_v3 = vpop.permute.xlu0 %6936 }
 0x5ef   :  { %16670 = vst [vmem:[#allocation299_spill] sm:$0xff] %v12796_v46  ;;  %16671 = vst [vmem:[#allocation335_spill] sm:$0xff] %v12798_v54  ;;  %v7235_v54 = vpack.i.bf16 %v12810_v56, %v12808_v38  ;;  %v7230_v60 = vpack.i.bf16 %v12806_v47, %v12796_v46  ;;  %v12842_v38 = vld [vmem:[#allocation3 + $0x38f] sm:$0xff]  ;;  %v12844_v47 = vld [vmem:[#allocation3 + $0x3a7] sm:$0xff] }
 0x5f0   :  { %16672 = vst [vmem:[#allocation336_spill] sm:$0xff] %v12800_v3  ;;  %16685 = vst [vmem:[#allocation337_spill] sm:$0xff] %v12842_v38  ;;  %v12846_v46 = vld [vmem:[#allocation3 + $0x3af] sm:$0xff] }
 0x5f1   :  { %7216 = vrot.lane.b32.xlu0 %v7215_v10, %s8303_s19  ;;  %v12814_v10 = vld [vmem:[#allocation3 + $0x347] sm:$0xff]  ;;  %16686 = vst [vmem:[#allocation338_spill] sm:$0xff] %v12844_v47  ;;  %16687 = vst [vmem:[#allocation33_spill] sm:$0xff] %v12846_v46 }
 0x5f2   :  { %7211 = vrot.lane.b32.xlu1 %v7210_v48, %s8303_s19  ;;  %16676 = vst [vmem:[#allocation93_spill] sm:$0xff] %v12814_v10  ;;  %v12816_v48 = vpop.permute.xlu1 %6941  ;;  %v12818_v3 = vpop.permute.xlu0 %6946  ;;  %v7240_v56 = vpack.i.bf16 %v12824_v30, %v12814_v10  ;;  %v12862_v30 = vld [vmem:[#allocation3 + $0x3e7] sm:$0xff]  ;;  %v12864_v10 = vld [vmem:[#allocation3 + $0x3ef] sm:$0xff] }
 0x5f3   :  { %16677 = vst [vmem:[#allocation95_spill] sm:$0xff] %v12816_v48  ;;  %16678 = vst [vmem:[#allocation96_spill] sm:$0xff] %v12818_v3  ;;  %v7245_v48 = vpack.i.bf16 %v12828_v26, %v12826_v19  ;;  %v12860_v19 = vld [vmem:[#allocation3 + $0x3cf] sm:$0xff] }
 0x5f4   :  { %16691 = vst [vmem:[#allocation99_spill] sm:$0xff] %v12860_v19  ;;  %16692 = vst [vmem:[#allocation100_spill] sm:$0xff] %v12862_v30 }
 0x5f5   :  { %7226 = vrot.lane.b32.xlu0 %v7225_v17, %s8303_s19  ;;  %16693 = vst [vmem:[#allocation198_spill] sm:$0xff] %v12864_v10 }
 0x5f6   :  { %7221 = vrot.lane.b32.xlu1 %v7220_v61, %s8303_s19  ;;  %v12832_v61 = vld [vmem:[#allocation3 + $0x387] sm:$0xff]  ;;  %v12834_v17 = vpop.permute.xlu1 %6951 }
 0x5f7   :  { %16682 = vst [vmem:[#allocation220_spill] sm:$0xff] %v12832_v61  ;;  %16683 = vst [vmem:[#allocation300_spill] sm:$0xff] %v12834_v17  ;;  %v7255_v17 = vpack.i.bf16 %v12846_v46, %v12844_v47  ;;  %v7250_v26 = vpack.i.bf16 %v12842_v38, %v12832_v61  ;;  %v12878_v47 = vld [vmem:[#allocation3 + $0x40f] sm:$0xff]  ;;  %v12880_v38 = vld [vmem:[#allocation3 + $0x427] sm:$0xff] }
 0x5f8   :  { %16697 = vst [vmem:[#allocation304_spill] sm:$0xff] %v12878_v47  ;;  %16698 = vst [vmem:[#allocation307_spill] sm:$0xff] %v12880_v38  ;;  %v12882_v61 = vld [vmem:[#allocation3 + $0x42f] sm:$0xff] }
 0x5f9   :  { %7236 = vrot.lane.b32.xlu0 %v7235_v54, %s8303_s19  ;;  %16699 = vst [vmem:[#allocation339_spill] sm:$0xff] %v12882_v61 }
 0x5fa   :  { %7231 = vrot.lane.b32.xlu1 %v7230_v60, %s8303_s19  ;;  %v12850_v60 = vld [vmem:[#allocation3 + $0x3c7] sm:$0xff] }
 0x5fb   :  { %v12836_v3 = vpop.permute.xlu0 %6956  ;;  %16688 = vst [vmem:[#allocation34_spill] sm:$0xff] %v12850_v60  ;;  %v7260_v46 = vpack.i.bf16 %v12860_v19, %v12850_v60  ;;  %v12948_v19 = vld [vmem:[#allocation3 + $0x88] sm:$0xff] }
 0x5fc   :  { %16684 = vst [vmem:[#allocation303_spill] sm:$0xff] %v12836_v3  ;;  %v12966_v60 = vld [vmem:[#allocation3 + $0xe8] sm:$0xff] }
 0x5fd   :  { %7246 = vrot.lane.b32.xlu0 %v7245_v48, %s8303_s19  ;;  %16716 = vst [vmem:[#allocation38_spill] sm:$0xff] %v12966_v60 }
 0x5fe   :  { %7241 = vrot.lane.b32.xlu1 %v7240_v56, %s8303_s19  ;;  %v12868_v56 = vld [vmem:[#allocation3 + $0x407] sm:$0xff] }
 0x5ff   :  { %v12854_v3 = vpop.permute.xlu0 %6966  ;;  %16694 = vst [vmem:[#allocation201_spill] sm:$0xff] %v12868_v56 }
 0x600   :  { %v12852_v54 = vpop.permute.xlu1 %6961  ;;  %16690 = vst [vmem:[#allocation97_spill] sm:$0xff] %v12854_v3  ;;  %v7265_v3 = vpack.i.bf16 %v12864_v10, %v12862_v30  ;;  %v12894_v10 = vld [vmem:[#allocation3 + $0x447] sm:$0xff]  ;;  %v12896_v30 = vld [vmem:[#allocation3 + $0x44f] sm:$0xff] }
 0x601   :  { %16689 = vst [vmem:[#allocation98_spill] sm:$0xff] %v12852_v54  ;;  %7256 = vrot.lane.b32.xlu0 %v7255_v17, %s8303_s19  ;;  %16702 = vst [vmem:[#allocation36_spill] sm:$0xff] %v12894_v10 }
 0x602   :  { %7251 = vrot.lane.b32.xlu1 %v7250_v26, %s8303_s19  ;;  %16703 = vst [vmem:[#allocation102_spill] sm:$0xff] %v12896_v30 }
 0x603   :  { %v12872_v54 = vpop.permute.xlu0 %6976 }
 0x604   :  { %v12870_v48 = vpop.permute.xlu1 %6971  ;;  %16696 = vst [vmem:[#allocation224_spill] sm:$0xff] %v12872_v54  ;;  %v7275_v54 = vpack.i.bf16 %v12882_v61, %v12880_v38 }
 0x605   :  { %16695 = vst [vmem:[#allocation223_spill] sm:$0xff] %v12870_v48  ;;  %7266 = vrot.lane.b32.xlu0 %v7265_v3, %s8303_s19  ;;  %v7270_v48 = vpack.i.bf16 %v12878_v47, %v12868_v56  ;;  %v12942_v47 = vld [vmem:[#allocation3 + $0xa8] sm:$0xff] }
 0x606   :  { %7261 = vrot.lane.b32.xlu1 %v7260_v46, %s8303_s19  ;;  %16711 = vst [vmem:[#allocation308_spill] sm:$0xff] %v12942_v47 }
 0x607   :  { %v12888_v17 = vpop.permute.xlu0 %6986 }
 0x608   :  { %v12886_v26 = vpop.permute.xlu1 %6981  ;;  %16701 = vst [vmem:[#allocation35_spill] sm:$0xff] %v12888_v17  ;;  %v7280_v17 = vpack.i.bf16 %v12896_v30, %v12894_v10  ;;  %v12922_v10 = vld [vmem:[#allocation3 + $0x48] sm:$0xff] }
 0x609   :  { %16700 = vst [vmem:[#allocation340_spill] sm:$0xff] %v12886_v26  ;;  %7276 = vrot.lane.b32.xlu0 %v7275_v54, %s8303_s19  ;;  %v5770_v26 = vld [vmem:[%s15105_s3 + $0x78] sm:$0xff] }
 0x60a   :  { %7271 = vrot.lane.b32.xlu1 %v7270_v48, %s8303_s19  ;;  %6768 = vmatpush1.msra.mxu1 %v5770_v26 }
 0x60b   :  { %v12902_v46 = vpop.permute.xlu0 %6996  ;;  %5913 = vmatpush1.msra.mxu0 %v5770_v26  ;;  %6751 = vmatprep.subr.mxu1 %v16403_v2  ;;  %v12944_v26 = vld [vmem:[#allocation3 + $0xb0] sm:$0xff] }
 0x60c   :  { %v12900_v3 = vpop.permute.xlu1 %6991  ;;  %16705 = vst [vmem:[#allocation103_spill] sm:$0xff] %v12902_v46  ;;  %v12918_v46 = vld [vmem:[#allocation3 + $0x70] sm:$0xff]  ;;  %5914 = vmatprep.subr.mxu0 %v16403_v2  ;;  %16712 = vst [vmem:[#allocation311_spill] sm:$0xff] %v12944_v26  ;;  %v7305_v56 = vpack.i.bf16 %v12944_v26, %v12942_v47 }
 0x60d   :  { %16704 = vst [vmem:[#allocation101_spill] sm:$0xff] %v12900_v3  ;;  %7286 = vrot.lane.b32.xlu0 %v12173_v49, %s8304_s20  ;;  %v12916_v3 = vld [vmem:[#allocation3 + $0x68] sm:$0xff]  ;;  %16708 = vst [vmem:[#allocation205_spill] sm:$0xff] %v12918_v46  ;;  %v12924_v49 = vld [vmem:[#allocation3 + $0x50] sm:$0xff] }
 0x60e   :  { %7281 = vrot.lane.b32.xlu1 %v7280_v17, %s8303_s19  ;;  %v7295_v30 = vpack.i.bf16 %v12918_v46, %v12916_v3  ;;  %v7290_v17 = vpack.i.bf16 %v12924_v49, %v12922_v10  ;;  %v12974_v46 = vld [vmem:[#allocation3 + $0xd0] sm:$0xff] }
 0x60f   :  { %v12914_v48 = vpop.permute.xlu0 %7006  ;;  %16719 = vst [vmem:[#allocation107_spill] sm:$0xff] %v12974_v46 }
 0x610   :  { %v12912_v54 = vpop.permute.xlu1 %7001  ;;  %16707 = vst [vmem:[#allocation202_spill] sm:$0xff] %v12914_v48  ;;  %v5768_v48 = vld [vmem:[%s15105_s3 + $0x68] sm:$0xff] }
 0x611   :  { %16706 = vst [vmem:[#allocation104_spill] sm:$0xff] %v12912_v54  ;;  %v5769_v54 = vld [vmem:[%s15105_s3 + $0x70] sm:$0xff]  ;;  %7296 = vrot.lane.b32.xlu0 %v7295_v30, %s8304_s20 }
 0x612   :  { %7291 = vrot.lane.b32.xlu1 %v7290_v17, %s8304_s20  ;;  %6769 = vmatpush1.msra.mxu1 %v5769_v54  ;;  %v12950_v30 = vld [vmem:[#allocation3 + $0x90] sm:$0xff] }
 0x613   :  { %v12940_v38 = vpop.permute.xlu0 %7016  ;;  %16713 = vst [vmem:[#allocation341_spill] sm:$0xff] %v12950_v30  ;;  %v7300_v17 = vpack.i.bf16 %v12950_v30, %v12948_v19  ;;  %6752 = vmatprep.subr.mxu1 %v16403_v2  ;;  %5915 = vmatpush1.msra.mxu0 %v5769_v54  ;;  %v12968_v54 = vld [vmem:[#allocation3 + $0xf0] sm:$0xff]  ;;  %v12972_v30 = vld [vmem:[#allocation3 + $0xc8] sm:$0xff] }
 0x614   :  { %v12938_v61 = vpop.permute.xlu1 %7011  ;;  %16710 = vst [vmem:[#allocation228_spill] sm:$0xff] %v12940_v38  ;;  %6770 = vmatpush1.msra.mxu1 %v5768_v48  ;;  %v5767_v38 = vld [vmem:[%s15105_s3 + $0x60] sm:$0xff]  ;;  %5916 = vmatprep.subr.mxu0 %v16403_v2  ;;  %16717 = vst [vmem:[#allocation106_spill] sm:$0xff] %v12968_v54  ;;  %v7315_v47 = vpack.i.bf16 %v12968_v54, %v12966_v60  ;;  %v12992_v60 = vld [vmem:[#allocation3 + $0x128] sm:$0xff] }
 0x615   :  { %16709 = vst [vmem:[#allocation227_spill] sm:$0xff] %v12938_v61  ;;  %7306 = vrot.lane.b32.xlu0 %v7305_v56, %s8304_s20  ;;  %6753 = vmatprep.subr.mxu1 %v16403_v2  ;;  %16718 = vst [vmem:[#allocation105_spill] sm:$0xff] %v12972_v30  ;;  %v7310_v56 = vpack.i.bf16 %v12974_v46, %v12972_v30  ;;  %v12998_v30 = vld [vmem:[#allocation3 + $0x108] sm:$0xff] }
 0x616   :  { %7301 = vrot.lane.b32.xlu1 %v7300_v17, %s8304_s20  ;;  %6771 = vmatpush1.msra.mxu1 %v5767_v38  ;;  %v5766_v17 = vld [vmem:[%s15105_s3 + $0x58] sm:$0xff]  ;;  %16722 = vst [vmem:[#allocation209_spill] sm:$0xff] %v12992_v60  ;;  %16724 = vst [vmem:[#allocation232_spill] sm:$0xff] %v12998_v30 }
 0x617   :  { %v12964_v26 = vpop.permute.xlu0 %7026  ;;  %5917 = vmatpush1.msra.mxu0 %v5768_v48  ;;  %6754 = vmatprep.subr.mxu1 %v16403_v2  ;;  %v12994_v48 = vld [vmem:[#allocation3 + $0x130] sm:$0xff] }
 0x618   :  { %v12962_v61 = vpop.permute.xlu1 %7021  ;;  %16715 = vst [vmem:[#allocation37_spill] sm:$0xff] %v12964_v26  ;;  %5918 = vmatprep.subr.mxu0 %v16403_v2  ;;  %v5765_v26 = vld [vmem:[%s15105_s3 + $0x50] sm:$0xff]  ;;  %6772 = vmatpush1.msra.mxu1 %v5766_v17  ;;  %16723 = vst [vmem:[#allocation231_spill] sm:$0xff] %v12994_v48  ;;  %v7325_v46 = vpack.i.bf16 %v12994_v48, %v12992_v60 }
 0x619   :  { %16714 = vst [vmem:[#allocation342_spill] sm:$0xff] %v12962_v61  ;;  %7316 = vrot.lane.b32.xlu0 %v7315_v47, %s8304_s20  ;;  %v13000_v47 = vld [vmem:[#allocation3 + $0x110] sm:$0xff]  ;;  %6755 = vmatprep.subr.mxu1 %v16403_v2 }
 0x61a   :  { %7311 = vrot.lane.b32.xlu1 %v7310_v56, %s8304_s20  ;;  %16725 = vst [vmem:[#allocation312_spill] sm:$0xff] %v13000_v47  ;;  %v7320_v56 = vpack.i.bf16 %v13000_v47, %v12998_v30  ;;  %5919 = vmatpush1.msra.mxu0 %v5767_v38  ;;  %v13016_v47 = vld [vmem:[#allocation3 + $0x148] sm:$0xff]  ;;  %v13018_v38 = vld [vmem:[#allocation3 + $0x150] sm:$0xff] }
 0x61b   :  { %v12990_v54 = vpop.permute.xlu0 %7036  ;;  %6773 = vmatpush1.msra.mxu1 %v5765_v26  ;;  %5920 = vmatprep.subr.mxu0 %v16403_v2  ;;  %16728 = vst [vmem:[#allocation344_spill] sm:$0xff] %v13016_v47  ;;  %16729 = vst [vmem:[#allocation39_spill] sm:$0xff] %v13018_v38  ;;  %v7330_v60 = vpack.i.bf16 %v13018_v38, %v13016_v47  ;;  %v16855_v38 = vld [vmem:[#allocation341_spill] sm:$0xff] }
 0x61c   :  { %v12988_v61 = vpop.permute.xlu1 %7031  ;;  %16721 = vst [vmem:[#allocation206_spill] sm:$0xff] %v12990_v54  ;;  %v5764_v54 = vld [vmem:[%s15105_s3 + $0x48] sm:$0xff]  ;;  %6756 = vmatprep.subr.mxu1 %v16403_v2  ;;  %5921 = vmatpush1.msra.mxu0 %v5766_v17  ;;  %v5761_v17 = vld [vmem:[%s15105_s3 + $0x30] sm:$0xff] }
 0x61d   :  { %16720 = vst [vmem:[#allocation108_spill] sm:$0xff] %v12988_v61  ;;  %7326 = vrot.lane.b32.xlu0 %v7325_v46, %s8304_s20  ;;  %6774 = vmatpush1.msra.mxu1 %v5764_v54  ;;  %v5763_v46 = vld [vmem:[%s15105_s3 + $0x40] sm:$0xff] }
 0x61e   :  { %7321 = vrot.lane.b32.xlu1 %v7320_v56, %s8304_s20  ;;  %6757 = vmatprep.subr.mxu1 %v16403_v2  ;;  %v5762_v56 = vld [vmem:[%s15105_s3 + $0x38] sm:$0xff] }
 0x61f   :  { %v13014_v48 = vpop.permute.xlu0 %7046  ;;  %5922 = vmatprep.subr.mxu0 %v16403_v2  ;;  %6775 = vmatpush1.msra.mxu1 %v5763_v46 }
 0x620   :  { %v13012_v61 = vpop.permute.xlu1 %7041  ;;  %16727 = vst [vmem:[#allocation343_spill] sm:$0xff] %v13014_v48  ;;  %6758 = vmatprep.subr.mxu1 %v16403_v2  ;;  %5923 = vmatpush1.msra.mxu0 %v5765_v26  ;;  %v5760_v26 = vld [vmem:[%s15105_s3 + $0x28] sm:$0xff] }
 0x621   :  { %16726 = vst [vmem:[#allocation313_spill] sm:$0xff] %v13012_v61  ;;  %7336 = vrot.lane.b32.xlu0 %v12237_v4, %s8304_s20  ;;  %6776 = vmatpush1.msra.mxu1 %v5762_v56 }
 0x622   :  { %7331 = vrot.lane.b32.xlu1 %v7330_v60, %s8304_s20  ;;  %5924 = vmatprep.subr.mxu0 %v16403_v2 }
 0x623   :  { %v13035_v61 = vpop.permute.xlu0 %7056  ;;  %6759 = vmatprep.subr.mxu1 %v16403_v2  ;;  %5925 = vmatpush1.msra.mxu0 %v5764_v54 }
 0x624   :  { %v13033_v48 = vpop.permute.xlu1 %7051  ;;  %16731 = vst [vmem:[#allocation110_spill] sm:$0xff] %v13035_v61  ;;  %6777 = vmatpush1.msra.mxu1 %v5761_v17  ;;  %v13054_v61 = vld [vmem:[#allocation3 + $0x208] sm:$0xff]  ;;  %5926 = vmatprep.subr.mxu0 %v16403_v2 }
 0x625   :  { %16730 = vst [vmem:[#allocation40_spill] sm:$0xff] %v13033_v48  ;;  %7346 = vrot.lane.b32.xlu0 %v12267_v20, %s8304_s20  ;;  %6760 = vmatprep.subr.mxu1 %v16403_v2  ;;  %v13065_v20 = vld [vmem:[#allocation3 + $0x210] sm:$0xff]  ;;  %v16867_v48 = vld [vmem:[#allocation86_spill] sm:$0xff] }
 0x626   :  { %7341 = vrot.lane.b32.xlu1 %v12251_v22, %s8304_s20  ;;  %v5759_v22 = vld [vmem:[%s15105_s3 + $0x20] sm:$0xff]  ;;  %6778 = vmatpush1.msra.mxu1 %v5760_v26 }
 0x627   :  { %v13049_v60 = vpop.permute.xlu0 %7066  ;;  %6761 = vmatprep.subr.mxu1 %v16403_v2  ;;  %5927 = vmatpush1.msra.mxu0 %v5763_v46  ;;  %v5757_v46 = vld [vmem:[%s15105_s3 + $0x10] sm:$0xff] }
 0x628   :  { %v13047_v4 = vpop.permute.xlu1 %7061  ;;  %16733 = vst [vmem:[#allocation111_spill] sm:$0xff] %v13049_v60  ;;  %6779 = vmatpush1.msra.mxu1 %v5759_v22  ;;  %5928 = vmatprep.subr.mxu0 %v16403_v2 }
 0x629   :  { %16732 = vst [vmem:[#allocation109_spill] sm:$0xff] %v13047_v4  ;;  %7356 = vrot.lane.b32.xlu0 %v12296_v35, %s8304_s20  ;;  %v7360_v4 = vpack.i.bf16 %v13065_v20, %v13054_v61  ;;  %6762 = vmatprep.subr.mxu1 %v16403_v2 }
 0x62a   :  { %7351 = vrot.lane.b32.xlu1 %v12283_v31, %s8304_s20  ;;  %v5758_v31 = vld [vmem:[%s15105_s3 + $0x18] sm:$0xff]  ;;  %5929 = vmatpush1.msra.mxu0 %v5762_v56  ;;  %v7385_v56 = vpack.i.bf16 %v12484_v12, %v12479_v40  ;;  %v7390_v12 = vpack.i.bf16 %v12714_v50, %v12708_v11 }
 0x62b   :  { %v13069_v60 = vpop.permute.xlu0 %7076  ;;  %6780 = vmatpush1.msra.mxu1 %v5758_v31  ;;  %5930 = vmatprep.subr.mxu0 %v16403_v2 }
 0x62c   :  { %v13067_v54 = vpop.permute.xlu1 %7071  ;;  %16735 = vst [vmem:[#allocation210_spill] sm:$0xff] %v13069_v60  ;;  %6763 = vmatprep.subr.mxu1 %v16403_v2  ;;  %5931 = vmatpush1.msra.mxu0 %v5761_v17  ;;  %v5772_v17 = vld [vmem:[%s15105_s3 + $0x88] sm:$0xff] }
 0x62d   :  { %16734 = vst [vmem:[#allocation112_spill] sm:$0xff] %v13067_v54  ;;  %7366 = vrot.lane.b32.xlu0 %v12311_v55, %s8304_s20  ;;  %v5756_v55 = vld [vmem:[%s15105_s3 + $0x8] sm:$0xff]  ;;  %6781 = vmatpush1.msra.mxu1 %v5757_v46  ;;  %v13499_v54 = vld [vmem:[#allocation3 + $0x410] sm:$0xff] }
 0x62e   :  { %7361 = vrot.lane.b32.xlu1 %v7360_v4, %s8304_s20  ;;  %6764 = vmatprep.subr.mxu1 %v16403_v2  ;;  %16890 = vst [vmem:[#allocation128_spill] sm:$0xff] %v13499_v54 }
 0x62f   :  { %v13084_v60 = vpop.permute.xlu0 %7086  ;;  %6782 = vmatpush1.msra.mxu1 %v5756_v55  ;;  %5932 = vmatprep.subr.mxu0 %v16403_v2 }
 0x630   :  { %v13082_v35 = vpop.permute.xlu1 %7081  ;;  %16737 = vst [vmem:[#allocation235_spill] sm:$0xff] %v13084_v60  ;;  %6765 = vmatprep.subr.mxu1 %v16403_v2  ;;  %5933 = vmatpush1.msra.mxu0 %v5760_v26 }
 0x631   :  { %16736 = vst [vmem:[#allocation213_spill] sm:$0xff] %v13082_v35  ;;  %7376 = vrot.lane.b32.xlu0 %v12336_v52, %s8304_s20  ;;  %5934 = vmatprep.subr.mxu0 %v16403_v2  ;;  %v16862_v35 = vld [vmem:[#allocation33_spill] sm:$0xff] }
 0x632   :  { %7371 = vrot.lane.b32.xlu1 %v12322_v45, %s8304_s20  ;;  %v5755_v45 = vld [vmem:[%s15105_s3] sm:$0xff]  ;;  %5935 = vmatpush1.msra.mxu0 %v5759_v22  ;;  %v16747_v22 = vpack.i.bf16 %v12259_v33, %v12245_v39 }
 0x633   :  { %v13100_v60 = vpop.permute.xlu0 %7096  ;;  %6783 = vmatpush1.msra.mxu1 %v5755_v45  ;;  %5936 = vmatprep.subr.mxu0 %v16403_v2 }
 0x634   :  { %v13098_v4 = vpop.permute.xlu1 %7091  ;;  %16739 = vst [vmem:[#allocation320_spill] sm:$0xff] %v13100_v60  ;;  %6766 = vmatprep.subr.mxu1 %v16403_v2  ;;  %5937 = vmatpush1.msra.mxu0 %v5758_v31 }
 0x635   :  { %16738 = vst [vmem:[#allocation236_spill] sm:$0xff] %v13098_v4  ;;  %7386 = vrot.lane.b32.xlu0 %v7385_v56, %s8305_s25  ;;  %v5771_v56 = vld [vmem:[%s15105_s3 + $0x80] sm:$0xff]  ;;  %6784 = vmatpush2.msra.mxu1 %v5772_v17  ;;  %v7405_v4 = vpack.i.bf16 %v12724_v42, %v12722_v8 }
 0x636   :  { %7381 = vrot.lane.b32.xlu1 %v12352_v15, %s8304_s20  ;;  %v16742_v15 = vpack.i.bf16 %v12243_v32, %v12232_v59  ;;  %6767 = vmatprep.subr.mxu1 %v16403_v2 }
 0x637   :  { %v13115_v40 = vpop.permute.xlu0 %7106  ;;  %6785 = vmatpush2.msra.mxu1 %v5771_v56  ;;  %5938 = vmatprep.subr.mxu0 %v16403_v2 }
 0x638   :  { %v13113_v52 = vpop.permute.xlu1 %7101  ;;  %16741 = vst [vmem:[#allocation345_spill] sm:$0xff] %v13115_v40  ;;  %v8121_v40 = vld [vmem:[#allocation3 + $0x171] sm:$0xff]  ;;  %5939 = vmatpush1.msra.mxu0 %v5757_v46  ;;  %v7445_v46 = vpack.i.bf16 %v12508_v44, %v12502_v51  ;;  %v13198_v51 = vld [vmem:[#allocation3 + $0x209] sm:$0xff] }
 0x639   :  { %16740 = vst [vmem:[#allocation321_spill] sm:$0xff] %v13113_v52  ;;  %7396 = vrot.lane.b32.xlu0 %v16742_v15, %s8306_s28  ;;  %v7400_v26 = vpack.i.bf16 %v12482_v37, %v8121_v40  ;;  %v7415_v37 = vpack.i.bf16 %v12494_v23, %v12488_v62  ;;  %5940 = vmatprep.subr.mxu0 %v16403_v2  ;;  %16758 = vst [vmem:[#allocation325_spill] sm:$0xff] %v13198_v51 }
 0x63a   :  { %7391 = vrot.lane.b32.xlu1 %v7390_v12, %s8307_s29  ;;  %v7420_v40 = vpack.i.bf16 %v12730_v36, %v12726_v24  ;;  %5941 = vmatpush1.msra.mxu0 %v5756_v55  ;;  %v16750_v62 = vpack.i.bf16 %v12275_v63, %v12261_v0  ;;  %v7435_v23 = vpack.i.bf16 %v12742_v9, %v12740_v58  ;;  %v3567_v12 = vld [vmem:[#allocation3 + $0x227] sm:$0xff] }
 0x63b   :  { %v13135_v60 = vpop.permute.xlu0 %7116  ;;  %5942 = vmatprep.subr.mxu0 %v16403_v2  ;;  %v7430_v36 = vpack.i.bf16 %v12496_v57, %v12500_v7  ;;  %v16755_v57 = vpack.i.bf16 %v12291_v53, %v12277_v25  ;;  %v7465_v53 = vpack.i.bf16 %v3567_v12, %v12758_v21  ;;  %v3640_v21 = vld [vmem:[#allocation3 + $0x230] sm:$0xff]  ;;  %v16771_v12 = vld [vmem:[#allocation11_spill] sm:$0xff] }
 0x63c   :  { %v13133_v52 = vpop.permute.xlu1 %7111  ;;  %16744 = vst [vmem:[#allocation41_spill] sm:$0xff] %v13135_v60  ;;  %5943 = vmatpush1.msra.mxu0 %v5755_v45  ;;  %v7450_v45 = vpack.i.bf16 %v12756_v27, %v12744_v41  ;;  %v13211_v27 = vld [vmem:[#allocation3 + $0x211] sm:$0xff] }
 0x63d   :  { %16743 = vst [vmem:[#allocation346_spill] sm:$0xff] %v13133_v52  ;;  %7406 = vrot.lane.b32.xlu0 %v7405_v4, %s8307_s29  ;;  %5972 = vmatprep.subr.mxu0 %v16403_v2  ;;  %16759 = vst [vmem:[#allocation347_spill] sm:$0xff] %v13211_v27  ;;  %v3534_v60 = vld [vmem:[#allocation3 + $0xf] sm:$0xff]  ;;  %v16826_v52 = vld [vmem:[#allocation190_spill] sm:$0xff] }
 0x63e   :  { %7401 = vrot.lane.b32.xlu1 %v7400_v26, %s8305_s25  ;;  %5973 = vmatpush2.msra.mxu0 %v5772_v17  ;;  %v7460_v17 = vpack.i.bf16 %v13198_v51, %v12512_v28  ;;  %v13463_v51 = vld [vmem:[#allocation3 + $0xc9] sm:$0xff] }
 0x63f   :  { %v13145_v32 = vpop.permute.xlu0 %7126  ;;  %5974 = vmatprep.subr.mxu0 %v16403_v2  ;;  %v8122_v2 = vld [vmem:[#allocation3 + $0x1f0] sm:$0xff]  ;;  %16873 = vst [vmem:[#allocation387_spill] sm:$0xff] %v13463_v51 }
 0x640   :  { %v13143_v59 = vpop.permute.xlu1 %7121  ;;  %16746 = vst [vmem:[#allocation114_spill] sm:$0xff] %v13145_v32  ;;  %5975 = vmatpush2.msra.mxu0 %v5771_v56  ;;  %v7455_v55 = vpack.i.bf16 %v13054_v61, %v8122_v2  ;;  %v3639_v61 = vld [vmem:[#allocation3 + $0x228] sm:$0xff]  ;;  %v7475_v56 = vpack.i.bf16 %v12516_v14, %v13211_v27  ;;  %v7505_v2 = vpack.i.bf16 %v12530_v13, %v12524_v43  ;;  %v13479_v27 = vld [vmem:[#allocation3 + $0x3f0] sm:$0xff] }
 0x641   :  { %16745 = vst [vmem:[#allocation42_spill] sm:$0xff] %v13143_v59  ;;  %7416 = vrot.lane.b32.xlu0 %v7415_v37, %s8305_s25  ;;  %v7470_v26 = vpack.i.bf16 %v3639_v61, %v13065_v20  ;;  %v3568_v37 = vld [vmem:[#allocation3 + $0x22f] sm:$0xff]  ;;  %v16816_v59 = vld [vmem:[#allocation182_spill] sm:$0xff]  ;;  %16879 = vst [vmem:[#allocation131_spill] sm:$0xff] %v13479_v27 }
 0x642   :  { %7411 = vrot.lane.b32.xlu1 %v16747_v22, %s8306_s28  ;;  %v13439_v32 = vld [vmem:[#allocation3 + $0xa9] sm:$0xff] }
 0x643   :  { %v13156_v31 = vpop.permute.xlu0 %7136  ;;  %16859 = vst [vmem:[#allocation229_spill] sm:$0xff] %v13439_v32  ;;  %v13533_v27 = vld [vmem:[#allocation3 + $0x129] sm:$0xff] }
 0x644   :  { %16748 = vst [vmem:[#allocation113_spill] sm:$0xff] %v13156_v31  ;;  %v13158_v4 = vpop.permute.xlu1 %7131  ;;  %v16857_v31 = vld [vmem:[#allocation338_spill] sm:$0xff]  ;;  %16907 = vst [vmem:[#allocation49_spill] sm:$0xff] %v13533_v27  ;;  %v8157_v51 = vld [vmem:[#allocation3 + $0x2f] sm:$0xff] }
 0x645   :  { %16749 = vst [vmem:[#allocation115_spill] sm:$0xff] %v13158_v4  ;;  %7426 = vrot.lane.b32.xlu0 %v16750_v62, %s8306_s28  ;;  %v13561_v27 = vld [vmem:[#allocation3 + $0x111] sm:$0xff]  ;;  %v13569_v4 = vld [vmem:[#allocation3 + $0x449] sm:$0xff] }
 0x646   :  { %7421 = vrot.lane.b32.xlu1 %v7420_v40, %s8307_s29  ;;  %v8123_v40 = vld [vmem:[#allocation3 + $0x288] sm:$0xff]  ;;  %16920 = vst [vmem:[#allocation234_spill] sm:$0xff] %v13561_v27  ;;  %16922 = vst [vmem:[#allocation257_spill] sm:$0xff] %v13569_v4 }
 0x647   :  { %v13168_v39 = vpop.permute.xlu0 %7146  ;;  %v7485_v62 = vpack.i.bf16 %v8123_v40, %v3640_v21 }
 0x648   :  { %16751 = vst [vmem:[#allocation116_spill] sm:$0xff] %v13168_v39  ;;  %v13170_v33 = vpop.permute.xlu1 %7141 }
 0x649   :  { %16752 = vst [vmem:[#allocation214_spill] sm:$0xff] %v13170_v33  ;;  %7436 = vrot.lane.b32.xlu0 %v7435_v23, %s8307_s29  ;;  %v7480_v23 = vpack.i.bf16 %v12762_v18, %v3568_v37  ;;  %v16845_v33 = vld [vmem:[#allocation219_spill] sm:$0xff] }
 0x64a   :  { %7431 = vrot.lane.b32.xlu1 %v7430_v36, %s8305_s25  ;;  %v7495_v36 = vpack.i.bf16 %v12772_v34, %v12770_v5  ;;  %v16766_v5 = vpack.i.bf16 %v12328_v29, %v12317_v1  ;;  %v16776_v1 = vld [vmem:[#allocation215_spill] sm:$0xff]  ;;  %v16777_v29 = vld [vmem:[#allocation216_spill] sm:$0xff] }
 0x64b   :  { %v13180_v0 = vpop.permute.xlu0 %7156  ;;  %v7525_v61 = vpack.i.bf16 %v16777_v29, %v16776_v1  ;;  %v16792_v1 = vld [vmem:[#allocation14_spill] sm:$0xff] }
 0x64c   :  { %16753 = vst [vmem:[#allocation217_spill] sm:$0xff] %v13180_v0  ;;  %v13182_v63 = vpop.permute.xlu1 %7151  ;;  %v13352_v0 = vld [vmem:[#allocation3 + $0x467] sm:$0xff] }
 0x64d   :  { %16754 = vst [vmem:[#allocation239_spill] sm:$0xff] %v13182_v63  ;;  %7446 = vrot.lane.b32.xlu0 %v7445_v46, %s8305_s25  ;;  %v7490_v46 = vpack.i.bf16 %v12518_v16, %v12522_v6  ;;  %v16769_v16 = vld [vmem:[#allocation91_spill] sm:$0xff]  ;;  %16828 = vst [vmem:[#allocation351_spill] sm:$0xff] %v13352_v0  ;;  %v16840_v63 = vld [vmem:[#allocation306_spill] sm:$0xff] }
 0x64e   :  { %7441 = vrot.lane.b32.xlu1 %v16755_v57, %s8306_s28  ;;  %v13429_v0 = vld [vmem:[#allocation3 + $0x3a8] sm:$0xff] }
 0x64f   :  { %v13191_v7 = vpop.permute.xlu0 %7166 }
 0x650   :  { %16756 = vst [vmem:[#allocation240_spill] sm:$0xff] %v13191_v7  ;;  %v13193_v9 = vpop.permute.xlu1 %7161 }
 0x651   :  { %16757 = vst [vmem:[#allocation324_spill] sm:$0xff] %v13193_v9  ;;  %7456 = vrot.lane.b32.xlu0 %v7455_v55, %s8306_s28  ;;  %v16770_v55 = vld [vmem:[#allocation92_spill] sm:$0xff] }
 0x652   :  { %7451 = vrot.lane.b32.xlu1 %v7450_v45, %s8307_s29  ;;  %v7510_v45 = vpack.i.bf16 %v16770_v55, %v16769_v16 }
 0x653   :  { %v13202_v44 = vpop.permute.xlu0 %7176 }
 0x654   :  { %v13204_v25 = vpop.permute.xlu1 %7171 }
 0x655   :  { %7466 = vrot.lane.b32.xlu0 %v7465_v53, %s8307_s29  ;;  %v16772_v53 = vld [vmem:[#allocation10_spill] sm:$0xff] }
 0x656   :  { %7461 = vrot.lane.b32.xlu1 %v7460_v17, %s8305_s25  ;;  %v16773_v17 = vpack.i.bf16 %v16771_v12, %v16772_v53  ;;  %v16790_v12 = vld [vmem:[#allocation299_spill] sm:$0xff] }
 0x657   :  { %v13213_v41 = vpop.permute.xlu0 %7186 }
 0x658   :  { %v13215_v15 = vpop.permute.xlu1 %7181 }
 0x659   :  { %7476 = vrot.lane.b32.xlu0 %v7475_v56, %s8305_s25  ;;  %v16778_v56 = vld [vmem:[#allocation76_spill] sm:$0xff] }
 0x65a   :  { %7471 = vrot.lane.b32.xlu1 %v7470_v26, %s8306_s28  ;;  %v16779_v26 = vld [vmem:[#allocation75_spill] sm:$0xff] }
 0x65b   :  { %v13222_v28 = vpop.permute.xlu0 %7196  ;;  %v7520_v21 = vpack.i.bf16 %v16779_v26, %v16778_v56  ;;  %v16796_v26 = vld [vmem:[#allocation315_spill] sm:$0xff] }
 0x65c   :  { %16760 = vst [vmem:[#allocation348_spill] sm:$0xff] %v13222_v28  ;;  %v13224_v22 = vpop.permute.xlu1 %7191 }
 0x65d   :  { %16761 = vst [vmem:[#allocation43_spill] sm:$0xff] %v13224_v22  ;;  %7486 = vrot.lane.b32.xlu0 %v7485_v62, %s8306_s28  ;;  %v16782_v62 = vld [vmem:[#allocation191_spill] sm:$0xff] }
 0x65e   :  { %7481 = vrot.lane.b32.xlu1 %v7480_v23, %s8307_s29  ;;  %v16783_v23 = vld [vmem:[#allocation192_spill] sm:$0xff] }
 0x65f   :  { %v13229_v14 = vpop.permute.xlu0 %7206 }
 0x660   :  { %16762 = vst [vmem:[#allocation44_spill] sm:$0xff] %v13229_v14  ;;  %v13231_v20 = vpop.permute.xlu1 %7201  ;;  %v13515_v14 = vld [vmem:[#allocation3 + $0x450] sm:$0xff] }
 0x661   :  { %16763 = vst [vmem:[#allocation118_spill] sm:$0xff] %v13231_v20  ;;  %7496 = vrot.lane.b32.xlu0 %v7495_v36, %s8307_s29  ;;  %v7535_v36 = vpack.i.bf16 %v16783_v23, %v16782_v62  ;;  %v16798_v23 = vld [vmem:[#allocation15_spill] sm:$0xff]  ;;  %v13483_v20 = vld [vmem:[#allocation3 + $0xe9] sm:$0xff]  ;;  %16898 = vst [vmem:[#allocation233_spill] sm:$0xff] %v13515_v14 }
 0x662   :  { %7491 = vrot.lane.b32.xlu1 %v7490_v46, %s8305_s25  ;;  %v16784_v46 = vld [vmem:[#allocation13_spill] sm:$0xff]  ;;  %16881 = vst [vmem:[#allocation132_spill] sm:$0xff] %v13483_v20 }
 0x663   :  { %v13239_v57 = vpop.permute.xlu0 %7216  ;;  %v13503_v20 = vld [vmem:[#allocation3 + $0x109] sm:$0xff] }
 0x664   :  { %16764 = vst [vmem:[#allocation117_spill] sm:$0xff] %v13239_v57  ;;  %v13241_v18 = vpop.permute.xlu1 %7211  ;;  %v13451_v57 = vld [vmem:[#allocation3 + $0x3d0] sm:$0xff]  ;;  %16891 = vst [vmem:[#allocation255_spill] sm:$0xff] %v13503_v20  ;;  %v8156_v20 = vld [vmem:[#allocation3 + $0x27] sm:$0xff] }
 0x665   :  { %16765 = vst [vmem:[#allocation119_spill] sm:$0xff] %v13241_v18  ;;  %7506 = vrot.lane.b32.xlu0 %v7505_v2, %s8305_s25  ;;  %v16785_v2 = vld [vmem:[#allocation12_spill] sm:$0xff]  ;;  %16865 = vst [vmem:[#allocation254_spill] sm:$0xff] %v13451_v57  ;;  %v13471_v18 = vld [vmem:[#allocation3 + $0xb1] sm:$0xff] }
 0x666   :  { %7501 = vrot.lane.b32.xlu1 %v16766_v5, %s8306_s28  ;;  %v16786_v5 = vpack.i.bf16 %v16784_v46, %v16785_v2  ;;  %v16801_v2 = vld [vmem:[#allocation31_spill] sm:$0xff]  ;;  %16875 = vst [vmem:[#allocation353_spill] sm:$0xff] %v13471_v18  ;;  %v13475_v57 = vld [vmem:[#allocation3 + $0x3e8] sm:$0xff] }
 0x667   :  { %v13250_v34 = vpop.permute.xlu0 %7226  ;;  %16877 = vst [vmem:[#allocation354_spill] sm:$0xff] %v13475_v57  ;;  %v13511_v18 = vld [vmem:[#allocation3 + $0x408] sm:$0xff]  ;;  %v13537_v57 = vld [vmem:[#allocation3 + $0x451] sm:$0xff] }
 0x668   :  { %16767 = vst [vmem:[#allocation120_spill] sm:$0xff] %v13250_v34  ;;  %v13252_v6 = vpop.permute.xlu1 %7221  ;;  %16896 = vst [vmem:[#allocation230_spill] sm:$0xff] %v13511_v18  ;;  %v13523_v34 = vld [vmem:[#allocation3 + $0xf1] sm:$0xff]  ;;  %v13563_v18 = vld [vmem:[#allocation3 + $0x429] sm:$0xff] }
 0x669   :  { %16768 = vst [vmem:[#allocation218_spill] sm:$0xff] %v13252_v6  ;;  %7516 = vrot.lane.b32.xlu0 %v16773_v17, %s8306_s28  ;;  %v16791_v17 = vld [vmem:[#allocation71_spill] sm:$0xff]  ;;  %v13447_v6 = vld [vmem:[#allocation3 + $0x91] sm:$0xff]  ;;  %16903 = vst [vmem:[#allocation389_spill] sm:$0xff] %v13523_v34 }
 0x66a   :  { %7511 = vrot.lane.b32.xlu1 %v7510_v45, %s8307_s29  ;;  %v16789_v45 = vld [vmem:[#allocation296_spill] sm:$0xff]  ;;  %v16793_v29 = vpack.i.bf16 %v16791_v17, %v16792_v1  ;;  %16863 = vst [vmem:[#allocation253_spill] sm:$0xff] %v13447_v6  ;;  %16909 = vst [vmem:[#allocation383_spill] sm:$0xff] %v13537_v57  ;;  %v13596_v57 = vld [vmem:[#allocation3 + $0x131] sm:$0xff] }
 0x66b   :  { %v13261_v43 = vpop.permute.xlu0 %7236  ;;  %v7540_v53 = vpack.i.bf16 %v16790_v12, %v16789_v45  ;;  %v16803_v12 = vld [vmem:[#allocation181_spill] sm:$0xff]  ;;  %16921 = vst [vmem:[#allocation237_spill] sm:$0xff] %v13563_v18  ;;  %16935 = vst [vmem:[#allocation358_spill] sm:$0xff] %v13596_v57  ;;  %v16941_v57 = vld [vmem:[#allocation330_spill] sm:$0xff] }
 0x66c   :  { %16774 = vst [vmem:[#allocation221_spill] sm:$0xff] %v13261_v43  ;;  %v13263_v13 = vpop.permute.xlu1 %7231  ;;  %v16856_v43 = vld [vmem:[#allocation26_spill] sm:$0xff]  ;;  %v6869_v4 = vunpack.i.h.bf16 %v16941_v57 }
 0x66d   :  { %16775 = vst [vmem:[#allocation243_spill] sm:$0xff] %v13263_v13  ;;  %7526 = vrot.lane.b32.xlu0 %v7525_v61, %s8307_s29  ;;  %v13435_v13 = vld [vmem:[#allocation3 + $0x3b0] sm:$0xff] }
 0x66e   :  { %7521 = vrot.lane.b32.xlu1 %v7520_v21, %s8305_s25  ;;  %v16797_v21 = vld [vmem:[#allocation314_spill] sm:$0xff] }
 0x66f   :  { %v13271_v37 = vpop.permute.xlu0 %7246  ;;  %v7555_v62 = vpack.i.bf16 %v16797_v21, %v16796_v26  ;;  %v16808_v26 = vld [vmem:[#allocation19_spill] sm:$0xff]  ;;  %v16809_v21 = vld [vmem:[#allocation77_spill] sm:$0xff] }
 0x670   :  { %16780 = vst [vmem:[#allocation244_spill] sm:$0xff] %v13271_v37  ;;  %v13273_v40 = vpop.permute.xlu1 %7241 }
 0x671   :  { %16781 = vst [vmem:[#allocation328_spill] sm:$0xff] %v13273_v40  ;;  %7536 = vrot.lane.b32.xlu0 %v7535_v36, %s8305_s25  ;;  %v13419_v40 = vld [vmem:[#allocation3 + $0x388] sm:$0xff] }
 0x672   :  { %7531 = vrot.lane.b32.xlu1 %v16786_v5, %s8306_s28  ;;  %v16802_v5 = vld [vmem:[#allocation32_spill] sm:$0xff] }
 0x673   :  { %v13282_v16 = vpop.permute.xlu0 %7256  ;;  %v7560_v45 = vpack.i.bf16 %v16802_v5, %v16801_v2 }
 0x674   :  { %16787 = vst [vmem:[#allocation331_spill] sm:$0xff] %v13282_v16  ;;  %v13284_v55 = vpop.permute.xlu1 %7251 }
 0x675   :  { %16788 = vst [vmem:[#allocation349_spill] sm:$0xff] %v13284_v55  ;;  %7546 = vrot.lane.b32.xlu0 %v16793_v29, %s8306_s28 }
 0x676   :  { %7541 = vrot.lane.b32.xlu1 %v7540_v53, %s8307_s29  ;;  %v16804_v53 = vld [vmem:[#allocation72_spill] sm:$0xff] }
 0x677   :  { %v13293_v61 = vpop.permute.xlu0 %7266  ;;  %v16805_v17 = vpack.i.bf16 %v16803_v12, %v16804_v53  ;;  %v16813_v12 = vld [vmem:[#allocation94_spill] sm:$0xff]  ;;  %v16814_v53 = vld [vmem:[#allocation93_spill] sm:$0xff] }
 0x678   :  { %16794 = vst [vmem:[#allocation350_spill] sm:$0xff] %v13293_v61  ;;  %v13295_v56 = vpop.permute.xlu1 %7261  ;;  %v16835_v61 = vld [vmem:[#allocation78_spill] sm:$0xff] }
 0x679   :  { %16795 = vst [vmem:[#allocation45_spill] sm:$0xff] %v13295_v56  ;;  %7556 = vrot.lane.b32.xlu0 %v7555_v62, %s8305_s25  ;;  %v7575_v62 = vpack.i.bf16 %v16809_v21, %v16808_v26  ;;  %v13375_v56 = vld [vmem:[#allocation3 + $0x49] sm:$0xff] }
 0x67a   :  { %7551 = vrot.lane.b32.xlu1 %v16798_v23, %s8304_s20  ;;  %v16810_v23 = vld [vmem:[#allocation16_spill] sm:$0xff] }
 0x67b   :  { %v13302_v36 = vpop.permute.xlu0 %7276 }
 0x67c   :  { %16799 = vst [vmem:[#allocation46_spill] sm:$0xff] %v13302_v36  ;;  %v13304_v46 = vpop.permute.xlu1 %7271  ;;  %v16821_v36 = vld [vmem:[#allocation17_spill] sm:$0xff] }
 0x67d   :  { %16800 = vst [vmem:[#allocation122_spill] sm:$0xff] %v13304_v46  ;;  %7566 = vrot.lane.b32.xlu0 %v16805_v17, %s8306_s28  ;;  %v7580_v17 = vpack.i.bf16 %v16814_v53, %v16813_v12  ;;  %v16822_v12 = vld [vmem:[#allocation316_spill] sm:$0xff] }
 0x67e   :  { %7561 = vrot.lane.b32.xlu1 %v7560_v45, %s8307_s29  ;;  %v16815_v45 = vld [vmem:[#allocation305_spill] sm:$0xff]  ;;  %v6809_v53 = vunpack.i.h.bf16 %v16822_v12  ;;  %v16825_v46 = vld [vmem:[#allocation24_spill] sm:$0xff] }
 0x67f   :  { %v13313_v1 = vpop.permute.xlu0 %7286  ;;  %v16817_v7 = vpack.i.bf16 %v16815_v45, %v16816_v59  ;;  %v6808_v59 = vunpack.i.l.bf16 %v16822_v12  ;;  %v8125_v45 = vld [vmem:[#allocation3 + $0x350] sm:$0xff] }
 0x680   :  { %16806 = vst [vmem:[#allocation121_spill] sm:$0xff] %v13313_v1  ;;  %v13315_v29 = vpop.permute.xlu1 %7281  ;;  %v7605_v9 = vpack.i.bf16 %v8125_v45, %v12922_v10  ;;  %v13358_v12 = vld [vmem:[#allocation3 + $0x470] sm:$0xff]  ;;  %v16858_v1 = vld [vmem:[#allocation308_spill] sm:$0xff] }
 0x681   :  { %16807 = vst [vmem:[#allocation123_spill] sm:$0xff] %v13315_v29  ;;  %7576 = vrot.lane.b32.xlu0 %v7575_v62, %s8305_s25  ;;  %v8124_v62 = vld [vmem:[#allocation3 + $0x29] sm:$0xff]  ;;  %16830 = vst [vmem:[#allocation47_spill] sm:$0xff] %v13358_v12  ;;  %v8126_v45 = vld [vmem:[#allocation3 + $0x31] sm:$0xff] }
 0x682   :  { %7571 = vrot.lane.b32.xlu1 %v16810_v23, %s8304_s20  ;;  %v16820_v23 = vld [vmem:[#allocation193_spill] sm:$0xff]  ;;  %v16852_v12 = vld [vmem:[#allocation327_spill] sm:$0xff] }
 0x683   :  { %v13322_v2 = vpop.permute.xlu0 %7296  ;;  %v7595_v29 = vpack.i.bf16 %v16820_v23, %v8124_v62  ;;  %v7600_v62 = vpack.i.bf16 %v16826_v52, %v16825_v46  ;;  %v3533_v23 = vld [vmem:[#allocation3 + $0x7] sm:$0xff] }
 0x684   :  { %16811 = vst [vmem:[#allocation124_spill] sm:$0xff] %v13322_v2  ;;  %v13324_v5 = vpop.permute.xlu1 %7291  ;;  %v13364_v10 = vsel %vm3380_vm12, %v3533_v23, %v6808_v59  ;;  %v13379_v59 = vld [vmem:[#allocation3 + $0x370] sm:$0xff] }
 0x685   :  { %16812 = vst [vmem:[#allocation222_spill] sm:$0xff] %v13324_v5  ;;  %7586 = vrot.lane.b32.xlu0 %v16817_v7, %s8306_s28  ;;  %16832 = vst [vmem:[#allocation126_spill] sm:$0xff] %v13364_v10  ;;  %v13395_v23 = vld [vmem:[#allocation3 + $0x69] sm:$0xff]  ;;  %v16868_v10 = vld [vmem:[#allocation34_spill] sm:$0xff] }
 0x686   :  { %7581 = vrot.lane.b32.xlu1 %v7580_v17, %s8307_s29  ;;  %v16851_v2 = vld [vmem:[#allocation205_spill] sm:$0xff]  ;;  %v16854_v5 = vld [vmem:[#allocation20_spill] sm:$0xff] }
 0x687   :  { %v13333_v26 = vpop.permute.xlu0 %7306 }
 0x688   :  { %16818 = vst [vmem:[#allocation225_spill] sm:$0xff] %v13333_v26  ;;  %v13335_v21 = vpop.permute.xlu1 %7301  ;;  %v16842_v26 = vld [vmem:[#allocation197_spill] sm:$0xff] }
 0x689   :  { %16819 = vst [vmem:[#allocation247_spill] sm:$0xff] %v13335_v21  ;;  %7596 = vrot.lane.b32.xlu0 %v7595_v29, %s8305_s25  ;;  %v13350_v29 = vld [vmem:[#allocation3 + $0x468] sm:$0xff]  ;;  %v16844_v21 = vld [vmem:[#allocation203_spill] sm:$0xff] }
 0x68a   :  { %7591 = vrot.lane.b32.xlu1 %v16821_v36, %s8304_s20  ;;  %16827 = vst [vmem:[#allocation385_spill] sm:$0xff] %v13350_v29  ;;  %v13356_v36 = vld [vmem:[#allocation3 + $0x46f] sm:$0xff]  ;;  %v7635_v55 = vpack.i.bf16 %v16845_v33, %v16844_v21 }
 0x68b   :  { %v13343_v7 = vpop.permute.xlu0 %7316  ;;  %16829 = vst [vmem:[#allocation352_spill] sm:$0xff] %v13356_v36  ;;  %v16849_v33 = vld [vmem:[#allocation204_spill] sm:$0xff]  ;;  %v13425_v36 = vld [vmem:[#allocation3 + $0x71] sm:$0xff] }
 0x68c   :  { %16823 = vst [vmem:[#allocation248_spill] sm:$0xff] %v13343_v7  ;;  %v13345_v17 = vpop.permute.xlu1 %7311  ;;  %v13361_v7 = vsel %vm3380_vm12, %v3534_v60, %v6809_v53  ;;  %v16837_v60 = vld [vmem:[#allocation194_spill] sm:$0xff]  ;;  %v16850_v21 = vld [vmem:[#allocation220_spill] sm:$0xff] }
 0x68d   :  { %16824 = vst [vmem:[#allocation334_spill] sm:$0xff] %v13345_v17  ;;  %7606 = vrot.lane.b32.xlu0 %v7605_v9, %s8306_s28  ;;  %16831 = vst [vmem:[#allocation48_spill] sm:$0xff] %v13361_v7  ;;  %v7615_v17 = vpack.i.bf16 %v16835_v61, %v8126_v45  ;;  %v7630_v53 = vpack.i.bf16 %v16837_v60, %v13375_v56  ;;  %v13385_v61 = vld [vmem:[#allocation3 + $0x168] sm:$0xff]  ;;  %v13401_v45 = vld [vmem:[#allocation3 + $0x51] sm:$0xff] }
 0x68e   :  { %7601 = vrot.lane.b32.xlu1 %v7600_v62, %s8307_s29  ;;  %v16836_v62 = vld [vmem:[#allocation211_spill] sm:$0xff]  ;;  %16839 = vst [vmem:[#allocation130_spill] sm:$0xff] %v13385_v61  ;;  %v8130_v9 = vld [vmem:[#allocation3 + $0x368] sm:$0xff]  ;;  %v13495_v29 = vld [vmem:[#allocation3 + $0xd1] sm:$0xff] }
 0x68f   :  { %v13366_v52 = vpop.permute.xlu0 %7326  ;;  %v7625_v56 = vpack.i.bf16 %v8130_v9, %v12924_v49  ;;  %v16841_v60 = vld [vmem:[#allocation84_spill] sm:$0xff]  ;;  %16888 = vst [vmem:[#allocation127_spill] sm:$0xff] %v13495_v29  ;;  %v16927_v29 = vld [vmem:[#allocation82_spill] sm:$0xff] }
 0x690   :  { %16833 = vst [vmem:[#allocation125_spill] sm:$0xff] %v13366_v52  ;;  %v13368_v46 = vpop.permute.xlu1 %7321  ;;  %v7620_v39 = vpack.i.bf16 %v16842_v26, %v16841_v60  ;;  %v13409_v9 = vld [vmem:[#allocation3 + $0x89] sm:$0xff]  ;;  %v6829_v47 = vunpack.i.h.bf16 %v16927_v29 }
 0x691   :  { %16834 = vst [vmem:[#allocation129_spill] sm:$0xff] %v13368_v46  ;;  %7616 = vrot.lane.b32.xlu0 %v7615_v17, %s8305_s25  ;;  %v16843_v46 = vld [vmem:[#allocation79_spill] sm:$0xff]  ;;  %v16846_v17 = vld [vmem:[#allocation317_spill] sm:$0xff]  ;;  %v16847_v26 = vld [vmem:[#allocation80_spill] sm:$0xff] }
 0x692   :  { %7611 = vrot.lane.b32.xlu1 %v16840_v63, %s8304_s20  ;;  %v13405_v63 = vld [vmem:[#allocation3 + $0x390] sm:$0xff]  ;;  %v13457_v7 = vld [vmem:[#allocation3 + $0x3c8] sm:$0xff] }
 0x693   :  { %v13413_v37 = vpop.permute.xlu0 %7336  ;;  %v16853_v52 = vld [vmem:[#allocation337_spill] sm:$0xff]  ;;  %16869 = vst [vmem:[#allocation386_spill] sm:$0xff] %v13457_v7  ;;  %v16883_v7 = vld [vmem:[#allocation22_spill] sm:$0xff]  ;;  %v13545_v61 = vld [vmem:[#allocation3 + $0x428] sm:$0xff] }
 0x694   :  { %v13415_v16 = vpop.permute.xlu1 %7331  ;;  %v16861_v60 = vld [vmem:[#allocation85_spill] sm:$0xff]  ;;  %v6814_v49 = vunpack.i.h.bf16 %v16883_v7  ;;  %v6813_v22 = vunpack.i.l.bf16 %v16883_v7  ;;  %16912 = vst [vmem:[#allocation134_spill] sm:$0xff] %v13545_v61  ;;  %v6828_v61 = vunpack.i.l.bf16 %v16927_v29  ;;  %v16938_v29 = vpack.i.bf16 %v16850_v21, %v16849_v33 }
 0x695   :  { %16848 = vst [vmem:[#allocation226_spill] sm:$0xff] %v13415_v16  ;;  %7626 = vrot.lane.b32.xlu0 %v7625_v56, %s8306_s28  ;;  %v16893_v56 = vld [vmem:[#allocation318_spill] sm:$0xff]  ;;  %v8166_v33 = vld [vmem:[#allocation3 + $0x6f] sm:$0xff] }
 0x696   :  { %7621 = vrot.lane.b32.xlu1 %v7620_v39, %s8307_s29  ;;  %v6819_v6 = vunpack.i.h.bf16 %v16893_v56  ;;  %v13540_v54 = vsel %vm3380_vm12, %v8156_v20, %v6813_v22  ;;  %v16916_v39 = vld [vmem:[#allocation74_spill] sm:$0xff]  ;;  %v16917_v22 = vpack.i.bf16 %v13379_v59, %v12916_v3  ;;  %v8162_v3 = vld [vmem:[#allocation3 + $0x4f] sm:$0xff] }
 0x697   :  { %v13467_v28 = vpop.permute.xlu0 %7346  ;;  %16910 = vst [vmem:[#allocation384_spill] sm:$0xff] %v13540_v54  ;;  %v8165_v54 = vld [vmem:[#allocation3 + $0x67] sm:$0xff] }
 0x698   :  { %v13469_v32 = vpop.permute.xlu1 %7341  ;;  %v13575_v59 = vsel %vm3380_vm12, %v8162_v3, %v6819_v6  ;;  %v16947_v6 = vld [vmem:[#allocation227_spill] sm:$0xff] }
 0x699   :  { %7636 = vrot.lane.b32.xlu0 %v7635_v55, %s8307_s29  ;;  %v6818_v55 = vunpack.i.l.bf16 %v16893_v56  ;;  %v13525_v56 = vld [vmem:[#allocation3 + $0x409] sm:$0xff]  ;;  %16924 = vst [vmem:[#allocation390_spill] sm:$0xff] %v13575_v59 }
 0x69a   :  { %7631 = vrot.lane.b32.xlu1 %v7630_v53, %s8305_s25  ;;  %16904 = vst [vmem:[#allocation355_spill] sm:$0xff] %v13525_v56  ;;  %v13529_v53 = vld [vmem:[#allocation3 + $0x430] sm:$0xff]  ;;  %v16932_v59 = vld [vmem:[#allocation208_spill] sm:$0xff]  ;;  %v6868_v56 = vunpack.i.l.bf16 %v16941_v57  ;;  %v16945_v57 = vld [vmem:[#allocation83_spill] sm:$0xff] }
 0x69b   :  { %v13517_v7 = vpop.permute.xlu0 %7356  ;;  %16905 = vst [vmem:[#allocation356_spill] sm:$0xff] %v13529_v53 }
 0x69c   :  { %16899 = vst [vmem:[#allocation256_spill] sm:$0xff] %v13517_v7  ;;  %v13519_v30 = vpop.permute.xlu1 %7351  ;;  %v13543_v7 = vsel %vm3380_vm12, %v8157_v51, %v6814_v49  ;;  %v13578_v51 = vld [vmem:[#allocation3 + $0x149] sm:$0xff] }
 0x69d   :  { %16900 = vst [vmem:[#allocation388_spill] sm:$0xff] %v13519_v30  ;;  %16911 = vst [vmem:[#allocation133_spill] sm:$0xff] %v13543_v7  ;;  %v13551_v30 = vld [vmem:[#allocation3 + $0x448] sm:$0xff]  ;;  %7646 = vrot.lane.b32.xlu0 %v16916_v39, %s8304_s20 }
 0x69e   :  { %7641 = vrot.lane.b32.xlu1 %v16917_v22, %s8306_s28  ;;  %v8161_v39 = vld [vmem:[#allocation3 + $0x47] sm:$0xff]  ;;  %v16925_v22 = vld [vmem:[#allocation322_spill] sm:$0xff]  ;;  %16926 = vst [vmem:[#allocation391_spill] sm:$0xff] %v13578_v51 }
 0x69f   :  { %v13572_v53 = vsel %vm3380_vm12, %v8161_v39, %v6818_v55  ;;  %v6823_v49 = vunpack.i.l.bf16 %v16925_v22  ;;  %v6824_v27 = vunpack.i.h.bf16 %v16925_v22  ;;  %v13584_v18 = vpop.permute.xlu0 %7366  ;;  %v16936_v7 = vld [vmem:[#allocation184_spill] sm:$0xff]  ;;  %v16939_v22 = vpack.i.bf16 %v16846_v17, %v13401_v45 }
 0x6a0   :  { %16923 = vst [vmem:[#allocation258_spill] sm:$0xff] %v13572_v53  ;;  %16928 = vst [vmem:[#allocation357_spill] sm:$0xff] %v13584_v18  ;;  %v13586_v20 = vpop.permute.xlu1 %7361  ;;  %v6854_v53 = vunpack.i.h.bf16 %v16932_v59  ;;  %v6859_v18 = vunpack.i.h.bf16 %v16936_v7  ;;  %v6858_v34 = vunpack.i.l.bf16 %v16936_v7  ;;  %v16937_v55 = vld [vmem:[#allocation28_spill] sm:$0xff] }
 0x6a1   :  { %v6864_v39 = vunpack.i.h.bf16 %v16937_v55  ;;  %7656 = vrot.lane.b32.xlu0 %v16938_v29, %s8307_s29  ;;  %v13614_v59 = vsel %vm3380_vm12, %v8165_v54, %v6823_v49  ;;  %v6863_v7 = vunpack.i.l.bf16 %v16937_v55  ;;  %v13620_v21 = vsel %vm3380_vm12, %v8166_v33, %v6824_v27  ;;  %v8167_v29 = vld [vmem:[#allocation3 + $0x8f] sm:$0xff]  ;;  %v8168_v55 = vld [vmem:[#allocation3 + $0x87] sm:$0xff] }
 0x6a2   :  { %7651 = vrot.lane.b32.xlu1 %v16939_v22, %s8305_s25  ;;  %16940 = vst [vmem:[#allocation50_spill] sm:$0xff] %v13614_v59  ;;  %16942 = vst [vmem:[#allocation51_spill] sm:$0xff] %v13620_v21  ;;  %v13623_v45 = vsel %vm3380_vm12, %v8167_v29, %v6829_v47  ;;  %v16944_v17 = vld [vmem:[#allocation188_spill] sm:$0xff]  ;;  %v13632_v59 = vsel %vm3380_vm12, %v8168_v55, %v6828_v61  ;;  %v5322_v29 = vsel %vm3380_vm12, %v16836_v62, %v6859_v18 }
 0x6a3   :  { %16943 = vst [vmem:[#allocation136_spill] sm:$0xff] %v13623_v45  ;;  %v6874_v22 = vunpack.i.h.bf16 %v16944_v17  ;;  %v6873_v3 = vunpack.i.l.bf16 %v16944_v17  ;;  %v13627_v54 = vpop.permute.xlu0 %7376  ;;  %v8169_v27 = vld [vmem:[#allocation3 + $0x12f] sm:$0xff]  ;;  %v8170_v45 = vld [vmem:[#allocation3 + $0x147] sm:$0xff]  ;;  %v13642_v14 = vsel %vm3380_vm12, %v12708_v11, %v6864_v39  ;;  %v7014_v61 = vunpack.i.h.bf16 %v16947_v6 }
 0x6a4   :  { %v13629_v49 = vpop.permute.xlu1 %7371  ;;  %v5320_v33 = vsel %vm3380_vm12, %v8169_v27, %v6854_v53  ;;  %v16946_v21 = vld [vmem:[#allocation88_spill] sm:$0xff]  ;;  %v5321_v17 = vsel %vm3380_vm12, %v8170_v45, %v6858_v34  ;;  %v16948_v55 = vpack.i.bf16 %v16843_v46, %v13395_v23  ;;  %v16949_v53 = vpack.i.bf16 %v13419_v40, %v16851_v2 }
 0x6a5   :  { %v6879_v47 = vunpack.i.h.bf16 %v16946_v21  ;;  %v8171_v18 = vld [vmem:[#allocation3 + $0x167] sm:$0xff]  ;;  %v13658_v11 = vsel %vm3380_vm12, %v12722_v8, %v6869_v4  ;;  %v13662_v34 = vsel %vm3380_vm12, %v12714_v50, %v6868_v56  ;;  %v13667_v23 = vsel %vm3380_vm12, %v12726_v24, %v6874_v22 }
 0x6a6   :  { %7666 = vrot.lane.b32.xlu0 %v16948_v55, %s8305_s25  ;;  %7661 = vrot.lane.b32.xlu1 %v16949_v53, %s8306_s28  ;;  %v13654_v27 = vsel %vm3380_vm12, %v8171_v18, %v6863_v7  ;;  %v16950_v39 = vld [vmem:[#allocation228_spill] sm:$0xff]  ;;  %v13671_v40 = vsel %vm3380_vm12, %v12724_v42, %v6873_v3  ;;  %v6878_v2 = vunpack.i.l.bf16 %v16946_v21  ;;  %v7174_v7 = vunpack.i.h.bf16 %v13204_v25 }
 0x6a7   :  { %v7018_v46 = vunpack.i.l.bf16 %v16950_v39  ;;  %v7387_v8 = vpop.permute.xlu0 %7386  ;;  %v13679_v50 = vsel %vm3380_vm12, %v12740_v58, %v6879_v47  ;;  %v7334_v24 = vunpack.i.h.bf16 %v13415_v16  ;;  %v5385_v56 = vsel %vm5365_vm15, %v5320_v33, %v7014_v61 }
 0x6a8   :  { %v13675_v4 = vpop.permute.xlu1 %7381  ;;  %v7019_v42 = vunpack.i.h.bf16 %v16950_v39  ;;  %v7178_v3 = vunpack.i.l.bf16 %v13202_v44  ;;  %v7388_v21 = vunpack.i.l.bf16 %v7387_v8  ;;  %v16951_v45 = vpack.i.bf16 %v13405_v63, %v12948_v19 }
 0x6a9   :  { %v16952_v58 = vpack.i.bf16 %v16853_v52, %v16852_v12  ;;  %v5386_v22 = vsel %vm5365_vm15, %v5321_v17, %v7018_v46  ;;  %v7338_v47 = vunpack.i.l.bf16 %v13413_v37  ;;  %v7179_v33 = vunpack.i.h.bf16 %v13202_v44  ;;  %v16953_v52 = vld [vmem:[#allocation295_spill] sm:$0xff] }
 0x6aa   :  { %7676 = vrot.lane.b32.xlu0 %v16951_v45, %s8306_s28  ;;  %v5450_v61 = vsel %vm5430_vm0, %v5385_v56, %v7174_v7  ;;  %v7389_v55 = vunpack.i.h.bf16 %v7387_v8  ;;  %v6884_v45 = vunpack.i.h.bf16 %v16953_v52  ;;  %v5451_v17 = vsel %vm5430_vm0, %v5386_v22, %v7178_v3  ;;  %v16955_v7 = vld [vmem:[#allocation73_spill] sm:$0xff]  ;;  %v16956_v56 = vld [vmem:[#allocation292_spill] sm:$0xff] }
 0x6ab   :  { %7671 = vrot.lane.b32.xlu1 %v16952_v58, %s8307_s29  ;;  %v7397_v53 = vpop.permute.xlu0 %7396  ;;  %v5515_v19 = vsel %vm5495_vm1, %v5450_v61, %v7334_v24  ;;  %v7339_v46 = vunpack.i.h.bf16 %v13413_v37  ;;  %v16954_v44 = vpack.i.bf16 %v16854_v5, %v13425_v36  ;;  %v6883_v24 = vunpack.i.l.bf16 %v16953_v52 }
 0x6ac   :  { %v7392_v18 = vpop.permute.xlu1 %7391  ;;  %v7398_v63 = vunpack.i.l.bf16 %v7397_v53  ;;  %v5580_v8 = vsel %vm5560_vm2, %v5515_v19, %v7388_v21  ;;  %v6889_v58 = vunpack.i.h.bf16 %v16956_v56  ;;  %v5516_v61 = vsel %vm5495_vm1, %v5451_v17, %v7338_v47  ;;  %v16957_v21 = vld [vmem:[#allocation342_spill] sm:$0xff] }
 0x6ad   :  { %v7394_v39 = vunpack.i.h.bf16 %v7392_v18  ;;  %v7393_v12 = vunpack.i.l.bf16 %v7392_v18  ;;  %v5387_v37 = vsel %vm5365_vm15, %v5322_v29, %v7019_v42  ;;  %v7399_v22 = vunpack.i.h.bf16 %v7397_v53 }
 0x6ae   :  { %7686 = vrot.lane.b32.xlu0 %v16954_v44, %s8305_s25  ;;  %v5581_v44 = vsel %vm5560_vm2, %v5516_v61, %v7389_v55  ;;  %v7023_v19 = vunpack.i.l.bf16 %v16957_v21  ;;  %v5452_v52 = vsel %vm5430_vm0, %v5387_v37, %v7179_v33  ;;  %v7183_v42 = vunpack.i.l.bf16 %v13215_v15  ;;  %v16960_v37 = vld [vmem:[#allocation332_spill] sm:$0xff] }
 0x6af   :  { %7681 = vrot.lane.b32.xlu1 %v16955_v7, %s8304_s20  ;;  %v5645_v3 = vsel %vm5625_vm3, %v5580_v8, %v7393_v12  ;;  %v13713_v18 = vpop.permute.xlu0 %7406  ;;  %v3570_v7 = vld [vmem:[#allocation3 + $0x24f] sm:$0xff]  ;;  %v5646_v47 = vsel %vm5625_vm3, %v5581_v44, %v7394_v39  ;;  %v8172_v12 = vld [vmem:[#allocation3 + $0x1c7] sm:$0xff]  ;;  %v5517_v53 = vsel %vm5495_vm1, %v5452_v52, %v7339_v46  ;;  %v16958_v55 = vpack.i.bf16 %v13429_v0, %v16855_v38 }
 0x6b0   :  { %v7402_v5 = vpop.permute.xlu1 %7401  ;;  %v5710_v36 = vsel %vm5690_vm4, %v5645_v3, %v7398_v63  ;;  %v13721_v29 = vsel %vm3380_vm12, %v8172_v12, %v6878_v2  ;;  %v7408_v63 = vunpack.i.l.bf16 %v13713_v18  ;;  %v16959_v33 = vpack.i.bf16 %v16857_v31, %v16856_v43  ;;  %v8173_v39 = vld [vmem:[#allocation3 + $0x1ef] sm:$0xff]  ;;  %v8175_v38 = vld [vmem:[#allocation3 + $0x1e7] sm:$0xff] }
 0x6b1   :  { %v7403_v51 = vunpack.i.l.bf16 %v7402_v5  ;;  %6072 = vmatmul.mubr.f32.vlgmr.msra.gmra.mxu1 %v5710_v36  ;;  %v13735_v2 = vsel %vm3380_vm12, %v8173_v39, %v6884_v45  ;;  %v6888_v17 = vunpack.i.l.bf16 %v16956_v56  ;;  %v7343_v46 = vunpack.i.l.bf16 %v13469_v32  ;;  %v8174_v8 = vld [vmem:[#allocation3 + $0x189] sm:$0xff] }
 0x6b2   :  { %7696 = vrot.lane.b32.xlu0 %v16958_v55, %s8306_s28  ;;  %6528 = vmatprep.mubr.msk.f32.mxu1 %vm3380_vm12, %v8174_v8  ;;  %v13742_v0 = vsel %vm3380_vm12, %v8175_v38, %v6883_v24  ;;  %v13745_v31 = vsel %vm3380_vm12, %v3570_v7, %v6889_v58  ;;  %v7404_v43 = vunpack.i.h.bf16 %v7402_v5  ;;  %v5711_v56 = vsel %vm5690_vm4, %v5646_v47, %v7399_v22  ;;  %v3569_v44 = vld [vmem:[#allocation3 + $0x247] sm:$0xff]  ;;  %v8176_v47 = vld [vmem:[#allocation3 + $0x191] sm:$0xff] }
 0x6b3   :  { %7691 = vrot.lane.b32.xlu1 %v16959_v33, %s8307_s29  ;;  %v5582_v61 = vsel %vm5560_vm2, %v5517_v53, %v7403_v51  ;;  %v13747_v3 = vpop.permute.xlu0 %7416  ;;  %v6894_v36 = vunpack.i.h.bf16 %v16960_v37  ;;  %v7024_v52 = vunpack.i.h.bf16 %v16957_v21  ;;  %v5388_v51 = vsel %vm5365_vm15, %v13654_v27, %v7023_v19  ;;  %v16963_v33 = vld [vmem:[#allocation37_spill] sm:$0xff] }
 0x6b4   :  { %v7412_v45 = vpop.permute.xlu1 %7411  ;;  %v6893_v24 = vunpack.i.l.bf16 %v16960_v37  ;;  %v7184_v58 = vunpack.i.h.bf16 %v13215_v15  ;;  %v5453_v5 = vsel %vm5430_vm0, %v5388_v51, %v7183_v42  ;;  %v16961_v22 = vpack.i.bf16 %v16862_v35, %v16861_v60 }
 0x6b5   :  { %v7413_v12 = vunpack.i.l.bf16 %v7412_v45  ;;  %6077 = vmatmul.mubr.f32.gmra.mxu1 %v5711_v56  ;;  %v16962_v7 = vpack.i.bf16 %v16847_v26, %v13409_v9  ;;  %v5647_v27 = vsel %vm5625_vm3, %v5582_v61, %v7408_v63  ;;  %v7344_v21 = vunpack.i.h.bf16 %v13469_v32  ;;  %v8177_v63 = vld [vmem:[#allocation3 + $0x26f] sm:$0xff] }
 0x6b6   :  { %7706 = vrot.lane.b32.xlu0 %v16961_v22, %s8307_s29  ;;  %v5518_v19 = vsel %vm5495_vm1, %v5453_v5, %v7343_v46  ;;  %v7409_v15 = vunpack.i.h.bf16 %v13713_v18  ;;  %6529 = vmatprep.mubr.msk.f32.mxu1 %vm3380_vm12, %v8176_v47  ;;  %v13772_v35 = vsel %vm3380_vm12, %v3569_v44, %v6888_v17  ;;  %v7418_v60 = vunpack.i.l.bf16 %v13747_v3  ;;  %v8178_v17 = vld [vmem:[#allocation3 + $0x267] sm:$0xff]  ;;  %v16964_v61 = vld [vmem:[#allocation333_spill] sm:$0xff] }
 0x6b7   :  { %7701 = vrot.lane.b32.xlu1 %v16962_v7, %s8305_s25  ;;  %v5712_v42 = vsel %vm5690_vm4, %v5647_v27, %v7413_v12  ;;  %v7414_v9 = vunpack.i.h.bf16 %v7412_v45  ;;  %v13775_v26 = vpop.permute.xlu0 %7426  ;;  %v5583_v32 = vsel %vm5560_vm2, %v5518_v19, %v7404_v43  ;;  %v13779_v55 = vsel %vm3380_vm12, %v8177_v63, %v6894_v36  ;;  %v16965_v56 = vld [vmem:[#allocation185_spill] sm:$0xff]  ;;  %v8181_v63 = vld [vmem:[#allocation3 + $0x287] sm:$0xff] }
 0x6b8   :  { %v7422_v53 = vpop.permute.xlu1 %7421  ;;  %v5389_v18 = vsel %vm5365_vm15, %v13642_v14, %v7024_v52  ;;  %v7028_v39 = vunpack.i.l.bf16 %v16963_v33  ;;  %v13785_v8 = vsel %vm3380_vm12, %v8178_v17, %v6893_v24  ;;  %v6899_v38 = vunpack.i.h.bf16 %v16964_v61  ;;  %v8179_v52 = vld [vmem:[#allocation3 + $0x1a9] sm:$0xff] }
 0x6b9   :  { %v7423_v46 = vunpack.i.l.bf16 %v7422_v53  ;;  %6082 = vmatmul.mubr.f32.gmra.mxu1 %v5712_v42  ;;  %v7188_v45 = vunpack.i.l.bf16 %v13213_v41  ;;  %v5454_v43 = vsel %vm5430_vm0, %v5389_v18, %v7184_v58  ;;  %v16966_v14 = vpack.i.bf16 %v13435_v13, %v16858_v1 }
 0x6ba   :  { %7716 = vrot.lane.b32.xlu0 %v16965_v56, %s8304_s20  ;;  %v6898_v37 = vunpack.i.l.bf16 %v16964_v61  ;;  %v7348_v36 = vunpack.i.l.bf16 %v13467_v28  ;;  %v5519_v44 = vsel %vm5495_vm1, %v5454_v43, %v7344_v21  ;;  %6530 = vmatprep.mubr.msk.f32.mxu1 %vm3380_vm12, %v8179_v52  ;;  %v5648_v51 = vsel %vm5625_vm3, %v5583_v32, %v7409_v15  ;;  %v16967_v15 = vld [vmem:[#allocation29_spill] sm:$0xff]  ;;  %v16972_v43 = vld [vmem:[#allocation30_spill] sm:$0xff] }
 0x6bb   :  { %7711 = vrot.lane.b32.xlu1 %v16966_v14, %s8306_s28  ;;  %v7419_v12 = vunpack.i.h.bf16 %v13747_v3  ;;  %v7428_v24 = vunpack.i.l.bf16 %v13775_v26  ;;  %v13803_v58 = vpop.permute.xlu0 %7436  ;;  %v5713_v13 = vsel %vm5690_vm4, %v5648_v51, %v7414_v9  ;;  %v5584_v1 = vsel %vm5560_vm2, %v5519_v44, %v7418_v60  ;;  %v8180_v3 = vld [vmem:[#allocation3 + $0x28f] sm:$0xff] }
 0x6bc   :  { %v13805_v5 = vpop.permute.xlu1 %7431  ;;  %v7029_v22 = vunpack.i.h.bf16 %v16963_v33  ;;  %v5390_v7 = vsel %vm5365_vm15, %v13662_v34, %v7028_v39  ;;  %v7424_v27 = vunpack.i.h.bf16 %v7422_v53  ;;  %v5649_v21 = vsel %vm5625_vm3, %v5584_v1, %v7423_v46  ;;  %v16969_v34 = vld [vmem:[#allocation195_spill] sm:$0xff]  ;;  %v16970_v53 = vld [vmem:[#allocation253_spill] sm:$0xff]  ;;  %v16973_v14 = vld [vmem:[#allocation108_spill] sm:$0xff] }
 0x6bd   :  { %6087 = vmatmul.mubr.f32.gmra.mxu1 %v5713_v13  ;;  %v13814_v19 = vsel %vm3380_vm12, %v8180_v3, %v6899_v38  ;;  %v6904_v47 = vunpack.i.h.bf16 %v16967_v15  ;;  %v7189_v42 = vunpack.i.h.bf16 %v13213_v41  ;;  %v5455_v9 = vsel %vm5430_vm0, %v5390_v7, %v7188_v45  ;;  %v8182_v46 = vld [vmem:[#allocation3 + $0x1b1] sm:$0xff]  ;;  %v16975_v13 = vld [vmem:[#allocation319_spill] sm:$0xff] }
 0x6be   :  { %v16968_v60 = vpack.i.bf16 %v16868_v10, %v16867_v48  ;;  %v16971_v32 = vpack.i.bf16 %v16969_v34, %v16970_v53  ;;  %v13828_v18 = vsel %vm3380_vm12, %v8181_v63, %v6898_v37  ;;  %v6903_v33 = vunpack.i.l.bf16 %v16967_v15  ;;  %6531 = vmatprep.mubr.msk.f32.mxu1 %vm3380_vm12, %v8182_v46  ;;  %v16976_v1 = vld [vmem:[#allocation229_spill] sm:$0xff] }
 0x6bf   :  { %v7349_v41 = vunpack.i.h.bf16 %v13467_v28  ;;  %v5520_v39 = vsel %vm5495_vm1, %v5455_v9, %v7348_v36  ;;  %v7429_v48 = vunpack.i.h.bf16 %v13775_v26  ;;  %v7433_v10 = vunpack.i.l.bf16 %v13805_v5  ;;  %v13836_v17 = vpop.permute.xlu0 %7446  ;;  %v8183_v36 = vld [vmem:[#allocation3 + $0x2af] sm:$0xff] }
 0x6c0   :  { %7726 = vrot.lane.b32.xlu0 %v16968_v60, %s8307_s29  ;;  %7721 = vrot.lane.b32.xlu1 %v16971_v32, %s8305_s25  ;;  %v13838_v61 = vpop.permute.xlu1 %7441  ;;  %v5714_v38 = vsel %vm5690_vm4, %v5649_v21, %v7428_v24  ;;  %v5585_v45 = vsel %vm5560_vm2, %v5520_v39, %v7419_v12  ;;  %v6909_v56 = vunpack.i.h.bf16 %v16972_v43  ;;  %v5391_v28 = vsel %vm5365_vm15, %v13658_v11, %v7029_v22  ;;  %v16974_v24 = vld [vmem:[#allocation43_spill] sm:$0xff]  ;;  %v16978_v11 = vld [vmem:[#allocation386_spill] sm:$0xff]  ;;  %v8185_v60 = vld [vmem:[#allocation3 + $0x1c9] sm:$0xff] }
 0x6c1   :  { %v7033_v37 = vunpack.i.l.bf16 %v16973_v14  ;;  %6092 = vmatmul.mubr.f32.gmra.mxu1 %v5714_v38  ;;  %v5650_v26 = vsel %vm5625_vm3, %v5585_v45, %v7424_v27  ;;  %v13848_v44 = vsel %vm3380_vm12, %v8183_v36, %v6904_v47  ;;  %v6908_v52 = vunpack.i.l.bf16 %v16972_v43  ;;  %v16979_v22 = vld [vmem:[#allocation311_spill] sm:$0xff]  ;;  %v16981_v47 = vld [vmem:[#allocation388_spill] sm:$0xff]  ;;  %v16982_v38 = vld [vmem:[#allocation90_spill] sm:$0xff] }
 0x6c2   :  { %v5456_v51 = vsel %vm5430_vm0, %v5391_v28, %v7189_v42  ;;  %v7193_v12 = vunpack.i.l.bf16 %v16974_v24  ;;  %v16977_v7 = vpack.i.bf16 %v16975_v13, %v16976_v1  ;;  %v16980_v21 = vpack.i.bf16 %v16978_v11, %v16979_v22  ;;  %v8184_v27 = vld [vmem:[#allocation3 + $0x2a7] sm:$0xff]  ;;  %6532 = vmatprep.mubr.msk.f32.mxu1 %vm3380_vm12, %v8185_v60  ;;  %v8188_v11 = vld [vmem:[#allocation3 + $0x1d1] sm:$0xff] }
 0x6c3   :  { %v13862_v3 = vsel %vm3380_vm12, %v8184_v27, %v6903_v33  ;;  %v5521_v15 = vsel %vm5495_vm1, %v5456_v51, %v7349_v41  ;;  %v7353_v42 = vunpack.i.l.bf16 %v16981_v47  ;;  %v7438_v9 = vunpack.i.l.bf16 %v13803_v58  ;;  %v13870_v32 = vpop.permute.xlu0 %7456  ;;  %v8186_v41 = vld [vmem:[#allocation3 + $0x2cf] sm:$0xff]  ;;  %v8187_v28 = vld [vmem:[#allocation3 + $0x2c7] sm:$0xff] }
 0x6c4   :  { %7736 = vrot.lane.b32.xlu0 %v16977_v7, %s8305_s25  ;;  %7731 = vrot.lane.b32.xlu1 %v16980_v21, %s8306_s28  ;;  %v7434_v34 = vunpack.i.h.bf16 %v13805_v5  ;;  %v7443_v53 = vunpack.i.l.bf16 %v13838_v61  ;;  %v13872_v63 = vpop.permute.xlu1 %7451  ;;  %v5715_v33 = vsel %vm5690_vm4, %v5650_v26, %v7429_v48  ;;  %v5586_v39 = vsel %vm5560_vm2, %v5521_v15, %v7433_v10  ;;  %v16984_v51 = vld [vmem:[#allocation105_spill] sm:$0xff]  ;;  %v16987_v1 = vld [vmem:[#allocation207_spill] sm:$0xff] }
 0x6c5   :  { %v13877_v46 = vsel %vm3380_vm12, %v8186_v41, %v6909_v56  ;;  %v6914_v45 = vunpack.i.h.bf16 %v16982_v38  ;;  %v7034_v43 = vunpack.i.h.bf16 %v16973_v14  ;;  %v5392_v5 = vsel %vm5365_vm15, %v13671_v40, %v7033_v37  ;;  %6097 = vmatmul.mubr.f32.gmra.mxu1 %v5715_v33  ;;  %v16983_v56 = vld [vmem:[#allocation254_spill] sm:$0xff]  ;;  %v16986_v14 = vld [vmem:[#allocation99_spill] sm:$0xff] }
 0x6c6   :  { %v13884_v36 = vsel %vm3380_vm12, %v8187_v28, %v6908_v52  ;;  %v6913_v48 = vunpack.i.l.bf16 %v16982_v38  ;;  %v7194_v10 = vunpack.i.h.bf16 %v16974_v24  ;;  %v5457_v26 = vsel %vm5430_vm0, %v5392_v5, %v7193_v12  ;;  %6533 = vmatprep.mubr.msk.f32.mxu1 %vm3380_vm12, %v8188_v11  ;;  %v16990_v38 = vld [vmem:[#allocation89_spill] sm:$0xff]  ;;  %v16991_v5 = vld [vmem:[#allocation348_spill] sm:$0xff] }
 0x6c7   :  { %v16985_v13 = vpack.i.bf16 %v16983_v56, %v16984_v51  ;;  %v16988_v40 = vpack.i.bf16 %v16986_v14, %v16987_v1  ;;  %v7354_v37 = vunpack.i.h.bf16 %v16981_v47  ;;  %v5522_v52 = vsel %vm5495_vm1, %v5457_v26, %v7353_v42  ;;  %v13904_v21 = vpop.permute.xlu0 %7466  ;;  %v8189_v42 = vld [vmem:[#allocation3 + $0x2ef] sm:$0xff] }
 0x6c8   :  { %v7439_v7 = vunpack.i.h.bf16 %v13803_v58  ;;  %v5651_v24 = vsel %vm5625_vm3, %v5586_v39, %v7438_v9  ;;  %v7448_v12 = vunpack.i.l.bf16 %v13836_v17  ;;  %v7444_v22 = vunpack.i.h.bf16 %v13838_v61  ;;  %v13906_v27 = vpop.permute.xlu1 %7461  ;;  %v16989_v9 = vld [vmem:[#allocation206_spill] sm:$0xff]  ;;  %v8190_v61 = vld [vmem:[#allocation3 + $0x2e7] sm:$0xff]  ;;  %v16993_v26 = vld [vmem:[#allocation353_spill] sm:$0xff] }
 0x6c9   :  { %7746 = vrot.lane.b32.xlu0 %v16985_v13, %s8306_s28  ;;  %7741 = vrot.lane.b32.xlu1 %v16988_v40, %s8307_s29  ;;  %v5716_v15 = vsel %vm5690_vm4, %v5651_v24, %v7443_v53  ;;  %v5587_v47 = vsel %vm5560_vm2, %v5522_v52, %v7434_v34  ;;  %v13911_v58 = vsel %vm3380_vm12, %v8189_v42, %v6914_v45  ;;  %v7038_v33 = vunpack.i.l.bf16 %v16989_v9  ;;  %v16992_v45 = vld [vmem:[#allocation196_spill] sm:$0xff] }
 0x6ca   :  { %v5393_v60 = vsel %vm5365_vm15, %v13667_v23, %v7034_v43  ;;  %v7453_v39 = vunpack.i.l.bf16 %v13872_v63  ;;  %6102 = vmatmul.mubr.f32.gmra.mxu1 %v5716_v15  ;;  %v13918_v41 = vsel %vm3380_vm12, %v8190_v61, %v6913_v48  ;;  %v6919_v53 = vunpack.i.h.bf16 %v16990_v38  ;;  %v16995_v23 = vld [vmem:[#allocation186_spill] sm:$0xff]  ;;  %v16996_v51 = vld [vmem:[#allocation256_spill] sm:$0xff]  ;;  %v16997_v61 = vld [vmem:[#allocation187_spill] sm:$0xff] }
 0x6cb   :  { %v7198_v34 = vunpack.i.l.bf16 %v16991_v5  ;;  %v5458_v28 = vsel %vm5430_vm0, %v5393_v60, %v7194_v10  ;;  %v16994_v56 = vpack.i.bf16 %v16992_v45, %v16993_v26  ;;  %v6918_v43 = vunpack.i.l.bf16 %v16990_v38  ;;  %v8191_v14 = vld [vmem:[#allocation3 + $0x1e9] sm:$0xff]  ;;  %v13936_v52 = vpop.permute.xlu0 %7476 }
 0x6cc   :  { %v7358_v13 = vunpack.i.l.bf16 %v16996_v51  ;;  %v5523_v48 = vsel %vm5495_vm1, %v5458_v28, %v7354_v37  ;;  %6534 = vmatprep.mubr.msk.f32.mxu1 %vm3380_vm12, %v8191_v14  ;;  %v5652_v1 = vsel %vm5625_vm3, %v5587_v47, %v7439_v7  ;;  %v7449_v10 = vunpack.i.h.bf16 %v13836_v17  ;;  %v13938_v11 = vpop.permute.xlu1 %7471  ;;  %v8192_v7 = vld [vmem:[#allocation3 + $0x30f] sm:$0xff]  ;;  %v16999_v28 = vld [vmem:[#allocation107_spill] sm:$0xff] }
 0x6cd   :  { %7756 = vrot.lane.b32.xlu0 %v16994_v56, %s8305_s25  ;;  %7751 = vrot.lane.b32.xlu1 %v16995_v23, %s8304_s20  ;;  %v7458_v40 = vunpack.i.l.bf16 %v13870_v32  ;;  %v5717_v24 = vsel %vm5690_vm4, %v5652_v1, %v7444_v22  ;;  %v5588_v15 = vsel %vm5560_vm2, %v5523_v48, %v7448_v12  ;;  %v7039_v42 = vunpack.i.h.bf16 %v16989_v9  ;;  %v16998_v9 = vld [vmem:[#allocation354_spill] sm:$0xff] }
 0x6ce   :  { %v5394_v37 = vsel %vm5365_vm15, %v13721_v29, %v7038_v33  ;;  %v7454_v60 = vunpack.i.h.bf16 %v13872_v63  ;;  %6107 = vmatmul.mubr.f32.gmra.mxu1 %v5717_v24  ;;  %v5653_v17 = vsel %vm5625_vm3, %v5588_v15, %v7453_v39  ;;  %v13948_v47 = vsel %vm3380_vm12, %v8192_v7, %v6919_v53  ;;  %v17001_v29 = vld [vmem:[#allocation100_spill] sm:$0xff]  ;;  %v8194_v56 = vld [vmem:[#allocation3 + $0x1f1] sm:$0xff] }
 0x6cf   :  { %v6924_v38 = vunpack.i.h.bf16 %v16997_v61  ;;  %v7199_v22 = vunpack.i.h.bf16 %v16991_v5  ;;  %v5459_v12 = vsel %vm5430_vm0, %v5394_v37, %v7198_v34  ;;  %v17000_v45 = vpack.i.bf16 %v16998_v9, %v16999_v28  ;;  %v17002_v63 = vld [vmem:[#allocation288_spill] sm:$0xff]  ;;  %6535 = vmatprep.mubr.msk.f32.mxu1 %vm3380_vm12, %v8194_v56  ;;  %v13970_v14 = vpop.permute.xlu0 %7486  ;;  %v17004_v15 = vld [vmem:[#allocation189_spill] sm:$0xff]  ;;  %v17007_v28 = vld [vmem:[#allocation198_spill] sm:$0xff] }
 0x6d0   :  { %v17003_v33 = vpack.i.bf16 %v17001_v29, %v17002_v63  ;;  %v8193_v39 = vld [vmem:[#allocation3 + $0x307] sm:$0xff]  ;;  %v6923_v26 = vunpack.i.l.bf16 %v16997_v61  ;;  %v7359_v5 = vunpack.i.h.bf16 %v16996_v51  ;;  %v5524_v34 = vsel %vm5495_vm1, %v5459_v12, %v7358_v13  ;;  %v13972_v1 = vpop.permute.xlu1 %7481  ;;  %v17005_v13 = vld [vmem:[#allocation313_spill] sm:$0xff] }
 0x6d1   :  { %7766 = vrot.lane.b32.xlu0 %v17000_v45, %s8306_s28  ;;  %v13962_v53 = vsel %vm3380_vm12, %v8193_v39, %v6918_v43  ;;  %v7459_v23 = vunpack.i.h.bf16 %v13870_v32  ;;  %v7463_v48 = vunpack.i.l.bf16 %v13906_v27  ;;  %v5718_v43 = vsel %vm5690_vm4, %v5653_v17, %v7458_v40  ;;  %v8195_v61 = vld [vmem:[#allocation3 + $0x32f] sm:$0xff]  ;;  %v17006_v17 = vld [vmem:[#allocation118_spill] sm:$0xff]  ;;  %v17008_v45 = vld [vmem:[#allocation291_spill] sm:$0xff] }
 0x6d2   :  { %7761 = vrot.lane.b32.xlu1 %v17003_v33, %s8307_s29  ;;  %v5589_v24 = vsel %vm5560_vm2, %v5524_v34, %v7449_v10  ;;  %v6929_v37 = vunpack.i.h.bf16 %v17004_v15  ;;  %v5395_v51 = vsel %vm5365_vm15, %v13679_v50, %v7039_v42  ;;  %v7043_v7 = vunpack.i.l.bf16 %v17005_v13  ;;  %6112 = vmatmul.mubr.f32.gmra.mxu1 %v5718_v43  ;;  %v17010_v50 = vld [vmem:[#allocation21_spill] sm:$0xff]  ;;  %v17011_v42 = vld [vmem:[#allocation387_spill] sm:$0xff] }
 0x6d3   :  { %v5654_v32 = vsel %vm5625_vm3, %v5589_v24, %v7454_v60  ;;  %v13982_v12 = vsel %vm3380_vm12, %v8195_v61, %v6924_v38  ;;  %v6928_v9 = vunpack.i.l.bf16 %v17004_v15  ;;  %v5460_v40 = vsel %vm5430_vm0, %v5395_v51, %v7199_v22  ;;  %v8196_v60 = vld [vmem:[#allocation3 + $0x327] sm:$0xff]  ;;  %v17013_v34 = vld [vmem:[#allocation325_spill] sm:$0xff]  ;;  %v14005_v24 = vpop.permute.xlu0 %7496 }
 0x6d4   :  { %v7203_v10 = vunpack.i.l.bf16 %v17006_v17  ;;  %v17009_v29 = vpack.i.bf16 %v17007_v28, %v17008_v45  ;;  %v17012_v63 = vpack.i.bf16 %v17010_v50, %v17011_v42  ;;  %v13996_v38 = vsel %vm3380_vm12, %v8196_v60, %v6923_v26  ;;  %6536 = vmatprep.mubr.msk.f32.mxu1 %vm3380_vm12, %v17013_v34  ;;  %v14007_v15 = vpop.permute.xlu1 %7491  ;;  %v17016_v42 = vld [vmem:[#allocation131_spill] sm:$0xff] }
 0x6d5   :  { %v5525_v33 = vsel %vm5495_vm1, %v5460_v40, %v7359_v5  ;;  %v7363_v22 = vunpack.i.l.bf16 %v13586_v20  ;;  %v7468_v39 = vunpack.i.l.bf16 %v13904_v21  ;;  %v7464_v56 = vunpack.i.h.bf16 %v13906_v27  ;;  %v8197_v5 = vld [vmem:[#allocation3 + $0x34f] sm:$0xff]  ;;  %v17014_v40 = vld [vmem:[#allocation335_spill] sm:$0xff] }
 0x6d6   :  { %7776 = vrot.lane.b32.xlu0 %v17009_v29, %s8307_s29  ;;  %7771 = vrot.lane.b32.xlu1 %v17012_v63, %s8305_s25  ;;  %v7473_v43 = vunpack.i.l.bf16 %v13938_v11  ;;  %v5719_v26 = vsel %vm5690_vm4, %v5654_v32, %v7459_v23  ;;  %v5590_v51 = vsel %vm5560_vm2, %v5525_v33, %v7463_v48  ;;  %v14012_v61 = vsel %vm3380_vm12, %v8197_v5, %v6929_v37  ;;  %v8198_v29 = vld [vmem:[#allocation3 + $0x347] sm:$0xff]  ;;  %v17015_v37 = vld [vmem:[#allocation309_spill] sm:$0xff] }
 0x6d7   :  { %v6934_v28 = vunpack.i.h.bf16 %v17014_v40  ;;  %v7044_v45 = vunpack.i.h.bf16 %v17005_v13  ;;  %v5396_v27 = vsel %vm5365_vm15, %v13742_v0, %v7043_v7  ;;  %6117 = vmatmul.mubr.f32.gmra.mxu1 %v5719_v26  ;;  %v14019_v50 = vsel %vm3380_vm12, %v8198_v29, %v6928_v9  ;;  %v17017_v13 = vld [vmem:[#allocation38_spill] sm:$0xff]  ;;  %v17019_v60 = vld [vmem:[#allocation347_spill] sm:$0xff]  ;;  %v14038_v34 = vpop.permute.xlu0 %7506 }
 0x6d8   :  { %v6933_v23 = vunpack.i.l.bf16 %v17014_v40  ;;  %v7204_v48 = vunpack.i.h.bf16 %v17006_v17  ;;  %v5461_v32 = vsel %vm5430_vm0, %v5396_v27, %v7203_v10  ;;  %v17018_v63 = vpack.i.bf16 %v17016_v42, %v17017_v13  ;;  %6537 = vmatprep.mubr.msk.f32.mxu1 %vm3380_vm12, %v17019_v60  ;;  %v14040_v26 = vpop.permute.xlu1 %7501  ;;  %v8199_v40 = vld [vmem:[#allocation3 + $0x36f] sm:$0xff]  ;;  %v8200_v29 = vld [vmem:[#allocation3 + $0x367] sm:$0xff] }
 0x6d9   :  { %v7364_v0 = vunpack.i.h.bf16 %v13586_v20  ;;  %v5526_v7 = vsel %vm5495_vm1, %v5461_v32, %v7363_v22  ;;  %v7469_v9 = vunpack.i.h.bf16 %v13904_v21  ;;  %v5655_v17 = vsel %vm5625_vm3, %v5590_v51, %v7468_v39  ;;  %v3711_v20 = vld [vmem:[#allocation3 + $0x229] sm:$0xff]  ;;  %v17020_v51 = vld [vmem:[#allocation343_spill] sm:$0xff] }
 0x6da   :  { %7786 = vrot.lane.b32.xlu0 %v17015_v37, %s8304_s20  ;;  %7781 = vrot.lane.b32.xlu1 %v17018_v63, %s8306_s28  ;;  %v7478_v10 = vunpack.i.l.bf16 %v13936_v52  ;;  %v7474_v33 = vunpack.i.h.bf16 %v13938_v11  ;;  %v5720_v5 = vsel %vm5690_vm4, %v5655_v17, %v7473_v43  ;;  %v5591_v22 = vsel %vm5560_vm2, %v5526_v7, %v7464_v56  ;;  %v17021_v43 = vld [vmem:[#allocation97_spill] sm:$0xff]  ;;  %v17022_v42 = vld [vmem:[#allocation44_spill] sm:$0xff] }
 0x6db   :  { %v14045_v21 = vsel %vm3380_vm12, %v8199_v40, %v6934_v28  ;;  %v5397_v39 = vsel %vm5365_vm15, %v13735_v2, %v7044_v45  ;;  %v7048_v27 = vunpack.i.l.bf16 %v17020_v51  ;;  %v7483_v11 = vunpack.i.l.bf16 %v13972_v1  ;;  %6122 = vmatmul.mubr.f32.gmra.mxu1 %v5720_v5  ;;  %v17023_v28 = vld [vmem:[#allocation201_spill] sm:$0xff]  ;;  %v17027_v45 = vld [vmem:[#allocation127_spill] sm:$0xff] }
 0x6dc   :  { %v14052_v32 = vsel %vm3380_vm12, %v8200_v29, %v6933_v23  ;;  %v6969_v37 = vunpack.i.h.bf16 %v17021_v43  ;;  %v7208_v56 = vunpack.i.l.bf16 %v17022_v42  ;;  %v5462_v13 = vsel %vm5430_vm0, %v5397_v39, %v7204_v48  ;;  %v17024_v63 = vld [vmem:[#allocation329_spill] sm:$0xff]  ;;  %6538 = vmatprep.mubr.msk.f32.mxu1 %vm3380_vm12, %v3711_v20  ;;  %v17030_v20 = vld [vmem:[#allocation48_spill] sm:$0xff] }
 0x6dd   :  { %v17025_v7 = vpack.i.bf16 %v17023_v28, %v17024_v63  ;;  %v17026_v2 = vld [vmem:[#allocation81_spill] sm:$0xff]  ;;  %v6968_v17 = vunpack.i.l.bf16 %v17021_v43  ;;  %v5527_v40 = vsel %vm5495_vm1, %v5462_v13, %v7364_v0  ;;  %v5656_v48 = vsel %vm5625_vm3, %v5591_v22, %v7469_v9  ;;  %v14072_v28 = vpop.permute.xlu0 %7516  ;;  %v14074_v63 = vpop.permute.xlu1 %7511  ;;  %v17031_v13 = vld [vmem:[#allocation223_spill] sm:$0xff] }
 0x6de   :  { %v17028_v60 = vpack.i.bf16 %v17026_v2, %v17027_v45  ;;  %v17029_v23 = vld [vmem:[#allocation357_spill] sm:$0xff]  ;;  %v7479_v39 = vunpack.i.h.bf16 %v13936_v52  ;;  %v7488_v29 = vunpack.i.l.bf16 %v13970_v14  ;;  %v5592_v43 = vsel %vm5560_vm2, %v5527_v40, %v7478_v10  ;;  %v17033_v40 = vld [vmem:[#allocation132_spill] sm:$0xff] }
 0x6df   :  { %7796 = vrot.lane.b32.xlu0 %v17025_v7, %s8307_s29  ;;  %v7368_v5 = vunpack.i.l.bf16 %v17029_v23  ;;  %v5721_v7 = vsel %vm5690_vm4, %v5656_v48, %v7474_v33  ;;  %v3712_v2 = vld [vmem:[#allocation3 + $0x231] sm:$0xff]  ;;  %v7049_v45 = vunpack.i.h.bf16 %v17020_v51  ;;  %v5398_v0 = vsel %vm5365_vm15, %v13772_v35, %v7048_v27  ;;  %v17032_v51 = vld [vmem:[#allocation199_spill] sm:$0xff] }
 0x6e0   :  { %7791 = vrot.lane.b32.xlu1 %v17028_v60, %s8305_s25  ;;  %v7484_v9 = vunpack.i.h.bf16 %v13972_v1  ;;  %6127 = vmatmul.mubr.f32.gmra.mxu1 %v5721_v7  ;;  %v5657_v52 = vsel %vm5625_vm3, %v5592_v43, %v7483_v11  ;;  %v14085_v22 = vsel %vm5365_vm15, %v17030_v20, %v6969_v37  ;;  %v6974_v60 = vunpack.i.h.bf16 %v17031_v13  ;;  %v17035_v35 = vld [vmem:[#allocation230_spill] sm:$0xff] }
 0x6e1   :  { %v7209_v33 = vunpack.i.h.bf16 %v17022_v42  ;;  %v5463_v10 = vsel %vm5430_vm0, %v5398_v0, %v7208_v56  ;;  %v17034_v48 = vpack.i.bf16 %v17032_v51, %v17033_v40  ;;  %v17036_v1 = vld [vmem:[#allocation106_spill] sm:$0xff]  ;;  %v6973_v7 = vunpack.i.l.bf16 %v17031_v13  ;;  %6539 = vmatprep.mubr.msk.f32.mxu1 %vm3380_vm12, %v3712_v2  ;;  %v14108_v20 = vpop.permute.xlu0 %7526  ;;  %v14110_v51 = vpop.permute.xlu1 %7521  ;;  %v17041_v2 = vld [vmem:[#allocation133_spill] sm:$0xff] }
 0x6e2   :  { %v17037_v27 = vpack.i.bf16 %v17035_v35, %v17036_v1  ;;  %v17038_v11 = vld [vmem:[#allocation126_spill] sm:$0xff]  ;;  %v7369_v42 = vunpack.i.h.bf16 %v17029_v23  ;;  %v5528_v56 = vsel %vm5495_vm1, %v5463_v10, %v7368_v5  ;;  %v7489_v43 = vunpack.i.h.bf16 %v13970_v14  ;;  %v17040_v5 = vld [vmem:[#allocation40_spill] sm:$0xff] }
 0x6e3   :  { %7806 = vrot.lane.b32.xlu0 %v17034_v48, %s8305_s25  ;;  %v14100_v37 = vsel %vm5365_vm15, %v17038_v11, %v6968_v17  ;;  %v7493_v0 = vunpack.i.l.bf16 %v14007_v15  ;;  %v5722_v40 = vsel %vm5690_vm4, %v5657_v52, %v7488_v29  ;;  %v5593_v17 = vsel %vm5560_vm2, %v5528_v56, %v7479_v39  ;;  %v17039_v48 = vld [vmem:[#allocation224_spill] sm:$0xff]  ;;  %v17042_v52 = vld [vmem:[#allocation119_spill] sm:$0xff] }
 0x6e4   :  { %7801 = vrot.lane.b32.xlu1 %v17037_v27, %s8306_s28  ;;  %v6978_v13 = vunpack.i.l.bf16 %v17039_v48  ;;  %v5399_v23 = vsel %vm5365_vm15, %v13745_v31, %v7049_v45  ;;  %v7053_v10 = vunpack.i.l.bf16 %v17040_v5  ;;  %6132 = vmatmul.mubr.f32.gmra.mxu1 %v5722_v40  ;;  %v5658_v14 = vsel %vm5625_vm3, %v5593_v17, %v7484_v9  ;;  %v17043_v27 = vld [vmem:[#allocation128_spill] sm:$0xff]  ;;  %v17047_v45 = vld [vmem:[#allocation27_spill] sm:$0xff] }
 0x6e5   :  { %v14121_v35 = vsel %vm5365_vm15, %v17041_v2, %v6974_v60  ;;  %v6979_v1 = vunpack.i.h.bf16 %v17039_v48  ;;  %v5464_v29 = vsel %vm5430_vm0, %v5399_v23, %v7209_v33  ;;  %v7213_v39 = vunpack.i.l.bf16 %v17042_v52  ;;  %v17044_v11 = vld [vmem:[#allocation232_spill] sm:$0xff] }
 0x6e6   :  { %v17045_v56 = vpack.i.bf16 %v17043_v27, %v17044_v11  ;;  %v17046_v31 = vld [vmem:[#allocation304_spill] sm:$0xff]  ;;  %v5529_v17 = vsel %vm5495_vm1, %v5464_v29, %v7369_v42  ;;  %v7373_v33 = vunpack.i.l.bf16 %v13629_v49  ;;  %v7498_v48 = vunpack.i.l.bf16 %v14005_v24  ;;  %v14144_v11 = vpop.permute.xlu0 %7536  ;;  %v17050_v42 = vld [vmem:[#allocation258_spill] sm:$0xff] }
 0x6e7   :  { %v17048_v40 = vpack.i.bf16 %v17046_v31, %v17047_v45  ;;  %v17049_v9 = vld [vmem:[#allocation384_spill] sm:$0xff]  ;;  %v7494_v2 = vunpack.i.h.bf16 %v14007_v15  ;;  %v7503_v27 = vunpack.i.l.bf16 %v14040_v26  ;;  %v5594_v31 = vsel %vm5560_vm2, %v5529_v17, %v7493_v0  ;;  %v17051_v15 = vld [vmem:[#allocation110_spill] sm:$0xff]  ;;  %v17054_v17 = vld [vmem:[#allocation389_spill] sm:$0xff] }
 0x6e8   :  { %7816 = vrot.lane.b32.xlu0 %v17045_v56, %s8306_s28  ;;  %v14136_v60 = vsel %vm5365_vm15, %v17049_v9, %v6973_v7  ;;  %v8201_v23 = vld [vmem:[#allocation3 + $0x289] sm:$0xff]  ;;  %v14146_v56 = vpop.permute.xlu1 %7531  ;;  %v5723_v7 = vsel %vm5690_vm4, %v5658_v14, %v7489_v43  ;;  %v14152_v29 = vsel %vm5365_vm15, %v17050_v42, %v6978_v13  ;;  %v7054_v45 = vunpack.i.h.bf16 %v17040_v5  ;;  %v17053_v13 = vld [vmem:[#allocation355_spill] sm:$0xff]  ;;  %v8202_v42 = vld [vmem:[#allocation3 + $0x291] sm:$0xff] }
 0x6e9   :  { %7811 = vrot.lane.b32.xlu1 %v17048_v40, %s8307_s29  ;;  %6540 = vmatprep.mubr.msk.f32.mxu1 %vm3380_vm12, %v8201_v23  ;;  %v5400_v40 = vsel %vm5365_vm15, %v13785_v8, %v7053_v10  ;;  %v7058_v9 = vunpack.i.l.bf16 %v17051_v15  ;;  %v17052_v23 = vld [vmem:[#allocation390_spill] sm:$0xff]  ;;  %v7059_v43 = vunpack.i.h.bf16 %v17051_v15  ;;  %v7214_v0 = vunpack.i.h.bf16 %v17042_v52 }
 0x6ea   :  { %6137 = vmatmul.mubr.f32.gmra.mxu1 %v5723_v7  ;;  %v14160_v16 = vsel %vm5365_vm15, %v17052_v23, %v6979_v1  ;;  %v5465_v14 = vsel %vm5430_vm0, %v5400_v40, %v7213_v39  ;;  %v17055_v5 = vpack.i.bf16 %v17053_v13, %v17054_v17  ;;  %v17056_v8 = vld [vmem:[#allocation310_spill] sm:$0xff]  ;;  %v7374_v10 = vunpack.i.h.bf16 %v13629_v49  ;;  %v14178_v15 = vpop.permute.xlu0 %7546 }
 0x6eb   :  { %v5530_v7 = vsel %vm5495_vm1, %v5465_v14, %v7373_v33  ;;  %v7499_v1 = vunpack.i.h.bf16 %v14005_v24  ;;  %6541 = vmatprep.mubr.msk.f32.mxu1 %vm3380_vm12, %v8202_v42  ;;  %v5659_v52 = vsel %vm5625_vm3, %v5594_v31, %v7498_v48  ;;  %v7508_v39 = vunpack.i.l.bf16 %v14038_v34  ;;  %v17057_v14 = vld [vmem:[#allocation109_spill] sm:$0xff]  ;;  %v17065_v42 = vld [vmem:[#allocation111_spill] sm:$0xff] }
 0x6ec   :  { %7826 = vrot.lane.b32.xlu0 %v17055_v5, %s8305_s25  ;;  %v7504_v40 = vunpack.i.h.bf16 %v14040_v26  ;;  %v14180_v23 = vpop.permute.xlu1 %7541  ;;  %v5724_v13 = vsel %vm5690_vm4, %v5659_v52, %v7503_v27  ;;  %v5595_v49 = vsel %vm5560_vm2, %v5530_v7, %v7494_v2  ;;  %v5401_v24 = vsel %vm5365_vm15, %v13779_v55, %v7054_v45  ;;  %v17058_v5 = vld [vmem:[#allocation117_spill] sm:$0xff]  ;;  %v17060_v55 = vld [vmem:[#allocation312_spill] sm:$0xff] }
 0x6ed   :  { %7821 = vrot.lane.b32.xlu1 %v17056_v8, %s8304_s20  ;;  %v5402_v33 = vsel %vm5365_vm15, %v13828_v18, %v7058_v9  ;;  %v7063_v48 = vunpack.i.l.bf16 %v17057_v14  ;;  %v7513_v31 = vunpack.i.l.bf16 %v14074_v63  ;;  %v5403_v26 = vsel %vm5365_vm15, %v13814_v19, %v7059_v43  ;;  %v17059_v8 = vld [vmem:[#allocation134_spill] sm:$0xff]  ;;  %v17062_v18 = vld [vmem:[#allocation307_spill] sm:$0xff]  ;;  %v17063_v9 = vld [vmem:[#allocation381_spill] sm:$0xff] }
 0x6ee   :  { %6142 = vmatmul.mubr.f32.gmra.mxu1 %v5724_v13  ;;  %v7064_v17 = vunpack.i.h.bf16 %v17057_v14  ;;  %v7218_v27 = vunpack.i.l.bf16 %v17058_v5  ;;  %v5466_v2 = vsel %vm5430_vm0, %v5401_v24, %v7214_v0  ;;  %v17061_v45 = vpack.i.bf16 %v17059_v8, %v17060_v55  ;;  %v8203_v13 = vld [vmem:[#allocation3 + $0x2a9] sm:$0xff]  ;;  %v14210_v8 = vpop.permute.xlu0 %7556 }
 0x6ef   :  { %v17064_v7 = vpack.i.bf16 %v17062_v18, %v17063_v9  ;;  %v7069_v52 = vunpack.i.h.bf16 %v17065_v42  ;;  %v7378_v19 = vunpack.i.l.bf16 %v13627_v54  ;;  %v5531_v43 = vsel %vm5495_vm1, %v5466_v2, %v7374_v10  ;;  %6542 = vmatprep.mubr.msk.f32.mxu1 %vm3380_vm12, %v8203_v13 }
 0x6f0   :  { %7836 = vrot.lane.b32.xlu0 %v17061_v45, %s8306_s28  ;;  %v5660_v0 = vsel %vm5625_vm3, %v5595_v49, %v7499_v1  ;;  %v7509_v24 = vunpack.i.h.bf16 %v14038_v34  ;;  %v7518_v14 = vunpack.i.l.bf16 %v14072_v28  ;;  %v14212_v55 = vpop.permute.xlu1 %7551  ;;  %v5596_v18 = vsel %vm5560_vm2, %v5531_v43, %v7508_v39  ;;  %v17066_v1 = vld [vmem:[#allocation112_spill] sm:$0xff]  ;;  %v17067_v39 = vld [vmem:[#allocation339_spill] sm:$0xff]  ;;  %v17068_v43 = vld [vmem:[#allocation382_spill] sm:$0xff] }
 0x6f1   :  { %7831 = vrot.lane.b32.xlu1 %v17064_v7, %s8307_s29  ;;  %v5725_v45 = vsel %vm5690_vm4, %v5660_v0, %v7504_v40  ;;  %v5404_v10 = vsel %vm5365_vm15, %v13862_v3, %v7063_v48  ;;  %v7068_v2 = vunpack.i.l.bf16 %v17065_v42  ;;  %v7514_v9 = vunpack.i.h.bf16 %v14074_v63  ;;  %v17070_v3 = vld [vmem:[#allocation200_spill] sm:$0xff]  ;;  %v17071_v48 = vld [vmem:[#allocation255_spill] sm:$0xff]  ;;  %v17073_v42 = vld [vmem:[#allocation210_spill] sm:$0xff] }
 0x6f2   :  { %6147 = vmatmul.mubr.f32.gmra.mxu1 %v5725_v45  ;;  %v5661_v34 = vsel %vm5625_vm3, %v5596_v18, %v7513_v31  ;;  %v7074_v49 = vunpack.i.h.bf16 %v17066_v1  ;;  %v7073_v7 = vunpack.i.l.bf16 %v17066_v1  ;;  %v7219_v13 = vunpack.i.h.bf16 %v17058_v5 }
 0x6f3   :  { %v5467_v40 = vsel %vm5430_vm0, %v5402_v33, %v7218_v27  ;;  %v17069_v0 = vpack.i.bf16 %v17067_v39, %v17068_v43  ;;  %v17072_v63 = vpack.i.bf16 %v17070_v3, %v17071_v48  ;;  %v14235_v31 = vsel %vm5365_vm15, %v13848_v44, %v7064_v17  ;;  %v8204_v27 = vld [vmem:[#allocation3 + $0x2b1] sm:$0xff]  ;;  %v14243_v39 = vpop.permute.xlu0 %7566 }
 0x6f4   :  { %v7078_v45 = vunpack.i.l.bf16 %v17073_v42  ;;  %v7379_v5 = vunpack.i.h.bf16 %v13627_v54  ;;  %v5532_v33 = vsel %vm5495_vm1, %v5467_v40, %v7378_v19  ;;  %6543 = vmatprep.mubr.msk.f32.mxu1 %vm3380_vm12, %v8204_v27  ;;  %v7519_v18 = vunpack.i.h.bf16 %v14072_v28  ;;  %v14245_v43 = vpop.permute.xlu1 %7561 }
 0x6f5   :  { %7846 = vrot.lane.b32.xlu0 %v17069_v0, %s8307_s29  ;;  %7841 = vrot.lane.b32.xlu1 %v17072_v63, %s8305_s25  ;;  %v7523_v1 = vunpack.i.l.bf16 %v14110_v51  ;;  %v5726_v44 = vsel %vm5690_vm4, %v5661_v34, %v7518_v14  ;;  %v5597_v17 = vsel %vm5560_vm2, %v5532_v33, %v7509_v24  ;;  %v5406_v54 = vsel %vm5365_vm15, %v13884_v36, %v7068_v2  ;;  %v17074_v36 = vld [vmem:[#allocation218_spill] sm:$0xff]  ;;  %v17077_v34 = vld [vmem:[#allocation209_spill] sm:$0xff] }
 0x6f6   :  { %v14253_v19 = vsel %vm5365_vm15, %v13877_v46, %v7069_v52  ;;  %v7079_v40 = vunpack.i.h.bf16 %v17073_v42  ;;  %6152 = vmatmul.mubr.f32.gmra.mxu1 %v5726_v44  ;;  %v5662_v28 = vsel %vm5625_vm3, %v5597_v17, %v7514_v9  ;;  %v14259_v0 = vsel %vm5365_vm15, %v13918_v41, %v7073_v7  ;;  %v17075_v46 = vld [vmem:[#allocation18_spill] sm:$0xff]  ;;  %v17076_v52 = vld [vmem:[#allocation356_spill] sm:$0xff]  ;;  %v17080_v44 = vld [vmem:[#allocation235_spill] sm:$0xff] }
 0x6f7   :  { %v14263_v14 = vsel %vm5365_vm15, %v13911_v58, %v7074_v49  ;;  %v5468_v24 = vsel %vm5430_vm0, %v5403_v26, %v7219_v13  ;;  %v7223_v2 = vunpack.i.l.bf16 %v17074_v36  ;;  %v17078_v3 = vpack.i.bf16 %v17076_v52, %v17077_v34  ;;  %v8205_v49 = vld [vmem:[#allocation3 + $0x2c9] sm:$0xff]  ;;  %v14283_v48 = vpop.permute.xlu0 %7576  ;;  %v17086_v34 = vld [vmem:[#allocation234_spill] sm:$0xff] }
 0x6f8   :  { %v14275_v41 = vsel %vm5365_vm15, %v13962_v53, %v7078_v45  ;;  %v5533_v9 = vsel %vm5495_vm1, %v5468_v24, %v7379_v5  ;;  %v7383_v58 = vunpack.i.l.bf16 %v13675_v4  ;;  %v7528_v26 = vunpack.i.l.bf16 %v14108_v20  ;;  %6544 = vmatprep.mubr.msk.f32.mxu1 %vm3380_vm12, %v8205_v49  ;;  %v14285_v63 = vpop.permute.xlu1 %7571  ;;  %v17079_v5 = vld [vmem:[#allocation213_spill] sm:$0xff]  ;;  %v17081_v17 = vld [vmem:[#allocation120_spill] sm:$0xff] }
 0x6f9   :  { %7856 = vrot.lane.b32.xlu0 %v17075_v46, %s8304_s20  ;;  %7851 = vrot.lane.b32.xlu1 %v17078_v3, %s8306_s28  ;;  %v7524_v7 = vunpack.i.h.bf16 %v14110_v51  ;;  %v7533_v13 = vunpack.i.l.bf16 %v14146_v56  ;;  %v5727_v53 = vsel %vm5690_vm4, %v5662_v28, %v7519_v18  ;;  %v5598_v42 = vsel %vm5560_vm2, %v5533_v9, %v7523_v1  ;;  %v17082_v1 = vld [vmem:[#allocation36_spill] sm:$0xff]  ;;  %v17083_v28 = vld [vmem:[#allocation87_spill] sm:$0xff] }
 0x6fa   :  { %v14291_v45 = vsel %vm5365_vm15, %v13948_v47, %v7079_v40  ;;  %v7084_v33 = vunpack.i.h.bf16 %v17079_v5  ;;  %v7083_v27 = vunpack.i.l.bf16 %v17079_v5  ;;  %v7089_v51 = vunpack.i.h.bf16 %v17080_v44  ;;  %6157 = vmatmul.mubr.f32.gmra.mxu1 %v5727_v53  ;;  %v17085_v40 = vld [vmem:[#allocation237_spill] sm:$0xff] }
 0x6fb   :  { %v7228_v24 = vunpack.i.l.bf16 %v17081_v17  ;;  %v7224_v46 = vunpack.i.h.bf16 %v17074_v36  ;;  %v5469_v52 = vsel %vm5430_vm0, %v5404_v10, %v7223_v2  ;;  %v7384_v18 = vunpack.i.h.bf16 %v13675_v4  ;;  %v8206_v53 = vld [vmem:[#allocation3 + $0x2d1] sm:$0xff]  ;;  %v14315_v5 = vpop.permute.xlu0 %7586 }
 0x6fc   :  { %v17084_v47 = vpack.i.bf16 %v17082_v1, %v17083_v28  ;;  %v17087_v3 = vpack.i.bf16 %v17085_v40, %v17086_v34  ;;  %v5534_v9 = vsel %vm5495_vm1, %v5469_v52, %v7383_v58  ;;  %v7529_v49 = vunpack.i.h.bf16 %v14108_v20  ;;  %6545 = vmatprep.mubr.msk.f32.mxu1 %vm3380_vm12, %v8206_v53  ;;  %v14317_v1 = vpop.permute.xlu1 %7581  ;;  %v17089_v34 = vld [vmem:[#allocation121_spill] sm:$0xff] }
 0x6fd   :  { %v7553_v36 = vunpack.i.l.bf16 %v14212_v55  ;;  %v5663_v4 = vsel %vm5625_vm3, %v5598_v42, %v7528_v26  ;;  %v7538_v10 = vunpack.i.l.bf16 %v14144_v11  ;;  %v7534_v2 = vunpack.i.h.bf16 %v14146_v56 }
 0x6fe   :  { %7866 = vrot.lane.b32.xlu0 %v17084_v47, %s8307_s29  ;;  %7861 = vrot.lane.b32.xlu1 %v17087_v3, %s8305_s25  ;;  %v5728_v28 = vsel %vm5690_vm4, %v5663_v4, %v7533_v13  ;;  %v5599_v58 = vsel %vm5560_vm2, %v5534_v9, %v7524_v7  ;;  %v14323_v20 = vsel %vm5365_vm15, %v13996_v38, %v7083_v27  ;;  %v7088_v52 = vunpack.i.l.bf16 %v17080_v44  ;;  %v17088_v47 = vld [vmem:[#allocation114_spill] sm:$0xff]  ;;  %v17090_v3 = vld [vmem:[#allocation23_spill] sm:$0xff]  ;;  %v17091_v38 = vld [vmem:[#allocation49_spill] sm:$0xff] }
 0x6ff   :  { %v7128_v26 = vunpack.i.l.bf16 %v17088_v47  ;;  %v7543_v42 = vunpack.i.l.bf16 %v14180_v23  ;;  %6162 = vmatmul.mubr.f32.gmra.mxu1 %v5728_v28  ;;  %v7229_v56 = vunpack.i.h.bf16 %v17081_v17  ;;  %v5471_v40 = vsel %vm5430_vm0, %v5406_v54, %v7228_v24  ;;  %v17093_v9 = vld [vmem:[#allocation231_spill] sm:$0xff]  ;;  %v8207_v24 = vld [vmem:[#allocation3 + $0x2e9] sm:$0xff] }
 0x700   :  { %v5470_v13 = vsel %vm5430_vm0, %v14235_v31, %v7224_v46  ;;  %v7288_v7 = vunpack.i.l.bf16 %v17089_v34  ;;  %v17092_v27 = vpack.i.bf16 %v17090_v3, %v17091_v38  ;;  %v17094_v53 = vpack.i.bf16 %v13551_v30, %v17093_v9  ;;  %6546 = vmatprep.mubr.msk.f32.mxu1 %vm3380_vm12, %v8207_v24  ;;  %v14348_v3 = vpop.permute.xlu0 %7596  ;;  %v14350_v38 = vpop.permute.xlu1 %7591  ;;  %v17110_v44 = vld [vmem:[#allocation39_spill] sm:$0xff] }
 0x701   :  { %v5535_v4 = vsel %vm5495_vm1, %v5470_v13, %v7384_v18  ;;  %v7539_v17 = vunpack.i.h.bf16 %v14144_v11  ;;  %v5536_v54 = vsel %vm5495_vm1, %v5471_v40, %v7553_v36  ;;  %v5664_v31 = vsel %vm5625_vm3, %v5599_v58, %v7529_v49  ;;  %v17095_v40 = vld [vmem:[#allocation243_spill] sm:$0xff]  ;;  %v17096_v13 = vld [vmem:[#allocation233_spill] sm:$0xff] }
 0x702   :  { %7876 = vrot.lane.b32.xlu0 %v17092_v27, %s8305_s25  ;;  %7871 = vrot.lane.b32.xlu1 %v17094_v53, %s8306_s28  ;;  %v7548_v46 = vunpack.i.l.bf16 %v14178_v15  ;;  %v7554_v28 = vunpack.i.h.bf16 %v14212_v55  ;;  %v5729_v27 = vsel %vm5690_vm4, %v5664_v31, %v7534_v2  ;;  %v5600_v18 = vsel %vm5560_vm2, %v5535_v4, %v7538_v10  ;;  %v8208_v4 = vld [vmem:[#allocation3 + $0x2f1] sm:$0xff] }
 0x703   :  { %v14356_v11 = vsel %vm5365_vm15, %v13982_v12, %v7084_v33  ;;  %v14360_v36 = vsel %vm5365_vm15, %v14019_v50, %v7088_v52  ;;  %v7129_v49 = vunpack.i.h.bf16 %v17088_v47  ;;  %6167 = vmatmul.mubr.f32.gmra.mxu1 %v5729_v27  ;;  %v5665_v55 = vsel %vm5625_vm3, %v5600_v18, %v7543_v42  ;;  %v17097_v12 = vld [vmem:[#allocation344_spill] sm:$0xff]  ;;  %v17099_v50 = vld [vmem:[#allocation102_spill] sm:$0xff]  ;;  %v17100_v52 = vld [vmem:[#allocation183_spill] sm:$0xff] }
 0x704   :  { %v5431_v58 = vsel %vm5430_vm0, %v14100_v37, %v7128_v26  ;;  %v7233_v2 = vunpack.i.l.bf16 %v17095_v40  ;;  %v7598_v10 = vunpack.i.l.bf16 %v14348_v3  ;;  %v17098_v33 = vpack.i.bf16 %v17096_v13, %v17097_v12  ;;  %6547 = vmatprep.mubr.msk.f32.mxu1 %vm3380_vm12, %v8208_v4  ;;  %v14386_v18 = vpop.permute.xlu0 %7606  ;;  %v17107_v4 = vld [vmem:[#allocation115_spill] sm:$0xff] }
 0x705   :  { %v17101_v9 = vpack.i.bf16 %v17099_v50, %v17100_v52  ;;  %v5601_v47 = vsel %vm5560_vm2, %v5536_v54, %v7539_v17  ;;  %v5472_v42 = vsel %vm5430_vm0, %v14253_v19, %v7229_v56  ;;  %v7544_v37 = vunpack.i.h.bf16 %v14180_v23  ;;  %v14388_v17 = vpop.permute.xlu1 %7601 }
 0x706   :  { %7886 = vrot.lane.b32.xlu0 %v17098_v33, %s8306_s28  ;;  %v7558_v26 = vunpack.i.l.bf16 %v14210_v8  ;;  %v7573_v53 = vunpack.i.l.bf16 %v14285_v63  ;;  %v7234_v24 = vunpack.i.h.bf16 %v17095_v40  ;;  %v5496_v31 = vsel %vm5495_vm1, %v5431_v58, %v7288_v7 }
 0x707   :  { %7881 = vrot.lane.b32.xlu1 %v17101_v9, %s8307_s29  ;;  %v5537_v27 = vsel %vm5495_vm1, %v5472_v42, %v7554_v28  ;;  %v5730_v19 = vsel %vm5690_vm4, %v5665_v55, %v7548_v46  ;;  %v7563_v23 = vunpack.i.l.bf16 %v14245_v43  ;;  %v7608_v56 = vunpack.i.l.bf16 %v14386_v18  ;;  %v17102_v46 = vld [vmem:[#allocation257_spill] sm:$0xff]  ;;  %v17103_v55 = vld [vmem:[#allocation358_spill] sm:$0xff] }
 0x708   :  { %v7603_v54 = vunpack.i.l.bf16 %v14388_v17  ;;  %6172 = vmatmul.mubr.f32.gmra.mxu1 %v5730_v19  ;;  %v5666_v12 = vsel %vm5625_vm3, %v5601_v47, %v7544_v37  ;;  %v5473_v7 = vsel %vm5430_vm0, %v14259_v0, %v7233_v2  ;;  %v7289_v28 = vunpack.i.h.bf16 %v17089_v34  ;;  %v8209_v2 = vld [vmem:[#allocation3 + $0x309] sm:$0xff]  ;;  %v14415_v47 = vpop.permute.xlu0 %7616 }
 0x709   :  { %v7549_v58 = vunpack.i.h.bf16 %v14178_v15  ;;  %v5561_v40 = vsel %vm5560_vm2, %v5496_v31, %v7598_v10  ;;  %v17104_v33 = vpack.i.bf16 %v17102_v46, %v17103_v55  ;;  %v17105_v50 = vpack.i.bf16 %v17096_v13, %v13551_v30  ;;  %6548 = vmatprep.mubr.msk.f32.mxu1 %vm3380_vm12, %v8209_v2  ;;  %v14417_v42 = vpop.permute.xlu1 %7611  ;;  %v17106_v13 = vld [vmem:[#allocation340_spill] sm:$0xff]  ;;  %v8211_v46 = vld [vmem:[#allocation3 + $0x311] sm:$0xff] }
 0x70a   :  { %v7559_v52 = vunpack.i.h.bf16 %v14210_v8  ;;  %v5538_v0 = vsel %vm5495_vm1, %v5473_v7, %v7573_v53  ;;  %v5626_v34 = vsel %vm5625_vm3, %v5561_v40, %v7603_v54  ;;  %v5602_v15 = vsel %vm5560_vm2, %v5537_v27, %v7558_v26  ;;  %v17108_v27 = vld [vmem:[#allocation221_spill] sm:$0xff]  ;;  %v17114_v2 = vld [vmem:[#allocation222_spill] sm:$0xff] }
 0x70b   :  { %7896 = vrot.lane.b32.xlu0 %v17104_v33, %s8305_s25  ;;  %7891 = vrot.lane.b32.xlu1 %v17105_v50, %s8304_s20  ;;  %v7568_v10 = vunpack.i.l.bf16 %v14243_v39  ;;  %v7574_v9 = vunpack.i.h.bf16 %v14285_v63  ;;  %v5691_v30 = vsel %vm5690_vm4, %v5626_v34, %v7608_v56  ;;  %v5731_v8 = vsel %vm5690_vm4, %v5666_v12, %v7549_v58  ;;  %v17109_v54 = vld [vmem:[#allocation385_spill] sm:$0xff] }
 0x70c   :  { %v6983_v37 = vunpack.i.l.bf16 %v17106_v13  ;;  %v14426_v53 = vsel %vm5365_vm15, %v14012_v61, %v7089_v51  ;;  %v5432_v26 = vsel %vm5430_vm0, %v14085_v22, %v7129_v49  ;;  %5977 = vmatmul.mubr.f32.vlgmr.msra.gmra.mxu0 %v5691_v30  ;;  %6177 = vmatmul.mubr.f32.gmra.mxu1 %v5731_v8  ;;  %v5667_v63 = vsel %vm5625_vm3, %v5602_v15, %v7563_v23  ;;  %v17112_v61 = vld [vmem:[#allocation351_spill] sm:$0xff]  ;;  %v8210_v40 = vld [vmem:[#allocation3 + $0x51] sm:$0xff]  ;;  %v14453_v50 = vpop.permute.xlu0 %7626  ;;  %v17115_v30 = vld [vmem:[#allocation352_spill] sm:$0xff] }
 0x70d   :  { %v7133_v31 = vunpack.i.l.bf16 %v17107_v4  ;;  %v7238_v19 = vunpack.i.l.bf16 %v17108_v27  ;;  %v7618_v56 = vunpack.i.l.bf16 %v14415_v47  ;;  %v17111_v12 = vpack.i.bf16 %v17109_v54, %v17110_v44  ;;  %6509 = vmatprep.mubr.msk.f32.mxu0 %vm3380_vm12, %v8210_v40  ;;  %6549 = vmatprep.mubr.msk.f32.mxu1 %vm3380_vm12, %v8211_v46  ;;  %v17116_v8 = vld [vmem:[#allocation212_spill] sm:$0xff] }
 0x70e   :  { %v17113_v51 = vpack.i.bf16 %v17112_v61, %v16836_v62  ;;  %v5603_v22 = vsel %vm5560_vm2, %v5538_v0, %v7559_v52  ;;  %v5474_v49 = vsel %vm5430_vm0, %v14263_v14, %v7234_v24  ;;  %v7564_v23 = vunpack.i.h.bf16 %v14245_v43  ;;  %v14455_v14 = vpop.permute.xlu1 %7621 }
 0x70f   :  { %7906 = vrot.lane.b32.xlu0 %v17111_v12, %s8306_s28  ;;  %v7578_v7 = vunpack.i.l.bf16 %v14283_v48  ;;  %v7593_v58 = vunpack.i.l.bf16 %v14350_v38  ;;  %v7239_v62 = vunpack.i.h.bf16 %v17108_v27  ;;  %v5497_v55 = vsel %vm5495_vm1, %v5432_v26, %v7289_v28  ;;  %v17118_v26 = vld [vmem:[#allocation383_spill] sm:$0xff] }
 0x710   :  { %7901 = vrot.lane.b32.xlu1 %v17113_v51, %s8307_s29  ;;  %v5539_v33 = vsel %vm5495_vm1, %v5474_v49, %v7574_v9  ;;  %v5732_v43 = vsel %vm5690_vm4, %v5667_v63, %v7568_v10  ;;  %v7583_v24 = vunpack.i.l.bf16 %v14317_v1  ;;  %v7628_v52 = vunpack.i.l.bf16 %v14453_v50  ;;  %v17119_v63 = vld [vmem:[#allocation391_spill] sm:$0xff] }
 0x711   :  { %v7623_v0 = vunpack.i.l.bf16 %v14455_v14  ;;  %6182 = vmatmul.mubr.f32.gmra.mxu1 %v5732_v43  ;;  %v5668_v34 = vsel %vm5625_vm3, %v5603_v22, %v7564_v23  ;;  %v5475_v28 = vsel %vm5430_vm0, %v14275_v41, %v7238_v19  ;;  %v7293_v15 = vunpack.i.l.bf16 %v17114_v2  ;;  %v8212_v19 = vld [vmem:[#allocation3 + $0x329] sm:$0xff]  ;;  %v14482_v22 = vpop.permute.xlu0 %7636  ;;  %v17122_v43 = vld [vmem:[#allocation130_spill] sm:$0xff] }
 0x712   :  { %v7569_v9 = vunpack.i.h.bf16 %v14243_v39  ;;  %v17117_v10 = vpack.i.bf16 %v17115_v30, %v17116_v8  ;;  %v17120_v27 = vpack.i.bf16 %v17118_v26, %v17119_v63  ;;  %v5562_v54 = vsel %vm5560_vm2, %v5497_v55, %v7618_v56  ;;  %6550 = vmatprep.mubr.msk.f32.mxu1 %vm3380_vm12, %v8212_v19  ;;  %v14484_v49 = vpop.permute.xlu1 %7631  ;;  %v8215_v19 = vld [vmem:[#allocation3 + $0x349] sm:$0xff] }
 0x713   :  { %v7579_v44 = vunpack.i.h.bf16 %v14283_v48  ;;  %v5540_v41 = vsel %vm5495_vm1, %v5475_v28, %v7593_v58  ;;  %v5627_v39 = vsel %vm5625_vm3, %v5562_v54, %v7623_v0  ;;  %v5604_v12 = vsel %vm5560_vm2, %v5539_v33, %v7578_v7  ;;  %v17121_v33 = vld [vmem:[#allocation47_spill] sm:$0xff]  ;;  %v17125_v28 = vld [vmem:[#allocation236_spill] sm:$0xff] }
 0x714   :  { %7916 = vrot.lane.b32.xlu0 %v17117_v10, %s8307_s29  ;;  %7911 = vrot.lane.b32.xlu1 %v17120_v27, %s8305_s25  ;;  %v7588_v61 = vunpack.i.l.bf16 %v14315_v5  ;;  %v7594_v51 = vunpack.i.h.bf16 %v14350_v38  ;;  %v5692_v56 = vsel %vm5690_vm4, %v5627_v39, %v7628_v52  ;;  %v5733_v48 = vsel %vm5690_vm4, %v5668_v34, %v7569_v9  ;;  %v8213_v52 = vld [vmem:[#allocation3 + $0x69] sm:$0xff] }
 0x715   :  { %v7134_v23 = vunpack.i.h.bf16 %v17107_v4  ;;  %v5433_v58 = vsel %vm5430_vm0, %v14136_v60, %v7133_v31  ;;  %v7633_v40 = vunpack.i.l.bf16 %v14484_v49  ;;  %5982 = vmatmul.mubr.f32.gmra.mxu0 %v5692_v56  ;;  %6187 = vmatmul.mubr.f32.gmra.mxu1 %v5733_v48  ;;  %v5669_v7 = vsel %vm5625_vm3, %v5604_v12, %v7583_v24  ;;  %v17124_v31 = vld [vmem:[#allocation328_spill] sm:$0xff]  ;;  %v14511_v8 = vpop.permute.xlu0 %7646 }
 0x716   :  { %v5476_v38 = vsel %vm5430_vm0, %v14291_v45, %v7239_v62  ;;  %v5498_v46 = vsel %vm5495_vm1, %v5433_v58, %v7293_v15  ;;  %v7638_v55 = vunpack.i.l.bf16 %v14482_v22  ;;  %v17123_v4 = vpack.i.bf16 %v17121_v33, %v17122_v43  ;;  %6510 = vmatprep.mubr.msk.f32.mxu0 %vm3380_vm12, %v8213_v52  ;;  %v8214_v62 = vld [vmem:[#allocation3 + $0x331] sm:$0xff]  ;;  %v14513_v10 = vpop.permute.xlu1 %7641 }
 0x717   :  { %v5605_v60 = vsel %vm5560_vm2, %v5540_v41, %v7579_v44  ;;  %v7243_v0 = vunpack.i.l.bf16 %v17124_v31  ;;  %v7584_v24 = vunpack.i.h.bf16 %v14317_v1  ;;  %v7599_v45 = vunpack.i.h.bf16 %v14348_v3  ;;  %6551 = vmatprep.mubr.msk.f32.mxu1 %vm3380_vm12, %v8214_v62  ;;  %v17126_v1 = vld [vmem:[#allocation113_spill] sm:$0xff] }
 0x718   :  { %7921 = vrot.lane.b32.xlu1 %v17123_v4, %s8306_s28  ;;  %v5563_v34 = vsel %vm5560_vm2, %v5498_v46, %v7633_v40  ;;  %v7094_v15 = vunpack.i.h.bf16 %v17125_v28  ;;  %v5541_v9 = vsel %vm5495_vm1, %v5476_v38, %v7594_v51  ;;  %v7604_v30 = vunpack.i.h.bf16 %v14388_v17  ;;  %v8217_v43 = vld [vmem:[#allocation3 + $0x351] sm:$0xff] }
 0x719   :  { %v5734_v26 = vsel %vm5690_vm4, %v5669_v7, %v7588_v61  ;;  %v7138_v63 = vunpack.i.l.bf16 %v17126_v1  ;;  %v7613_v3 = vunpack.i.l.bf16 %v14417_v42  ;;  %v7643_v27 = vunpack.i.l.bf16 %v14513_v10  ;;  %v14533_v48 = vpop.permute.xlu0 %7656 }
 0x71a   :  { %6192 = vmatmul.mubr.f32.gmra.mxu1 %v5734_v26  ;;  %v5670_v54 = vsel %vm5625_vm3, %v5605_v60, %v7584_v24  ;;  %v5434_v44 = vsel %vm5430_vm0, %v14121_v35, %v7134_v23  ;;  %v7294_v17 = vunpack.i.h.bf16 %v17114_v2  ;;  %v7589_v41 = vunpack.i.h.bf16 %v14315_v5  ;;  %v14535_v5 = vpop.permute.xlu1 %7651 }
 0x71b   :  { %6552 = vmatprep.mubr.msk.f32.mxu1 %vm3380_vm12, %v8215_v19  ;;  %v5628_v39 = vsel %vm5625_vm3, %v5563_v34, %v7638_v55  ;;  %v7244_v12 = vunpack.i.h.bf16 %v17124_v31  ;;  %v5477_v61 = vsel %vm5430_vm0, %v14323_v20, %v7243_v0  ;;  %v5606_v56 = vsel %vm5560_vm2, %v5541_v9, %v7599_v45 }
 0x71c   :  { %v5693_v51 = vsel %vm5690_vm4, %v5628_v39, %v7643_v27  ;;  %v7609_v35 = vunpack.i.h.bf16 %v14386_v18  ;;  %v7619_v2 = vunpack.i.h.bf16 %v14415_v47  ;;  %v5735_v23 = vsel %vm5690_vm4, %v5670_v54, %v7589_v41  ;;  %v8216_v18 = vld [vmem:[#allocation3 + $0x71] sm:$0xff] }
 0x71d   :  { %5987 = vmatmul.mubr.f32.gmra.mxu0 %v5693_v51  ;;  %v5671_v58 = vsel %vm5625_vm3, %v5606_v56, %v7604_v30  ;;  %v7614_v40 = vunpack.i.h.bf16 %v14417_v42  ;;  %v5542_v20 = vsel %vm5495_vm1, %v5477_v61, %v7613_v3  ;;  %v7624_v7 = vunpack.i.h.bf16 %v14455_v14  ;;  %v17127_v14 = vld [vmem:[#allocation244_spill] sm:$0xff]  ;;  %v14557_v24 = vpop.permute.xlu0 %7666  ;;  %v17129_v41 = vld [vmem:[#allocation349_spill] sm:$0xff] }
 0x71e   :  { %v7653_v38 = vunpack.i.l.bf16 %v14535_v5  ;;  %6511 = vmatprep.mubr.msk.f32.mxu0 %vm3380_vm12, %v8216_v18  ;;  %6197 = vmatmul.mubr.f32.gmra.mxu1 %v5735_v23  ;;  %v7093_v47 = vunpack.i.l.bf16 %v17125_v28  ;;  %v7139_v46 = vunpack.i.h.bf16 %v17126_v1  ;;  %v5499_v55 = vsel %vm5495_vm1, %v5434_v44, %v7294_v17  ;;  %v14559_v45 = vpop.permute.xlu1 %7661  ;;  %v8219_v23 = vld [vmem:[#allocation3 + $0x89] sm:$0xff] }
 0x71f   :  { %v7658_v33 = vunpack.i.l.bf16 %v14533_v48  ;;  %6553 = vmatprep.mubr.msk.f32.mxu1 %vm3380_vm12, %v8217_v43  ;;  %v5435_v42 = vsel %vm5430_vm0, %v14152_v29, %v7138_v63  ;;  %v7248_v4 = vunpack.i.l.bf16 %v17127_v14  ;;  %v7634_v52 = vunpack.i.h.bf16 %v14484_v49  ;;  %v17128_v29 = vld [vmem:[#allocation124_spill] sm:$0xff] }
 0x720   :  { %v5564_v60 = vsel %vm5560_vm2, %v5499_v55, %v7653_v38  ;;  %v5478_v31 = vsel %vm5430_vm0, %v14356_v11, %v7244_v12  ;;  %v7629_v0 = vunpack.i.h.bf16 %v14453_v50  ;;  %v5736_v62 = vsel %vm5690_vm4, %v5671_v58, %v7609_v35  ;;  %v8218_v63 = vld [vmem:[#allocation3 + $0x369] sm:$0xff]  ;;  %v8220_v58 = vld [vmem:[#allocation3 + $0x371] sm:$0xff] }
 0x721   :  { %v5607_v34 = vsel %vm5560_vm2, %v5542_v20, %v7619_v2  ;;  %v7298_v9 = vunpack.i.l.bf16 %v17128_v29  ;;  %v5543_v30 = vsel %vm5495_vm1, %v5478_v31, %v7614_v40  ;;  %v7663_v49 = vunpack.i.l.bf16 %v14559_v45  ;;  %v14580_v12 = vpop.permute.xlu0 %7676 }
 0x722   :  { %6202 = vmatmul.mubr.f32.gmra.mxu1 %v5736_v62  ;;  %v5672_v26 = vsel %vm5625_vm3, %v5607_v34, %v7624_v7  ;;  %v7639_v11 = vunpack.i.h.bf16 %v14482_v22  ;;  %v7648_v50 = vunpack.i.l.bf16 %v14511_v8  ;;  %v7668_v1 = vunpack.i.l.bf16 %v14557_v24  ;;  %v7672_v61 = vpop.permute.xlu1 %7671 }
 0x723   :  { %6554 = vmatprep.mubr.msk.f32.mxu1 %vm3380_vm12, %v8218_v63  ;;  %v5629_v3 = vsel %vm5625_vm3, %v5564_v60, %v7658_v33  ;;  %v7249_v27 = vunpack.i.h.bf16 %v17127_v14  ;;  %v7644_v54 = vunpack.i.h.bf16 %v14513_v10  ;;  %v5608_v17 = vsel %vm5560_vm2, %v5543_v30, %v7634_v52 }
 0x724   :  { %v5694_v44 = vsel %vm5690_vm4, %v5629_v3, %v7663_v49  ;;  %v5479_v22 = vsel %vm5430_vm0, %v14360_v36, %v7248_v4  ;;  %v7253_v19 = vunpack.i.l.bf16 %v17129_v41  ;;  %v7654_v39 = vunpack.i.h.bf16 %v14535_v5 }
 0x725   :  { %5992 = vmatmul.mubr.f32.gmra.mxu0 %v5694_v44  ;;  %v5737_v51 = vsel %vm5690_vm4, %v5672_v26, %v7629_v0  ;;  %v7299_v56 = vunpack.i.h.bf16 %v17128_v29  ;;  %v5500_v10 = vsel %vm5495_vm1, %v5435_v42, %v7298_v9  ;;  %v7678_v35 = vunpack.i.l.bf16 %v14580_v12  ;;  %v7687_v43 = vpop.permute.xlu0 %7686  ;;  %v17130_v0 = vld [vmem:[#allocation214_spill] sm:$0xff] }
 0x726   :  { %v7673_v2 = vunpack.i.l.bf16 %v7672_v61  ;;  %6512 = vmatprep.mubr.msk.f32.mxu0 %vm3380_vm12, %v8219_v23  ;;  %6207 = vmatmul.mubr.f32.gmra.mxu1 %v5737_v51  ;;  %v7649_v36 = vunpack.i.h.bf16 %v14511_v8  ;;  %v5544_v5 = vsel %vm5495_vm1, %v5479_v22, %v7648_v50  ;;  %v5565_v40 = vsel %vm5560_vm2, %v5500_v10, %v7668_v1  ;;  %v7682_v42 = vpop.permute.xlu1 %7681  ;;  %v8221_v29 = vld [vmem:[#allocation3 + $0x91] sm:$0xff] }
 0x727   :  { %6555 = vmatprep.mubr.msk.f32.mxu1 %vm3380_vm12, %v8220_v58  ;;  %v5673_v20 = vsel %vm5625_vm3, %v5608_v17, %v7639_v11  ;;  %v7659_v7 = vunpack.i.h.bf16 %v14533_v48  ;;  %v7669_v38 = vunpack.i.h.bf16 %v14557_v24  ;;  %v7664_v33 = vunpack.i.h.bf16 %v14559_v45  ;;  %v17132_v17 = vld [vmem:[#allocation247_spill] sm:$0xff] }
 0x728   :  { %v5630_v18 = vsel %vm5625_vm3, %v5565_v40, %v7673_v2  ;;  %v5738_v55 = vsel %vm5690_vm4, %v5673_v20, %v7644_v54  ;;  %v7674_v8 = vunpack.i.h.bf16 %v7672_v61  ;;  %v5609_v4 = vsel %vm5560_vm2, %v5544_v5, %v7654_v39  ;;  %v17131_v54 = vld [vmem:[#allocation50_spill] sm:$0xff] }
 0x729   :  { %v5695_v14 = vsel %vm5690_vm4, %v5630_v18, %v7678_v35  ;;  %v5416_v52 = vsel %vm5365_vm15, %v14052_v32, %v7093_v47  ;;  %v5436_v48 = vsel %vm5430_vm0, %v14160_v16, %v7139_v46  ;;  %v5480_v60 = vsel %vm5430_vm0, %v14426_v53, %v7249_v27  ;;  %v8222_v32 = vld [vmem:[#allocation3 + $0x389] sm:$0xff]  ;;  %v7697_v49 = vpop.permute.xlu0 %7696 }
 0x72a   :  { %v7683_v31 = vunpack.i.l.bf16 %v7682_v42  ;;  %5997 = vmatmul.mubr.f32.gmra.mxu0 %v5695_v14  ;;  %6212 = vmatmul.mubr.f32.gmra.mxu1 %v5738_v55  ;;  %v7143_v24 = vunpack.i.l.bf16 %v17130_v0  ;;  %v7254_v45 = vunpack.i.h.bf16 %v17129_v41  ;;  %v5545_v62 = vsel %vm5495_vm1, %v5480_v60, %v7649_v36  ;;  %v7692_v26 = vpop.permute.xlu1 %7691  ;;  %v8225_v18 = vld [vmem:[#allocation3 + $0x3a9] sm:$0xff] }
 0x72b   :  { %v7688_v34 = vunpack.i.l.bf16 %v7687_v43  ;;  %6513 = vmatprep.mubr.msk.f32.mxu0 %vm3380_vm12, %v8221_v29  ;;  %6556 = vmatprep.mubr.msk.f32.mxu1 %vm3380_vm12, %v8222_v32  ;;  %v5481_v16 = vsel %vm5430_vm0, %v5416_v52, %v7253_v19  ;;  %v5501_v53 = vsel %vm5495_vm1, %v5436_v48, %v7299_v56  ;;  %v5674_v47 = vsel %vm5625_vm3, %v5609_v4, %v7659_v7  ;;  %v8223_v19 = vld [vmem:[#allocation3 + $0x391] sm:$0xff]  ;;  %v8227_v52 = vld [vmem:[#allocation3 + $0xa7] sm:$0xff] }
 0x72c   :  { %v5610_v46 = vsel %vm5560_vm2, %v5545_v62, %v7669_v38  ;;  %v7679_v9 = vunpack.i.h.bf16 %v14580_v12  ;;  %v7689_v30 = vunpack.i.h.bf16 %v7687_v43  ;;  %v5739_v11 = vsel %vm5690_vm4, %v5674_v47, %v7664_v33  ;;  %v8224_v38 = vld [vmem:[#allocation3 + $0xa9] sm:$0xff]  ;;  %v17136_v29 = vld [vmem:[#allocation331_spill] sm:$0xff] }
 0x72d   :  { %v5675_v50 = vsel %vm5625_vm3, %v5610_v46, %v7674_v8  ;;  %v5546_v1 = vsel %vm5495_vm1, %v5481_v16, %v7683_v31  ;;  %v7698_v63 = vunpack.i.l.bf16 %v7697_v49  ;;  %v7694_v3 = vunpack.i.h.bf16 %v7692_v26  ;;  %v7707_v10 = vpop.permute.xlu0 %7706  ;;  %v8226_v55 = vld [vmem:[#allocation3 + $0xaf] sm:$0xff] }
 0x72e   :  { %v7693_v27 = vunpack.i.l.bf16 %v7692_v26  ;;  %6217 = vmatmul.mubr.f32.gmra.mxu1 %v5739_v11  ;;  %v5372_v44 = vsel %vm5365_vm15, %v17131_v54, %v6983_v37  ;;  %v7303_v22 = vunpack.i.l.bf16 %v17132_v17  ;;  %v7684_v41 = vunpack.i.h.bf16 %v7682_v42  ;;  %v7702_v35 = vpop.permute.xlu1 %7701  ;;  %v17134_v43 = vld [vmem:[#allocation336_spill] sm:$0xff] }
 0x72f   :  { %6557 = vmatprep.mubr.msk.f32.mxu1 %vm3380_vm12, %v8223_v19  ;;  %v5566_v39 = vsel %vm5560_vm2, %v5501_v53, %v7688_v34  ;;  %v6833_v12 = vunpack.i.l.bf16 %v16945_v57  ;;  %v5417_v61 = vsel %vm5365_vm15, %v14045_v21, %v7094_v15  ;;  %v5437_v51 = vsel %vm5430_vm0, %v5372_v44, %v7143_v24  ;;  %v17135_v31 = vld [vmem:[#allocation320_spill] sm:$0xff] }
 0x730   :  { %v5631_v56 = vsel %vm5625_vm3, %v5566_v39, %v7693_v27  ;;  %v7699_v37 = vunpack.i.h.bf16 %v7697_v49  ;;  %v5740_v23 = vsel %vm5690_vm4, %v5675_v50, %v7679_v9  ;;  %v5611_v36 = vsel %vm5560_vm2, %v5546_v1, %v7689_v30  ;;  %v8228_v9 = vld [vmem:[#allocation3 + $0x3b1] sm:$0xff]  ;;  %v8229_v26 = vld [vmem:[#allocation3 + $0x387] sm:$0xff] }
 0x731   :  { %v5696_v2 = vsel %vm5690_vm4, %v5631_v56, %v7698_v63  ;;  %v5482_v5 = vsel %vm5430_vm0, %v5417_v61, %v7254_v45  ;;  %v7704_v58 = vunpack.i.h.bf16 %v7702_v35  ;;  %v7703_v28 = vunpack.i.l.bf16 %v7702_v35  ;;  %v14654_v45 = vpop.permute.xlu0 %7716  ;;  %v17137_v1 = vld [vmem:[#allocation51_spill] sm:$0xff]  ;;  %v8230_v61 = vld [vmem:[#allocation3 + $0xb1] sm:$0xff]  ;;  %v8231_v35 = vld [vmem:[#allocation3 + $0x3c9] sm:$0xff] }
 0x732   :  { %6002 = vmatmul.mubr.f32.gmra.mxu0 %v5696_v2  ;;  %6222 = vmatmul.mubr.f32.gmra.mxu1 %v5740_v23  ;;  %v5676_v21 = vsel %vm5625_vm3, %v5611_v36, %v7694_v3  ;;  %v5502_v15 = vsel %vm5495_vm1, %v5437_v51, %v7303_v22  ;;  %v5547_v40 = vsel %vm5495_vm1, %v5482_v5, %v7684_v41  ;;  %v7709_v20 = vunpack.i.h.bf16 %v7707_v10  ;;  %v17138_v3 = vld [vmem:[#allocation35_spill] sm:$0xff]  ;;  %v17139_v2 = vld [vmem:[#allocation116_spill] sm:$0xff] }
 0x733   :  { %v7708_v7 = vunpack.i.l.bf16 %v7707_v10  ;;  %6514 = vmatprep.mubr.msk.f32.mxu0 %vm3380_vm12, %v8224_v38  ;;  %6558 = vmatprep.mubr.msk.f32.mxu1 %vm3380_vm12, %v8225_v18  ;;  %v17133_v33 = vunpack.i.h.bf16 %v16945_v57  ;;  %v6938_v42 = vunpack.i.l.bf16 %v17134_v43  ;;  %v5567_v14 = vsel %vm5560_vm2, %v5502_v15, %v7703_v28  ;;  %v7712_v57 = vpop.permute.xlu1 %7711  ;;  %v17140_v28 = vld [vmem:[#allocation323_spill] sm:$0xff]  ;;  %v8232_v15 = vld [vmem:[#allocation3 + $0x38f] sm:$0xff] }
 0x734   :  { %v5612_v4 = vsel %vm5560_vm2, %v5547_v40, %v7704_v58  ;;  %v14650_v48 = vsel %vm3380_vm12, %v8227_v52, %v6833_v12  ;;  %v6984_v60 = vunpack.i.h.bf16 %v17106_v13  ;;  %v7098_v24 = vunpack.i.l.bf16 %v17135_v31 }
 0x735   :  { %v14644_v8 = vsel %vm3380_vm12, %v8226_v55, %v17133_v33  ;;  %v5741_v62 = vsel %vm5690_vm4, %v5676_v21, %v7699_v37  ;;  %v7144_v34 = vunpack.i.h.bf16 %v17130_v0  ;;  %v7258_v32 = vunpack.i.l.bf16 %v17136_v29 }
 0x736   :  { %v7714_v16 = vunpack.i.h.bf16 %v7712_v57  ;;  %v7713_v53 = vunpack.i.l.bf16 %v7712_v57  ;;  %6227 = vmatmul.mubr.f32.gmra.mxu1 %v5741_v62  ;;  %v7304_v47 = vunpack.i.h.bf16 %v17132_v17  ;;  %v7718_v46 = vunpack.i.l.bf16 %v14654_v45  ;;  %v7727_v17 = vpop.permute.xlu0 %7726 }
 0x737   :  { %6559 = vmatprep.mubr.msk.f32.mxu1 %vm3380_vm12, %v8228_v9  ;;  %v5632_v13 = vsel %vm5625_vm3, %v5567_v14, %v7708_v7  ;;  %v5677_v30 = vsel %vm5625_vm3, %v5612_v4, %v7709_v20  ;;  %v6939_v49 = vunpack.i.h.bf16 %v17134_v43  ;;  %v5353_v0 = vsel %vm3380_vm12, %v8229_v26, %v6938_v42  ;;  %v7722_v22 = vpop.permute.xlu1 %7721  ;;  %v17141_v20 = vld [vmem:[#allocation225_spill] sm:$0xff] }
 0x738   :  { %v5697_v11 = vsel %vm5690_vm4, %v5632_v13, %v7713_v53  ;;  %v5742_v50 = vsel %vm5690_vm4, %v5677_v30, %v7714_v16  ;;  %v5373_v63 = vsel %vm5365_vm15, %v17137_v1, %v6984_v60  ;;  %v6988_v27 = vunpack.i.l.bf16 %v17138_v3  ;;  %v8233_v26 = vld [vmem:[#allocation3 + $0xc9] sm:$0xff] }
 0x739   :  { %v7099_v54 = vunpack.i.h.bf16 %v17135_v31  ;;  %v5418_v44 = vsel %vm5365_vm15, %v5353_v0, %v7098_v24  ;;  %6007 = vmatmul.mubr.f32.gmra.mxu0 %v5697_v11  ;;  %v5438_v41 = vsel %vm5430_vm0, %v5373_v63, %v7144_v34  ;;  %v7724_v39 = vunpack.i.h.bf16 %v7722_v22  ;;  %v17142_v34 = vld [vmem:[#allocation95_spill] sm:$0xff]  ;;  %v8234_v0 = vld [vmem:[#allocation3 + $0x3d1] sm:$0xff] }
 0x73a   :  { %v5483_v19 = vsel %vm5430_vm0, %v5418_v44, %v7258_v32  ;;  %v7723_v12 = vunpack.i.l.bf16 %v7722_v22  ;;  %6515 = vmatprep.mubr.msk.f32.mxu0 %vm3380_vm12, %v8230_v61  ;;  %6232 = vmatmul.mubr.f32.gmra.mxu1 %v5742_v50  ;;  %v5503_v51 = vsel %vm5495_vm1, %v5438_v41, %v7304_v47  ;;  %v7729_v37 = vunpack.i.h.bf16 %v7727_v17  ;;  %v7737_v18 = vpop.permute.xlu0 %7736  ;;  %v17144_v50 = vld [vmem:[#allocation45_spill] sm:$0xff]  ;;  %v8235_v41 = vld [vmem:[#allocation3 + $0x3a7] sm:$0xff] }
 0x73b   :  { %v5548_v56 = vsel %vm5495_vm1, %v5483_v19, %v7718_v46  ;;  %v7728_v10 = vunpack.i.l.bf16 %v7727_v17  ;;  %6560 = vmatprep.mubr.msk.f32.mxu1 %vm3380_vm12, %v8231_v35  ;;  %v7148_v23 = vunpack.i.l.bf16 %v17139_v2  ;;  %v7259_v36 = vunpack.i.h.bf16 %v17136_v29  ;;  %v7732_v55 = vpop.permute.xlu1 %7731  ;;  %v17143_v29 = vld [vmem:[#allocation321_spill] sm:$0xff] }
 0x73c   :  { %v5568_v5 = vsel %vm5560_vm2, %v5503_v51, %v7723_v12  ;;  %v5613_v58 = vsel %vm5560_vm2, %v5548_v56, %v7724_v39  ;;  %v6839_v21 = vunpack.i.h.bf16 %v17140_v28  ;;  %v5354_v40 = vsel %vm3380_vm12, %v8232_v15, %v6939_v49  ;;  %v8236_v56 = vld [vmem:[#allocation3 + $0xcf] sm:$0xff] }
 0x73d   :  { %v7308_v7 = vunpack.i.l.bf16 %v17141_v20  ;;  %v7719_v38 = vunpack.i.h.bf16 %v14654_v45  ;;  %v5374_v33 = vsel %vm5365_vm15, %v13632_v59, %v6988_v27  ;;  %v5419_v43 = vsel %vm5365_vm15, %v5354_v40, %v7099_v54 }
 0x73e   :  { %v7734_v42 = vunpack.i.h.bf16 %v7732_v55  ;;  %v7733_v14 = vunpack.i.l.bf16 %v7732_v55  ;;  %v7739_v4 = vunpack.i.h.bf16 %v7737_v18  ;;  %v7738_v52 = vunpack.i.l.bf16 %v7737_v18  ;;  %v7747_v47 = vpop.permute.xlu0 %7746 }
 0x73f   :  { %v5633_v60 = vsel %vm5625_vm3, %v5568_v5, %v7728_v10  ;;  %v5678_v31 = vsel %vm5625_vm3, %v5613_v58, %v7729_v37  ;;  %v5439_v24 = vsel %vm5430_vm0, %v5374_v33, %v7148_v23  ;;  %v5484_v57 = vsel %vm5430_vm0, %v5419_v43, %v7259_v36  ;;  %v7742_v46 = vpop.permute.xlu1 %7741  ;;  %v17145_v10 = vld [vmem:[#allocation25_spill] sm:$0xff]  ;;  %v17146_v36 = vld [vmem:[#allocation136_spill] sm:$0xff] }
 0x740   :  { %v5698_v45 = vsel %vm5690_vm4, %v5633_v60, %v7733_v14  ;;  %v5743_v62 = vsel %vm5690_vm4, %v5678_v31, %v7734_v42  ;;  %v6943_v59 = vunpack.i.l.bf16 %v17142_v34  ;;  %v7103_v32 = vunpack.i.l.bf16 %v17143_v29  ;;  %v17148_v42 = vld [vmem:[#allocation239_spill] sm:$0xff] }
 0x741   :  { %v5504_v16 = vsel %vm5495_vm1, %v5439_v24, %v7308_v7  ;;  %v5549_v53 = vsel %vm5495_vm1, %v5484_v57, %v7719_v38  ;;  %6012 = vmatmul.mubr.f32.gmra.mxu0 %v5698_v45  ;;  %6237 = vmatmul.mubr.f32.gmra.mxu1 %v5743_v62  ;;  %v7749_v9 = vunpack.i.h.bf16 %v7747_v47  ;;  %v7748_v13 = vunpack.i.l.bf16 %v7747_v47  ;;  %v8238_v7 = vld [vmem:[#allocation3 + $0x3e9] sm:$0xff] }
 0x742   :  { %v7744_v30 = vunpack.i.h.bf16 %v7742_v46  ;;  %v7743_v49 = vunpack.i.l.bf16 %v7742_v46  ;;  %6516 = vmatprep.mubr.msk.f32.mxu0 %vm3380_vm12, %v8233_v26  ;;  %6561 = vmatprep.mubr.msk.f32.mxu1 %vm3380_vm12, %v8234_v0  ;;  %v6989_v11 = vunpack.i.h.bf16 %v17138_v3  ;;  %v7263_v1 = vunpack.i.l.bf16 %v17144_v50  ;;  %v7757_v3 = vpop.permute.xlu0 %7756  ;;  %v17147_v38 = vld [vmem:[#allocation101_spill] sm:$0xff] }
 0x743   :  { %v5569_v63 = vsel %vm5560_vm2, %v5504_v16, %v7738_v52  ;;  %v5614_v27 = vsel %vm5560_vm2, %v5549_v53, %v7739_v4  ;;  %v6838_v54 = vunpack.i.l.bf16 %v17140_v28  ;;  %v7149_v44 = vunpack.i.h.bf16 %v17139_v2  ;;  %v7752_v12 = vpop.permute.xlu1 %7751  ;;  %v8239_v47 = vld [vmem:[#allocation3 + $0x3af] sm:$0xff] }
 0x744   :  { %v5634_v17 = vsel %vm5625_vm3, %v5569_v63, %v7743_v49  ;;  %v5679_v22 = vsel %vm5625_vm3, %v5614_v27, %v7744_v30  ;;  %v5355_v19 = vsel %vm3380_vm12, %v8235_v41, %v6943_v59  ;;  %v7309_v39 = vunpack.i.h.bf16 %v17141_v20  ;;  %v8237_v20 = vld [vmem:[#allocation3 + $0xd1] sm:$0xff] }
 0x745   :  { %v5699_v61 = vsel %vm5690_vm4, %v5634_v17, %v7748_v13  ;;  %v5744_v51 = vsel %vm5690_vm4, %v5679_v22, %v7749_v9  ;;  %v14715_v37 = vsel %vm3380_vm12, %v8236_v56, %v6839_v21  ;;  %v6844_v35 = vunpack.i.h.bf16 %v17145_v10 }
 0x746   :  { %v5420_v2 = vsel %vm5365_vm15, %v5355_v19, %v7103_v32  ;;  %v7753_v23 = vunpack.i.l.bf16 %v7752_v12  ;;  %6017 = vmatmul.mubr.f32.gmra.mxu0 %v5699_v61  ;;  %6242 = vmatmul.mubr.f32.gmra.mxu1 %v5744_v51  ;;  %v5375_v5 = vsel %vm5365_vm15, %v17146_v36, %v6989_v11  ;;  %v7759_v15 = vunpack.i.h.bf16 %v7757_v3  ;;  %v7767_v60 = vpop.permute.xlu0 %7766  ;;  %v8240_v19 = vld [vmem:[#allocation3 + $0xe9] sm:$0xff] }
 0x747   :  { %v5485_v58 = vsel %vm5430_vm0, %v5420_v2, %v7263_v1  ;;  %v7758_v40 = vunpack.i.l.bf16 %v7757_v3  ;;  %6517 = vmatprep.mubr.msk.f32.mxu0 %vm3380_vm12, %v8237_v20  ;;  %6562 = vmatprep.mubr.msk.f32.mxu1 %vm3380_vm12, %v8238_v7  ;;  %v6944_v21 = vunpack.i.h.bf16 %v17142_v34  ;;  %v6993_v18 = vunpack.i.l.bf16 %v17147_v38  ;;  %v7762_v31 = vpop.permute.xlu1 %7761  ;;  %v17149_v34 = vld [vmem:[#allocation334_spill] sm:$0xff]  ;;  %v8242_v3 = vld [vmem:[#allocation3 + $0xc7] sm:$0xff] }
 0x748   :  { %v5440_v55 = vsel %vm5430_vm0, %v5375_v5, %v7149_v44  ;;  %v5550_v33 = vsel %vm5495_vm1, %v5485_v58, %v7753_v23  ;;  %v7104_v43 = vunpack.i.h.bf16 %v17143_v29  ;;  %v7153_v14 = vunpack.i.l.bf16 %v17148_v42  ;;  %v17150_v61 = vld [vmem:[#allocation96_spill] sm:$0xff] }
 0x749   :  { %v7264_v4 = vunpack.i.h.bf16 %v17144_v50  ;;  %v5505_v52 = vsel %vm5495_vm1, %v5440_v55, %v7309_v39  ;;  %v7769_v24 = vunpack.i.h.bf16 %v7767_v60  ;;  %v7768_v57 = vunpack.i.l.bf16 %v7767_v60  ;;  %v8241_v39 = vld [vmem:[#allocation3 + $0x3f1] sm:$0xff]  ;;  %v8244_v5 = vld [vmem:[#allocation3 + $0xe7] sm:$0xff] }
 0x74a   :  { %v7764_v45 = vunpack.i.h.bf16 %v7762_v31  ;;  %v7763_v62 = vunpack.i.l.bf16 %v7762_v31  ;;  %v7313_v59 = vunpack.i.l.bf16 %v17149_v34  ;;  %v7754_v32 = vunpack.i.h.bf16 %v7752_v12  ;;  %v7777_v26 = vpop.permute.xlu0 %7776  ;;  %v8243_v23 = vld [vmem:[#allocation3 + $0xef] sm:$0xff] }
 0x74b   :  { %v5570_v16 = vsel %vm5560_vm2, %v5505_v52, %v7758_v40  ;;  %v5615_v53 = vsel %vm5560_vm2, %v5550_v33, %v7759_v15  ;;  %v6843_v29 = vunpack.i.l.bf16 %v17145_v10  ;;  %v5356_v46 = vsel %vm3380_vm12, %v8239_v47, %v6944_v21  ;;  %v7772_v0 = vpop.permute.xlu1 %7771  ;;  %v17151_v15 = vld [vmem:[#allocation345_spill] sm:$0xff]  ;;  %v17152_v21 = vld [vmem:[#allocation350_spill] sm:$0xff] }
 0x74c   :  { %v5635_v9 = vsel %vm5625_vm3, %v5570_v16, %v7763_v62  ;;  %v5680_v13 = vsel %vm5625_vm3, %v5615_v53, %v7764_v45  ;;  %v5376_v30 = vsel %vm5365_vm15, %v14650_v48, %v6993_v18  ;;  %v5421_v49 = vsel %vm5365_vm15, %v5356_v46, %v7104_v43  ;;  %v8246_v47 = vld [vmem:[#allocation3 + $0xf1] sm:$0xff] }
 0x74d   :  { %v5700_v11 = vsel %vm5690_vm4, %v5635_v9, %v7768_v57  ;;  %v5745_v50 = vsel %vm5690_vm4, %v5680_v13, %v7769_v24  ;;  %v5441_v1 = vsel %vm5430_vm0, %v5376_v30, %v7153_v14  ;;  %v5486_v63 = vsel %vm5430_vm0, %v5421_v49, %v7264_v4  ;;  %v8245_v4 = vld [vmem:[#allocation3 + $0x3c7] sm:$0xff]  ;;  %v17154_v49 = vld [vmem:[#allocation217_spill] sm:$0xff] }
 0x74e   :  { %v7774_v27 = vunpack.i.h.bf16 %v7772_v0  ;;  %v7773_v44 = vunpack.i.l.bf16 %v7772_v0  ;;  %6022 = vmatmul.mubr.f32.gmra.mxu0 %v5700_v11  ;;  %6247 = vmatmul.mubr.f32.gmra.mxu1 %v5745_v50  ;;  %v5506_v17 = vsel %vm5495_vm1, %v5441_v1, %v7313_v59  ;;  %v5551_v48 = vsel %vm5495_vm1, %v5486_v63, %v7754_v32  ;;  %v14766_v40 = vpop.permute.xlu0 %7786  ;;  %v17153_v24 = vld [vmem:[#allocation103_spill] sm:$0xff]  ;;  %v17155_v1 = vld [vmem:[#allocation326_spill] sm:$0xff] }
 0x74f   :  { %v7779_v22 = vunpack.i.h.bf16 %v7777_v26  ;;  %v7778_v41 = vunpack.i.l.bf16 %v7777_v26  ;;  %6518 = vmatprep.mubr.msk.f32.mxu0 %vm3380_vm12, %v8240_v19  ;;  %6563 = vmatprep.mubr.msk.f32.mxu1 %vm3380_vm12, %v8241_v39  ;;  %v5313_v12 = vsel %vm3380_vm12, %v8242_v3, %v6838_v54  ;;  %v6948_v51 = vunpack.i.l.bf16 %v17150_v61  ;;  %v7782_v20 = vpop.permute.xlu1 %7781 }
 0x750   :  { %v5571_v56 = vsel %vm5560_vm2, %v5506_v17, %v7773_v44  ;;  %v5616_v2 = vsel %vm5560_vm2, %v5551_v48, %v7774_v27  ;;  %v14759_v36 = vsel %vm3380_vm12, %v8243_v23, %v6844_v35  ;;  %v14762_v58 = vsel %vm3380_vm12, %v8244_v5, %v6843_v29  ;;  %v8248_v27 = vld [vmem:[#allocation3 + $0x3cf] sm:$0xff] }
 0x751   :  { %v6994_v28 = vunpack.i.h.bf16 %v17147_v38  ;;  %v7108_v54 = vunpack.i.l.bf16 %v17151_v15  ;;  %v7154_v7 = vunpack.i.h.bf16 %v17148_v42  ;;  %v7268_v18 = vunpack.i.l.bf16 %v17152_v21  ;;  %v17156_v17 = vld [vmem:[#allocation248_spill] sm:$0xff] }
 0x752   :  { %v7784_v55 = vunpack.i.h.bf16 %v7782_v20  ;;  %v7783_v10 = vunpack.i.l.bf16 %v7782_v20  ;;  %v7314_v35 = vunpack.i.h.bf16 %v17149_v34  ;;  %v7788_v33 = vunpack.i.l.bf16 %v14766_v40  ;;  %v7797_v34 = vpop.permute.xlu0 %7796  ;;  %v17157_v20 = vld [vmem:[#allocation300_spill] sm:$0xff] }
 0x753   :  { %v5636_v43 = vsel %vm5625_vm3, %v5571_v56, %v7778_v41  ;;  %v5681_v14 = vsel %vm5625_vm3, %v5616_v2, %v7779_v22  ;;  %v6949_v38 = vunpack.i.h.bf16 %v17150_v61  ;;  %v5357_v52 = vsel %vm3380_vm12, %v8245_v4, %v6948_v51  ;;  %v7792_v59 = vpop.permute.xlu1 %7791  ;;  %v8249_v4 = vld [vmem:[#allocation3 + $0x109] sm:$0xff] }
 0x754   :  { %v5701_v60 = vsel %vm5690_vm4, %v5636_v43, %v7783_v10  ;;  %v5746_v42 = vsel %vm5690_vm4, %v5681_v14, %v7784_v55  ;;  %v5377_v31 = vsel %vm5365_vm15, %v14644_v8, %v6994_v28  ;;  %v6998_v57 = vunpack.i.l.bf16 %v17153_v24  ;;  %v8247_v8 = vld [vmem:[#allocation3 + $0x409] sm:$0xff] }
 0x755   :  { %v7109_v45 = vunpack.i.h.bf16 %v17151_v15  ;;  %v5422_v62 = vsel %vm5365_vm15, %v5357_v52, %v7108_v54  ;;  %6027 = vmatmul.mubr.f32.gmra.mxu0 %v5701_v60  ;;  %6252 = vmatmul.mubr.f32.gmra.mxu1 %v5746_v42  ;;  %v5442_v32 = vsel %vm5430_vm0, %v5377_v31, %v7154_v7  ;;  %v7794_v53 = vunpack.i.h.bf16 %v7792_v59  ;;  %v17158_v7 = vld [vmem:[#allocation346_spill] sm:$0xff] }
 0x756   :  { %v5487_v16 = vsel %vm5430_vm0, %v5422_v62, %v7268_v18  ;;  %v7793_v29 = vunpack.i.l.bf16 %v7792_v59  ;;  %6519 = vmatprep.mubr.msk.f32.mxu0 %vm3380_vm12, %v8246_v47  ;;  %6564 = vmatprep.mubr.msk.f32.mxu1 %vm3380_vm12, %v8247_v8  ;;  %v5507_v46 = vsel %vm5495_vm1, %v5442_v32, %v7314_v35  ;;  %v7799_v13 = vunpack.i.h.bf16 %v7797_v34  ;;  %v7807_v41 = vpop.permute.xlu0 %7806  ;;  %v8250_v52 = vld [vmem:[#allocation3 + $0x411] sm:$0xff] }
 0x757   :  { %v5552_v9 = vsel %vm5495_vm1, %v5487_v16, %v7788_v33  ;;  %v7798_v30 = vunpack.i.l.bf16 %v7797_v34  ;;  %v7158_v26 = vunpack.i.l.bf16 %v17154_v49  ;;  %v7269_v0 = vunpack.i.h.bf16 %v17152_v21  ;;  %v7802_v19 = vpop.permute.xlu1 %7801  ;;  %v17159_v42 = vld [vmem:[#allocation122_spill] sm:$0xff]  ;;  %v8251_v16 = vld [vmem:[#allocation3 + $0x3e7] sm:$0xff] }
 0x758   :  { %v5572_v11 = vsel %vm5560_vm2, %v5507_v46, %v7793_v29  ;;  %v5617_v50 = vsel %vm5560_vm2, %v5552_v9, %v7794_v53  ;;  %v6849_v63 = vunpack.i.h.bf16 %v17155_v1  ;;  %v5358_v44 = vsel %vm3380_vm12, %v8248_v27, %v6949_v38  ;;  %v8252_v9 = vld [vmem:[#allocation3 + $0x10f] sm:$0xff] }
 0x759   :  { %v7318_v48 = vunpack.i.l.bf16 %v17156_v17  ;;  %v7789_v22 = vunpack.i.h.bf16 %v14766_v40  ;;  %v5378_v39 = vsel %vm5365_vm15, %v5313_v12, %v6998_v57  ;;  %v5423_v3 = vsel %vm5365_vm15, %v5358_v44, %v7109_v45 }
 0x75a   :  { %v7804_v61 = vunpack.i.h.bf16 %v7802_v19  ;;  %v7803_v51 = vunpack.i.l.bf16 %v7802_v19  ;;  %v7809_v56 = vunpack.i.h.bf16 %v7807_v41  ;;  %v7808_v2 = vunpack.i.l.bf16 %v7807_v41  ;;  %v7817_v10 = vpop.permute.xlu0 %7816 }
 0x75b   :  { %v5637_v23 = vsel %vm5625_vm3, %v5572_v11, %v7798_v30  ;;  %v5682_v5 = vsel %vm5625_vm3, %v5617_v50, %v7799_v13  ;;  %v5443_v28 = vsel %vm5430_vm0, %v5378_v39, %v7158_v26  ;;  %v5488_v15 = vsel %vm5430_vm0, %v5423_v3, %v7269_v0  ;;  %v7812_v35 = vpop.permute.xlu1 %7811  ;;  %v17160_v30 = vld [vmem:[#allocation208_spill] sm:$0xff] }
 0x75c   :  { %v5702_v54 = vsel %vm5690_vm4, %v5637_v23, %v7803_v51  ;;  %v5747_v40 = vsel %vm5690_vm4, %v5682_v5, %v7804_v61  ;;  %v6953_v12 = vunpack.i.l.bf16 %v17157_v20  ;;  %v7113_v21 = vunpack.i.l.bf16 %v17158_v7  ;;  %v17162_v3 = vld [vmem:[#allocation324_spill] sm:$0xff] }
 0x75d   :  { %v5508_v18 = vsel %vm5495_vm1, %v5443_v28, %v7318_v48  ;;  %v5553_v55 = vsel %vm5495_vm1, %v5488_v15, %v7789_v22  ;;  %6032 = vmatmul.mubr.f32.gmra.mxu0 %v5702_v54  ;;  %6257 = vmatmul.mubr.f32.gmra.mxu1 %v5747_v40  ;;  %v7819_v33 = vunpack.i.h.bf16 %v7817_v10  ;;  %v7818_v43 = vunpack.i.l.bf16 %v7817_v10  ;;  %v8254_v48 = vld [vmem:[#allocation3 + $0x429] sm:$0xff]  ;;  %v17164_v10 = vld [vmem:[#allocation303_spill] sm:$0xff] }
 0x75e   :  { %v7814_v14 = vunpack.i.h.bf16 %v7812_v35  ;;  %v7813_v38 = vunpack.i.l.bf16 %v7812_v35  ;;  %6520 = vmatprep.mubr.msk.f32.mxu0 %vm3380_vm12, %v8249_v4  ;;  %6565 = vmatprep.mubr.msk.f32.mxu1 %vm3380_vm12, %v8250_v52  ;;  %v6999_v60 = vunpack.i.h.bf16 %v17153_v24  ;;  %v7273_v31 = vunpack.i.l.bf16 %v17159_v42  ;;  %v7827_v24 = vpop.permute.xlu0 %7826  ;;  %v17161_v22 = vld [vmem:[#allocation104_spill] sm:$0xff]  ;;  %v17163_v40 = vld [vmem:[#allocation129_spill] sm:$0xff] }
 0x75f   :  { %v5573_v57 = vsel %vm5560_vm2, %v5508_v18, %v7808_v2  ;;  %v5618_v45 = vsel %vm5560_vm2, %v5553_v55, %v7809_v56  ;;  %v6848_v62 = vunpack.i.l.bf16 %v17155_v1  ;;  %v7159_v34 = vunpack.i.h.bf16 %v17154_v49  ;;  %v7822_v47 = vpop.permute.xlu1 %7821  ;;  %v17165_v1 = vld [vmem:[#allocation41_spill] sm:$0xff] }
 0x760   :  { %v5638_v59 = vsel %vm5625_vm3, %v5573_v57, %v7813_v38  ;;  %v5683_v32 = vsel %vm5625_vm3, %v5618_v45, %v7814_v14  ;;  %v5359_v53 = vsel %vm3380_vm12, %v8251_v16, %v6953_v12  ;;  %v7319_v29 = vunpack.i.h.bf16 %v17156_v17  ;;  %v8253_v17 = vld [vmem:[#allocation3 + $0x111] sm:$0xff] }
 0x761   :  { %v5703_v8 = vsel %vm5690_vm4, %v5638_v59, %v7818_v43  ;;  %v5748_v46 = vsel %vm5690_vm4, %v5683_v32, %v7819_v33  ;;  %v14824_v13 = vsel %vm3380_vm12, %v8252_v9, %v6849_v63  ;;  %v6853_v49 = vunpack.i.l.bf16 %v17160_v30 }
 0x762   :  { %v5424_v26 = vsel %vm5365_vm15, %v5359_v53, %v7113_v21  ;;  %v7823_v0 = vunpack.i.l.bf16 %v7822_v47  ;;  %6037 = vmatmul.mubr.f32.gmra.mxu0 %v5703_v8  ;;  %6262 = vmatmul.mubr.f32.gmra.mxu1 %v5748_v46  ;;  %v5379_v11 = vsel %vm5365_vm15, %v14715_v37, %v6999_v60  ;;  %v7829_v27 = vunpack.i.h.bf16 %v7827_v24  ;;  %v7837_v2 = vpop.permute.xlu0 %7836  ;;  %v8256_v53 = vld [vmem:[#allocation3 + $0x129] sm:$0xff] }
 0x763   :  { %v5489_v50 = vsel %vm5430_vm0, %v5424_v26, %v7273_v31  ;;  %v7828_v44 = vunpack.i.l.bf16 %v7827_v24  ;;  %6521 = vmatprep.mubr.msk.f32.mxu0 %vm3380_vm12, %v8253_v17  ;;  %6566 = vmatprep.mubr.msk.f32.mxu1 %vm3380_vm12, %v8254_v48  ;;  %v6954_v63 = vunpack.i.h.bf16 %v17157_v20  ;;  %v7003_v41 = vunpack.i.l.bf16 %v17161_v22  ;;  %v7832_v23 = vpop.permute.xlu1 %7831  ;;  %v8258_v24 = vld [vmem:[#allocation3 + $0x107] sm:$0xff] }
 0x764   :  { %v5444_v19 = vsel %vm5430_vm0, %v5379_v11, %v7159_v34  ;;  %v5554_v39 = vsel %vm5495_vm1, %v5489_v50, %v7823_v0  ;;  %v7114_v37 = vunpack.i.h.bf16 %v17158_v7  ;;  %v7163_v61 = vunpack.i.l.bf16 %v17162_v3  ;;  %v8255_v7 = vld [vmem:[#allocation3 + $0x3ef] sm:$0xff]  ;;  %v8259_v26 = vld [vmem:[#allocation3 + $0x127] sm:$0xff] }
 0x765   :  { %v7274_v51 = vunpack.i.h.bf16 %v17159_v42  ;;  %v5509_v56 = vsel %vm5495_vm1, %v5444_v19, %v7319_v29  ;;  %v7839_v5 = vunpack.i.h.bf16 %v7837_v2  ;;  %v7838_v28 = vunpack.i.l.bf16 %v7837_v2  ;;  %v8257_v29 = vld [vmem:[#allocation3 + $0x431] sm:$0xff] }
 0x766   :  { %v7834_v15 = vunpack.i.h.bf16 %v7832_v23  ;;  %v7833_v54 = vunpack.i.l.bf16 %v7832_v23  ;;  %v7323_v20 = vunpack.i.l.bf16 %v17163_v40  ;;  %v7824_v12 = vunpack.i.h.bf16 %v7822_v47  ;;  %v8260_v11 = vld [vmem:[#allocation3 + $0x40f] sm:$0xff] }
 0x767   :  { %v5574_v21 = vsel %vm5560_vm2, %v5509_v56, %v7828_v44  ;;  %v5619_v18 = vsel %vm5560_vm2, %v5554_v39, %v7829_v27  ;;  %v5360_v55 = vsel %vm3380_vm12, %v8255_v7, %v6954_v63  ;;  %v6959_v35 = vunpack.i.h.bf16 %v17164_v10  ;;  %v7847_v4 = vpop.permute.xlu0 %7846  ;;  %v7842_v52 = vpop.permute.xlu1 %7841  ;;  %v17166_v63 = vld [vmem:[#allocation46_spill] sm:$0xff] }
 0x768   :  { %v5639_v33 = vsel %vm5625_vm3, %v5574_v21, %v7833_v54  ;;  %v5684_v43 = vsel %vm5625_vm3, %v5619_v18, %v7834_v15  ;;  %v5380_v14 = vsel %vm5365_vm15, %v14762_v58, %v7003_v41  ;;  %v5425_v38 = vsel %vm5365_vm15, %v5360_v55, %v7114_v37  ;;  %v17167_v56 = vld [vmem:[#allocation98_spill] sm:$0xff] }
 0x769   :  { %v5704_v60 = vsel %vm5690_vm4, %v5639_v33, %v7838_v28  ;;  %v5749_v42 = vsel %vm5690_vm4, %v5684_v43, %v7839_v5  ;;  %v5445_v31 = vsel %vm5430_vm0, %v5380_v14, %v7163_v61  ;;  %v5490_v57 = vsel %vm5430_vm0, %v5425_v38, %v7274_v51  ;;  %v17168_v28 = vld [vmem:[#allocation202_spill] sm:$0xff]  ;;  %v17169_v38 = vld [vmem:[#allocation240_spill] sm:$0xff] }
 0x76a   :  { %v7844_v45 = vunpack.i.h.bf16 %v7842_v52  ;;  %v7843_v34 = vunpack.i.l.bf16 %v7842_v52  ;;  %6042 = vmatmul.mubr.f32.gmra.mxu0 %v5704_v60  ;;  %6267 = vmatmul.mubr.f32.gmra.mxu1 %v5749_v42  ;;  %v5510_v59 = vsel %vm5495_vm1, %v5445_v31, %v7323_v20  ;;  %v5555_v58 = vsel %vm5495_vm1, %v5490_v57, %v7824_v12  ;;  %v8264_v31 = vld [vmem:[#allocation3 + $0x42f] sm:$0xff] }
 0x76b   :  { %v7849_v32 = vunpack.i.h.bf16 %v7847_v4  ;;  %v7848_v16 = vunpack.i.l.bf16 %v7847_v4  ;;  %6522 = vmatprep.mubr.msk.f32.mxu0 %vm3380_vm12, %v8256_v53  ;;  %6567 = vmatprep.mubr.msk.f32.mxu1 %vm3380_vm12, %v8257_v29  ;;  %v5317_v47 = vsel %vm3380_vm12, %v8258_v24, %v6848_v62  ;;  %v6958_v8 = vunpack.i.l.bf16 %v17164_v10  ;;  %v14873_v62 = vpop.permute.xlu0 %7856  ;;  %v7852_v17 = vpop.permute.xlu1 %7851  ;;  %v8262_v10 = vld [vmem:[#allocation3 + $0x131] sm:$0xff] }
 0x76c   :  { %v5575_v46 = vsel %vm5560_vm2, %v5510_v59, %v7843_v34  ;;  %v5620_v9 = vsel %vm5560_vm2, %v5555_v58, %v7844_v45  ;;  %v14868_v0 = vsel %vm3380_vm12, %v8259_v26, %v6853_v49  ;;  %v5362_v50 = vsel %vm3380_vm12, %v8260_v11, %v6959_v35  ;;  %v17170_v34 = vld [vmem:[#allocation125_spill] sm:$0xff] }
 0x76d   :  { %v7004_v27 = vunpack.i.h.bf16 %v17161_v22  ;;  %v7118_v44 = vunpack.i.l.bf16 %v17165_v1  ;;  %v7164_v48 = vunpack.i.h.bf16 %v17162_v3  ;;  %v7278_v41 = vunpack.i.l.bf16 %v17166_v63  ;;  %v8261_v22 = vld [vmem:[#allocation3 + $0x407] sm:$0xff] }
 0x76e   :  { %v7854_v19 = vunpack.i.h.bf16 %v7852_v17  ;;  %v7853_v39 = vunpack.i.l.bf16 %v7852_v17  ;;  %v7324_v30 = vunpack.i.h.bf16 %v17163_v40  ;;  %v7858_v49 = vunpack.i.l.bf16 %v14873_v62  ;;  %v17171_v17 = vld [vmem:[#allocation42_spill] sm:$0xff] }
 0x76f   :  { %v5640_v37 = vsel %vm5625_vm3, %v5575_v46, %v7848_v16  ;;  %v5685_v61 = vsel %vm5625_vm3, %v5620_v9, %v7849_v32  ;;  %v5361_v51 = vsel %vm3380_vm12, %v8261_v22, %v6958_v8  ;;  %v6964_v2 = vunpack.i.h.bf16 %v17167_v56  ;;  %v8265_v22 = vld [vmem:[#allocation3 + $0x149] sm:$0xff] }
 0x770   :  { %v5705_v23 = vsel %vm5690_vm4, %v5640_v37, %v7853_v39  ;;  %v5750_v3 = vsel %vm5690_vm4, %v5685_v61, %v7854_v19  ;;  %v5381_v5 = vsel %vm5365_vm15, %v14759_v36, %v7004_v27  ;;  %v7008_v15 = vunpack.i.l.bf16 %v17168_v28  ;;  %v7867_v20 = vpop.permute.xlu0 %7866  ;;  %v7862_v12 = vpop.permute.xlu1 %7861  ;;  %v8263_v36 = vld [vmem:[#allocation3 + $0x449] sm:$0xff] }
 0x771   :  { %v7119_v54 = vunpack.i.h.bf16 %v17165_v1  ;;  %v5426_v40 = vsel %vm5365_vm15, %v5361_v51, %v7118_v44  ;;  %6047 = vmatmul.mubr.f32.gmra.mxu0 %v5705_v23  ;;  %6272 = vmatmul.mubr.f32.gmra.mxu1 %v5750_v3  ;;  %v5446_v21 = vsel %vm5430_vm0, %v5381_v5, %v7164_v48  ;;  %v7864_v7 = vunpack.i.h.bf16 %v7862_v12  ;;  %v6073_v51 = vpop.f32.mrf.mxu1 }
 0x772   :  { %v5491_v18 = vsel %vm5430_vm0, %v5426_v40, %v7278_v41  ;;  %v7863_v55 = vunpack.i.l.bf16 %v7862_v12  ;;  %6523 = vmatprep.mubr.msk.f32.mxu0 %vm3380_vm12, %v8262_v10  ;;  %6568 = vmatprep.mubr.msk.f32.mxu1 %vm3380_vm12, %v8263_v36  ;;  %v5511_v35 = vsel %vm5495_vm1, %v5446_v21, %v7324_v30  ;;  %v7869_v43 = vunpack.i.h.bf16 %v7867_v20 }
 0x773   :  { %v5556_v33 = vsel %vm5495_vm1, %v5491_v18, %v7858_v49  ;;  %v7868_v14 = vunpack.i.l.bf16 %v7867_v20  ;;  %v7168_v4 = vunpack.i.l.bf16 %v17169_v38  ;;  %v7279_v52 = vunpack.i.h.bf16 %v17166_v63  ;;  %v6075_v20 = vpop.f32.mrf.mxu1  ;;  %v3747_v18 = vld [vmem:[#allocation3 + $0x469] sm:$0xff] }
 0x774   :  { %v5576_v60 = vsel %vm5560_vm2, %v5511_v35, %v7863_v55  ;;  %v5621_v42 = vsel %vm5560_vm2, %v5556_v33, %v7864_v7  ;;  %v14901_v57 = vsel %vm3380_vm12, %v8264_v31, %v6964_v2  ;;  %v6963_v45 = vunpack.i.l.bf16 %v17167_v56  ;;  %v7877_v32 = vpop.permute.xlu0 %7876  ;;  %v7872_v16 = vpop.permute.xlu1 %7871  ;;  %v8266_v56 = vld [vmem:[#allocation3 + $0x451] sm:$0xff]  ;;  %v17172_v2 = vld [vmem:[#allocation123_spill] sm:$0xff] }
 0x775   :  { %v7328_v59 = vunpack.i.l.bf16 %v17170_v34  ;;  %v7859_v58 = vunpack.i.h.bf16 %v14873_v62  ;;  %v5382_v53 = vsel %vm5365_vm15, %v5317_v47, %v7008_v15  ;;  %v5427_v29 = vsel %vm5365_vm15, %v5362_v50, %v7119_v54  ;;  %v14917_v47 = vld [vmem:[%s15106_s4] ss:$0 sm:$0xff]  ;;  %v8267_v15 = vld [vmem:[#allocation3 + $0x427] sm:$0xff]  ;;  %s8308_s4 = smov [#allocation4]  }
 0x776   :  { %v7874_v24 = vunpack.i.h.bf16 %v7872_v16  ;;  %v7873_v8 = vunpack.i.l.bf16 %v7872_v16  ;;  %v7879_v46 = vunpack.i.h.bf16 %v7877_v32  ;;  %v7878_v9 = vunpack.i.l.bf16 %v7877_v32  ;;  %s6430_s7 = sshll.u32 %s8308_s4, 4  ;;  %s6431_s7 = int_to_ptr.vmem [resolvable:$true] %s6430_s7 }
 0x777   :  { %v5641_v26 = vsel %vm5625_vm3, %v5576_v60, %v7868_v14  ;;  %v5686_v11 = vsel %vm5625_vm3, %v5621_v42, %v7869_v43  ;;  %v5447_v27 = vsel %vm5430_vm0, %v5382_v53, %v7168_v4  ;;  %v5492_v1 = vsel %vm5430_vm0, %v5427_v29, %v7279_v52  ;;  %v6078_v52 = vpop.f32.mrf.mxu1  ;;  %v17173_v29 = vld [vmem:[#allocation226_spill] sm:$0xff]  ;;  %s8270_s8 = scalar_lea.vmem %s6431_s7, 8192  ;;  %p8275_p1 = scmp.lt.s32.totalorder %s6431_s7, %s6431_s7 }
 0x778   :  { %v5706_v44 = vsel %vm5690_vm4, %v5641_v26, %v7873_v8  ;;  %v5751_v62 = vsel %vm5690_vm4, %v5686_v11, %v7874_v24  ;;  %v7009_v50 = vunpack.i.h.bf16 %v17168_v28  ;;  %v7123_v48 = vunpack.i.l.bf16 %v17171_v17  ;;  %v7887_v19 = vpop.permute.xlu0 %7886  ;;  %p8271_p0 = scmp.ne.s32.totalorder %s6431_s7, %s8270_s8  ;;  %p8276_p2 = scmp.lt.s32.totalorder %s8270_s8, %s8270_s8 }
 0x779   :  { %v5512_v63 = vsel %vm5495_vm1, %v5447_v27, %v7328_v59  ;;  %v5557_v41 = vsel %vm5495_vm1, %v5492_v1, %v7859_v58  ;;  %v7882_v39 = vpop.permute.xlu1 %7881  ;;  %6052 = vmatmul.mubr.f32.gmra.mxu0 %v5706_v44  ;;  %6277 = vmatmul.mubr.f32.gmra.mxu1 %v5751_v62  ;;  %v7889_v30 = vunpack.i.h.bf16 %v7887_v19  ;;  %v7888_v49 = vunpack.i.l.bf16 %v7887_v19  ;;  %v6080_v32 = vpop.f32.mrf.mxu1 }
 0x77a   :  { %v7884_v37 = vunpack.i.h.bf16 %v7882_v39  ;;  %v7883_v61 = vunpack.i.l.bf16 %v7882_v39  ;;  %6524 = vmatprep.mubr.msk.f32.mxu0 %vm3380_vm12, %v8265_v22  ;;  %6569 = vmatprep.mubr.msk.f32.mxu1 %vm3380_vm12, %v8266_v56  ;;  %v7283_v23 = vunpack.i.l.bf16 %v17172_v2  ;;  %v6074_v3 = vadd.f32 %v14917_v47, %v6073_v51  ;;  %p8277_p3 = por %p8276_p2, %p8275_p1 }
 0x77b   :  { %v5577_v5 = vsel %vm5560_vm2, %v5512_v63, %v7878_v9  ;;  %v5622_v28 = vsel %vm5560_vm2, %v5557_v41, %v7879_v46  ;;  %v5363_v54 = vsel %vm3380_vm12, %v8267_v15, %v6963_v45  ;;  %v7169_v40 = vunpack.i.h.bf16 %v17169_v38  ;;  %v6083_v44 = vpop.f32.mrf.mxu1 }
 0x77c   :  { %v5642_v12 = vsel %vm5625_vm3, %v5577_v5, %v7883_v61  ;;  %v5687_v21 = vsel %vm5625_vm3, %v5622_v28, %v7884_v37  ;;  %v7329_v7 = vunpack.i.h.bf16 %v17170_v34  ;;  %v6316_v55 = vmax.f32 %v6074_v3, 0.0  ;;  %v8268_v34 = vld [vmem:[#allocation3 + $0x151] sm:$0xff]  ;;  %p8278_p4 = pnand %p8277_p3, %p8271_p0 }
 0x77d   :  { %v7897_v10 = vpop.permute.xlu0 %7896  ;;  %v7892_v36 = vpop.permute.xlu1 %7891  ;;  %v5707_v35 = vsel %vm5690_vm4, %v5642_v12, %v7888_v49  ;;  %v5752_v33 = vsel %vm5690_vm4, %v5687_v21, %v7889_v30  ;;  %v5383_v43 = vsel %vm5365_vm15, %v14824_v13, %v7009_v50  ;;  %v7013_v14 = vunpack.i.l.bf16 %v16947_v6  ;;  %v3748_v30 = vld [vmem:[#allocation3 + $0x471] sm:$0xff] }
 0x77e   :  { %v5428_v38 = vsel %vm5365_vm15, %v5363_v54, %v7123_v48  ;;  %v7893_v4 = vunpack.i.l.bf16 %v7892_v36  ;;  %6057 = vmatmul.mubr.f32.gmra.mxu0 %v5707_v35  ;;  %6282 = vmatmul.mubr.f32.gmra.mxu1 %v5752_v33  ;;  %6380 = vst.msk [vmem:[#allocation4 + $0x98] sm:$0xff] %vm5365_vm15, %v6316_v55  ;;  %v7899_v42 = vunpack.i.h.bf16 %v7897_v10  ;;  %v7898_v31 = vunpack.i.l.bf16 %v7897_v10  ;;  %v6085_v41 = vpop.f32.mrf.mxu1 }
 0x77f   :  { %v5493_v60 = vsel %vm5430_vm0, %v5428_v38, %v7283_v23  ;;  %v6079_v45 = vadd.f32 %v14917_v47, %v6078_v52  ;;  %6525 = vmatprep.mubr.msk.f32.mxu0 %vm3380_vm12, %v8268_v34  ;;  %6570 = vmatprep.mubr.msk.f32.mxu1 %vm3380_vm12, %v3747_v18  ;;  %v7124_v6 = vunpack.i.h.bf16 %v17171_v17  ;;  %v5448_v13 = vsel %vm5430_vm0, %v5383_v43, %v7169_v40  ;;  %v8269_v40 = vld [vmem:[#allocation3 + $0x169] sm:$0xff] }
 0x780   :  { %v7173_v59 = vunpack.i.l.bf16 %v13204_v25  ;;  %v5558_v58 = vsel %vm5495_vm1, %v5493_v60, %v7893_v4  ;;  %v7284_v16 = vunpack.i.h.bf16 %v17172_v2  ;;  %v5513_v53 = vsel %vm5495_vm1, %v5448_v13, %v7329_v7  ;;  %v6088_v3 = vpop.f32.mrf.mxu1 }
 0x781   :  { %v7333_v24 = vunpack.i.l.bf16 %v17173_v29  ;;  %v6317_v8 = vmax.f32 %v6079_v45, 0.0  ;;  %v7907_v46 = vpop.permute.xlu0 %7906  ;;  %v7894_v62 = vunpack.i.h.bf16 %v7892_v36  ;;  %v6084_v25 = vadd.f32 %v14917_v47, %v6083_v44 }
 0x782   :  { %v7902_v9 = vpop.permute.xlu1 %7901  ;;  %v7909_v26 = vunpack.i.h.bf16 %v7907_v46  ;;  %v7908_v11 = vunpack.i.l.bf16 %v7907_v46  ;;  %v5578_v50 = vsel %vm5560_vm2, %v5513_v53, %v7898_v31  ;;  %v5623_v17 = vsel %vm5560_vm2, %v5558_v58, %v7899_v42  ;;  %v6090_v20 = vpop.f32.mrf.mxu1 }
 0x783   :  { %v7904_v27 = vunpack.i.h.bf16 %v7902_v9  ;;  %v7903_v1 = vunpack.i.l.bf16 %v7902_v9  ;;  %6381 = vst.msk [vmem:[#allocation4 + $0xa0] sm:$0xff] %vm5365_vm15, %v6317_v8  ;;  %v5384_v48 = vsel %vm5365_vm15, %v14868_v0, %v7013_v14  ;;  %v5429_v63 = vsel %vm5365_vm15, %v14901_v57, %v7124_v6 }
 0x784   :  { %v5449_v49 = vsel %vm5430_vm0, %v5384_v48, %v7173_v59  ;;  %v6318_v37 = vmax.f32 %v6084_v25, 0.0  ;;  %v5494_v0 = vsel %vm5430_vm0, %v5429_v63, %v7284_v16  ;;  %v6089_v54 = vadd.f32 %v14917_v47, %v6088_v3  ;;  %v6093_v36 = vpop.f32.mrf.mxu1 }
 0x785   :  { %v5643_v19 = vsel %vm5625_vm3, %v5578_v50, %v7903_v1  ;;  %v5688_v39 = vsel %vm5625_vm3, %v5623_v17, %v7904_v27  ;;  %v5514_v2 = vsel %vm5495_vm1, %v5449_v49, %v7333_v24  ;;  %v5559_v5 = vsel %vm5495_vm1, %v5494_v0, %v7894_v62 }
 0x786   :  { %v7917_v61 = vpop.permute.xlu0 %7916  ;;  %v7912_v22 = vpop.permute.xlu1 %7911  ;;  %v5708_v51 = vsel %vm5690_vm4, %v5643_v19, %v7908_v11  ;;  %v5753_v56 = vsel %vm5690_vm4, %v5688_v39, %v7909_v26  ;;  %6382 = vst.msk [vmem:[#allocation4 + $0xa8] sm:$0xff] %vm5365_vm15, %v6318_v37  ;;  %v6319_v18 = vmax.f32 %v6089_v54, 0.0  ;;  %v6094_v35 = vadd.f32 %v14917_v47, %v6093_v36 }
 0x787   :  { %v7914_v57 = vunpack.i.h.bf16 %v7912_v22  ;;  %v7913_v23 = vunpack.i.l.bf16 %v7912_v22  ;;  %6062 = vmatmul.mubr.f32.gmra.mxu0 %v5708_v51  ;;  %6287 = vmatmul.mubr.f32.gmra.mxu1 %v5753_v56  ;;  %v7919_v28 = vunpack.i.h.bf16 %v7917_v61  ;;  %v7918_v15 = vunpack.i.l.bf16 %v7917_v61  ;;  %v6095_v14 = vpop.f32.mrf.mxu1 }
 0x788   :  { %6526 = vmatprep.mubr.msk.f32.mxu0 %vm3380_vm12, %v8269_v40  ;;  %6571 = vmatprep.mubr.msk.f32.mxu1 %vm3380_vm12, %v3748_v30  ;;  %6383 = vst.msk [vmem:[#allocation4 + $0xb0] sm:$0xff] %vm5365_vm15, %v6319_v18  ;;  %v6320_v52 = vmax.f32 %v6094_v35, 0.0 }
 0x789   :  { %v5579_v12 = vsel %vm5560_vm2, %v5514_v2, %v7913_v23  ;;  %v5624_v21 = vsel %vm5560_vm2, %v5559_v5, %v7914_v57  ;;  %v6098_v60 = vpop.f32.mrf.mxu1 }
 0x78a   :  { %v7922_v7 = vpop.permute.xlu1 %7921  ;;  %v5644_v33 = vsel %vm5625_vm3, %v5579_v12, %v7918_v15  ;;  %v5689_v43 = vsel %vm5625_vm3, %v5624_v21, %v7919_v28  ;;  %6384 = vst.msk [vmem:[#allocation4 + $0xb8] sm:$0xff] %vm5365_vm15, %v6320_v52  ;;  %v6099_v42 = vadd.f32 %v14917_v47, %v6098_v60 }
 0x78b   :  { %v7924_v55 = vunpack.i.h.bf16 %v7922_v7  ;;  %v7923_v10 = vunpack.i.l.bf16 %v7922_v7  ;;  %v6100_v31 = vpop.f32.mrf.mxu1 }
 0x78c   :  { %v6321_v45 = vmax.f32 %v6099_v42, 0.0 }
 0x78d   :  { %v5709_v38 = vsel %vm5690_vm4, %v5644_v33, %v7923_v10  ;;  %v5754_v4 = vsel %vm5690_vm4, %v5689_v43, %v7924_v55  ;;  %v6103_v34 = vpop.f32.mrf.mxu1 }
 0x78e   :  { %6067 = vmatmul.mubr.f32.gmra.mxu0 %v5709_v38  ;;  %6292 = vmatmul.mubr.f32.gmra.mxu1 %v5754_v4  ;;  %6385 = vst.msk [vmem:[#allocation4 + $0xc0] sm:$0xff] %vm5365_vm15, %v6321_v45  ;;  %v6104_v6 = vadd.f32 %v14917_v47, %v6103_v34 }
 0x78f   :  { %v6105_v13 = vpop.f32.mrf.mxu1 }
 0x790   :  { %v6322_v59 = vmax.f32 %v6104_v6, 0.0 }
 0x791   :  { %v6108_v58 = vpop.f32.mrf.mxu1 }
 0x792   :  { %6386 = vst.msk [vmem:[#allocation4 + $0xc8] sm:$0xff] %vm5365_vm15, %v6322_v59  ;;  %v6109_v32 = vadd.f32 %v14917_v47, %v6108_v58 }
 0x793   :  { %v6110_v16 = vpop.f32.mrf.mxu1 }
 0x794   :  { %v6323_v53 = vmax.f32 %v6109_v32, 0.0 }
 0x795   :  { %v6113_v29 = vpop.f32.mrf.mxu1 }
 0x796   :  { %6387 = vst.msk [vmem:[#allocation4 + $0xd0] sm:$0xff] %vm5365_vm15, %v6323_v53  ;;  %v6114_v24 = vadd.f32 %v14917_v47, %v6113_v29 }
 0x797   :  { %v6115_v8 = vpop.f32.mrf.mxu1 }
 0x798   :  { %v6324_v46 = vmax.f32 %v6114_v24, 0.0 }
 0x799   :  { %v6118_v9 = vpop.f32.mrf.mxu1 }
 0x79a   :  { %6388 = vst.msk [vmem:[#allocation4 + $0xd8] sm:$0xff] %vm5365_vm15, %v6324_v46  ;;  %v6119_v26 = vadd.f32 %v14917_v47, %v6118_v9 }
 0x79b   :  { %v6120_v11 = vpop.f32.mrf.mxu1 }
 0x79c   :  { %v6325_v27 = vmax.f32 %v6119_v26, 0.0 }
 0x79d   :  { %v6123_v1 = vpop.f32.mrf.mxu1 }
 0x79e   :  { %6389 = vst.msk [vmem:[#allocation4 + $0xe0] sm:$0xff] %vm5365_vm15, %v6325_v27  ;;  %v6124_v44 = vadd.f32 %v14917_v47, %v6123_v1 }
 0x79f   :  { %v6125_v62 = vpop.f32.mrf.mxu1 }
 0x7a0   :  { %v6326_v25 = vmax.f32 %v6124_v44, 0.0 }
 0x7a1   :  { %v6128_v50 = vpop.f32.mrf.mxu1 }
 0x7a2   :  { %6390 = vst.msk [vmem:[#allocation4 + $0xe8] sm:$0xff] %vm5365_vm15, %v6326_v25  ;;  %v6129_v17 = vadd.f32 %v14917_v47, %v6128_v50 }
 0x7a3   :  { %v6130_v48 = vpop.f32.mrf.mxu1 }
 0x7a4   :  { %v6327_v63 = vmax.f32 %v6129_v17, 0.0 }
 0x7a5   :  { %v6133_v41 = vpop.f32.mrf.mxu1 }
 0x7a6   :  { %6391 = vst.msk [vmem:[#allocation4 + $0xf0] sm:$0xff] %vm5365_vm15, %v6327_v63  ;;  %v6134_v19 = vadd.f32 %v14917_v47, %v6133_v41 }
 0x7a7   :  { %v6135_v39 = vpop.f32.mrf.mxu1 }
 0x7a8   :  { %v6328_v30 = vmax.f32 %v6134_v19, 0.0 }
 0x7aa   :  { %v6138_v49 = vpop.f32.mrf.mxu1  ;;  %6392 = vst.msk [vmem:[#allocation4 + $0xf8] sm:$0xff] %vm5365_vm15, %v6328_v30 }
 0x7ab   :  { %v6139_v37 = vadd.f32 %v14917_v47, %v6138_v49 }
 0x7ac   :  { %v6140_v61 = vpop.f32.mrf.mxu1 }
 0x7ad   :  { %v6329_v22 = vmax.f32 %v6139_v37, 0.0 }
 0x7ae   :  { %v6143_v51 = vpop.f32.mrf.mxu1 }
 0x7af   :  { %6393 = vst.msk [vmem:[#allocation4 + $0x100] sm:$0xff] %vm5365_vm15, %v6329_v22  ;;  %v6144_v56 = vadd.f32 %v14917_v47, %v6143_v51 }
 0x7b0   :  { %v6145_v0 = vpop.f32.mrf.mxu1 }
 0x7b1   :  { %v6330_v2 = vmax.f32 %v6144_v56, 0.0 }
 0x7b2   :  { %v6148_v57 = vpop.f32.mrf.mxu1 }
 0x7b3   :  { %6394 = vst.msk [vmem:[#allocation4 + $0x108] sm:$0xff] %vm5365_vm15, %v6330_v2  ;;  %v6149_v23 = vadd.f32 %v14917_v47, %v6148_v57 }
 0x7b4   :  { %v6150_v3 = vpop.f32.mrf.mxu1 }
 0x7b5   :  { %v6331_v5 = vmax.f32 %v6149_v23, 0.0 }
 0x7b6   :  { %v6153_v28 = vpop.f32.mrf.mxu1 }
 0x7b7   :  { %6395 = vst.msk [vmem:[#allocation4 + $0x110] sm:$0xff] %vm5365_vm15, %v6331_v5  ;;  %v6154_v15 = vadd.f32 %v14917_v47, %v6153_v28 }
 0x7b8   :  { %v6155_v54 = vpop.f32.mrf.mxu1 }
 0x7b9   :  { %v6332_v40 = vmax.f32 %v6154_v15, 0.0 }
 0x7ba   :  { %v6158_v20 = vpop.f32.mrf.mxu1 }
 0x7bb   :  { %6396 = vst.msk [vmem:[#allocation4 + $0x118] sm:$0xff] %vm5365_vm15, %v6332_v40  ;;  %v6159_v12 = vadd.f32 %v14917_v47, %v6158_v20 }
 0x7bc   :  { %v6160_v21 = vpop.f32.mrf.mxu1 }
 0x7bd   :  { %v6333_v18 = vmax.f32 %v6159_v12, 0.0 }
 0x7bf   :  { %v6163_v7 = vpop.f32.mrf.mxu1  ;;  %6397 = vst.msk [vmem:[#allocation4 + $0x120] sm:$0xff] %vm5365_vm15, %v6333_v18 }
 0x7c0   :  { %v6164_v55 = vadd.f32 %v14917_v47, %v6163_v7 }
 0x7c1   :  { %v6165_v10 = vpop.f32.mrf.mxu1 }
 0x7c2   :  { %v6334_v36 = vmax.f32 %v6164_v55, 0.0 }
 0x7c3   :  { %v6168_v35 = vpop.f32.mrf.mxu1 }
 0x7c4   :  { %6398 = vst.msk [vmem:[#allocation4 + $0x128] sm:$0xff] %vm5365_vm15, %v6334_v36  ;;  %v6169_v33 = vadd.f32 %v14917_v47, %v6168_v35 }
 0x7c5   :  { %v6170_v43 = vpop.f32.mrf.mxu1 }
 0x7c6   :  { %v6335_v14 = vmax.f32 %v6169_v33, 0.0 }
 0x7c8   :  { %v6173_v38 = vpop.f32.mrf.mxu1  ;;  %6399 = vst.msk [vmem:[#allocation4 + $0x130] sm:$0xff] %vm5365_vm15, %v6335_v14 }
 0x7c9   :  { %v6174_v4 = vadd.f32 %v14917_v47, %v6173_v38 }
 0x7ca   :  { %v6175_v52 = vpop.f32.mrf.mxu1 }
 0x7cb   :  { %v6336_v60 = vmax.f32 %v6174_v4, 0.0 }
 0x7cc   :  { %v5978_v42 = vpop.f32.mrf.mxu0  ;;  %v6178_v31 = vpop.f32.mrf.mxu1 }
 0x7cd   :  { %6400 = vst.msk [vmem:[#allocation4 + $0x138] sm:$0xff] %vm5365_vm15, %v6336_v60  ;;  %v5979_v45 = vadd.f32 %v14917_v47, %v5978_v42  ;;  %v6179_v34 = vadd.f32 %v14917_v47, %v6178_v31 }
 0x7ce   :  { %v5980_v6 = vpop.f32.mrf.mxu0  ;;  %v6180_v13 = vpop.f32.mrf.mxu1 }
 0x7cf   :  { %v6297_v59 = vmax.f32 %v5979_v45, 0.0  ;;  %v6337_v58 = vmax.f32 %v6179_v34, 0.0 }
 0x7d1   :  { %v6183_v32 = vpop.f32.mrf.mxu1  ;;  %6361 = vst.msk [vmem:[#allocation4] sm:$0xff] %vm5365_vm15, %v6297_v59  ;;  %6401 = vst.msk [vmem:[#allocation4 + $0x140] sm:$0xff] %vm5365_vm15, %v6337_v58 }
 0x7d2   :  { %v6184_v16 = vadd.f32 %v14917_v47, %v6183_v32 }
 0x7d3   :  { %v6185_v53 = vpop.f32.mrf.mxu1 }
 0x7d4   :  { %v6338_v29 = vmax.f32 %v6184_v16, 0.0 }
 0x7d5   :  { %v5983_v24 = vpop.f32.mrf.mxu0  ;;  %v6188_v8 = vpop.f32.mrf.mxu1 }
 0x7d6   :  { %6402 = vst.msk [vmem:[#allocation4 + $0x148] sm:$0xff] %vm5365_vm15, %v6338_v29  ;;  %v5984_v46 = vadd.f32 %v14917_v47, %v5983_v24  ;;  %v6189_v9 = vadd.f32 %v14917_v47, %v6188_v8 }
 0x7d7   :  { %v5985_v26 = vpop.f32.mrf.mxu0  ;;  %v6190_v11 = vpop.f32.mrf.mxu1 }
 0x7d8   :  { %v6298_v27 = vmax.f32 %v5984_v46, 0.0  ;;  %v6339_v1 = vmax.f32 %v6189_v9, 0.0 }
 0x7da   :  { %v6193_v44 = vpop.f32.mrf.mxu1  ;;  %6362 = vst.msk [vmem:[#allocation4 + $0x8] sm:$0xff] %vm5365_vm15, %v6298_v27  ;;  %6403 = vst.msk [vmem:[#allocation4 + $0x150] sm:$0xff] %vm5365_vm15, %v6339_v1 }
 0x7db   :  { %v6194_v62 = vadd.f32 %v14917_v47, %v6193_v44 }
 0x7dc   :  { %v6195_v25 = vpop.f32.mrf.mxu1 }
 0x7dd   :  { %v6340_v50 = vmax.f32 %v6194_v62, 0.0  ;;  %v5988_v17 = vpop.f32.mrf.mxu0 }
 0x7de   :  { %v5989_v48 = vadd.f32 %v14917_v47, %v5988_v17  ;;  %v6198_v63 = vpop.f32.mrf.mxu1 }
 0x7df   :  { %6404 = vst.msk [vmem:[#allocation4 + $0x158] sm:$0xff] %vm5365_vm15, %v6340_v50  ;;  %v6199_v41 = vadd.f32 %v14917_v47, %v6198_v63  ;;  %v5990_v19 = vpop.f32.mrf.mxu0 }
 0x7e0   :  { %v6299_v39 = vmax.f32 %v5989_v48, 0.0  ;;  %v6200_v30 = vpop.f32.mrf.mxu1 }
 0x7e1   :  { %v6341_v49 = vmax.f32 %v6199_v41, 0.0 }
 0x7e2   :  { %6363 = vst.msk [vmem:[#allocation4 + $0x10] sm:$0xff] %vm5365_vm15, %v6299_v39  ;;  %v6203_v37 = vpop.f32.mrf.mxu1 }
 0x7e3   :  { %6405 = vst.msk [vmem:[#allocation4 + $0x160] sm:$0xff] %vm5365_vm15, %v6341_v49  ;;  %v6204_v61 = vadd.f32 %v14917_v47, %v6203_v37 }
 0x7e4   :  { %v6205_v22 = vpop.f32.mrf.mxu1 }
 0x7e5   :  { %v6342_v51 = vmax.f32 %v6204_v61, 0.0  ;;  %v5993_v56 = vpop.f32.mrf.mxu0 }
 0x7e6   :  { %v5994_v0 = vadd.f32 %v14917_v47, %v5993_v56  ;;  %v6208_v2 = vpop.f32.mrf.mxu1 }
 0x7e7   :  { %6406 = vst.msk [vmem:[#allocation4 + $0x168] sm:$0xff] %vm5365_vm15, %v6342_v51  ;;  %v6209_v57 = vadd.f32 %v14917_v47, %v6208_v2  ;;  %v5995_v23 = vpop.f32.mrf.mxu0 }
 0x7e8   :  { %v6300_v3 = vmax.f32 %v5994_v0, 0.0  ;;  %v6210_v5 = vpop.f32.mrf.mxu1 }
 0x7e9   :  { %v6343_v28 = vmax.f32 %v6209_v57, 0.0 }
 0x7ea   :  { %6364 = vst.msk [vmem:[#allocation4 + $0x18] sm:$0xff] %vm5365_vm15, %v6300_v3  ;;  %v5998_v15 = vpop.f32.mrf.mxu0  ;;  %v6213_v54 = vpop.f32.mrf.mxu1 }
 0x7eb   :  { %6407 = vst.msk [vmem:[#allocation4 + $0x170] sm:$0xff] %vm5365_vm15, %v6343_v28  ;;  %v5999_v40 = vadd.f32 %v14917_v47, %v5998_v15  ;;  %v6214_v20 = vadd.f32 %v14917_v47, %v6213_v54 }
 0x7ec   :  { %v6000_v12 = vpop.f32.mrf.mxu0  ;;  %v6215_v21 = vpop.f32.mrf.mxu1 }
 0x7ed   :  { %v6301_v18 = vmax.f32 %v5999_v40, 0.0  ;;  %v6344_v7 = vmax.f32 %v6214_v20, 0.0 }
 0x7ee   :  { %v6218_v55 = vpop.f32.mrf.mxu1 }
 0x7ef   :  { %6365 = vst.msk [vmem:[#allocation4 + $0x20] sm:$0xff] %vm5365_vm15, %v6301_v18  ;;  %6408 = vst.msk [vmem:[#allocation4 + $0x178] sm:$0xff] %vm5365_vm15, %v6344_v7  ;;  %v6219_v10 = vadd.f32 %v14917_v47, %v6218_v55 }
 0x7f0   :  { %v6220_v36 = vpop.f32.mrf.mxu1 }
 0x7f1   :  { %v6345_v35 = vmax.f32 %v6219_v10, 0.0 }
 0x7f2   :  { %v6003_v33 = vpop.f32.mrf.mxu0  ;;  %v6223_v43 = vpop.f32.mrf.mxu1 }
 0x7f3   :  { %6409 = vst.msk [vmem:[#allocation4 + $0x180] sm:$0xff] %vm5365_vm15, %v6345_v35  ;;  %v6004_v14 = vadd.f32 %v14917_v47, %v6003_v33  ;;  %v6224_v38 = vadd.f32 %v14917_v47, %v6223_v43 }
 0x7f4   :  { %v6005_v4 = vpop.f32.mrf.mxu0  ;;  %v6225_v52 = vpop.f32.mrf.mxu1 }
 0x7f5   :  { %v6302_v60 = vmax.f32 %v6004_v14, 0.0  ;;  %v6346_v42 = vmax.f32 %v6224_v38, 0.0 }
 0x7f6   :  { %v6228_v31 = vpop.f32.mrf.mxu1 }
 0x7f7   :  { %6366 = vst.msk [vmem:[#allocation4 + $0x28] sm:$0xff] %vm5365_vm15, %v6302_v60  ;;  %6410 = vst.msk [vmem:[#allocation4 + $0x188] sm:$0xff] %vm5365_vm15, %v6346_v42  ;;  %v6229_v45 = vadd.f32 %v14917_v47, %v6228_v31 }
 0x7f8   :  { %v6230_v34 = vpop.f32.mrf.mxu1 }
 0x7f9   :  { %v6347_v6 = vmax.f32 %v6229_v45, 0.0  ;;  %v6008_v13 = vpop.f32.mrf.mxu0 }
 0x7fa   :  { %v6009_v59 = vadd.f32 %v14917_v47, %v6008_v13  ;;  %v6233_v58 = vpop.f32.mrf.mxu1 }
 0x7fb   :  { %6411 = vst.msk [vmem:[#allocation4 + $0x190] sm:$0xff] %vm5365_vm15, %v6347_v6  ;;  %v6234_v32 = vadd.f32 %v14917_v47, %v6233_v58  ;;  %v6010_v16 = vpop.f32.mrf.mxu0 }
 0x7fc   :  { %v6303_v53 = vmax.f32 %v6009_v59, 0.0  ;;  %v6235_v29 = vpop.f32.mrf.mxu1 }
 0x7fd   :  { %v6348_v24 = vmax.f32 %v6234_v32, 0.0 }
 0x7fe   :  { %6367 = vst.msk [vmem:[#allocation4 + $0x30] sm:$0xff] %vm5365_vm15, %v6303_v53 }
 0x7ff   :  { %6412 = vst.msk [vmem:[#allocation4 + $0x198] sm:$0xff] %vm5365_vm15, %v6348_v24 }
 0x801   :  { %v6013_v8 = vpop.f32.mrf.mxu0  ;;  %v6238_v46 = vpop.f32.mrf.mxu1 }
 0x802   :  { %v6014_v9 = vadd.f32 %v14917_v47, %v6013_v8  ;;  %v6239_v26 = vadd.f32 %v14917_v47, %v6238_v46 }
 0x803   :  { %v6015_v11 = vpop.f32.mrf.mxu0  ;;  %v6240_v27 = vpop.f32.mrf.mxu1 }
 0x804   :  { %v6304_v1 = vmax.f32 %v6014_v9, 0.0  ;;  %v6349_v44 = vmax.f32 %v6239_v26, 0.0 }
 0x806   :  { %6368 = vst.msk [vmem:[#allocation4 + $0x38] sm:$0xff] %vm5365_vm15, %v6304_v1  ;;  %6413 = vst.msk [vmem:[#allocation4 + $0x1a0] sm:$0xff] %vm5365_vm15, %v6349_v44  ;;  %v6018_v62 = vpop.f32.mrf.mxu0  ;;  %v6243_v25 = vpop.f32.mrf.mxu1 }
 0x807   :  { %v6019_v50 = vadd.f32 %v14917_v47, %v6018_v62  ;;  %v6244_v17 = vadd.f32 %v14917_v47, %v6243_v25 }
 0x808   :  { %v6020_v48 = vpop.f32.mrf.mxu0  ;;  %v6245_v63 = vpop.f32.mrf.mxu1 }
 0x809   :  { %v6305_v41 = vmax.f32 %v6019_v50, 0.0  ;;  %v6350_v19 = vmax.f32 %v6244_v17, 0.0 }
 0x80b   :  { %6369 = vst.msk [vmem:[#allocation4 + $0x40] sm:$0xff] %vm5365_vm15, %v6305_v41  ;;  %6414 = vst.msk [vmem:[#allocation4 + $0x1a8] sm:$0xff] %vm5365_vm15, %v6350_v19 }
 0x80e   :  { %v6023_v39 = vpop.f32.mrf.mxu0  ;;  %v6248_v30 = vpop.f32.mrf.mxu1 }
 0x80f   :  { %v6024_v49 = vadd.f32 %v14917_v47, %v6023_v39  ;;  %v6249_v37 = vadd.f32 %v14917_v47, %v6248_v30 }
 0x810   :  { %v6025_v61 = vpop.f32.mrf.mxu0  ;;  %v6250_v22 = vpop.f32.mrf.mxu1 }
 0x811   :  { %v6306_v51 = vmax.f32 %v6024_v49, 0.0  ;;  %v6351_v56 = vmax.f32 %v6249_v37, 0.0 }
 0x813   :  { %6370 = vst.msk [vmem:[#allocation4 + $0x48] sm:$0xff] %vm5365_vm15, %v6306_v51  ;;  %6415 = vst.msk [vmem:[#allocation4 + $0x1b0] sm:$0xff] %vm5365_vm15, %v6351_v56 }
 0x815   :  { %v6028_v0 = vpop.f32.mrf.mxu0  ;;  %v6253_v2 = vpop.f32.mrf.mxu1 }
 0x816   :  { %v6029_v57 = vadd.f32 %v14917_v47, %v6028_v0  ;;  %v6254_v23 = vadd.f32 %v14917_v47, %v6253_v2 }
 0x817   :  { %v6030_v3 = vpop.f32.mrf.mxu0  ;;  %v6255_v5 = vpop.f32.mrf.mxu1 }
 0x818   :  { %v6307_v28 = vmax.f32 %v6029_v57, 0.0  ;;  %v6352_v15 = vmax.f32 %v6254_v23, 0.0 }
 0x81a   :  { %6371 = vst.msk [vmem:[#allocation4 + $0x50] sm:$0xff] %vm5365_vm15, %v6307_v28  ;;  %6416 = vst.msk [vmem:[#allocation4 + $0x1b8] sm:$0xff] %vm5365_vm15, %v6352_v15 }
 0x81d   :  { %v6033_v54 = vpop.f32.mrf.mxu0  ;;  %v6258_v40 = vpop.f32.mrf.mxu1 }
 0x81e   :  { %v6034_v20 = vadd.f32 %v14917_v47, %v6033_v54  ;;  %v6259_v12 = vadd.f32 %v14917_v47, %v6258_v40 }
 0x81f   :  { %v6035_v21 = vpop.f32.mrf.mxu0  ;;  %v6260_v18 = vpop.f32.mrf.mxu1 }
 0x820   :  { %v6308_v7 = vmax.f32 %v6034_v20, 0.0  ;;  %v6353_v55 = vmax.f32 %v6259_v12, 0.0 }
 0x822   :  { %6372 = vst.msk [vmem:[#allocation4 + $0x58] sm:$0xff] %vm5365_vm15, %v6308_v7  ;;  %6417 = vst.msk [vmem:[#allocation4 + $0x1c0] sm:$0xff] %vm5365_vm15, %v6353_v55  ;;  %v6038_v10 = vpop.f32.mrf.mxu0  ;;  %v6263_v36 = vpop.f32.mrf.mxu1 }
 0x823   :  { %v6039_v35 = vadd.f32 %v14917_v47, %v6038_v10  ;;  %v6264_v33 = vadd.f32 %v14917_v47, %v6263_v36 }
 0x824   :  { %v6040_v43 = vpop.f32.mrf.mxu0  ;;  %v6265_v14 = vpop.f32.mrf.mxu1 }
 0x825   :  { %v6309_v38 = vmax.f32 %v6039_v35, 0.0  ;;  %v6354_v4 = vmax.f32 %v6264_v33, 0.0 }
 0x827   :  { %6373 = vst.msk [vmem:[#allocation4 + $0x60] sm:$0xff] %vm5365_vm15, %v6309_v38  ;;  %6418 = vst.msk [vmem:[#allocation4 + $0x1c8] sm:$0xff] %vm5365_vm15, %v6354_v4 }
 0x82a   :  { %v6043_v52 = vpop.f32.mrf.mxu0  ;;  %v6268_v60 = vpop.f32.mrf.mxu1 }
 0x82b   :  { %v6044_v42 = vadd.f32 %v14917_v47, %v6043_v52  ;;  %v6269_v31 = vadd.f32 %v14917_v47, %v6268_v60 }
 0x82c   :  { %v6045_v45 = vpop.f32.mrf.mxu0  ;;  %v6270_v34 = vpop.f32.mrf.mxu1 }
 0x82d   :  { %v6310_v6 = vmax.f32 %v6044_v42, 0.0  ;;  %v6355_v13 = vmax.f32 %v6269_v31, 0.0 }
 0x82f   :  { %6374 = vst.msk [vmem:[#allocation4 + $0x68] sm:$0xff] %vm5365_vm15, %v6310_v6  ;;  %6419 = vst.msk [vmem:[#allocation4 + $0x1d0] sm:$0xff] %vm5365_vm15, %v6355_v13 }
 0x831   :  { %v6048_v59 = vpop.f32.mrf.mxu0  ;;  %v6273_v58 = vpop.f32.mrf.mxu1 }
 0x832   :  { %v6049_v32 = vadd.f32 %v14917_v47, %v6048_v59  ;;  %v6274_v16 = vadd.f32 %v14917_v47, %v6273_v58 }
 0x833   :  { %v6050_v53 = vpop.f32.mrf.mxu0  ;;  %v6275_v29 = vpop.f32.mrf.mxu1 }
 0x834   :  { %v6311_v24 = vmax.f32 %v6049_v32, 0.0  ;;  %v6356_v8 = vmax.f32 %v6274_v16, 0.0 }
 0x836   :  { %6375 = vst.msk [vmem:[#allocation4 + $0x70] sm:$0xff] %vm5365_vm15, %v6311_v24  ;;  %6420 = vst.msk [vmem:[#allocation4 + $0x1d8] sm:$0xff] %vm5365_vm15, %v6356_v8 }
 0x839   :  { %v6053_v46 = vpop.f32.mrf.mxu0  ;;  %v6278_v9 = vpop.f32.mrf.mxu1 }
 0x83a   :  { %v6054_v26 = vadd.f32 %v14917_v47, %v6053_v46  ;;  %v6279_v11 = vadd.f32 %v14917_v47, %v6278_v9 }
 0x83b   :  { %v6055_v27 = vpop.f32.mrf.mxu0  ;;  %v6280_v1 = vpop.f32.mrf.mxu1 }
 0x83c   :  { %v6312_v44 = vmax.f32 %v6054_v26, 0.0  ;;  %v6357_v62 = vmax.f32 %v6279_v11, 0.0 }
 0x83e   :  { %6376 = vst.msk [vmem:[#allocation4 + $0x78] sm:$0xff] %vm5365_vm15, %v6312_v44  ;;  %6421 = vst.msk [vmem:[#allocation4 + $0x1e0] sm:$0xff] %vm5365_vm15, %v6357_v62  ;;  %v6058_v25 = vpop.f32.mrf.mxu0  ;;  %v6283_v50 = vpop.f32.mrf.mxu1 }
 0x83f   :  { %v6059_v17 = vadd.f32 %v14917_v47, %v6058_v25  ;;  %v6284_v48 = vadd.f32 %v14917_v47, %v6283_v50 }
 0x840   :  { %v6060_v63 = vpop.f32.mrf.mxu0  ;;  %v6285_v41 = vpop.f32.mrf.mxu1 }
 0x841   :  { %v6313_v19 = vmax.f32 %v6059_v17, 0.0  ;;  %v6358_v39 = vmax.f32 %v6284_v48, 0.0 }
 0x843   :  { %6377 = vst.msk [vmem:[#allocation4 + $0x80] sm:$0xff] %vm5365_vm15, %v6313_v19  ;;  %6422 = vst.msk [vmem:[#allocation4 + $0x1e8] sm:$0xff] %vm5365_vm15, %v6358_v39 }
 0x847   :  { %v6063_v30 = vpop.f32.mrf.mxu0  ;;  %v6288_v49 = vpop.f32.mrf.mxu1 }
 0x848   :  { %v6064_v37 = vadd.f32 %v14917_v47, %v6063_v30  ;;  %v6289_v61 = vadd.f32 %v14917_v47, %v6288_v49 }
 0x849   :  { %v6065_v22 = vpop.f32.mrf.mxu0  ;;  %v6290_v51 = vpop.f32.mrf.mxu1 }
 0x84a   :  { %v6314_v56 = vmax.f32 %v6064_v37, 0.0  ;;  %v6359_v0 = vmax.f32 %v6289_v61, 0.0 }
 0x84c   :  { %6378 = vst.msk [vmem:[#allocation4 + $0x88] sm:$0xff] %vm5365_vm15, %v6314_v56  ;;  %6423 = vst.msk [vmem:[#allocation4 + $0x1f0] sm:$0xff] %vm5365_vm15, %v6359_v0 }
 0x84e   :  { %v6068_v2 = vpop.f32.mrf.mxu0  ;;  %v6293_v57 = vpop.f32.mrf.mxu1 }
 0x84f   :  { %v6069_v23 = vadd.f32 %v14917_v47, %v6068_v2  ;;  %v6294_v3 = vadd.f32 %v14917_v47, %v6293_v57 }
 0x850   :  { %v6070_v5 = vpop.f32.mrf.mxu0  ;;  %v6295_v28 = vpop.f32.mrf.mxu1 }
 0x851   :  { %v6315_v15 = vmax.f32 %v6069_v23, 0.0  ;;  %v6360_v54 = vmax.f32 %v6294_v3, 0.0 }
 0x853   :  { %6379 = vst.msk [vmem:[#allocation4 + $0x90] sm:$0xff] %vm5365_vm15, %v6315_v15  ;;  %6424 = vst.msk [vmem:[#allocation4 + $0x1f8] sm:$0xff] %vm5365_vm15, %v6360_v54 }
 0x854   :  { %8281 = shalt.err (!%p8278_p4)
}
 0x855   :  { %s8309_s9 = smov 128   ;;  %s8310_s10 = smov 8  }
 0x856   :  { %6436 = dma.vmem_to_hbm [thread:$0]  %s6431_s7, 8192, %s15107_s5, [#allocation5], %s8309_s9, %s8309_s9, %s8310_s10  }
 0x857   :  { %8290 = dma.done.wait [#allocation5], 8192  }
 0x858   :  { %8291 = vsyncadd [#allocation5], 4294959104 }
 0x859   :  { %6440 = vsyncpa [#allocation5], 1 }

</bundles_post_ra>
